<compile_context>
chip_gen: v7x
topology: tpu7x:2x2x1
jax: 0.10.0
libtpu: 0.0.40
codegen_flags: <defaults>
</compile_context>

<pallas_src>
import functools
import math

import jax
import jax.numpy as jnp
from jax.experimental import pallas as pl
from jax.experimental.pallas import tpu as pltpu

# ----------------------------- config (bert-base-uncased) -----------------------------
CFG = dict(
    vocab=30522,
    hidden=768,
    layers=12,
    heads=12,
    inter=3072,
    max_pos=512,
    type_vocab=2,
    eps=1e-12,
    cls_hidden=50,
    num_labels=2,
)

DTYPE = jnp.bfloat16           # matmul operand / hidden-state storage dtype
VMEM_LIMIT = 48 * 1024 * 1024  # safe on v5e/v6e (128 MiB) and v7x (64 MiB physical)
FFN_CHUNK = 768                # reduction-chunk over the 3072-wide FFN intermediate


def _choose_tm(m, cap=256):
    """Row-tile size: largest divisor <= cap that still gives >= 2 grid steps
    (keeps both v7x TensorCores busy); falls back to a single full-size step."""
    best = None
    for c in (512, 384, 256, 192, 128, 96, 64, 48, 32, 16, 8):
        if c > cap or c > m or m % c != 0:
            continue
        if m // c >= 2:
            return c
        if best is None:
            best = c
    return best if best is not None else m


def _gelu(x):
    # TODO(synk): HF BERT uses exact erf-GELU; tanh approximation kept for Mosaic-safe lowering.
    return 0.5 * x * (1.0 + jnp.tanh(0.7978845608028654 * (x + 0.044715 * x * x * x)))


def _ln(x_f32, gamma, beta, eps):
    mean = jnp.mean(x_f32, axis=-1, keepdims=True)
    xc = x_f32 - mean
    var = jnp.mean(xc * xc, axis=-1, keepdims=True)
    inv = jax.lax.rsqrt(var + eps)
    return xc * inv * gamma + beta


# ----------------------------------- Pallas kernels -----------------------------------

def _ln_kernel(x_ref, g_ref, b_ref, o_ref, *, eps):
    x = x_ref[...].astype(jnp.float32)
    o_ref[...] = _ln(x, g_ref[...], b_ref[...], eps).astype(o_ref.dtype)


def layernorm(x, gamma, beta, eps, out_dtype=DTYPE):
    """LayerNorm over the last axis (used for the embedding LN)."""
    M, D = x.shape
    tm = _choose_tm(M)
    assert M % tm == 0
    return pl.pallas_call(
        functools.partial(_ln_kernel, eps=eps),
        grid=(M // tm,),
        out_shape=jax.ShapeDtypeStruct((M, D), out_dtype),
        in_specs=[
            pl.BlockSpec((tm, D), lambda i: (i, 0)),
            pl.BlockSpec((1, D), lambda i: (0, 0)),
            pl.BlockSpec((1, D), lambda i: (0, 0)),
        ],
        out_specs=pl.BlockSpec((tm, D), lambda i: (i, 0)),
        compiler_params=pltpu.CompilerParams(dimension_semantics=("parallel",)),
    )(x, gamma.reshape(1, D), beta.reshape(1, D))


def _attn_kernel(h_ref, wq_ref, wk_ref, wv_ref, bq_ref, bk_ref, bv_ref, m_ref, o_ref,
                 *, head_dim, scale):
    """Fused QKV projection + softmax attention for one (batch, head-pair) grid point."""
    h = h_ref[...]                                   # (S, D) bf16
    mask = m_ref[0]                                  # (1, S) fp32 additive mask
    q = (jnp.dot(h, wq_ref[...], preferred_element_type=jnp.float32)
         + bq_ref[...]).astype(h.dtype)              # (S, 128)
    k = (jnp.dot(h, wk_ref[...], preferred_element_type=jnp.float32)
         + bk_ref[...]).astype(h.dtype)
    v = (jnp.dot(h, wv_ref[...], preferred_element_type=jnp.float32)
         + bv_ref[...]).astype(h.dtype)

    ctx = []
    for i in range(2):                               # the two heads of this 128-lane pair
        lo, hi = i * head_dim, (i + 1) * head_dim
        s = jax.lax.dot_general(
            q[:, lo:hi], k[:, lo:hi], (((1,), (1,)), ((), ())),
            preferred_element_type=jnp.float32) * scale      # (S, S) fp32
        s = s + mask
        s = s - jnp.max(s, axis=-1, keepdims=True)
        p = jnp.exp(s)
        inv = pl.reciprocal(jnp.sum(p, axis=-1, keepdims=True), approx=True)
        p = (p * inv).astype(h.dtype)
        ctx.append(jnp.dot(p, v[:, lo:hi], preferred_element_type=jnp.float32))
    # single lane-dense (S, 128) store for the head pair
    o_ref[...] = jnp.concatenate(ctx, axis=-1).astype(o_ref.dtype)


def attention_qkv(hidden, wq, wk, wv, bq, bk, bv, mask_add, B, S, heads, head_dim):
    """hidden: (B*S, D); QKV projection fused in-kernel; grid over (batch, head-pairs)."""
    assert heads % 2 == 0
    D = heads * head_dim
    pair = 2 * head_dim
    scale = 1.0 / math.sqrt(head_dim)
    return pl.pallas_call(
        functools.partial(_attn_kernel, head_dim=head_dim, scale=scale),
        grid=(B, heads // 2),
        out_shape=jax.ShapeDtypeStruct((B * S, D), hidden.dtype),
        in_specs=[
            pl.BlockSpec((S, D), lambda b, p: (b, 0)),        # hidden rows of batch b
            pl.BlockSpec((D, pair), lambda b, p: (0, p)),     # per-pair Q weight cols
            pl.BlockSpec((D, pair), lambda b, p: (0, p)),     # per-pair K weight cols
            pl.BlockSpec((D, pair), lambda b, p: (0, p)),     # per-pair V weight cols
            pl.BlockSpec((1, pair), lambda b, p: (0, p)),
            pl.BlockSpec((1, pair), lambda b, p: (0, p)),
            pl.BlockSpec((1, pair), lambda b, p: (0, p)),
            pl.BlockSpec((1, 1, S), lambda b, p: (b, 0, 0)),  # additive mask
        ],
        out_specs=pl.BlockSpec((S, pair), lambda b, p: (b, p)),
        compiler_params=pltpu.CompilerParams(
            dimension_semantics=("parallel", "parallel"),
            vmem_limit_bytes=VMEM_LIMIT,
        ),
    )(hidden, wq, wk, wv,
      bq.reshape(1, D), bk.reshape(1, D), bv.reshape(1, D), mask_add)


def _attn_out_ffn_kernel(ctx_ref, res_ref, ow_ref, ob_ref, g1_ref, b1_ref,
                         wi_ref, bi_ref, wf_ref, bf_ref, g2_ref, b2_ref,
                         o_ref, h1_ref, acc_ref, *, eps):
    """o-proj + residual + LN1, then FFN accumulated over I-chunks, then residual + LN2."""
    c = pl.program_id(1)

    @pl.when(c == 0)
    def _():
        y = jnp.dot(ctx_ref[...], ow_ref[...], preferred_element_type=jnp.float32)
        y = y + ob_ref[...] + res_ref[...].astype(jnp.float32)
        h1_ref[...] = _ln(y, g1_ref[...], b1_ref[...], eps)       # fp32 (tm, D)
        acc_ref[...] = jnp.zeros_like(acc_ref)

    h1b = h1_ref[...].astype(DTYPE)                               # bf16 operand for MXU
    u = jnp.dot(h1b, wi_ref[...], preferred_element_type=jnp.float32) + bi_ref[...]
    u = _gelu(u).astype(DTYPE)                                    # (tm, chunk)
    acc_ref[...] += jnp.dot(u, wf_ref[...], preferred_element_type=jnp.float32)

    @pl.when(c == pl.num_programs(1) - 1)
    def _():
        x = acc_ref[...] + bf_ref[...] + h1_ref[...]
        o_ref[...] = _ln(x, g2_ref[...], b2_ref[...], eps).astype(o_ref.dtype)


def attn_out_ffn_layernorm(ctx, resid, ow, ob, g1, b1, wi, bi, wf, bf, g2, b2, eps,
                           out_dtype=DTYPE, ti=FFN_CHUNK):
    """LN2(FFN(LN1(ctx @ ow + ob + resid)) + LN1(...)) in one pallas_call.
    Grid: (row tiles [parallel], FFN intermediate chunks [arbitrary/reduction])."""
    M, D = ctx.shape
    I = wi.shape[1]
    assert I % ti == 0
    tm = _choose_tm(M)
    assert M % tm == 0
    return pl.pallas_call(
        functools.partial(_attn_out_ffn_kernel, eps=eps),
        grid=(M // tm, I // ti),
        out_shape=jax.ShapeDtypeStruct((M, D), out_dtype),
        in_specs=[
            pl.BlockSpec((tm, D), lambda i, c: (i, 0)),   # ctx rows
            pl.BlockSpec((tm, D), lambda i, c: (i, 0)),   # residual rows
            pl.BlockSpec((D, D), lambda i, c: (0, 0)),    # o-proj weight (resident)
            pl.BlockSpec((1, D), lambda i, c: (0, 0)),    # o-proj bias
            pl.BlockSpec((1, D), lambda i, c: (0, 0)),    # LN1 gamma
            pl.BlockSpec((1, D), lambda i, c: (0, 0)),    # LN1 beta
            pl.BlockSpec((D, ti), lambda i, c: (0, c)),   # FFN up-proj chunk
            pl.BlockSpec((1, ti), lambda i, c: (0, c)),   # FFN up-proj bias chunk
            pl.BlockSpec((ti, D), lambda i, c: (c, 0)),   # FFN down-proj chunk
            pl.BlockSpec((1, D), lambda i, c: (0, 0)),    # FFN down-proj bias
            pl.BlockSpec((1, D), lambda i, c: (0, 0)),    # LN2 gamma
            pl.BlockSpec((1, D), lambda i, c: (0, 0)),    # LN2 beta
        ],
        out_specs=pl.BlockSpec((tm, D), lambda i, c: (i, 0)),
        scratch_shapes=[
            pltpu.VMEM((tm, D), jnp.float32),             # h1 (post-LN1 activations)
            pltpu.VMEM((tm, D), jnp.float32),             # FFN fp32 accumulator
        ],
        compiler_params=pltpu.CompilerParams(
            dimension_semantics=("parallel", "arbitrary"),
            vmem_limit_bytes=VMEM_LIMIT,
        ),
    )(ctx, resid, ow, ob.reshape(1, D), g1.reshape(1, D), b1.reshape(1, D),
      wi, bi.reshape(1, I), wf, bf.reshape(1, D), g2.reshape(1, D), b2.reshape(1, D))


def _head_kernel(x_ref, w1_ref, b1_ref, w2_ref, b2_ref, o_ref):
    x = x_ref[...].astype(jnp.float32)
    h = jnp.dot(x, w1_ref[...], preferred_element_type=jnp.float32) + b1_ref[...]
    h = jnp.maximum(h, 0.0)
    y = jnp.dot(h, w2_ref[...], preferred_element_type=jnp.float32) + b2_ref[...]
    o_ref[...] = y.astype(o_ref.dtype)


def classifier_head(cls, w1, b1, w2, b2):
    """Fused Linear(768->50) + ReLU + Linear(50->2); negligible FLOPs, one launch."""
    B, D = cls.shape
    H = w1.shape[1]
    O = w2.shape[1]
    return pl.pallas_call(
        _head_kernel,
        out_shape=jax.ShapeDtypeStruct((B, O), jnp.float32),
        in_specs=[
            pl.BlockSpec((B, D), lambda: (0, 0)),
            pl.BlockSpec((D, H), lambda: (0, 0)),
            pl.BlockSpec((1, H), lambda: (0, 0)),
            pl.BlockSpec((H, O), lambda: (0, 0)),
            pl.BlockSpec((1, O), lambda: (0, 0)),
        ],
        out_specs=pl.BlockSpec((B, O), lambda: (0, 0)),
    )(cls, w1, b1.reshape(1, H), w2, b2.reshape(1, O))


# ------------------------------------- model glue --------------------------------------

def bert_embeddings(params, input_ids, cfg):
    B, S = input_ids.shape
    D = cfg["hidden"]
    # TODO(synk): embedding gather stays in plain JAX (no clean rectangular-tile Pallas equivalent).
    we = jnp.take(params["word_emb"], input_ids, axis=0)               # (B, S, D)
    pe = params["pos_emb"][:S][None, :, :]                             # (1, S, D)
    te = params["type_emb"][0][None, None, :]                          # token_type_ids = 0
    emb = (we + pe + te).reshape(B * S, D).astype(jnp.float32)
    # TODO(synk): dropout treated as identity (eval-mode semantics).
    return layernorm(emb, params["emb_ln_g"], params["emb_ln_b"], cfg["eps"])


def bert_layer(lp, hidden, mask_add, B, S, cfg):
    D = cfg["hidden"]
    nH = cfg["heads"]
    dH = D // nH

    ctx = attention_qkv(hidden, lp["q_w"], lp["k_w"], lp["v_w"],
                        lp["q_b"], lp["k_b"], lp["v_b"], mask_add, B, S, nH, dH)
    hidden2 = attn_out_ffn_layernorm(ctx, hidden,
                                     lp["o_w"], lp["o_b"], lp["ln1_g"], lp["ln1_b"],
                                     lp["i_w"], lp["i_b"], lp["f_w"], lp["f_b"],
                                     lp["ln2_g"], lp["ln2_b"], cfg["eps"])
    return hidden2


def bert_classifier_forward(params, input_ids, attention_mask, cfg):
    B, S = input_ids.shape
    D = cfg["hidden"]

    hidden = bert_embeddings(params, input_ids, cfg)                   # (B*S, D) bf16
    mask_add = ((1.0 - attention_mask.astype(jnp.float32)) * -1e9).reshape(B, 1, S)

    for lp in params["layers"]:
        hidden = bert_layer(lp, hidden, mask_add, B, S, cfg)

    cls = hidden.reshape(B, S, D)[:, 0, :]                             # (B, 768)
    logits = classifier_head(cls, params["cls_w1"], params["cls_b1"],
                             params["cls_w2"], params["cls_b2"])       # (B, 2) fp32
    return logits


# ---------------------------------- parameter init -------------------------------------

def init_params(key, cfg):
    D, I = cfg["hidden"], cfg["inter"]

    def nrm(k, shape, dtype=DTYPE):
        return (0.02 * jax.random.normal(k, shape, dtype=jnp.float32)).astype(dtype)

    keys = iter(jax.random.split(key, 8 + cfg["layers"] * 8 + 8))

    params = dict(
        word_emb=nrm(next(keys), (cfg["vocab"], D), jnp.float32),
        pos_emb=nrm(next(keys), (cfg["max_pos"], D), jnp.float32),
        type_emb=nrm(next(keys), (cfg["type_vocab"], D), jnp.float32),
        emb_ln_g=jnp.ones((D,), jnp.float32),
        emb_ln_b=jnp.zeros((D,), jnp.float32),
        layers=[],
    )
    for _ in range(cfg["layers"]):
        # Q/K/V weights kept separate; columns are head-major (head0 | head1 | ...),
        # matching the head-pair BlockSpec slicing in the attention kernel.
        lp = dict(
            q_w=nrm(next(keys), (D, D)), q_b=jnp.zeros((D,), jnp.float32),
            k_w=nrm(next(keys), (D, D)), k_b=jnp.zeros((D,), jnp.float32),
            v_w=nrm(next(keys), (D, D)), v_b=jnp.zeros((D,), jnp.float32),
            o_w=nrm(next(keys), (D, D)), o_b=jnp.zeros((D,), jnp.float32),
            ln1_g=jnp.ones((D,), jnp.float32), ln1_b=jnp.zeros((D,), jnp.float32),
            i_w=nrm(next(keys), (D, I)), i_b=jnp.zeros((I,), jnp.float32),
            f_w=nrm(next(keys), (I, D)), f_b=jnp.zeros((D,), jnp.float32),
            ln2_g=jnp.ones((D,), jnp.float32), ln2_b=jnp.zeros((D,), jnp.float32),
        )
        params["layers"].append(lp)

    params["cls_w1"] = nrm(next(keys), (D, cfg["cls_hidden"]), jnp.float32)
    params["cls_b1"] = jnp.zeros((cfg["cls_hidden"],), jnp.float32)
    params["cls_w2"] = nrm(next(keys), (cfg["cls_hidden"], cfg["num_labels"]), jnp.float32)
    params["cls_b2"] = jnp.zeros((cfg["num_labels"],), jnp.float32)
    return params


# --------------------------------------- main ------------------------------------------

if __name__ == "__main__":
    B, S = 2, 8  # batch_size, max_length (small shapes consistent with the module)

    root = jax.random.PRNGKey(0)
    k_params, k_ids = jax.random.split(root)

    params = init_params(k_params, CFG)

    input_ids = jax.random.randint(k_ids, (B, S), 0, CFG["vocab"], dtype=jnp.int32)
    attention_mask = jnp.array(
        [[1, 1, 1, 1, 1, 1, 1, 1],
         [1, 1, 1, 1, 1, 1, 0, 0]], dtype=jnp.int32
    )

    fwd = jax.jit(lambda p, ids, mask: bert_classifier_forward(p, ids, mask, CFG))
    logits = fwd(params, input_ids, attention_mask)
    jax.block_until_ready(logits)

    assert logits.shape == (B, CFG["num_labels"])
    assert logits.dtype == jnp.float32
    assert bool(jnp.all(jnp.isfinite(logits)))
    print("KERNEL_OK")
</pallas_src>

<mosaic_0001>
module attributes {stable_mosaic.version = 11 : i64} {
  func.func @_ln_kernel(%arg0: i32, %arg1: memref<8x768xf32, #tpu.memory_space<vmem>>, %arg2: memref<1x768xf32, #tpu.memory_space<vmem>>, %arg3: memref<1x768xf32, #tpu.memory_space<vmem>>, %arg4: memref<8x768xbf16, #tpu.memory_space<vmem>>) attributes {dimension_semantics = [#tpu.dimension_semantics<parallel>], iteration_bounds = array<i64: 2>, scalar_prefetch = 0 : i64, scratch_operands = 0 : i64, tpu.core_type = #tpu.core_type<tc>, window_params = [{transform_indices = @transform_0, window_bounds = array<i64: 8, 768>}, {pipeline_mode = #tpu.pipeline_mode<synchronous>, transform_indices = @transform_1, window_bounds = array<i64: 1, 768>}, {pipeline_mode = #tpu.pipeline_mode<synchronous>, transform_indices = @transform_2, window_bounds = array<i64: 1, 768>}, {transform_indices = @transform_3, window_bounds = array<i64: 8, 768>}]} {
    %c0 = arith.constant 0 : index
    %c0_0 = arith.constant 0 : index
    %0 = vector.load %arg1[%c0, %c0_0] : memref<8x768xf32, #tpu.memory_space<vmem>>, vector<8x768xf32>
    %c0_1 = arith.constant 0 : index
    %c0_2 = arith.constant 0 : index
    %1 = vector.load %arg2[%c0_1, %c0_2] : memref<1x768xf32, #tpu.memory_space<vmem>>, vector<1x768xf32>
    %c0_3 = arith.constant 0 : index
    %c0_4 = arith.constant 0 : index
    %2 = vector.load %arg3[%c0_3, %c0_4] : memref<1x768xf32, #tpu.memory_space<vmem>>, vector<1x768xf32>
    %cst = arith.constant dense<0.000000e+00> : vector<8xf32>
    %3 = vector.multi_reduction <add>, %0, %cst [1] : vector<8x768xf32> to vector<8xf32>
    %4 = vector.shape_cast %3 : vector<8xf32> to vector<8x1xf32>
    %cst_5 = arith.constant 7.680000e+02 : f32
    %5 = vector.broadcast %cst_5 : f32 to vector<8x1xf32>
    %6 = arith.divf %4, %5 : vector<8x1xf32>
    %7 = vector.broadcast %6 : vector<8x1xf32> to vector<8x768xf32>
    %8 = arith.subf %0, %7 : vector<8x768xf32>
    %9 = arith.mulf %8, %8 : vector<8x768xf32>
    %cst_6 = arith.constant dense<0.000000e+00> : vector<8xf32>
    %10 = vector.multi_reduction <add>, %9, %cst_6 [1] : vector<8x768xf32> to vector<8xf32>
    %11 = vector.shape_cast %10 : vector<8xf32> to vector<8x1xf32>
    %cst_7 = arith.constant 7.680000e+02 : f32
    %12 = vector.broadcast %cst_7 : f32 to vector<8x1xf32>
    %13 = arith.divf %11, %12 : vector<8x1xf32>
    %cst_8 = arith.constant 9.99999996E-13 : f32
    %14 = vector.broadcast %cst_8 : f32 to vector<8x1xf32>
    %15 = arith.addf %13, %14 : vector<8x1xf32>
    %16 = math.rsqrt %15 : vector<8x1xf32>
    %17 = vector.broadcast %16 : vector<8x1xf32> to vector<8x768xf32>
    %18 = arith.mulf %8, %17 : vector<8x768xf32>
    %19 = vector.broadcast %1 : vector<1x768xf32> to vector<8x768xf32>
    %20 = arith.mulf %18, %19 : vector<8x768xf32>
    %21 = vector.broadcast %2 : vector<1x768xf32> to vector<8x768xf32>
    %22 = arith.addf %20, %21 : vector<8x768xf32>
    %23 = arith.truncf %22 : vector<8x768xf32> to vector<8x768xbf16>
    %c0_9 = arith.constant 0 : index
    %c0_10 = arith.constant 0 : index
    %24 = vector.load %arg4[%c0_9, %c0_10] : memref<8x768xbf16, #tpu.memory_space<vmem>>, vector<8x768xbf16>
    tpu.vector_store %arg4[%c0_9, %c0_10], %23 {strides = array<i32>} : memref<8x768xbf16, #tpu.memory_space<vmem>>, vector<8x768xbf16>,
    return
  }
  func.func @transform_0(%arg0: i32) -> (i32, i32) {
    %c0_i32 = arith.constant 0 : i32
    %c0_i32_0 = arith.constant 0 : i32
    return %arg0, %c0_i32 : i32, i32
  }
  func.func @transform_1(%arg0: i32) -> (i32, i32) {
    %c0_i32 = arith.constant 0 : i32
    %c0_i32_0 = arith.constant 0 : i32
    %c0_i32_1 = arith.constant 0 : i32
    return %c0_i32, %c0_i32_0 : i32, i32
  }
  func.func @transform_2(%arg0: i32) -> (i32, i32) {
    %c0_i32 = arith.constant 0 : i32
    %c0_i32_0 = arith.constant 0 : i32
    %c0_i32_1 = arith.constant 0 : i32
    return %c0_i32, %c0_i32_0 : i32, i32
  }
  func.func @transform_3(%arg0: i32) -> (i32, i32) {
    %c0_i32 = arith.constant 0 : i32
    %c0_i32_0 = arith.constant 0 : i32
    return %arg0, %c0_i32 : i32, i32
  }
}

module attributes {stable_mosaic.version = 11 : i64} {
  func.func @_attn_kernel(%arg0: i32, %arg1: i32, %arg2: memref<8x768xbf16, #tpu.memory_space<vmem>>, %arg3: memref<768x128xbf16, #tpu.memory_space<vmem>>, %arg4: memref<768x128xbf16, #tpu.memory_space<vmem>>, %arg5: memref<768x128xbf16, #tpu.memory_space<vmem>>, %arg6: memref<1x128xf32, #tpu.memory_space<vmem>>, %arg7: memref<1x128xf32, #tpu.memory_space<vmem>>, %arg8: memref<1x128xf32, #tpu.memory_space<vmem>>, %arg9: memref<1x1x8xf32, #tpu.memory_space<vmem>>, %arg10: memref<8x128xbf16, #tpu.memory_space<vmem>>) attributes {dimension_semantics = [#tpu.dimension_semantics<parallel>, #tpu.dimension_semantics<parallel>], iteration_bounds = array<i64: 2, 6>, scalar_prefetch = 0 : i64, scratch_operands = 0 : i64, tpu.core_type = #tpu.core_type<tc>, window_params = [{transform_indices = @transform_0, window_bounds = array<i64: 8, 768>}, {transform_indices = @transform_1, window_bounds = array<i64: 768, 128>}, {transform_indices = @transform_2, window_bounds = array<i64: 768, 128>}, {transform_indices = @transform_3, window_bounds = array<i64: 768, 128>}, {transform_indices = @transform_4, window_bounds = array<i64: 1, 128>}, {transform_indices = @transform_5, window_bounds = array<i64: 1, 128>}, {transform_indices = @transform_6, window_bounds = array<i64: 1, 128>}, {transform_indices = @transform_7, window_bounds = array<i64: 1, 1, 8>}, {transform_indices = @transform_8, window_bounds = array<i64: 8, 128>}]} {
    %c0 = arith.constant 0 : index
    %c0_0 = arith.constant 0 : index
    %0 = vector.load %arg2[%c0, %c0_0] : memref<8x768xbf16, #tpu.memory_space<vmem>>, vector<8x768xbf16>
    %c0_1 = arith.constant 0 : index
    %c0_2 = arith.constant 0 : index
    %c0_3 = arith.constant 0 : index
    %1 = vector.load %arg9[%c0_1, %c0_2, %c0_3] : memref<1x1x8xf32, #tpu.memory_space<vmem>>, vector<1x1x8xf32>
    %2 = vector.shape_cast %1 : vector<1x1x8xf32> to vector<1x8xf32>
    %c0_4 = arith.constant 0 : index
    %c0_5 = arith.constant 0 : index
    %3 = vector.load %arg3[%c0_4, %c0_5] : memref<768x128xbf16, #tpu.memory_space<vmem>>, vector<768x128xbf16>
    %cst = arith.constant dense<0.000000e+00> : vector<8x128xf32>
    %4 = tpu.matmul %0, %3, %cst {dimension_numbers = #tpu.dot_dimension_numbers<[1], [0], [0], [1], [0, 0, 1, 1], [], []>} : vector<8x768xbf16>, vector<768x128xbf16>, vector<8x128xf32> -> vector<8x128xf32>
    %c0_6 = arith.constant 0 : index
    %c0_7 = arith.constant 0 : index
    %5 = vector.load %arg6[%c0_6, %c0_7] : memref<1x128xf32, #tpu.memory_space<vmem>>, vector<1x128xf32>
    %6 = vector.broadcast %5 : vector<1x128xf32> to vector<8x128xf32>
    %7 = arith.addf %4, %6 : vector<8x128xf32>
    %8 = arith.truncf %7 : vector<8x128xf32> to vector<8x128xbf16>
    %c0_8 = arith.constant 0 : index
    %c0_9 = arith.constant 0 : index
    %9 = vector.load %arg4[%c0_8, %c0_9] : memref<768x128xbf16, #tpu.memory_space<vmem>>, vector<768x128xbf16>
    %cst_10 = arith.constant dense<0.000000e+00> : vector<8x128xf32>
    %10 = tpu.matmul %0, %9, %cst_10 {dimension_numbers = #tpu.dot_dimension_numbers<[1], [0], [0], [1], [0, 0, 1, 1], [], []>} : vector<8x768xbf16>, vector<768x128xbf16>, vector<8x128xf32> -> vector<8x128xf32>
    %c0_11 = arith.constant 0 : index
    %c0_12 = arith.constant 0 : index
    %11 = vector.load %arg7[%c0_11, %c0_12] : memref<1x128xf32, #tpu.memory_space<vmem>>, vector<1x128xf32>
    %12 = vector.broadcast %11 : vector<1x128xf32> to vector<8x128xf32>
    %13 = arith.addf %10, %12 : vector<8x128xf32>
    %14 = arith.truncf %13 : vector<8x128xf32> to vector<8x128xbf16>
    %c0_13 = arith.constant 0 : index
    %c0_14 = arith.constant 0 : index
    %15 = vector.load %arg5[%c0_13, %c0_14] : memref<768x128xbf16, #tpu.memory_space<vmem>>, vector<768x128xbf16>
    %cst_15 = arith.constant dense<0.000000e+00> : vector<8x128xf32>
    %16 = tpu.matmul %0, %15, %cst_15 {dimension_numbers = #tpu.dot_dimension_numbers<[1], [0], [0], [1], [0, 0, 1, 1], [], []>} : vector<8x768xbf16>, vector<768x128xbf16>, vector<8x128xf32> -> vector<8x128xf32>
    %c0_16 = arith.constant 0 : index
    %c0_17 = arith.constant 0 : index
    %17 = vector.load %arg8[%c0_16, %c0_17] : memref<1x128xf32, #tpu.memory_space<vmem>>, vector<1x128xf32>
    %18 = vector.broadcast %17 : vector<1x128xf32> to vector<8x128xf32>
    %19 = arith.addf %16, %18 : vector<8x128xf32>
    %20 = arith.truncf %19 : vector<8x128xf32> to vector<8x128xbf16>
    %21 = vector.extract_strided_slice %8 {offsets = [0, 0], sizes = [8, 64], strides = [1, 1]} : vector<8x128xbf16> to vector<8x64xbf16>
    %22 = vector.extract_strided_slice %14 {offsets = [0, 0], sizes = [8, 64], strides = [1, 1]} : vector<8x128xbf16> to vector<8x64xbf16>
    %cst_18 = arith.constant dense<0.000000e+00> : vector<8x8xf32>
    %23 = tpu.matmul %21, %22, %cst_18 {dimension_numbers = #tpu.dot_dimension_numbers<[1], [1], [0], [0], [0, 0, 1, 0], [], []>} : vector<8x64xbf16>, vector<8x64xbf16>, vector<8x8xf32> -> vector<8x8xf32>
    %cst_19 = arith.constant 1.250000e-01 : f32
    %24 = vector.broadcast %cst_19 : f32 to vector<8x8xf32>
    %25 = arith.mulf %23, %24 : vector<8x8xf32>
    %26 = vector.broadcast %2 : vector<1x8xf32> to vector<8x8xf32>
    %27 = arith.addf %25, %26 : vector<8x8xf32>
    %cst_20 = arith.constant dense<0xFF800000> : vector<8xf32>
    %28 = vector.multi_reduction <maximumf>, %27, %cst_20 [1] : vector<8x8xf32> to vector<8xf32>
    %29 = vector.shape_cast %28 : vector<8xf32> to vector<8x1xf32>
    %30 = vector.broadcast %29 : vector<8x1xf32> to vector<8x8xf32>
    %31 = arith.subf %27, %30 : vector<8x8xf32>
    %32 = math.exp %31 : vector<8x8xf32>
    %cst_21 = arith.constant dense<0.000000e+00> : vector<8xf32>
    %33 = vector.multi_reduction <add>, %32, %cst_21 [1] : vector<8x8xf32> to vector<8xf32>
    %34 = vector.shape_cast %33 : vector<8xf32> to vector<8x1xf32>
    %35 = tpu.reciprocal %34 {approx = true} : vector<8x1xf32> -> vector<8x1xf32>
    %36 = vector.broadcast %35 : vector<8x1xf32> to vector<8x8xf32>
    %37 = arith.mulf %32, %36 : vector<8x8xf32>
    %38 = arith.truncf %37 : vector<8x8xf32> to vector<8x8xbf16>
    %39 = vector.extract_strided_slice %20 {offsets = [0, 0], sizes = [8, 64], strides = [1, 1]} : vector<8x128xbf16> to vector<8x64xbf16>
    %cst_22 = arith.constant dense<0.000000e+00> : vector<8x64xf32>
    %40 = tpu.matmul %38, %39, %cst_22 {dimension_numbers = #tpu.dot_dimension_numbers<[1], [0], [0], [1], [0, 0, 1, 1], [], []>} : vector<8x8xbf16>, vector<8x64xbf16>, vector<8x64xf32> -> vector<8x64xf32>
    %41 = vector.extract_strided_slice %8 {offsets = [0, 64], sizes = [8, 64], strides = [1, 1]} : vector<8x128xbf16> to vector<8x64xbf16>
    %42 = vector.extract_strided_slice %14 {offsets = [0, 64], sizes = [8, 64], strides = [1, 1]} : vector<8x128xbf16> to vector<8x64xbf16>
    %cst_23 = arith.constant dense<0.000000e+00> : vector<8x8xf32>
    %43 = tpu.matmul %41, %42, %cst_23 {dimension_numbers = #tpu.dot_dimension_numbers<[1], [1], [0], [0], [0, 0, 1, 0], [], []>} : vector<8x64xbf16>, vector<8x64xbf16>, vector<8x8xf32> -> vector<8x8xf32>
    %cst_24 = arith.constant 1.250000e-01 : f32
    %44 = vector.broadcast %cst_24 : f32 to vector<8x8xf32>
    %45 = arith.mulf %43, %44 : vector<8x8xf32>
    %46 = vector.broadcast %2 : vector<1x8xf32> to vector<8x8xf32>
    %47 = arith.addf %45, %46 : vector<8x8xf32>
    %cst_25 = arith.constant dense<0xFF800000> : vector<8xf32>
    %48 = vector.multi_reduction <maximumf>, %47, %cst_25 [1] : vector<8x8xf32> to vector<8xf32>
    %49 = vector.shape_cast %48 : vector<8xf32> to vector<8x1xf32>
    %50 = vector.broadcast %49 : vector<8x1xf32> to vector<8x8xf32>
    %51 = arith.subf %47, %50 : vector<8x8xf32>
    %52 = math.exp %51 : vector<8x8xf32>
    %cst_26 = arith.constant dense<0.000000e+00> : vector<8xf32>
    %53 = vector.multi_reduction <add>, %52, %cst_26 [1] : vector<8x8xf32> to vector<8xf32>
    %54 = vector.shape_cast %53 : vector<8xf32> to vector<8x1xf32>
    %55 = tpu.reciprocal %54 {approx = true} : vector<8x1xf32> -> vector<8x1xf32>
    %56 = vector.broadcast %55 : vector<8x1xf32> to vector<8x8xf32>
    %57 = arith.mulf %52, %56 : vector<8x8xf32>
    %58 = arith.truncf %57 : vector<8x8xf32> to vector<8x8xbf16>
    %59 = vector.extract_strided_slice %20 {offsets = [0, 64], sizes = [8, 64], strides = [1, 1]} : vector<8x128xbf16> to vector<8x64xbf16>
    %cst_27 = arith.constant dense<0.000000e+00> : vector<8x64xf32>
    %60 = tpu.matmul %58, %59, %cst_27 {dimension_numbers = #tpu.dot_dimension_numbers<[1], [0], [0], [1], [0, 0, 1, 1], [], []>} : vector<8x8xbf16>, vector<8x64xbf16>, vector<8x64xf32> -> vector<8x64xf32>
    %61 = tpu.concatenate %40, %60 in 1 : vector<8x64xf32>, vector<8x64xf32> -> vector<8x128xf32>
    %62 = arith.truncf %61 : vector<8x128xf32> to vector<8x128xbf16>
    %c0_28 = arith.constant 0 : index
    %c0_29 = arith.constant 0 : index
    %63 = vector.load %arg10[%c0_28, %c0_29] : memref<8x128xbf16, #tpu.memory_space<vmem>>, vector<8x128xbf16>
    tpu.vector_store %arg10[%c0_28, %c0_29], %62 {strides = array<i32>} : memref<8x128xbf16, #tpu.memory_space<vmem>>, vector<8x128xbf16>,
    return
  }
  func.func @transform_0(%arg0: i32, %arg1: i32) -> (i32, i32) {
    %c0_i32 = arith.constant 0 : i32
    %c0_i32_0 = arith.constant 0 : i32
    return %arg0, %c0_i32 : i32, i32
  }
  func.func @transform_1(%arg0: i32, %arg1: i32) -> (i32, i32) {
    %c0_i32 = arith.constant 0 : i32
    %c0_i32_0 = arith.constant 0 : i32
    return %c0_i32, %arg1 : i32, i32
  }
  func.func @transform_2(%arg0: i32, %arg1: i32) -> (i32, i32) {
    %c0_i32 = arith.constant 0 : i32
    %c0_i32_0 = arith.constant 0 : i32
    return %c0_i32, %arg1 : i32, i32
  }
  func.func @transform_3(%arg0: i32, %arg1: i32) -> (i32, i32) {
    %c0_i32 = arith.constant 0 : i32
    %c0_i32_0 = arith.constant 0 : i32
    return %c0_i32, %arg1 : i32, i32
  }
  func.func @transform_4(%arg0: i32, %arg1: i32) -> (i32, i32) {
    %c0_i32 = arith.constant 0 : i32
    %c0_i32_0 = arith.constant 0 : i32
    return %c0_i32, %arg1 : i32, i32
  }
  func.func @transform_5(%arg0: i32, %arg1: i32) -> (i32, i32) {
    %c0_i32 = arith.constant 0 : i32
    %c0_i32_0 = arith.constant 0 : i32
    return %c0_i32, %arg1 : i32, i32
  }
  func.func @transform_6(%arg0: i32, %arg1: i32) -> (i32, i32) {
    %c0_i32 = arith.constant 0 : i32
    %c0_i32_0 = arith.constant 0 : i32
    return %c0_i32, %arg1 : i32, i32
  }
  func.func @transform_7(%arg0: i32, %arg1: i32) -> (i32, i32, i32) {
    %c0_i32 = arith.constant 0 : i32
    %c0_i32_0 = arith.constant 0 : i32
    %c0_i32_1 = arith.constant 0 : i32
    return %arg0, %c0_i32, %c0_i32_0 : i32, i32, i32
  }
  func.func @transform_8(%arg0: i32, %arg1: i32) -> (i32, i32) {
    %c0_i32 = arith.constant 0 : i32
    return %arg0, %arg1 : i32, i32
  }
}

module attributes {stable_mosaic.version = 11 : i64} {
  func.func @_attn_out_ffn_kernel(%arg0: i32, %arg1: i32, %arg2: memref<8x768xbf16, #tpu.memory_space<vmem>>, %arg3: memref<8x768xbf16, #tpu.memory_space<vmem>>, %arg4: memref<768x768xbf16, #tpu.memory_space<vmem>>, %arg5: memref<1x768xf32, #tpu.memory_space<vmem>>, %arg6: memref<1x768xf32, #tpu.memory_space<vmem>>, %arg7: memref<1x768xf32, #tpu.memory_space<vmem>>, %arg8: memref<768x768xbf16, #tpu.memory_space<vmem>>, %arg9: memref<1x768xf32, #tpu.memory_space<vmem>>, %arg10: memref<768x768xbf16, #tpu.memory_space<vmem>>, %arg11: memref<1x768xf32, #tpu.memory_space<vmem>>, %arg12: memref<1x768xf32, #tpu.memory_space<vmem>>, %arg13: memref<1x768xf32, #tpu.memory_space<vmem>>, %arg14: memref<8x768xbf16, #tpu.memory_space<vmem>>, %arg15: memref<8x768xf32, #tpu.memory_space<vmem>>, %arg16: memref<8x768xf32, #tpu.memory_space<vmem>>) attributes {dimension_semantics = [#tpu.dimension_semantics<parallel>, #tpu.dimension_semantics<arbitrary>], iteration_bounds = array<i64: 2, 4>, scalar_prefetch = 0 : i64, scratch_operands = 2 : i64, tpu.core_type = #tpu.core_type<tc>, window_params = [{transform_indices = @transform_0, window_bounds = array<i64: 8, 768>}, {transform_indices = @transform_1, window_bounds = array<i64: 8, 768>}, {pipeline_mode = #tpu.pipeline_mode<synchronous>, transform_indices = @transform_2, window_bounds = array<i64: 768, 768>}, {pipeline_mode = #tpu.pipeline_mode<synchronous>, transform_indices = @transform_3, window_bounds = array<i64: 1, 768>}, {pipeline_mode = #tpu.pipeline_mode<synchronous>, transform_indices = @transform_4, window_bounds = array<i64: 1, 768>}, {pipeline_mode = #tpu.pipeline_mode<synchronous>, transform_indices = @transform_5, window_bounds = array<i64: 1, 768>}, {transform_indices = @transform_6, window_bounds = array<i64: 768, 768>}, {transform_indices = @transform_7, window_bounds = array<i64: 1, 768>}, {transform_indices = @transform_8, window_bounds = array<i64: 768, 768>}, {pipeline_mode = #tpu.pipeline_mode<synchronous>, transform_indices = @transform_9, window_bounds = array<i64: 1, 768>}, {pipeline_mode = #tpu.pipeline_mode<synchronous>, transform_indices = @transform_10, window_bounds = array<i64: 1, 768>}, {pipeline_mode = #tpu.pipeline_mode<synchronous>, transform_indices = @transform_11, window_bounds = array<i64: 1, 768>}, {transform_indices = @transform_12, window_bounds = array<i64: 8, 768>}]} {
    %c0_i32 = arith.constant 0 : i32
    %0 = arith.cmpi eq, %arg1, %c0_i32 : i32
    %1 = arith.extui %0 : i1 to i32
    %c0_i32_0 = arith.constant 0 : i32
    %2 = arith.cmpi ne, %1, %c0_i32_0 : i32
    scf.if %2 {
      %c0_18 = arith.constant 0 : index
      %c0_19 = arith.constant 0 : index
      %32 = vector.load %arg2[%c0_18, %c0_19] : memref<8x768xbf16, #tpu.memory_space<vmem>>, vector<8x768xbf16>
      %c0_20 = arith.constant 0 : index
      %c0_21 = arith.constant 0 : index
      %33 = vector.load %arg4[%c0_20, %c0_21] : memref<768x768xbf16, #tpu.memory_space<vmem>>, vector<768x768xbf16>
      %cst_22 = arith.constant dense<0.000000e+00> : vector<8x768xf32>
      %34 = tpu.matmul %32, %33, %cst_22 {dimension_numbers = #tpu.dot_dimension_numbers<[1], [0], [0], [1], [0, 0, 1, 1], [], []>} : vector<8x768xbf16>, vector<768x768xbf16>, vector<8x768xf32> -> vector<8x768xf32>
      %c0_23 = arith.constant 0 : index
      %c0_24 = arith.constant 0 : index
      %35 = vector.load %arg5[%c0_23, %c0_24] : memref<1x768xf32, #tpu.memory_space<vmem>>, vector<1x768xf32>
      %36 = vector.broadcast %35 : vector<1x768xf32> to vector<8x768xf32>
      %37 = arith.addf %34, %36 : vector<8x768xf32>
      %c0_25 = arith.constant 0 : index
      %c0_26 = arith.constant 0 : index
      %38 = vector.load %arg3[%c0_25, %c0_26] : memref<8x768xbf16, #tpu.memory_space<vmem>>, vector<8x768xbf16>
      %39 = arith.extf %38 : vector<8x768xbf16> to vector<8x768xf32>
      %40 = arith.addf %37, %39 : vector<8x768xf32>
      %c0_27 = arith.constant 0 : index
      %c0_28 = arith.constant 0 : index
      %41 = vector.load %arg6[%c0_27, %c0_28] : memref<1x768xf32, #tpu.memory_space<vmem>>, vector<1x768xf32>
      %c0_29 = arith.constant 0 : index
      %c0_30 = arith.constant 0 : index
      %42 = vector.load %arg7[%c0_29, %c0_30] : memref<1x768xf32, #tpu.memory_space<vmem>>, vector<1x768xf32>
      %cst_31 = arith.constant dense<0.000000e+00> : vector<8xf32>
      %43 = vector.multi_reduction <add>, %40, %cst_31 [1] : vector<8x768xf32> to vector<8xf32>
      %44 = vector.shape_cast %43 : vector<8xf32> to vector<8x1xf32>
      %cst_32 = arith.constant 7.680000e+02 : f32
      %45 = vector.broadcast %cst_32 : f32 to vector<8x1xf32>
      %46 = arith.divf %44, %45 : vector<8x1xf32>
      %47 = vector.broadcast %46 : vector<8x1xf32> to vector<8x768xf32>
      %48 = arith.subf %40, %47 : vector<8x768xf32>
      %49 = arith.mulf %48, %48 : vector<8x768xf32>
      %cst_33 = arith.constant dense<0.000000e+00> : vector<8xf32>
      %50 = vector.multi_reduction <add>, %49, %cst_33 [1] : vector<8x768xf32> to vector<8xf32>
      %51 = vector.shape_cast %50 : vector<8xf32> to vector<8x1xf32>
      %cst_34 = arith.constant 7.680000e+02 : f32
      %52 = vector.broadcast %cst_34 : f32 to vector<8x1xf32>
      %53 = arith.divf %51, %52 : vector<8x1xf32>
      %cst_35 = arith.constant 9.99999996E-13 : f32
      %54 = vector.broadcast %cst_35 : f32 to vector<8x1xf32>
      %55 = arith.addf %53, %54 : vector<8x1xf32>
      %56 = math.rsqrt %55 : vector<8x1xf32>
      %57 = vector.broadcast %56 : vector<8x1xf32> to vector<8x768xf32>
      %58 = arith.mulf %48, %57 : vector<8x768xf32>
      %59 = vector.broadcast %41 : vector<1x768xf32> to vector<8x768xf32>
      %60 = arith.mulf %58, %59 : vector<8x768xf32>
      %61 = vector.broadcast %42 : vector<1x768xf32> to vector<8x768xf32>
      %62 = arith.addf %60, %61 : vector<8x768xf32>
      %c0_36 = arith.constant 0 : index
      %c0_37 = arith.constant 0 : index
      %63 = vector.load %arg15[%c0_36, %c0_37] : memref<8x768xf32, #tpu.memory_space<vmem>>, vector<8x768xf32>
      tpu.vector_store %arg15[%c0_36, %c0_37], %62 {strides = array<i32>} : memref<8x768xf32, #tpu.memory_space<vmem>>, vector<8x768xf32>,
      %cst_38 = arith.constant 0.000000e+00 : f32
      %64 = vector.broadcast %cst_38 : f32 to vector<8x768xf32>
      %c0_39 = arith.constant 0 : index
      %c0_40 = arith.constant 0 : index
      %65 = vector.load %arg16[%c0_39, %c0_40] : memref<8x768xf32, #tpu.memory_space<vmem>>, vector<8x768xf32>
      tpu.vector_store %arg16[%c0_39, %c0_40], %64 {strides = array<i32>} : memref<8x768xf32, #tpu.memory_space<vmem>>, vector<8x768xf32>,
    } else {
    }
    %c0 = arith.constant 0 : index
    %c0_1 = arith.constant 0 : index
    %3 = vector.load %arg15[%c0, %c0_1] : memref<8x768xf32, #tpu.memory_space<vmem>>, vector<8x768xf32>
    %4 = arith.truncf %3 : vector<8x768xf32> to vector<8x768xbf16>
    %c0_2 = arith.constant 0 : index
    %c0_3 = arith.constant 0 : index
    %5 = vector.load %arg8[%c0_2, %c0_3] : memref<768x768xbf16, #tpu.memory_space<vmem>>, vector<768x768xbf16>
    %cst = arith.constant dense<0.000000e+00> : vector<8x768xf32>
    %6 = tpu.matmul %4, %5, %cst {dimension_numbers = #tpu.dot_dimension_numbers<[1], [0], [0], [1], [0, 0, 1, 1], [], []>} : vector<8x768xbf16>, vector<768x768xbf16>, vector<8x768xf32> -> vector<8x768xf32>
    %c0_4 = arith.constant 0 : index
    %c0_5 = arith.constant 0 : index
    %7 = vector.load %arg9[%c0_4, %c0_5] : memref<1x768xf32, #tpu.memory_space<vmem>>, vector<1x768xf32>
    %8 = vector.broadcast %7 : vector<1x768xf32> to vector<8x768xf32>
    %9 = arith.addf %6, %8 : vector<8x768xf32>
    %cst_6 = arith.constant 5.000000e-01 : f32
    %10 = vector.broadcast %cst_6 : f32 to vector<8x768xf32>
    %11 = arith.mulf %10, %9 : vector<8x768xf32>
    %cst_7 = arith.constant 4.471500e-02 : f32
    %12 = vector.broadcast %cst_7 : f32 to vector<8x768xf32>
    %13 = arith.mulf %12, %9 : vector<8x768xf32>
    %14 = arith.mulf %13, %9 : vector<8x768xf32>
    %15 = arith.mulf %14, %9 : vector<8x768xf32>
    %16 = arith.addf %9, %15 : vector<8x768xf32>
    %cst_8 = arith.constant 0.797884583 : f32
    %17 = vector.broadcast %cst_8 : f32 to vector<8x768xf32>
    %18 = arith.mulf %17, %16 : vector<8x768xf32>
    %19 = math.tanh %18 : vector<8x768xf32>
    %cst_9 = arith.constant 1.000000e+00 : f32
    %20 = vector.broadcast %cst_9 : f32 to vector<8x768xf32>
    %21 = arith.addf %20, %19 : vector<8x768xf32>
    %22 = arith.mulf %11, %21 : vector<8x768xf32>
    %23 = arith.truncf %22 : vector<8x768xf32> to vector<8x768xbf16>
    %c0_10 = arith.constant 0 : index
    %c0_11 = arith.constant 0 : index
    %24 = vector.load %arg16[%c0_10, %c0_11] : memref<8x768xf32, #tpu.memory_space<vmem>>, vector<8x768xf32>
    %c0_12 = arith.constant 0 : index
    %c0_13 = arith.constant 0 : index
    %25 = vector.load %arg10[%c0_12, %c0_13] : memref<768x768xbf16, #tpu.memory_space<vmem>>, vector<768x768xbf16>
    %cst_14 = arith.constant dense<0.000000e+00> : vector<8x768xf32>
    %26 = tpu.matmul %23, %25, %cst_14 {dimension_numbers = #tpu.dot_dimension_numbers<[1], [0], [0], [1], [0, 0, 1, 1], [], []>} : vector<8x768xbf16>, vector<768x768xbf16>, vector<8x768xf32> -> vector<8x768xf32>
    %27 = arith.addf %24, %26 : vector<8x768xf32>
    %c0_15 = arith.constant 0 : index
    %c0_16 = arith.constant 0 : index
    %28 = vector.load %arg16[%c0_15, %c0_16] : memref<8x768xf32, #tpu.memory_space<vmem>>, vector<8x768xf32>
    tpu.vector_store %arg16[%c0_15, %c0_16], %27 {strides = array<i32>} : memref<8x768xf32, #tpu.memory_space<vmem>>, vector<8x768xf32>,
    %c3_i32 = arith.constant 3 : i32
    %29 = arith.cmpi eq, %arg1, %c3_i32 : i32
    %30 = arith.extui %29 : i1 to i32
    %c0_i32_17 = arith.constant 0 : i32
    %31 = arith.cmpi ne, %30, %c0_i32_17 : i32
    scf.if %31 {
      %c0_18 = arith.constant 0 : index
      %c0_19 = arith.constant 0 : index
      %32 = vector.load %arg16[%c0_18, %c0_19] : memref<8x768xf32, #tpu.memory_space<vmem>>, vector<8x768xf32>
      %c0_20 = arith.constant 0 : index
      %c0_21 = arith.constant 0 : index
      %33 = vector.load %arg11[%c0_20, %c0_21] : memref<1x768xf32, #tpu.memory_space<vmem>>, vector<1x768xf32>
      %34 = vector.broadcast %33 : vector<1x768xf32> to vector<8x768xf32>
      %35 = arith.addf %32, %34 : vector<8x768xf32>
      %c0_22 = arith.constant 0 : index
      %c0_23 = arith.constant 0 : index
      %36 = vector.load %arg15[%c0_22, %c0_23] : memref<8x768xf32, #tpu.memory_space<vmem>>, vector<8x768xf32>
      %37 = arith.addf %35, %36 : vector<8x768xf32>
      %c0_24 = arith.constant 0 : index
      %c0_25 = arith.constant 0 : index
      %38 = vector.load %arg12[%c0_24, %c0_25] : memref<1x768xf32, #tpu.memory_space<vmem>>, vector<1x768xf32>
      %c0_26 = arith.constant 0 : index
      %c0_27 = arith.constant 0 : index
      %39 = vector.load %arg13[%c0_26, %c0_27] : memref<1x768xf32, #tpu.memory_space<vmem>>, vector<1x768xf32>
      %cst_28 = arith.constant dense<0.000000e+00> : vector<8xf32>
      %40 = vector.multi_reduction <add>, %37, %cst_28 [1] : vector<8x768xf32> to vector<8xf32>
      %41 = vector.shape_cast %40 : vector<8xf32> to vector<8x1xf32>
      %cst_29 = arith.constant 7.680000e+02 : f32
      %42 = vector.broadcast %cst_29 : f32 to vector<8x1xf32>
      %43 = arith.divf %41, %42 : vector<8x1xf32>
      %44 = vector.broadcast %43 : vector<8x1xf32> to vector<8x768xf32>
      %45 = arith.subf %37, %44 : vector<8x768xf32>
      %46 = arith.mulf %45, %45 : vector<8x768xf32>
      %cst_30 = arith.constant dense<0.000000e+00> : vector<8xf32>
      %47 = vector.multi_reduction <add>, %46, %cst_30 [1] : vector<8x768xf32> to vector<8xf32>
      %48 = vector.shape_cast %47 : vector<8xf32> to vector<8x1xf32>
      %cst_31 = arith.constant 7.680000e+02 : f32
      %49 = vector.broadcast %cst_31 : f32 to vector<8x1xf32>
      %50 = arith.divf %48, %49 : vector<8x1xf32>
      %cst_32 = arith.constant 9.99999996E-13 : f32
      %51 = vector.broadcast %cst_32 : f32 to vector<8x1xf32>
      %52 = arith.addf %50, %51 : vector<8x1xf32>
      %53 = math.rsqrt %52 : vector<8x1xf32>
      %54 = vector.broadcast %53 : vector<8x1xf32> to vector<8x768xf32>
      %55 = arith.mulf %45, %54 : vector<8x768xf32>
      %56 = vector.broadcast %38 : vector<1x768xf32> to vector<8x768xf32>
      %57 = arith.mulf %55, %56 : vector<8x768xf32>
      %58 = vector.broadcast %39 : vector<1x768xf32> to vector<8x768xf32>
      %59 = arith.addf %57, %58 : vector<8x768xf32>
      %60 = arith.truncf %59 : vector<8x768xf32> to vector<8x768xbf16>
      %c0_33 = arith.constant 0 : index
      %c0_34 = arith.constant 0 : index
      %61 = vector.load %arg14[%c0_33, %c0_34] : memref<8x768xbf16, #tpu.memory_space<vmem>>, vector<8x768xbf16>
      tpu.vector_store %arg14[%c0_33, %c0_34], %60 {strides = array<i32>} : memref<8x768xbf16, #tpu.memory_space<vmem>>, vector<8x768xbf16>,
    } else {
    }
    return
  }
  func.func @transform_0(%arg0: i32, %arg1: i32) -> (i32, i32) {
    %c0_i32 = arith.constant 0 : i32
    %c0_i32_0 = arith.constant 0 : i32
    return %arg0, %c0_i32 : i32, i32
  }
  func.func @transform_1(%arg0: i32, %arg1: i32) -> (i32, i32) {
    %c0_i32 = arith.constant 0 : i32
    %c0_i32_0 = arith.constant 0 : i32
    return %arg0, %c0_i32 : i32, i32
  }
  func.func @transform_2(%arg0: i32, %arg1: i32) -> (i32, i32) {
    %c0_i32 = arith.constant 0 : i32
    %c0_i32_0 = arith.constant 0 : i32
    %c0_i32_1 = arith.constant 0 : i32
    return %c0_i32, %c0_i32_0 : i32, i32
  }
  func.func @transform_3(%arg0: i32, %arg1: i32) -> (i32, i32) {
    %c0_i32 = arith.constant 0 : i32
    %c0_i32_0 = arith.constant 0 : i32
    %c0_i32_1 = arith.constant 0 : i32
    return %c0_i32, %c0_i32_0 : i32, i32
  }
  func.func @transform_4(%arg0: i32, %arg1: i32) -> (i32, i32) {
    %c0_i32 = arith.constant 0 : i32
    %c0_i32_0 = arith.constant 0 : i32
    %c0_i32_1 = arith.constant 0 : i32
    return %c0_i32, %c0_i32_0 : i32, i32
  }
  func.func @transform_5(%arg0: i32, %arg1: i32) -> (i32, i32) {
    %c0_i32 = arith.constant 0 : i32
    %c0_i32_0 = arith.constant 0 : i32
    %c0_i32_1 = arith.constant 0 : i32
    return %c0_i32, %c0_i32_0 : i32, i32
  }
  func.func @transform_6(%arg0: i32, %arg1: i32) -> (i32, i32) {
    %c0_i32 = arith.constant 0 : i32
    %c0_i32_0 = arith.constant 0 : i32
    return %c0_i32, %arg1 : i32, i32
  }
  func.func @transform_7(%arg0: i32, %arg1: i32) -> (i32, i32) {
    %c0_i32 = arith.constant 0 : i32
    %c0_i32_0 = arith.constant 0 : i32
    return %c0_i32, %arg1 : i32, i32
  }
  func.func @transform_8(%arg0: i32, %arg1: i32) -> (i32, i32) {
    %c0_i32 = arith.constant 0 : i32
    %c0_i32_0 = arith.constant 0 : i32
    return %arg1, %c0_i32 : i32, i32
  }
  func.func @transform_9(%arg0: i32, %arg1: i32) -> (i32, i32) {
    %c0_i32 = arith.constant 0 : i32
    %c0_i32_0 = arith.constant 0 : i32
    %c0_i32_1 = arith.constant 0 : i32
    return %c0_i32, %c0_i32_0 : i32, i32
  }
  func.func @transform_10(%arg0: i32, %arg1: i32) -> (i32, i32) {
    %c0_i32 = arith.constant 0 : i32
    %c0_i32_0 = arith.constant 0 : i32
    %c0_i32_1 = arith.constant 0 : i32
    return %c0_i32, %c0_i32_0 : i32, i32
  }
  func.func @transform_11(%arg0: i32, %arg1: i32) -> (i32, i32) {
    %c0_i32 = arith.constant 0 : i32
    %c0_i32_0 = arith.constant 0 : i32
    %c0_i32_1 = arith.constant 0 : i32
    return %c0_i32, %c0_i32_0 : i32, i32
  }
  func.func @transform_12(%arg0: i32, %arg1: i32) -> (i32, i32) {
    %c0_i32 = arith.constant 0 : i32
    %c0_i32_0 = arith.constant 0 : i32
    return %arg0, %c0_i32 : i32, i32
  }
}

module attributes {stable_mosaic.version = 11 : i64} {
  func.func @_head_kernel(%arg0: memref<2x768xbf16, #tpu.memory_space<vmem>>, %arg1: memref<768x50xf32, #tpu.memory_space<vmem>>, %arg2: memref<1x50xf32, #tpu.memory_space<vmem>>, %arg3: memref<50x2xf32, #tpu.memory_space<vmem>>, %arg4: memref<1x2xf32, #tpu.memory_space<vmem>>, %arg5: memref<2x2xf32, #tpu.memory_space<vmem>>) attributes {dimension_semantics = [], scalar_prefetch = 0 : i64, scratch_operands = 0 : i64, tpu.core_type = #tpu.core_type<tc>} {
    %c0 = arith.constant 0 : index
    %c0_0 = arith.constant 0 : index
    %0 = vector.load %arg0[%c0, %c0_0] : memref<2x768xbf16, #tpu.memory_space<vmem>>, vector<2x768xbf16>
    %1 = arith.extf %0 : vector<2x768xbf16> to vector<2x768xf32>
    %c0_1 = arith.constant 0 : index
    %c0_2 = arith.constant 0 : index
    %2 = vector.load %arg1[%c0_1, %c0_2] : memref<768x50xf32, #tpu.memory_space<vmem>>, vector<768x50xf32>
    %cst = arith.constant dense<0.000000e+00> : vector<2x50xf32>
    %3 = tpu.matmul %1, %2, %cst {dimension_numbers = #tpu.dot_dimension_numbers<[1], [0], [0], [1], [0, 0, 1, 1], [], []>} : vector<2x768xf32>, vector<768x50xf32>, vector<2x50xf32> -> vector<2x50xf32>
    %c0_3 = arith.constant 0 : index
    %c0_4 = arith.constant 0 : index
    %4 = vector.load %arg2[%c0_3, %c0_4] : memref<1x50xf32, #tpu.memory_space<vmem>>, vector<1x50xf32>
    %5 = vector.broadcast %4 : vector<1x50xf32> to vector<2x50xf32>
    %6 = arith.addf %3, %5 : vector<2x50xf32>
    %cst_5 = arith.constant 0.000000e+00 : f32
    %7 = vector.broadcast %cst_5 : f32 to vector<2x50xf32>
    %8 = arith.maximumf %6, %7 : vector<2x50xf32>
    %c0_6 = arith.constant 0 : index
    %c0_7 = arith.constant 0 : index
    %9 = vector.load %arg3[%c0_6, %c0_7] : memref<50x2xf32, #tpu.memory_space<vmem>>, vector<50x2xf32>
    %cst_8 = arith.constant dense<0.000000e+00> : vector<2x2xf32>
    %10 = tpu.matmul %8, %9, %cst_8 {dimension_numbers = #tpu.dot_dimension_numbers<[1], [0], [0], [1], [0, 0, 1, 1], [], []>} : vector<2x50xf32>, vector<50x2xf32>, vector<2x2xf32> -> vector<2x2xf32>
    %c0_9 = arith.constant 0 : index
    %c0_10 = arith.constant 0 : index
    %11 = vector.load %arg4[%c0_9, %c0_10] : memref<1x2xf32, #tpu.memory_space<vmem>>, vector<1x2xf32>
    %12 = vector.broadcast %11 : vector<1x2xf32> to vector<2x2xf32>
    %13 = arith.addf %10, %12 : vector<2x2xf32>
    %c0_11 = arith.constant 0 : index
    %c0_12 = arith.constant 0 : index
    %14 = vector.load %arg5[%c0_11, %c0_12] : memref<2x2xf32, #tpu.memory_space<vmem>>, vector<2x2xf32>
    tpu.vector_store %arg5[%c0_11, %c0_12], %13 {strides = array<i32>} : memref<2x2xf32, #tpu.memory_space<vmem>>, vector<2x2xf32>,
    return
  }
}

</mosaic_0001>

<bundles_post_ra>
// kernel: _lambda_.26
= control target key start
LH: loop header
LB: loop body
LE: loop exit
PB: predicated region body
PF: predicated region fallthrough
CT: control target
= control target key end

     0   :  { %s427_s12 = smov 0   ;;  %s454_s0 = inlined_call_operand.vmem [shape: f32[16,768], index: 0, kind: input, shape index: {}]   ;;  %s455_s1 = inlined_call_operand.vmem [shape: f32[1,768], index: 1, kind: input, shape index: {}]   ;;  %s456_s2 = inlined_call_operand.vmem [shape: f32[1,768], index: 2, kind: input, shape index: {}]   ;;  %s457_s3 = inlined_call_operand.vmem [shape: bf16[16,768], index: 3, kind: output, shape index: {}]  }
   0x1 LB: > { %s372_s13 = sadd.s32 4294967295, %s405_s12   ;;  %p376_p0 = scmp.ge.s32.totalorder %s405_s12, 1  ;;  %s405_s12 = sphi %s427_s12, %s13_s12  }
   0x2   : > { %p137_p1 = scmp.lt.s32.totalorder %s405_s12, 3 }
   0x4   : > { %p138_p2 = pnand %p376_p0, %p137_p1 }
   0x5   : > { %p161_p3 = scmp.lt.s32.totalorder (!%p138_p2), %s372_s13, 1  ;;  %v217_v31 = vlaneseq (!%p138_p2)  ;;  %v177_v37 = vld [vmem:[%s455_s1] sm:$0x3f] (!%p138_p2) }
   0x6   : > { %141 = sbr.rel (%p138_p2) target bundleno = 353 (0x161), region = 32  ;;  %v178_v42 = vld [vmem:[%s456_s2] sm:$0x3f] (!%p138_p2) }
   0x7   : > { %v218_v34 = vshrl.u32 (!%p138_p2), %v217_v31, 7 }
   0x9   : > { %v219_v35 = vsub.s32 (!%p138_p2), 0, %v218_v34  ;;  %v223_v36 = vsub.s32 (!%p138_p2), 1, %v218_v34  ;;  %v227_v38 = vsub.s32 (!%p138_p2), 2, %v218_v34  ;;  %v231_v39 = vsub.s32 (!%p138_p2), 3, %v218_v34 }
   0xa   : > { %v235_v40 = vsub.s32 (!%p138_p2), 4, %v218_v34  ;;  %v239_v41 = vsub.s32 (!%p138_p2), 5, %v218_v34 }
   0xb   : > { %v220_v43 = vrot.slane (!%p138_p2), %v177_v37, %v219_v35  ;;  %v224_v44 = vrot.slane (!%p138_p2), %v177_v37, %v223_v36  ;;  %v228_v45 = vrot.slane (!%p138_p2), %v177_v37, %v227_v38  ;;  %v232_v46 = vrot.slane (!%p138_p2), %v177_v37, %v231_v39 }
   0xc   : > { %v236_v47 = vrot.slane (!%p138_p2), %v177_v37, %v235_v40  ;;  %v240_v48 = vrot.slane (!%p138_p2), %v177_v37, %v239_v41  ;;  %v257_v50 = vrot.slane (!%p138_p2), %v178_v42, %v219_v35  ;;  %v261_v51 = vrot.slane (!%p138_p2), %v178_v42, %v223_v36 }
   0xd   : > { %s459_s13 = smov (!%p161_p3, %s372_s13), 1  ;;  %v265_v52 = vrot.slane %v178_v42, %v227_v38  ;;  %v269_v53 = vrot.slane %v178_v42, %v231_v39  ;;  %v273_v58 = vrot.slane %v178_v42, %v235_v40  ;;  %v277_v59 = vrot.slane %v178_v42, %v239_v41 }
   0xe   : > { %s387_s14 = smul.u32 48, %s459_s13 }
   0xf   : > { %s388_s22 = smul.u32 24, %s459_s13 }
  0x10   : > { %s165_s17 = scalar_lea.vmem %s454_s0, %s387_s14 }
  0x11   : > { %v171_v0 = vld [vmem:[%s165_s17] sm:$0xff]  ;;  %v172_v1 = vld [vmem:[%s165_s17 + $0x8] sm:$0xff]  ;;  %v173_v2 = vld [vmem:[%s165_s17 + $0x10] sm:$0xff]  ;;  %s170_s25 = scalar_lea.vmem %s457_s3, %s388_s22 }
  0x12   : > { %v179_v3 = vadd.f32 %v172_v1, %v171_v0  ;;  %v174_v4 = vld [vmem:[%s165_s17 + $0x18] sm:$0xff]  ;;  %v175_v6 = vld [vmem:[%s165_s17 + $0x20] sm:$0xff]  ;;  %v176_v8 = vld [vmem:[%s165_s17 + $0x28] sm:$0xff] }
  0x14   : > { %v180_v5 = vadd.f32 %v179_v3, %v173_v2 }
  0x16   : > { %v181_v7 = vadd.f32 %v180_v5, %v174_v4 }
  0x18   : > { %v182_v9 = vadd.f32 %v181_v7, %v175_v6 }
  0x1a   : > { %v183_v10 = vadd.f32 %v182_v9, %v176_v8 }
  0x1c   : > { %184 = vadd.xlane.f32.xlu0 %v183_v10 }
  0xa9   : > { %v185_v11 = vpop.xlane.xlu0 %184 }
  0xaa   : > { %v187_v12 = vmul.f32 0.0013020834, %v185_v11 }
  0xac   : > { %v188_v13 = vsub.f32 %v171_v0, %v187_v12  ;;  %v189_v14 = vsub.f32 %v172_v1, %v187_v12  ;;  %v190_v15 = vsub.f32 %v173_v2, %v187_v12  ;;  %v191_v16 = vsub.f32 %v174_v4, %v187_v12 }
  0xad   : > { %v192_v19 = vsub.f32 %v175_v6, %v187_v12  ;;  %v193_v22 = vsub.f32 %v176_v8, %v187_v12 }
  0xae   : > { %v194_v17 = vmul.f32 %v188_v13, %v188_v13  ;;  %v195_v18 = vmul.f32 %v189_v14, %v189_v14  ;;  %v196_v20 = vmul.f32 %v190_v15, %v190_v15  ;;  %v197_v23 = vmul.f32 %v191_v16, %v191_v16 }
  0xaf   : > { %v198_v25 = vmul.f32 %v192_v19, %v192_v19  ;;  %v199_v27 = vmul.f32 %v193_v22, %v193_v22 }
  0xb0   : > { %v200_v21 = vadd.f32 %v195_v18, %v194_v17 }
  0xb2   : > { %v201_v24 = vadd.f32 %v200_v21, %v196_v20 }
  0xb4   : > { %v202_v26 = vadd.f32 %v201_v24, %v197_v23 }
  0xb6   : > { %v203_v28 = vadd.f32 %v202_v26, %v198_v25 }
  0xb8   : > { %v204_v29 = vadd.f32 %v203_v28, %v199_v27 }
  0xba   : > { %205 = vadd.xlane.f32.xlu0 %v204_v29 }
 0x147   : > { %v206_v30 = vpop.xlane.xlu0 %205 }
 0x148   : > { %v207_v32 = vmul.f32 0.0013020834, %v206_v30 }
 0x14a   : > { %v208_v33 = vadd.f32 1e-12, %v207_v32 }
 0x14c   : > { %397 = vrsqrt.f32 %v208_v33 }
 0x156   : > { %v398_v49 = vpop.eup %397 }
 0x157   : > { %v210_v54 = vmul.f32 %v398_v49, %v188_v13  ;;  %v211_v55 = vmul.f32 %v398_v49, %v189_v14  ;;  %v212_v56 = vmul.f32 %v398_v49, %v190_v15  ;;  %v213_v57 = vmul.f32 %v398_v49, %v191_v16 }
 0x158   : > { %v214_v60 = vmul.f32 %v398_v49, %v192_v19  ;;  %v215_v61 = vmul.f32 %v398_v49, %v193_v22 }
 0x159   : > { %v247_v62 = vmul.f32 %v220_v43, %v210_v54  ;;  %v248_v63 = vmul.f32 %v224_v44, %v211_v55  ;;  %v249_v0 = vmul.f32 %v228_v45, %v212_v56  ;;  %v250_v1 = vmul.f32 %v232_v46, %v213_v57 }
 0x15a   : > { %v251_v2 = vmul.f32 %v236_v47, %v214_v60  ;;  %v252_v3 = vmul.f32 %v240_v48, %v215_v61 }
 0x15b   : > { %v284_v4 = vadd.f32 %v257_v50, %v247_v62  ;;  %v285_v5 = vadd.f32 %v261_v51, %v248_v63  ;;  %v286_v6 = vadd.f32 %v265_v52, %v249_v0  ;;  %v287_v7 = vadd.f32 %v269_v53, %v250_v1 }
 0x15c   : > { %v288_v8 = vadd.f32 %v273_v58, %v251_v2  ;;  %v289_v9 = vadd.f32 %v277_v59, %v252_v3 }
 0x15d   : > { %v384_v10 = vpack.c.bf16 %v285_v5, %v284_v4  ;;  %v385_v11 = vpack.c.bf16 %v287_v7, %v286_v6 }
 0x15e   : > { %v386_v12 = vpack.c.bf16 %v289_v9, %v288_v8 }
 0x15f   : > { %314 = vst [vmem:[%s170_s25] sm:$0xff] %v384_v10  ;;  %315 = vst [vmem:[%s170_s25 + $0x8] sm:$0xff] %v385_v11 }
 0x160   : > { %316 = vst [vmem:[%s170_s25 + $0x10] sm:$0xff] %v386_v12 }
 0x161 PF: > { %s13_s12 = sadd.s32 1, %s405_s12  }
 0x162   : > { %p10_p4 = scmp.ge.s32.totalorder %s13_s12, 4  }
 0x164   :  { %12 = sbr.rel (!%p10_p4) target bundleno = 1 (0x1), region = 62 }

// kernel: _lambda_.51
= control target key start
LH: loop header
LB: loop body
LE: loop exit
PB: predicated region body
PF: predicated region fallthrough
CT: control target
= control target key end

     0   :  { %v747_v48 = vmov 1983009808   ;;  %v133_v50 = vlaneseq  ;;  %s1117_s0 = inlined_call_operand.vmem [shape: bf16[2,768], index: 0, kind: input, shape index: {}]   ;;  %s1118_s1 = inlined_call_operand.vmem [shape: f32[768,50], index: 1, kind: input, shape index: {}]   ;;  %s1119_s2 = inlined_call_operand.vmem [shape: f32[1,50], index: 2, kind: input, shape index: {}]   ;;  %s1120_s3 = inlined_call_operand.vmem [shape: f32[50,2], index: 3, kind: input, shape index: {}]   ;;  %s1121_s4 = inlined_call_operand.vmem [shape: f32[1,2], index: 4, kind: input, shape index: {}]   ;;  %s1122_s5 = inlined_call_operand.hbm [shape: f32[2,2], index: 5, kind: output, shape index: {}]  }
   0x1   :  { %v40_v0 = vld [vmem:[%s1118_s1 + $0x80] sm:$0xff]  ;;  %v41_v1 = vld [vmem:[%s1118_s1 + $0x88] sm:$0xff]  ;;  %v42_v11 = vld [vmem:[%s1118_s1 + $0x90] sm:$0xff]  ;;  %v131_v49 = vunpack.c.l.s4 %v747_v48 }
   0x2   :  { %v24_v2 = vld [vmem:[%s1118_s1] sm:$0xff]  ;;  %v613_v3 = vpack.c.bf16 %v41_v1, %v40_v0  ;;  %v25_v4 = vld [vmem:[%s1118_s1 + $0x8] sm:$0xff]  ;;  %v43_v13 = vld [vmem:[%s1118_s1 + $0x98] sm:$0xff] }
   0x3   :  { %v72_v5 = vld [vmem:[%s1118_s1 + $0x180] sm:$0xff]  ;;  %v73_v6 = vld [vmem:[%s1118_s1 + $0x188] sm:$0xff]  ;;  %v615_v7 = vpack.c.bf16 %v25_v4, %v24_v2  ;;  %v26_v14 = vld [vmem:[%s1118_s1 + $0x10] sm:$0xff]  ;;  %v617_v16 = vpack.c.bf16 %v43_v13, %v42_v11  ;;  %v132_v1 = vunpack.c.0.s8 %v131_v49  ;;  %v134_v2 = vshrl.u32 %v133_v50, 7 }
   0x4   :  { %v645_v8 = vpack.c.bf16 %v73_v6, %v72_v5  ;;  %v56_v9 = vld [vmem:[%s1118_s1 + $0x100] sm:$0xff]  ;;  %v57_v10 = vld [vmem:[%s1118_s1 + $0x108] sm:$0xff]  ;;  %614 = vmatprep.subr.bf16.mxu0 %v613_v3  ;;  %v27_v15 = vld [vmem:[%s1118_s1 + $0x18] sm:$0xff] }
   0x5   :  { %v647_v12 = vpack.c.bf16 %v57_v10, %v56_v9  ;;  %616 = vmatpush3.bf16.msra.mxu0 %v615_v7  ;;  %v619_v17 = vpack.c.bf16 %v27_v15, %v26_v14  ;;  %v74_v18 = vld [vmem:[%s1118_s1 + $0x190] sm:$0xff]  ;;  %v75_v19 = vld [vmem:[%s1118_s1 + $0x198] sm:$0xff]  ;;  %v44_v23 = vld [vmem:[%s1118_s1 + $0xa0] sm:$0xff]  ;;  %v135_v15 = vsub.s32 %v132_v1, %v134_v2 }
   0x6   :  { %646 = vmatprep.subr.bf16.mxu1 %v645_v8  ;;  %v58_v20 = vld [vmem:[%s1118_s1 + $0x110] sm:$0xff]  ;;  %v649_v21 = vpack.c.bf16 %v75_v19, %v74_v18  ;;  %v59_v22 = vld [vmem:[%s1118_s1 + $0x118] sm:$0xff]  ;;  %v45_v24 = vld [vmem:[%s1118_s1 + $0xa8] sm:$0xff]  ;;  %618 = vmatprep.subr.bf16.mxu0 %v617_v16 }
   0x7   :  { %648 = vmatpush3.bf16.msra.mxu1 %v647_v12  ;;  %v651_v25 = vpack.c.bf16 %v59_v22, %v58_v20  ;;  %v621_v26 = vpack.c.bf16 %v45_v24, %v44_v23  ;;  %v28_v27 = vld [vmem:[%s1118_s1 + $0x20] sm:$0xff]  ;;  %v29_v28 = vld [vmem:[%s1118_s1 + $0x28] sm:$0xff]  ;;  %v46_v35 = vld [vmem:[%s1118_s1 + $0xb0] sm:$0xff] }
   0x8   :  { %v76_v29 = vld [vmem:[%s1118_s1 + $0x1a0] sm:$0xff]  ;;  %650 = vmatprep.subr.bf16.mxu1 %v649_v21  ;;  %v77_v30 = vld [vmem:[%s1118_s1 + $0x1a8] sm:$0xff]  ;;  %v623_v33 = vpack.c.bf16 %v29_v28, %v28_v27  ;;  %v47_v36 = vld [vmem:[%s1118_s1 + $0xb8] sm:$0xff] }
   0x9   :  { %v60_v31 = vld [vmem:[%s1118_s1 + $0x120] sm:$0xff]  ;;  %v61_v32 = vld [vmem:[%s1118_s1 + $0x128] sm:$0xff]  ;;  %620 = vmatpush3.bf16.msra.mxu0 %v619_v17  ;;  %v653_v34 = vpack.c.bf16 %v77_v30, %v76_v29  ;;  %v30_v37 = vld [vmem:[%s1118_s1 + $0x30] sm:$0xff]  ;;  %v625_v39 = vpack.c.bf16 %v47_v36, %v46_v35 }
   0xa   :  { %622 = vmatprep.subr.bf16.mxu0 %v621_v26  ;;  %v655_v38 = vpack.c.bf16 %v61_v32, %v60_v31  ;;  %v31_v40 = vld [vmem:[%s1118_s1 + $0x38] sm:$0xff]  ;;  %v78_v41 = vld [vmem:[%s1118_s1 + $0x1b0] sm:$0xff]  ;;  %v48_v46 = vld [vmem:[%s1118_s1 + $0xc0] sm:$0xff] }
   0xb   :  { %652 = vmatpush3.bf16.msra.mxu1 %v651_v25  ;;  %v79_v42 = vld [vmem:[%s1118_s1 + $0x1b8] sm:$0xff]  ;;  %v62_v44 = vld [vmem:[%s1118_s1 + $0x130] sm:$0xff]  ;;  %v49_v47 = vld [vmem:[%s1118_s1 + $0xc8] sm:$0xff]  ;;  %v627_v51 = vpack.c.bf16 %v31_v40, %v30_v37 }
   0xc   :  { %654 = vmatprep.subr.bf16.mxu1 %v653_v34  ;;  %v657_v43 = vpack.c.bf16 %v79_v42, %v78_v41  ;;  %v63_v45 = vld [vmem:[%s1118_s1 + $0x138] sm:$0xff]  ;;  %v80_v52 = vld [vmem:[%s1118_s1 + $0x1c0] sm:$0xff]  ;;  %v81_v53 = vld [vmem:[%s1118_s1 + $0x1c8] sm:$0xff]  ;;  %v629_v55 = vpack.c.bf16 %v49_v47, %v48_v46 }
   0xd   :  { %624 = vmatpush3.bf16.msra.mxu0 %v623_v33  ;;  %v659_v54 = vpack.c.bf16 %v63_v45, %v62_v44  ;;  %v32_v56 = vld [vmem:[%s1118_s1 + $0x40] sm:$0xff]  ;;  %v33_v57 = vld [vmem:[%s1118_s1 + $0x48] sm:$0xff]  ;;  %v661_v59 = vpack.c.bf16 %v81_v53, %v80_v52  ;;  %v50_v61 = vld [vmem:[%s1118_s1 + $0xd0] sm:$0xff] }
   0xe   :  { %626 = vmatprep.subr.bf16.mxu0 %v625_v39  ;;  %v64_v58 = vld [vmem:[%s1118_s1 + $0x140] sm:$0xff]  ;;  %v65_v60 = vld [vmem:[%s1118_s1 + $0x148] sm:$0xff]  ;;  %v51_v62 = vld [vmem:[%s1118_s1 + $0xd8] sm:$0xff]  ;;  %v631_v3 = vpack.c.bf16 %v33_v57, %v32_v56 }
   0xf   :  { %656 = vmatpush3.bf16.msra.mxu1 %v655_v38  ;;  %v82_v63 = vld [vmem:[%s1118_s1 + $0x1d0] sm:$0xff]  ;;  %v83_v0 = vld [vmem:[%s1118_s1 + $0x1d8] sm:$0xff]  ;;  %v663_v4 = vpack.c.bf16 %v65_v60, %v64_v58  ;;  %v633_v5 = vpack.c.bf16 %v51_v62, %v50_v61  ;;  %v52_v11 = vld [vmem:[%s1118_s1 + $0xe0] sm:$0xff] }
  0x10   :  { %658 = vmatprep.subr.bf16.mxu1 %v657_v43  ;;  %v34_v6 = vld [vmem:[%s1118_s1 + $0x50] sm:$0xff]  ;;  %v35_v7 = vld [vmem:[%s1118_s1 + $0x58] sm:$0xff]  ;;  %v665_v9 = vpack.c.bf16 %v83_v0, %v82_v63  ;;  %v53_v12 = vld [vmem:[%s1118_s1 + $0xe8] sm:$0xff] }
  0x11   :  { %628 = vmatpush3.bf16.msra.mxu0 %v627_v51  ;;  %v66_v8 = vld [vmem:[%s1118_s1 + $0x150] sm:$0xff]  ;;  %v67_v10 = vld [vmem:[%s1118_s1 + $0x158] sm:$0xff]  ;;  %v84_v13 = vld [vmem:[%s1118_s1 + $0x1e0] sm:$0xff]  ;;  %v635_v16 = vpack.c.bf16 %v35_v7, %v34_v6  ;;  %v637_v20 = vpack.c.bf16 %v53_v12, %v52_v11 }
  0x12   :  { %630 = vmatprep.subr.bf16.mxu0 %v629_v55  ;;  %v85_v14 = vld [vmem:[%s1118_s1 + $0x1e8] sm:$0xff]  ;;  %v36_v17 = vld [vmem:[%s1118_s1 + $0x60] sm:$0xff]  ;;  %v667_v19 = vpack.c.bf16 %v67_v10, %v66_v8  ;;  %v54_v26 = vld [vmem:[%s1118_s1 + $0xf0] sm:$0xff] }
  0x13   :  { %660 = vmatpush3.bf16.msra.mxu1 %v659_v54  ;;  %v21_v18 = vld [vmem:[%s1117_s0] sm:$0x3f]  ;;  %v37_v21 = vld [vmem:[%s1118_s1 + $0x68] sm:$0xff]  ;;  %v669_v25 = vpack.c.bf16 %v85_v14, %v84_v13  ;;  %v55_v27 = vld [vmem:[%s1118_s1 + $0xf8] sm:$0xff] }
  0x14   :  { %662 = vmatprep.subr.bf16.mxu1 %v661_v59  ;;  %v68_v22 = vld [vmem:[%s1118_s1 + $0x160] sm:$0xff]  ;;  %v69_v23 = vld [vmem:[%s1118_s1 + $0x168] sm:$0xff]  ;;  %v22_v24 = vunpack.c.l.bf16 %v21_v18  ;;  %v86_v28 = vld [vmem:[%s1118_s1 + $0x1f0] sm:$0xff]  ;;  %v639_v32 = vpack.c.bf16 %v37_v21, %v36_v17  ;;  %v641_v34 = vpack.c.bf16 %v55_v27, %v54_v26  ;;  %v23_v37 = vunpack.c.h.bf16 %v21_v18 }
  0x15   :  { %632 = vmatpush3.bf16.msra.mxu0 %v631_v3  ;;  %v87_v29 = vld [vmem:[%s1118_s1 + $0x1f8] sm:$0xff]  ;;  %v671_v33 = vpack.c.bf16 %v69_v23, %v68_v22  ;;  %v38_v35 = vld [vmem:[%s1118_s1 + $0x70] sm:$0xff]  ;;  %v104_v43 = vld [vmem:[%s1118_s1 + $0x280] sm:$0xff] }
  0x16   :  { %634 = vmatprep.subr.bf16.mxu0 %v633_v5  ;;  %v136_v30 = vrot.slane %v22_v24, %v135_v15  ;;  %v129_v31 = vcombine.high %v22_v24, %v22_v24  ;;  %v39_v36 = vld [vmem:[%s1118_s1 + $0x78] sm:$0xff]  ;;  %v70_v39 = vld [vmem:[%s1118_s1 + $0x170] sm:$0xff]  ;;  %v673_v41 = vpack.c.bf16 %v87_v29, %v86_v28  ;;  %v105_v44 = vld [vmem:[%s1118_s1 + $0x288] sm:$0xff]  ;;  %v989_v51 = vrot.slane %v23_v37, %v135_v15 }
  0x17   :  { %664 = vmatpush3.bf16.msra.mxu1 %v663_v4  ;;  %v71_v42 = vld [vmem:[%s1118_s1 + $0x178] sm:$0xff]  ;;  %v643_v46 = vpack.c.bf16 %v39_v36, %v38_v35  ;;  %v677_v48 = vpack.c.bf16 %v105_v44, %v104_v43  ;;  %v88_v49 = vld [vmem:[%s1118_s1 + $0x200] sm:$0xff]  ;;  %v89_v50 = vld [vmem:[%s1118_s1 + $0x208] sm:$0xff] }
  0x18   :  { %666 = vmatprep.subr.bf16.mxu1 %v665_v9  ;;  %v144_v38 = vcombine.high %v136_v30, %v136_v30  ;;  %v143_v40 = vrot.slane %v129_v31, %v135_v15  ;;  %v675_v47 = vpack.c.bf16 %v71_v42, %v70_v39  ;;  %v106_v52 = vld [vmem:[%s1118_s1 + $0x290] sm:$0xff]  ;;  %v107_v53 = vld [vmem:[%s1118_s1 + $0x298] sm:$0xff]  ;;  %v679_v54 = vpack.c.bf16 %v89_v50, %v88_v49 }
  0x19   :  { %636 = vmatpush3.bf16.msra.mxu0 %v635_v16 }
  0x1a   :  { %638 = vmatprep.subr.bf16.mxu0 %v637_v20  ;;  %224 = vmatprep.mubr.f32.mxu0 %v144_v38  ;;  %v145_v45 = vcombine.high %v143_v40, %v143_v40 }
  0x1b   :  { %668 = vmatpush3.bf16.msra.mxu1 %v667_v19 }
  0x1c   :  { %670 = vmatprep.subr.bf16.mxu1 %v669_v25  ;;  %294 = vmatprep.mubr.f32.mxu1 %v145_v45 }
  0x1d   :  { %640 = vmatpush3.bf16.msra.mxu0 %v639_v32 }
  0x1e   :  { %642 = vmatprep.subr.bf16.mxu0 %v641_v34 }
  0x1f   :  { %672 = vmatpush3.bf16.msra.mxu1 %v671_v33 }
  0x20   :  { %674 = vmatprep.subr.bf16.mxu1 %v673_v41 }
  0x21   :  { %644 = vmatpush3.bf16.msra.mxu0 %v643_v46 }
  0x22   :  { %10 = vsyncpa [#allocation3], 0  ;;  %678 = vmatprep.subr.bf16.mxu0 %v677_v48  ;;  %v681_v55 = vpack.c.bf16 %v107_v53, %v106_v52  ;;  %v90_v56 = vld [vmem:[%s1118_s1 + $0x210] sm:$0xff]  ;;  %v91_v57 = vld [vmem:[%s1118_s1 + $0x218] sm:$0xff]  ;;  %v153_v58 = vcombine.high %v989_v51, %v989_v51  ;;  %v748_v35 = vmov 0.0|0.0   ;;  %v749_v42 = vmov 0.0  }
  0x23   :  { %676 = vmatpush3.bf16.msra.mxu1 %v675_v47  ;;  %v108_v59 = vld [vmem:[%s1118_s1 + $0x2a0] sm:$0xff]  ;;  %v109_v60 = vld [vmem:[%s1118_s1 + $0x2a8] sm:$0xff]  ;;  %v683_v61 = vpack.c.bf16 %v91_v57, %v90_v56  ;;  %v110_v1 = vld [vmem:[%s1118_s1 + $0x2b0] sm:$0xff]  ;;  %vm389_vm0 = vcmask 1041408   ;;  %vm750_vm1 = vmmov 0   ;;  %vm385_vm2 = vcmask 408576  }
  0x24   :  { %225 = vmatmul.mubr.f32.vlgmr.msra.gmra.mrb[0].mxu0 %v136_v30  ;;  %v685_v62 = vpack.c.bf16 %v109_v60, %v108_v59  ;;  %v92_v63 = vld [vmem:[%s1118_s1 + $0x220] sm:$0xff]  ;;  %v93_v0 = vld [vmem:[%s1118_s1 + $0x228] sm:$0xff]  ;;  %v111_v2 = vld [vmem:[%s1118_s1 + $0x2b8] sm:$0xff]  ;;  %709 = vmatprep.subr.bf16.mxu1 %v748_v35  ;;  %s751_s24 = smov [#allocation2]   ;;  %vm463_vm3 = vcmask 9216  }
  0x25   :  { %680 = vmatpush3.bf16.msra.mxu0 %v679_v54  ;;  %364 = vmatprep.mubr.f32.mxu0 %v153_v58  ;;  %v687_v3 = vpack.c.bf16 %v93_v0, %v92_v63  ;;  %v689_v4 = vpack.c.bf16 %v111_v2, %v110_v1  ;;  %v94_v5 = vld [vmem:[%s1118_s1 + $0x230] sm:$0xff]  ;;  %v95_v6 = vld [vmem:[%s1118_s1 + $0x238] sm:$0xff]  ;;  %v112_v7 = vld [vmem:[%s1118_s1 + $0x2c0] sm:$0xff] }
  0x26   :  { %295 = vmatmul.mubr.f32.vlgmr.msra.gmra.mrb[0].mxu1 %v143_v40  ;;  %682 = vmatprep.subr.bf16.mxu0 %v681_v55  ;;  %v113_v8 = vld [vmem:[%s1118_s1 + $0x2c8] sm:$0xff]  ;;  %v691_v9 = vpack.c.bf16 %v95_v6, %v94_v5  ;;  %v96_v11 = vld [vmem:[%s1118_s1 + $0x240] sm:$0xff]  ;;  %v114_v13 = vld [vmem:[%s1118_s1 + $0x2d0] sm:$0xff] }
  0x27   :  { %v693_v10 = vpack.c.bf16 %v113_v8, %v112_v7  ;;  %v97_v12 = vld [vmem:[%s1118_s1 + $0x248] sm:$0xff]  ;;  %v115_v14 = vld [vmem:[%s1118_s1 + $0x2d8] sm:$0xff]  ;;  %v98_v17 = vld [vmem:[%s1118_s1 + $0x250] sm:$0xff]  ;;  %610 = vmatprep.mubr.msk.f32.mxu1 %vm750_vm1, %v749_v42 }
  0x28   :  { %v695_v15 = vpack.c.bf16 %v97_v12, %v96_v11  ;;  %v697_v16 = vpack.c.bf16 %v115_v14, %v114_v13  ;;  %v99_v18 = vld [vmem:[%s1118_s1 + $0x258] sm:$0xff]  ;;  %v116_v19 = vld [vmem:[%s1118_s1 + $0x2e0] sm:$0xff]  ;;  %v117_v20 = vld [vmem:[%s1118_s1 + $0x2e8] sm:$0xff] }
  0x29   :  { %684 = vmatpush3.bf16.msra.mxu0 %v683_v61  ;;  %v699_v21 = vpack.c.bf16 %v99_v18, %v98_v17  ;;  %v701_v22 = vpack.c.bf16 %v117_v20, %v116_v19  ;;  %v100_v23 = vld [vmem:[%s1118_s1 + $0x260] sm:$0xff]  ;;  %v101_v24 = vld [vmem:[%s1118_s1 + $0x268] sm:$0xff]  ;;  %v118_v25 = vld [vmem:[%s1118_s1 + $0x2f0] sm:$0xff] }
  0x2a   :  { %686 = vmatprep.subr.bf16.mxu0 %v685_v62  ;;  %v119_v26 = vld [vmem:[%s1118_s1 + $0x2f8] sm:$0xff]  ;;  %v703_v27 = vpack.c.bf16 %v101_v24, %v100_v23  ;;  %v102_v29 = vld [vmem:[%s1118_s1 + $0x270] sm:$0xff]  ;;  %v371_v32 = vld [vmem:[%s1120_s3] sm:$0xff] }
  0x2b   :  { %v705_v28 = vpack.c.bf16 %v119_v26, %v118_v25  ;;  %v103_v30 = vld [vmem:[%s1118_s1 + $0x278] sm:$0xff]  ;;  %v372_v33 = vld [vmem:[%s1120_s3 + $0x8] sm:$0xff]  ;;  %v373_v34 = vld [vmem:[%s1120_s3 + $0x10] sm:$0xff] }
  0x2c   :  { %v707_v31 = vpack.c.bf16 %v103_v30, %v102_v29  ;;  %v710_v36 = vpack.c.bf16 %v372_v33, %v371_v32  ;;  %v374_v37 = vld [vmem:[%s1120_s3 + $0x18] sm:$0xff]  ;;  %v375_v39 = vld [vmem:[%s1120_s3 + $0x20] sm:$0xff]  ;;  %v376_v40 = vld [vmem:[%s1120_s3 + $0x28] sm:$0xff] }
  0x2d   :  { %688 = vmatpush3.bf16.msra.mxu0 %v687_v3  ;;  %v713_v38 = vpack.c.bf16 %v374_v37, %v373_v34  ;;  %v716_v41 = vpack.c.bf16 %v376_v40, %v375_v39  ;;  %v377_v43 = vld [vmem:[%s1120_s3 + $0x30] sm:$0x3]  ;;  %v479_v45 = vld [vmem:[%s1119_s2] ss:$0 sm:$0xff]  ;;  %s471_s2 = sshll.u32 %s751_s24, 4  ;;  %s472_s2 = int_to_ptr.vmem [resolvable:$true] %s471_s2 }
  0x2e   :  { %690 = vmatprep.subr.bf16.mxu0 %v689_v4  ;;  %711 = vmatpush3.bf16.msra.mxu1 %v710_v36  ;;  %v480_v58 = vld [vmem:[%s1121_s4] ss:$0 sm:$0xff]  ;;  %s723_s25 = scalar_lea.vmem %s472_s2, 32  ;;  %p728_p1 = scmp.lt.s32.totalorder %s472_s2, %s472_s2 }
  0x2f   :  { %712 = vmatprep.subr.bf16.mxu1 %v748_v35  ;;  %p724_p0 = scmp.ne.s32.totalorder %s472_s2, %s723_s25  ;;  %p729_p2 = scmp.lt.s32.totalorder %s723_s25, %s723_s25 }
  0x31   :  { %692 = vmatpush3.bf16.msra.mxu0 %v691_v9  ;;  %p730_p3 = por %p729_p2, %p728_p1 }
  0x32   :  { %694 = vmatprep.subr.bf16.mxu0 %v693_v10  ;;  %714 = vmatpush3.bf16.msra.mxu1 %v713_v38 }
  0x33   :  { %715 = vmatprep.subr.bf16.mxu1 %v748_v35  ;;  %p731_p4 = pnand %p730_p3, %p724_p0 }
  0x35   :  { %696 = vmatpush3.bf16.msra.mxu0 %v695_v15 }
  0x36   :  { %698 = vmatprep.subr.bf16.mxu0 %v697_v16  ;;  %717 = vmatpush3.bf16.msra.mxu1 %v716_v41 }
  0x37   :  { %608 = vmatprep.subr.mxu1 %v749_v42 }
  0x39   :  { %700 = vmatpush3.bf16.msra.mxu0 %v699_v21 }
  0x3a   :  { %702 = vmatprep.subr.bf16.mxu0 %v701_v22  ;;  %609 = vmatpush3.msk.msra.mxu1 %vm389_vm0, %v377_v43 }
  0x3d   :  { %704 = vmatpush3.bf16.msra.mxu0 %v703_v27 }
  0x3e   :  { %706 = vmatprep.subr.bf16.mxu0 %v705_v28 }
  0x41   :  { %708 = vmatpush3.bf16.msra.mxu0 %v707_v31 }
  0x44   :  { %365 = vmatmul.mubr.f32.vlgmr.msra.gmra.mrb[2].mxu0 %v989_v51 }
  0xf7   :  { %v515_v44 = vpop.f32.mrb[0].mxu0 }
  0xf8   :  { %v516_v46 = vpop.f32.mrb[1].mxu0 }
  0xf9   :  { %v550_v47 = vpop.f32.mrb[0].mxu1  ;;  %v517_v48 = vadd.f32 %v516_v46, %v515_v44 }
  0xfa   :  { %v551_v49 = vpop.f32.mrb[1].mxu1 }
  0xfb   :  { %v552_v50 = vadd.f32 %v551_v49, %v550_v47  ;;  %v227_v51 = vadd.f32 %v517_v48, %v479_v45 }
  0xfd   :  { %v297_v52 = vadd.f32 %v552_v50, %v227_v51 }
 0x117   :  { %v585_v53 = vpop.f32.mrb[2].mxu0 }
 0x118   :  { %v586_v54 = vpop.f32.mrb[3].mxu0 }
 0x119   :  { %v587_v55 = vadd.f32 %v586_v54, %v585_v53 }
 0x11b   :  { %v367_v56 = vadd.f32 %v587_v55, %v297_v52 }
 0x11d   :  { %v370_v57 = vmax.f32 %v367_v56, 0.0 }
 0x11f   :  { %611 = vmatmul.mubr.msk.f32.vlgmr.msra.gmra.mrb[2].mxu1 %vm385_vm2, %v370_v57 }
 0x1f2   :  { %v459_v59 = vpop.f32.mrb[2].mxu1 }
 0x1f3   :  { %v460_v60 = vadd.f32 %v480_v58, %v459_v59  ;;  %v612_v61 = vpop.f32.mrb[3].mxu1 }
 0x1f5   :  { %464 = vst.msk [vmem:[#allocation2] sm:$0x3] %vm463_vm3, %v460_v60 }
 0x1f6   :  { %734 = shalt.err (!%p731_p4)
}
 0x1f7   :  { %s735_s28 = scalar_lea.hbm %s1122_s5, 32 }
 0x1f8   :  { %p736_p5 = scmp.ne.s32.totalorder %s1122_s5, %s735_s28  ;;  %p739_p6 = scmp.lt.u32.totalorder %s735_s28, %s1122_s5 }
 0x1fa   :  { %p741_p7 = pnand %p739_p6, %p736_p5 }
 0x1fc   :  { %744 = shalt.err (!%p741_p7)
}
 0x1fd   :  { %474 = dma.vmem_to_hbm [thread:$0]  %s472_s2, 32, %s1122_s5, [#allocation3]  }
 0x1fe   :  { %745 = dma.done.wait [#allocation3], 32  }
 0x1ff   :  { %746 = vsyncadd [#allocation3], 4294967264 }
 0x200   :  { %478 = vsyncpa [#allocation3], 1 }

// kernel: _lambda_.27
= control target key start
LH: loop header
LB: loop body
LE: loop exit
PB: predicated region body
PF: predicated region fallthrough
CT: control target
= control target key end

     0   :  { %13 = vsyncpa [#allocation3], 0  ;;  %s4852_s0 = inlined_call_operand.vmem [shape: bf16[16,768], index: 0, kind: input, shape index: {}]   ;;  %s4853_s1 = inlined_call_operand.hbm [shape: bf16[768,768], index: 1, kind: input, shape index: {}]   ;;  %s4854_s2 = inlined_call_operand.vmem [shape: bf16[768,768], index: 2, kind: input, shape index: {}]   ;;  %s4855_s3 = inlined_call_operand.vmem [shape: bf16[768,768], index: 3, kind: input, shape index: {}]   ;;  %s4856_s4 = inlined_call_operand.vmem [shape: f32[1,768], index: 4, kind: input, shape index: {}]   ;;  %s4857_s5 = inlined_call_operand.vmem [shape: f32[1,768], index: 5, kind: input, shape index: {}]   ;;  %s4858_s6 = inlined_call_operand.vmem [shape: f32[1,768], index: 6, kind: input, shape index: {}]   ;;  %s4859_s7 = inlined_call_operand.vmem [shape: f32[2,1,8], index: 7, kind: input, shape index: {}]   ;;  %s4860_s8 = inlined_call_operand.vmem [shape: bf16[16,768], index: 8, kind: output, shape index: {}]  }
   0x1   :  { %15 = vsyncpa [#allocation3 + $0x1], 0  ;;  %s4062_s27 = smov 0   ;;  %s4064_s28 = smov 0  }
   0x2   :  { %s4066_s29 = smov 0   ;;  %s4068_s30 = smov 0  }
   0x3   :  { %s4070_s9 = smov 0   ;;  %s4072_s10 = smov 0  }
   0x4   :  { %s4074_s11 = smov 0   ;;  %s4076_s12 = smov 0  }
   0x5 LB: > { %s3278_s13 = sadd.s32 4294967295, %s4008_s12   ;;  %s30_s14 = sadd.s32 1, %s4000_s10  ;;  %s4008_s12 = sphi %s4076_s12, %s21_s12   ;;  %s4004_s11 = sphi %s4074_s11, %s4874_s11   ;;  %s4000_s10 = sphi %s4072_s10, %s4873_s10   ;;  %s3996_s9 = sphi %s4070_s9, %s4872_s9   ;;  %s3992_s30 = sphi %s4068_s30, %s4871_s30   ;;  %s3988_s29 = sphi %s4066_s29, %s4870_s29   ;;  %s3984_s28 = sphi %s4064_s28, %s4869_s28   ;;  %s3980_s27 = sphi %s4062_s27, %s4868_s27  }
   0x6   : > { %p31_p0 = scmp.ge.s32.totalorder %s30_s14, 6  ;;  %s33_s15 = sadd.s32 1, %s4004_s11 }
   0x7   : > { %s66_s16 = sadd.s32 1, %s3988_s29  ;;  %p73_p1 = scmp.ne.s32.totalorder %s3988_s29, %s3984_s28 }
   0x8   : > { %s4876_s14 = smov (%p31_p0, %s30_s14), 0  ;;  %s4878_s15 = smov (!%p31_p0, %s33_s15), %s4004_s11 }
   0x9   : > { %4862 = sst [smem:[#allocation7_spill]] %s4876_s14  ;;  %s63_s17 = ssub.s32 %s4000_s10, %s4876_s14 }
   0xa   : > { %p74_p2 = scmp.eq.s32.totalorder %s4008_s12, 0  ;;  %p35_p3 = scmp.ge.s32.totalorder %s4878_s15, 2 }
   0xb   : > { %p64_p4 = scmp.eq.s32.totalorder %s63_s17, 0  ;;  %p79_p6 = scmp.ne.s32.totalorder %s3984_s28, %s3980_s27 }
   0xc   : > { %p4112_p5 = por %p74_p2, %p73_p1  ;;  %s4880_s15 = smov (%p35_p3, %s4878_s15), 0 }
   0xd   : > { %4864 = sst [smem:[#allocation8_spill]] %s4880_s15  ;;  %p80_p7 = scmp.eq.s32.totalorder %s3278_s13, 0 }
   0xe   : > { %s4120_s19 = scalar_select %p64_p4, %s3988_s29, %s66_s16  }
   0xf   : > { %p4122_p8 = por %p80_p7, %p79_p6  ;;  %p3281_p9 = scmp.ge.s32.totalorder %s4008_s12, 12 }
  0x10   : > { %s295_s21 = sand.u32 (!%p3281_p9), 1, %s3988_s29   ;;  %s3282_s22 = sshll.u32 (!%p3281_p9), %s4000_s10, 6 }
  0x11   : > { %283 = sbr.rel (%p3281_p9) target bundleno = 178 (0xb2), region = 16  ;;  %s4134_s26 = scalar_lea.hbm (!%p3281_p9), %s4853_s1, %s3282_s22 }
  0x12   : > { %s4129_s23 = smul.u32 (!%p3281_p9), 384, %s295_s21  ;;  %s4139_s16 = scalar_lea.sflag (!%p3281_p9), [#allocation3], %s295_s21 }
  0x13   : > { %s3914_s17 = scalar_lea.hbm (!%p3281_p9), %s4134_s26, 6144  ;;  %s3918_s22 = scalar_lea.hbm (!%p3281_p9), %s4853_s1, 36864 }
  0x14   : > { %s299_s27 = scalar_lea.vmem (!%p3281_p9), [#allocation2], %s4129_s23  ;;  %p3915_p10 = scmp.ne.s32.totalorder (!%p3281_p9), %s4134_s26, %s3914_s17 }
  0x15   : > { %s305_s13 = sshll.u32 (!%p3281_p9), %s299_s27, 4  ;;  %p3919_p13 = scmp.lt.u32.totalorder (!%p3281_p9), %s4134_s26, %s4853_s1  ;;  %s4137_s13 = int_to_ptr.vmem [resolvable:$true] %s305_s13 }
  0x16   : > { %p3916_p11 = pnand (!%p3281_p9), %p3915_p10, %p4112_p5  ;;  %p3920_p0 = scmp.lt.u32.totalorder (!%p3281_p9), %s3918_s22, %s3914_s17 }
  0x17   : > { %p3922_p2 = scmp.lt.u32.totalorder (!%p3281_p9), %s3914_s17, %s4134_s26 }
  0x18   : > { %p3917_p12 = pneg %p3916_p11  ;;  %p3921_p1 = por %p3920_p0, %p3919_p13 }
  0x1a   : > { %p3923_p3 = por %p3922_p2, %p3921_p1 }
  0x1c   : > { %p3924_p4 = pnand %p3923_p3, %p3917_p12 }
  0x1e   : > { %3927 = shalt.err (!%p3924_p4)
}
  0x1f   : > { %s3928_s21 = scalar_lea.vmem %s4137_s13, 6144  ;;  %s4010_s15 = smov [#allocation2]  }
  0x20   : > { %p3929_p6 = scmp.ne.s32.totalorder %s4137_s13, %s3928_s21  ;;  %s3932_s27 = sshll.u32 %s4010_s15, 4  ;;  %s3933_s27 = int_to_ptr.vmem [resolvable:$false] %s3932_s27 }
  0x21   : > { %s3934_s14 = scalar_lea.vmem %s3933_s27, 12288  ;;  %p3935_p10 = scmp.lt.s32.totalorder %s4137_s13, %s3933_s27 }
  0x22   : > { %p3930_p7 = pnand %p3929_p6, %p4112_p5  ;;  %p3936_p11 = scmp.lt.s32.totalorder %s3934_s14, %s3928_s21 }
  0x24   : > { %p3931_p9 = pneg %p3930_p7  ;;  %p3937_p13 = por %p3936_p11, %p3935_p10 }
  0x26   : > { %p3938_p0 = pnand %p3937_p13, %p3931_p9 }
  0x28   : > { %3941 = shalt.err (!%p3938_p0)
}
  0x29   : > { %s4011_s17 = smov 384   ;;  %s4012_s24 = smov 64  }
  0x2a   : > { %s4013_s22 = smov 4   ;;  %314 = sbr.rel (!%p4112_p5) target bundleno = 111 (0x6f), region = 28 }
  0x2b   : > { %3684 = dma.hbm_to_vmem [thread:$0]  (%p4112_p5), %s4134_s26, 6144, %s4137_s13, %s4139_s16, %s4011_s17, %s4012_s24, %s4013_s22  }
  0x2c   : > { %s3283_s25 = sshll.u32 (%p4112_p5), %s4000_s10, 2  ;;  %s4175_s26 = scalar_lea.vmem (%p4112_p5), [#allocation4], %s4129_s23 }
  0x2d   : > { %s4169_s27 = scalar_lea.vmem (%p4112_p5), %s4854_s2, %s3283_s25 }
  0x2e   : > { %v336_v0 = vld [vmem:[%s4169_s27] sm:$0xf] (%p4112_p5)  ;;  %v338_v1 = vld [vmem:[%s4169_s27 + $0x18] sm:$0xf] (%p4112_p5)  ;;  %v340_v2 = vld [vmem:[%s4169_s27 + $0x30] sm:$0xf] (%p4112_p5) }
  0x2f   : > { %337 = vst [vmem:[%s4175_s26] sm:$0xf] (%p4112_p5), %v336_v0  ;;  %339 = vst [vmem:[%s4175_s26 + $0x4] sm:$0xf] (%p4112_p5), %v338_v1  ;;  %v342_v3 = vld [vmem:[%s4169_s27 + $0x48] sm:$0xf] (%p4112_p5) }
  0x30   : > { %341 = vst [vmem:[%s4175_s26 + $0x8] sm:$0xf] (%p4112_p5), %v340_v2  ;;  %v344_v4 = vld [vmem:[%s4169_s27 + $0x60] sm:$0xf] (%p4112_p5)  ;;  %v346_v5 = vld [vmem:[%s4169_s27 + $0x78] sm:$0xf] (%p4112_p5) }
  0x31   : > { %343 = vst [vmem:[%s4175_s26 + $0xc] sm:$0xf] %v342_v3  ;;  %345 = vst [vmem:[%s4175_s26 + $0x10] sm:$0xf] %v344_v4  ;;  %v348_v6 = vld [vmem:[%s4169_s27 + $0x90] sm:$0xf] }
  0x32   : > { %347 = vst [vmem:[%s4175_s26 + $0x14] sm:$0xf] %v346_v5  ;;  %v350_v7 = vld [vmem:[%s4169_s27 + $0xa8] sm:$0xf]  ;;  %v352_v8 = vld [vmem:[%s4169_s27 + $0xc0] sm:$0xf] }
  0x33   : > { %349 = vst [vmem:[%s4175_s26 + $0x18] sm:$0xf] %v348_v6  ;;  %351 = vst [vmem:[%s4175_s26 + $0x1c] sm:$0xf] %v350_v7  ;;  %v354_v9 = vld [vmem:[%s4169_s27 + $0xd8] sm:$0xf] }
  0x34   : > { %353 = vst [vmem:[%s4175_s26 + $0x20] sm:$0xf] %v352_v8  ;;  %v356_v10 = vld [vmem:[%s4169_s27 + $0xf0] sm:$0xf]  ;;  %v358_v11 = vld [vmem:[%s4169_s27 + $0x108] sm:$0xf] }
  0x35   : > { %355 = vst [vmem:[%s4175_s26 + $0x24] sm:$0xf] %v354_v9  ;;  %357 = vst [vmem:[%s4175_s26 + $0x28] sm:$0xf] %v356_v10  ;;  %v360_v12 = vld [vmem:[%s4169_s27 + $0x120] sm:$0xf] }
  0x36   : > { %359 = vst [vmem:[%s4175_s26 + $0x2c] sm:$0xf] %v358_v11  ;;  %v362_v13 = vld [vmem:[%s4169_s27 + $0x138] sm:$0xf]  ;;  %v364_v14 = vld [vmem:[%s4169_s27 + $0x150] sm:$0xf] }
  0x37   : > { %361 = vst [vmem:[%s4175_s26 + $0x30] sm:$0xf] %v360_v12  ;;  %363 = vst [vmem:[%s4175_s26 + $0x34] sm:$0xf] %v362_v13  ;;  %v366_v15 = vld [vmem:[%s4169_s27 + $0x168] sm:$0xf] }
  0x38   : > { %365 = vst [vmem:[%s4175_s26 + $0x38] sm:$0xf] %v364_v14  ;;  %v368_v16 = vld [vmem:[%s4169_s27 + $0x180] sm:$0xf]  ;;  %v370_v17 = vld [vmem:[%s4169_s27 + $0x198] sm:$0xf] }
  0x39   : > { %367 = vst [vmem:[%s4175_s26 + $0x3c] sm:$0xf] %v366_v15  ;;  %369 = vst [vmem:[%s4175_s26 + $0x40] sm:$0xf] %v368_v16  ;;  %v372_v18 = vld [vmem:[%s4169_s27 + $0x1b0] sm:$0xf] }
  0x3a   : > { %371 = vst [vmem:[%s4175_s26 + $0x44] sm:$0xf] %v370_v17  ;;  %v374_v19 = vld [vmem:[%s4169_s27 + $0x1c8] sm:$0xf]  ;;  %v376_v20 = vld [vmem:[%s4169_s27 + $0x1e0] sm:$0xf] }
  0x3b   : > { %373 = vst [vmem:[%s4175_s26 + $0x48] sm:$0xf] %v372_v18  ;;  %375 = vst [vmem:[%s4175_s26 + $0x4c] sm:$0xf] %v374_v19  ;;  %v378_v21 = vld [vmem:[%s4169_s27 + $0x1f8] sm:$0xf] }
  0x3c   : > { %377 = vst [vmem:[%s4175_s26 + $0x50] sm:$0xf] %v376_v20  ;;  %v380_v22 = vld [vmem:[%s4169_s27 + $0x210] sm:$0xf]  ;;  %v382_v23 = vld [vmem:[%s4169_s27 + $0x228] sm:$0xf] }
  0x3d   : > { %379 = vst [vmem:[%s4175_s26 + $0x54] sm:$0xf] %v378_v21  ;;  %381 = vst [vmem:[%s4175_s26 + $0x58] sm:$0xf] %v380_v22  ;;  %v384_v24 = vld [vmem:[%s4169_s27 + $0x240] sm:$0xf] }
  0x3e   : > { %383 = vst [vmem:[%s4175_s26 + $0x5c] sm:$0xf] %v382_v23  ;;  %v386_v25 = vld [vmem:[%s4169_s27 + $0x258] sm:$0xf]  ;;  %v388_v26 = vld [vmem:[%s4169_s27 + $0x270] sm:$0xf] }
  0x3f   : > { %385 = vst [vmem:[%s4175_s26 + $0x60] sm:$0xf] %v384_v24  ;;  %387 = vst [vmem:[%s4175_s26 + $0x64] sm:$0xf] %v386_v25  ;;  %v390_v27 = vld [vmem:[%s4169_s27 + $0x288] sm:$0xf] }
  0x40   : > { %389 = vst [vmem:[%s4175_s26 + $0x68] sm:$0xf] %v388_v26  ;;  %v392_v28 = vld [vmem:[%s4169_s27 + $0x2a0] sm:$0xf]  ;;  %v394_v29 = vld [vmem:[%s4169_s27 + $0x2b8] sm:$0xf] }
  0x41   : > { %391 = vst [vmem:[%s4175_s26 + $0x6c] sm:$0xf] %v390_v27  ;;  %393 = vst [vmem:[%s4175_s26 + $0x70] sm:$0xf] %v392_v28  ;;  %v396_v30 = vld [vmem:[%s4169_s27 + $0x2d0] sm:$0xf] }
  0x42   : > { %395 = vst [vmem:[%s4175_s26 + $0x74] sm:$0xf] %v394_v29  ;;  %v398_v31 = vld [vmem:[%s4169_s27 + $0x2e8] sm:$0xf]  ;;  %v400_v32 = vld [vmem:[%s4169_s27 + $0x300] sm:$0xf] }
  0x43   : > { %397 = vst [vmem:[%s4175_s26 + $0x78] sm:$0xf] %v396_v30  ;;  %399 = vst [vmem:[%s4175_s26 + $0x7c] sm:$0xf] %v398_v31  ;;  %v402_v33 = vld [vmem:[%s4169_s27 + $0x318] sm:$0xf] }
  0x44   : > { %401 = vst [vmem:[%s4175_s26 + $0x80] sm:$0xf] %v400_v32  ;;  %v404_v34 = vld [vmem:[%s4169_s27 + $0x330] sm:$0xf]  ;;  %v406_v35 = vld [vmem:[%s4169_s27 + $0x348] sm:$0xf] }
  0x45   : > { %403 = vst [vmem:[%s4175_s26 + $0x84] sm:$0xf] %v402_v33  ;;  %405 = vst [vmem:[%s4175_s26 + $0x88] sm:$0xf] %v404_v34  ;;  %v408_v36 = vld [vmem:[%s4169_s27 + $0x360] sm:$0xf] }
  0x46   : > { %407 = vst [vmem:[%s4175_s26 + $0x8c] sm:$0xf] %v406_v35  ;;  %v410_v37 = vld [vmem:[%s4169_s27 + $0x378] sm:$0xf]  ;;  %v412_v38 = vld [vmem:[%s4169_s27 + $0x390] sm:$0xf] }
  0x47   : > { %409 = vst [vmem:[%s4175_s26 + $0x90] sm:$0xf] %v408_v36  ;;  %411 = vst [vmem:[%s4175_s26 + $0x94] sm:$0xf] %v410_v37  ;;  %v414_v39 = vld [vmem:[%s4169_s27 + $0x3a8] sm:$0xf] }
  0x48   : > { %413 = vst [vmem:[%s4175_s26 + $0x98] sm:$0xf] %v412_v38  ;;  %v416_v40 = vld [vmem:[%s4169_s27 + $0x3c0] sm:$0xf]  ;;  %v418_v41 = vld [vmem:[%s4169_s27 + $0x3d8] sm:$0xf] }
  0x49   : > { %415 = vst [vmem:[%s4175_s26 + $0x9c] sm:$0xf] %v414_v39  ;;  %417 = vst [vmem:[%s4175_s26 + $0xa0] sm:$0xf] %v416_v40  ;;  %v420_v42 = vld [vmem:[%s4169_s27 + $0x3f0] sm:$0xf] }
  0x4a   : > { %419 = vst [vmem:[%s4175_s26 + $0xa4] sm:$0xf] %v418_v41  ;;  %v422_v43 = vld [vmem:[%s4169_s27 + $0x408] sm:$0xf]  ;;  %v424_v44 = vld [vmem:[%s4169_s27 + $0x420] sm:$0xf] }
  0x4b   : > { %421 = vst [vmem:[%s4175_s26 + $0xa8] sm:$0xf] %v420_v42  ;;  %423 = vst [vmem:[%s4175_s26 + $0xac] sm:$0xf] %v422_v43  ;;  %v426_v45 = vld [vmem:[%s4169_s27 + $0x438] sm:$0xf] }
  0x4c   : > { %425 = vst [vmem:[%s4175_s26 + $0xb0] sm:$0xf] %v424_v44  ;;  %v428_v46 = vld [vmem:[%s4169_s27 + $0x450] sm:$0xf]  ;;  %v430_v47 = vld [vmem:[%s4169_s27 + $0x468] sm:$0xf] }
  0x4d   : > { %427 = vst [vmem:[%s4175_s26 + $0xb4] sm:$0xf] %v426_v45  ;;  %429 = vst [vmem:[%s4175_s26 + $0xb8] sm:$0xf] %v428_v46  ;;  %v432_v48 = vld [vmem:[%s4169_s27 + $0x480] sm:$0xf] }
  0x4e   : > { %431 = vst [vmem:[%s4175_s26 + $0xbc] sm:$0xf] %v430_v47  ;;  %v434_v49 = vld [vmem:[%s4169_s27 + $0x498] sm:$0xf]  ;;  %v436_v50 = vld [vmem:[%s4169_s27 + $0x4b0] sm:$0xf] }
  0x4f   : > { %433 = vst [vmem:[%s4175_s26 + $0xc0] sm:$0xf] %v432_v48  ;;  %435 = vst [vmem:[%s4175_s26 + $0xc4] sm:$0xf] %v434_v49  ;;  %v438_v51 = vld [vmem:[%s4169_s27 + $0x4c8] sm:$0xf] }
  0x50   : > { %437 = vst [vmem:[%s4175_s26 + $0xc8] sm:$0xf] %v436_v50  ;;  %v440_v52 = vld [vmem:[%s4169_s27 + $0x4e0] sm:$0xf]  ;;  %v442_v53 = vld [vmem:[%s4169_s27 + $0x4f8] sm:$0xf] }
  0x51   : > { %439 = vst [vmem:[%s4175_s26 + $0xcc] sm:$0xf] %v438_v51  ;;  %441 = vst [vmem:[%s4175_s26 + $0xd0] sm:$0xf] %v440_v52  ;;  %v444_v54 = vld [vmem:[%s4169_s27 + $0x510] sm:$0xf] }
  0x52   : > { %443 = vst [vmem:[%s4175_s26 + $0xd4] sm:$0xf] %v442_v53  ;;  %v446_v55 = vld [vmem:[%s4169_s27 + $0x528] sm:$0xf]  ;;  %v448_v56 = vld [vmem:[%s4169_s27 + $0x540] sm:$0xf] }
  0x53   : > { %445 = vst [vmem:[%s4175_s26 + $0xd8] sm:$0xf] %v444_v54  ;;  %447 = vst [vmem:[%s4175_s26 + $0xdc] sm:$0xf] %v446_v55  ;;  %v450_v57 = vld [vmem:[%s4169_s27 + $0x558] sm:$0xf] }
  0x54   : > { %449 = vst [vmem:[%s4175_s26 + $0xe0] sm:$0xf] %v448_v56  ;;  %v452_v58 = vld [vmem:[%s4169_s27 + $0x570] sm:$0xf]  ;;  %v454_v59 = vld [vmem:[%s4169_s27 + $0x588] sm:$0xf] }
  0x55   : > { %451 = vst [vmem:[%s4175_s26 + $0xe4] sm:$0xf] %v450_v57  ;;  %453 = vst [vmem:[%s4175_s26 + $0xe8] sm:$0xf] %v452_v58  ;;  %v456_v60 = vld [vmem:[%s4169_s27 + $0x5a0] sm:$0xf] }
  0x56   : > { %455 = vst [vmem:[%s4175_s26 + $0xec] sm:$0xf] %v454_v59  ;;  %v458_v61 = vld [vmem:[%s4169_s27 + $0x5b8] sm:$0xf]  ;;  %v460_v62 = vld [vmem:[%s4169_s27 + $0x5d0] sm:$0xf] }
  0x57   : > { %457 = vst [vmem:[%s4175_s26 + $0xf0] sm:$0xf] %v456_v60  ;;  %459 = vst [vmem:[%s4175_s26 + $0xf4] sm:$0xf] %v458_v61  ;;  %v462_v63 = vld [vmem:[%s4169_s27 + $0x5e8] sm:$0xf] }
  0x58   : > { %461 = vst [vmem:[%s4175_s26 + $0xf8] sm:$0xf] %v460_v62  ;;  %v464_v0 = vld [vmem:[%s4169_s27 + $0x600] sm:$0xf]  ;;  %v466_v1 = vld [vmem:[%s4169_s27 + $0x618] sm:$0xf] }
  0x59   : > { %463 = vst [vmem:[%s4175_s26 + $0xfc] sm:$0xf] %v462_v63  ;;  %465 = vst [vmem:[%s4175_s26 + $0x100] sm:$0xf] %v464_v0  ;;  %v468_v2 = vld [vmem:[%s4169_s27 + $0x630] sm:$0xf] }
  0x5a   : > { %467 = vst [vmem:[%s4175_s26 + $0x104] sm:$0xf] %v466_v1  ;;  %v470_v3 = vld [vmem:[%s4169_s27 + $0x648] sm:$0xf]  ;;  %v472_v4 = vld [vmem:[%s4169_s27 + $0x660] sm:$0xf] }
  0x5b   : > { %469 = vst [vmem:[%s4175_s26 + $0x108] sm:$0xf] %v468_v2  ;;  %471 = vst [vmem:[%s4175_s26 + $0x10c] sm:$0xf] %v470_v3  ;;  %v474_v5 = vld [vmem:[%s4169_s27 + $0x678] sm:$0xf] }
  0x5c   : > { %473 = vst [vmem:[%s4175_s26 + $0x110] sm:$0xf] %v472_v4  ;;  %v476_v6 = vld [vmem:[%s4169_s27 + $0x690] sm:$0xf]  ;;  %v478_v7 = vld [vmem:[%s4169_s27 + $0x6a8] sm:$0xf] }
  0x5d   : > { %475 = vst [vmem:[%s4175_s26 + $0x114] sm:$0xf] %v474_v5  ;;  %477 = vst [vmem:[%s4175_s26 + $0x118] sm:$0xf] %v476_v6  ;;  %v480_v8 = vld [vmem:[%s4169_s27 + $0x6c0] sm:$0xf] }
  0x5e   : > { %479 = vst [vmem:[%s4175_s26 + $0x11c] sm:$0xf] %v478_v7  ;;  %v482_v9 = vld [vmem:[%s4169_s27 + $0x6d8] sm:$0xf]  ;;  %v484_v10 = vld [vmem:[%s4169_s27 + $0x6f0] sm:$0xf] }
  0x5f   : > { %481 = vst [vmem:[%s4175_s26 + $0x120] sm:$0xf] %v480_v8  ;;  %483 = vst [vmem:[%s4175_s26 + $0x124] sm:$0xf] %v482_v9  ;;  %v486_v11 = vld [vmem:[%s4169_s27 + $0x708] sm:$0xf] }
  0x60   : > { %485 = vst [vmem:[%s4175_s26 + $0x128] sm:$0xf] %v484_v10  ;;  %v488_v12 = vld [vmem:[%s4169_s27 + $0x720] sm:$0xf]  ;;  %v490_v13 = vld [vmem:[%s4169_s27 + $0x738] sm:$0xf] }
  0x61   : > { %487 = vst [vmem:[%s4175_s26 + $0x12c] sm:$0xf] %v486_v11  ;;  %489 = vst [vmem:[%s4175_s26 + $0x130] sm:$0xf] %v488_v12  ;;  %v492_v14 = vld [vmem:[%s4169_s27 + $0x750] sm:$0xf] }
  0x62   : > { %491 = vst [vmem:[%s4175_s26 + $0x134] sm:$0xf] %v490_v13  ;;  %v494_v15 = vld [vmem:[%s4169_s27 + $0x768] sm:$0xf]  ;;  %v496_v16 = vld [vmem:[%s4169_s27 + $0x780] sm:$0xf] }
  0x63   : > { %493 = vst [vmem:[%s4175_s26 + $0x138] sm:$0xf] %v492_v14  ;;  %495 = vst [vmem:[%s4175_s26 + $0x13c] sm:$0xf] %v494_v15  ;;  %v498_v17 = vld [vmem:[%s4169_s27 + $0x798] sm:$0xf] }
  0x64   : > { %497 = vst [vmem:[%s4175_s26 + $0x140] sm:$0xf] %v496_v16  ;;  %v500_v18 = vld [vmem:[%s4169_s27 + $0x7b0] sm:$0xf]  ;;  %v502_v19 = vld [vmem:[%s4169_s27 + $0x7c8] sm:$0xf] }
  0x65   : > { %499 = vst [vmem:[%s4175_s26 + $0x144] sm:$0xf] %v498_v17  ;;  %501 = vst [vmem:[%s4175_s26 + $0x148] sm:$0xf] %v500_v18  ;;  %v504_v20 = vld [vmem:[%s4169_s27 + $0x7e0] sm:$0xf] }
  0x66   : > { %503 = vst [vmem:[%s4175_s26 + $0x14c] sm:$0xf] %v502_v19  ;;  %v506_v21 = vld [vmem:[%s4169_s27 + $0x7f8] sm:$0xf]  ;;  %v508_v22 = vld [vmem:[%s4169_s27 + $0x810] sm:$0xf] }
  0x67   : > { %505 = vst [vmem:[%s4175_s26 + $0x150] sm:$0xf] %v504_v20  ;;  %507 = vst [vmem:[%s4175_s26 + $0x154] sm:$0xf] %v506_v21  ;;  %v510_v23 = vld [vmem:[%s4169_s27 + $0x828] sm:$0xf] }
  0x68   : > { %509 = vst [vmem:[%s4175_s26 + $0x158] sm:$0xf] %v508_v22  ;;  %v512_v24 = vld [vmem:[%s4169_s27 + $0x840] sm:$0xf]  ;;  %v514_v25 = vld [vmem:[%s4169_s27 + $0x858] sm:$0xf] }
  0x69   : > { %511 = vst [vmem:[%s4175_s26 + $0x15c] sm:$0xf] %v510_v23  ;;  %513 = vst [vmem:[%s4175_s26 + $0x160] sm:$0xf] %v512_v24  ;;  %v516_v26 = vld [vmem:[%s4169_s27 + $0x870] sm:$0xf] }
  0x6a   : > { %515 = vst [vmem:[%s4175_s26 + $0x164] sm:$0xf] %v514_v25  ;;  %v518_v27 = vld [vmem:[%s4169_s27 + $0x888] sm:$0xf]  ;;  %v520_v28 = vld [vmem:[%s4169_s27 + $0x8a0] sm:$0xf] }
  0x6b   : > { %517 = vst [vmem:[%s4175_s26 + $0x168] sm:$0xf] %v516_v26  ;;  %519 = vst [vmem:[%s4175_s26 + $0x16c] sm:$0xf] %v518_v27  ;;  %v522_v29 = vld [vmem:[%s4169_s27 + $0x8b8] sm:$0xf] }
  0x6c   : > { %521 = vst [vmem:[%s4175_s26 + $0x170] sm:$0xf] %v520_v28  ;;  %v524_v30 = vld [vmem:[%s4169_s27 + $0x8d0] sm:$0xf]  ;;  %v526_v31 = vld [vmem:[%s4169_s27 + $0x8e8] sm:$0xf] }
  0x6d   : > { %523 = vst [vmem:[%s4175_s26 + $0x174] sm:$0xf] %v522_v29  ;;  %525 = vst [vmem:[%s4175_s26 + $0x178] sm:$0xf] %v524_v30 }
  0x6e   : > { %527 = vst [vmem:[%s4175_s26 + $0x17c] sm:$0xf] %v526_v31 }
  0x6f PF: > { %742 = sbr.rel (!%p4112_p5) target bundleno = 178 (0xb2), region = 69  ;;  %s3284_s13 = sshll.u32 (%p4112_p5), %s4000_s10, 2 }
  0x70   : > { %s4372_s17 = scalar_lea.vmem (%p4112_p5), %s4855_s3, %s3284_s13  ;;  %s4378_s18 = scalar_lea.vmem (%p4112_p5), [#allocation5], %s4129_s23 }
  0x71   : > { %v764_v32 = vld [vmem:[%s4372_s17] sm:$0xf] (%p4112_p5)  ;;  %v766_v33 = vld [vmem:[%s4372_s17 + $0x18] sm:$0xf] (%p4112_p5)  ;;  %v768_v34 = vld [vmem:[%s4372_s17 + $0x30] sm:$0xf] (%p4112_p5) }
  0x72   : > { %765 = vst [vmem:[%s4378_s18] sm:$0xf] (%p4112_p5), %v764_v32  ;;  %767 = vst [vmem:[%s4378_s18 + $0x4] sm:$0xf] (%p4112_p5), %v766_v33  ;;  %v770_v35 = vld [vmem:[%s4372_s17 + $0x48] sm:$0xf] (%p4112_p5) }
  0x73   : > { %769 = vst [vmem:[%s4378_s18 + $0x8] sm:$0xf] (%p4112_p5), %v768_v34  ;;  %v772_v36 = vld [vmem:[%s4372_s17 + $0x60] sm:$0xf] (%p4112_p5)  ;;  %v774_v37 = vld [vmem:[%s4372_s17 + $0x78] sm:$0xf] (%p4112_p5) }
  0x74   : > { %771 = vst [vmem:[%s4378_s18 + $0xc] sm:$0xf] (%p4112_p5), %v770_v35  ;;  %773 = vst [vmem:[%s4378_s18 + $0x10] sm:$0xf] (%p4112_p5), %v772_v36  ;;  %v776_v38 = vld [vmem:[%s4372_s17 + $0x90] sm:$0xf] (%p4112_p5) }
  0x75   : > { %775 = vst [vmem:[%s4378_s18 + $0x14] sm:$0xf] (%p4112_p5), %v774_v37  ;;  %v778_v39 = vld [vmem:[%s4372_s17 + $0xa8] sm:$0xf] (%p4112_p5)  ;;  %v780_v40 = vld [vmem:[%s4372_s17 + $0xc0] sm:$0xf] (%p4112_p5) }
  0x76   : > { %777 = vst [vmem:[%s4378_s18 + $0x18] sm:$0xf] %v776_v38  ;;  %779 = vst [vmem:[%s4378_s18 + $0x1c] sm:$0xf] %v778_v39  ;;  %v782_v41 = vld [vmem:[%s4372_s17 + $0xd8] sm:$0xf] }
  0x77   : > { %781 = vst [vmem:[%s4378_s18 + $0x20] sm:$0xf] %v780_v40  ;;  %v784_v42 = vld [vmem:[%s4372_s17 + $0xf0] sm:$0xf]  ;;  %v786_v43 = vld [vmem:[%s4372_s17 + $0x108] sm:$0xf] }
  0x78   : > { %783 = vst [vmem:[%s4378_s18 + $0x24] sm:$0xf] %v782_v41  ;;  %785 = vst [vmem:[%s4378_s18 + $0x28] sm:$0xf] %v784_v42  ;;  %v788_v44 = vld [vmem:[%s4372_s17 + $0x120] sm:$0xf] }
  0x79   : > { %787 = vst [vmem:[%s4378_s18 + $0x2c] sm:$0xf] %v786_v43  ;;  %v790_v45 = vld [vmem:[%s4372_s17 + $0x138] sm:$0xf]  ;;  %v792_v46 = vld [vmem:[%s4372_s17 + $0x150] sm:$0xf] }
  0x7a   : > { %789 = vst [vmem:[%s4378_s18 + $0x30] sm:$0xf] %v788_v44  ;;  %791 = vst [vmem:[%s4378_s18 + $0x34] sm:$0xf] %v790_v45  ;;  %v794_v47 = vld [vmem:[%s4372_s17 + $0x168] sm:$0xf] }
  0x7b   : > { %793 = vst [vmem:[%s4378_s18 + $0x38] sm:$0xf] %v792_v46  ;;  %v796_v48 = vld [vmem:[%s4372_s17 + $0x180] sm:$0xf]  ;;  %v798_v49 = vld [vmem:[%s4372_s17 + $0x198] sm:$0xf] }
  0x7c   : > { %795 = vst [vmem:[%s4378_s18 + $0x3c] sm:$0xf] %v794_v47  ;;  %797 = vst [vmem:[%s4378_s18 + $0x40] sm:$0xf] %v796_v48  ;;  %v800_v50 = vld [vmem:[%s4372_s17 + $0x1b0] sm:$0xf] }
  0x7d   : > { %799 = vst [vmem:[%s4378_s18 + $0x44] sm:$0xf] %v798_v49  ;;  %v802_v51 = vld [vmem:[%s4372_s17 + $0x1c8] sm:$0xf]  ;;  %v804_v52 = vld [vmem:[%s4372_s17 + $0x1e0] sm:$0xf] }
  0x7e   : > { %801 = vst [vmem:[%s4378_s18 + $0x48] sm:$0xf] %v800_v50  ;;  %803 = vst [vmem:[%s4378_s18 + $0x4c] sm:$0xf] %v802_v51  ;;  %v806_v53 = vld [vmem:[%s4372_s17 + $0x1f8] sm:$0xf] }
  0x7f   : > { %805 = vst [vmem:[%s4378_s18 + $0x50] sm:$0xf] %v804_v52  ;;  %v808_v54 = vld [vmem:[%s4372_s17 + $0x210] sm:$0xf]  ;;  %v810_v55 = vld [vmem:[%s4372_s17 + $0x228] sm:$0xf] }
  0x80   : > { %807 = vst [vmem:[%s4378_s18 + $0x54] sm:$0xf] %v806_v53  ;;  %809 = vst [vmem:[%s4378_s18 + $0x58] sm:$0xf] %v808_v54  ;;  %v812_v56 = vld [vmem:[%s4372_s17 + $0x240] sm:$0xf] }
  0x81   : > { %811 = vst [vmem:[%s4378_s18 + $0x5c] sm:$0xf] %v810_v55  ;;  %v814_v57 = vld [vmem:[%s4372_s17 + $0x258] sm:$0xf]  ;;  %v816_v58 = vld [vmem:[%s4372_s17 + $0x270] sm:$0xf] }
  0x82   : > { %813 = vst [vmem:[%s4378_s18 + $0x60] sm:$0xf] %v812_v56  ;;  %815 = vst [vmem:[%s4378_s18 + $0x64] sm:$0xf] %v814_v57  ;;  %v818_v59 = vld [vmem:[%s4372_s17 + $0x288] sm:$0xf] }
  0x83   : > { %817 = vst [vmem:[%s4378_s18 + $0x68] sm:$0xf] %v816_v58  ;;  %v820_v60 = vld [vmem:[%s4372_s17 + $0x2a0] sm:$0xf]  ;;  %v822_v61 = vld [vmem:[%s4372_s17 + $0x2b8] sm:$0xf] }
  0x84   : > { %819 = vst [vmem:[%s4378_s18 + $0x6c] sm:$0xf] %v818_v59  ;;  %821 = vst [vmem:[%s4378_s18 + $0x70] sm:$0xf] %v820_v60  ;;  %v824_v62 = vld [vmem:[%s4372_s17 + $0x2d0] sm:$0xf] }
  0x85   : > { %823 = vst [vmem:[%s4378_s18 + $0x74] sm:$0xf] %v822_v61  ;;  %v826_v63 = vld [vmem:[%s4372_s17 + $0x2e8] sm:$0xf]  ;;  %v828_v0 = vld [vmem:[%s4372_s17 + $0x300] sm:$0xf] }
  0x86   : > { %825 = vst [vmem:[%s4378_s18 + $0x78] sm:$0xf] %v824_v62  ;;  %827 = vst [vmem:[%s4378_s18 + $0x7c] sm:$0xf] %v826_v63  ;;  %v830_v1 = vld [vmem:[%s4372_s17 + $0x318] sm:$0xf] }
  0x87   : > { %829 = vst [vmem:[%s4378_s18 + $0x80] sm:$0xf] %v828_v0  ;;  %v832_v2 = vld [vmem:[%s4372_s17 + $0x330] sm:$0xf]  ;;  %v834_v3 = vld [vmem:[%s4372_s17 + $0x348] sm:$0xf] }
  0x88   : > { %831 = vst [vmem:[%s4378_s18 + $0x84] sm:$0xf] %v830_v1  ;;  %833 = vst [vmem:[%s4378_s18 + $0x88] sm:$0xf] %v832_v2  ;;  %v836_v4 = vld [vmem:[%s4372_s17 + $0x360] sm:$0xf] }
  0x89   : > { %835 = vst [vmem:[%s4378_s18 + $0x8c] sm:$0xf] %v834_v3  ;;  %v838_v5 = vld [vmem:[%s4372_s17 + $0x378] sm:$0xf]  ;;  %v840_v6 = vld [vmem:[%s4372_s17 + $0x390] sm:$0xf] }
  0x8a   : > { %837 = vst [vmem:[%s4378_s18 + $0x90] sm:$0xf] %v836_v4  ;;  %839 = vst [vmem:[%s4378_s18 + $0x94] sm:$0xf] %v838_v5  ;;  %v842_v7 = vld [vmem:[%s4372_s17 + $0x3a8] sm:$0xf] }
  0x8b   : > { %841 = vst [vmem:[%s4378_s18 + $0x98] sm:$0xf] %v840_v6  ;;  %v844_v8 = vld [vmem:[%s4372_s17 + $0x3c0] sm:$0xf]  ;;  %v846_v9 = vld [vmem:[%s4372_s17 + $0x3d8] sm:$0xf] }
  0x8c   : > { %843 = vst [vmem:[%s4378_s18 + $0x9c] sm:$0xf] %v842_v7  ;;  %845 = vst [vmem:[%s4378_s18 + $0xa0] sm:$0xf] %v844_v8  ;;  %v848_v10 = vld [vmem:[%s4372_s17 + $0x3f0] sm:$0xf] }
  0x8d   : > { %847 = vst [vmem:[%s4378_s18 + $0xa4] sm:$0xf] %v846_v9  ;;  %v850_v11 = vld [vmem:[%s4372_s17 + $0x408] sm:$0xf]  ;;  %v852_v12 = vld [vmem:[%s4372_s17 + $0x420] sm:$0xf] }
  0x8e   : > { %849 = vst [vmem:[%s4378_s18 + $0xa8] sm:$0xf] %v848_v10  ;;  %851 = vst [vmem:[%s4378_s18 + $0xac] sm:$0xf] %v850_v11  ;;  %v854_v13 = vld [vmem:[%s4372_s17 + $0x438] sm:$0xf] }
  0x8f   : > { %853 = vst [vmem:[%s4378_s18 + $0xb0] sm:$0xf] %v852_v12  ;;  %v856_v14 = vld [vmem:[%s4372_s17 + $0x450] sm:$0xf]  ;;  %v858_v15 = vld [vmem:[%s4372_s17 + $0x468] sm:$0xf] }
  0x90   : > { %855 = vst [vmem:[%s4378_s18 + $0xb4] sm:$0xf] %v854_v13  ;;  %857 = vst [vmem:[%s4378_s18 + $0xb8] sm:$0xf] %v856_v14  ;;  %v860_v16 = vld [vmem:[%s4372_s17 + $0x480] sm:$0xf] }
  0x91   : > { %859 = vst [vmem:[%s4378_s18 + $0xbc] sm:$0xf] %v858_v15  ;;  %v862_v17 = vld [vmem:[%s4372_s17 + $0x498] sm:$0xf]  ;;  %v864_v18 = vld [vmem:[%s4372_s17 + $0x4b0] sm:$0xf] }
  0x92   : > { %861 = vst [vmem:[%s4378_s18 + $0xc0] sm:$0xf] %v860_v16  ;;  %863 = vst [vmem:[%s4378_s18 + $0xc4] sm:$0xf] %v862_v17  ;;  %v866_v19 = vld [vmem:[%s4372_s17 + $0x4c8] sm:$0xf] }
  0x93   : > { %865 = vst [vmem:[%s4378_s18 + $0xc8] sm:$0xf] %v864_v18  ;;  %v868_v20 = vld [vmem:[%s4372_s17 + $0x4e0] sm:$0xf]  ;;  %v870_v21 = vld [vmem:[%s4372_s17 + $0x4f8] sm:$0xf] }
  0x94   : > { %867 = vst [vmem:[%s4378_s18 + $0xcc] sm:$0xf] %v866_v19  ;;  %869 = vst [vmem:[%s4378_s18 + $0xd0] sm:$0xf] %v868_v20  ;;  %v872_v22 = vld [vmem:[%s4372_s17 + $0x510] sm:$0xf] }
  0x95   : > { %871 = vst [vmem:[%s4378_s18 + $0xd4] sm:$0xf] %v870_v21  ;;  %v874_v23 = vld [vmem:[%s4372_s17 + $0x528] sm:$0xf]  ;;  %v876_v24 = vld [vmem:[%s4372_s17 + $0x540] sm:$0xf] }
  0x96   : > { %873 = vst [vmem:[%s4378_s18 + $0xd8] sm:$0xf] %v872_v22  ;;  %875 = vst [vmem:[%s4378_s18 + $0xdc] sm:$0xf] %v874_v23  ;;  %v878_v25 = vld [vmem:[%s4372_s17 + $0x558] sm:$0xf] }
  0x97   : > { %877 = vst [vmem:[%s4378_s18 + $0xe0] sm:$0xf] %v876_v24  ;;  %v880_v26 = vld [vmem:[%s4372_s17 + $0x570] sm:$0xf]  ;;  %v882_v27 = vld [vmem:[%s4372_s17 + $0x588] sm:$0xf] }
  0x98   : > { %879 = vst [vmem:[%s4378_s18 + $0xe4] sm:$0xf] %v878_v25  ;;  %881 = vst [vmem:[%s4378_s18 + $0xe8] sm:$0xf] %v880_v26  ;;  %v884_v28 = vld [vmem:[%s4372_s17 + $0x5a0] sm:$0xf] }
  0x99   : > { %883 = vst [vmem:[%s4378_s18 + $0xec] sm:$0xf] %v882_v27  ;;  %v886_v29 = vld [vmem:[%s4372_s17 + $0x5b8] sm:$0xf]  ;;  %v888_v30 = vld [vmem:[%s4372_s17 + $0x5d0] sm:$0xf] }
  0x9a   : > { %885 = vst [vmem:[%s4378_s18 + $0xf0] sm:$0xf] %v884_v28  ;;  %887 = vst [vmem:[%s4378_s18 + $0xf4] sm:$0xf] %v886_v29  ;;  %v890_v31 = vld [vmem:[%s4372_s17 + $0x5e8] sm:$0xf] }
  0x9b   : > { %889 = vst [vmem:[%s4378_s18 + $0xf8] sm:$0xf] %v888_v30  ;;  %v892_v32 = vld [vmem:[%s4372_s17 + $0x600] sm:$0xf]  ;;  %v894_v33 = vld [vmem:[%s4372_s17 + $0x618] sm:$0xf] }
  0x9c   : > { %891 = vst [vmem:[%s4378_s18 + $0xfc] sm:$0xf] %v890_v31  ;;  %893 = vst [vmem:[%s4378_s18 + $0x100] sm:$0xf] %v892_v32  ;;  %v896_v34 = vld [vmem:[%s4372_s17 + $0x630] sm:$0xf] }
  0x9d   : > { %895 = vst [vmem:[%s4378_s18 + $0x104] sm:$0xf] %v894_v33  ;;  %v898_v35 = vld [vmem:[%s4372_s17 + $0x648] sm:$0xf]  ;;  %v900_v36 = vld [vmem:[%s4372_s17 + $0x660] sm:$0xf] }
  0x9e   : > { %897 = vst [vmem:[%s4378_s18 + $0x108] sm:$0xf] %v896_v34  ;;  %899 = vst [vmem:[%s4378_s18 + $0x10c] sm:$0xf] %v898_v35  ;;  %v902_v37 = vld [vmem:[%s4372_s17 + $0x678] sm:$0xf] }
  0x9f   : > { %901 = vst [vmem:[%s4378_s18 + $0x110] sm:$0xf] %v900_v36  ;;  %v904_v38 = vld [vmem:[%s4372_s17 + $0x690] sm:$0xf]  ;;  %v906_v39 = vld [vmem:[%s4372_s17 + $0x6a8] sm:$0xf] }
  0xa0   : > { %903 = vst [vmem:[%s4378_s18 + $0x114] sm:$0xf] %v902_v37  ;;  %905 = vst [vmem:[%s4378_s18 + $0x118] sm:$0xf] %v904_v38  ;;  %v908_v40 = vld [vmem:[%s4372_s17 + $0x6c0] sm:$0xf] }
  0xa1   : > { %907 = vst [vmem:[%s4378_s18 + $0x11c] sm:$0xf] %v906_v39  ;;  %v910_v41 = vld [vmem:[%s4372_s17 + $0x6d8] sm:$0xf]  ;;  %v912_v42 = vld [vmem:[%s4372_s17 + $0x6f0] sm:$0xf] }
  0xa2   : > { %909 = vst [vmem:[%s4378_s18 + $0x120] sm:$0xf] %v908_v40  ;;  %911 = vst [vmem:[%s4378_s18 + $0x124] sm:$0xf] %v910_v41  ;;  %v914_v43 = vld [vmem:[%s4372_s17 + $0x708] sm:$0xf] }
  0xa3   : > { %913 = vst [vmem:[%s4378_s18 + $0x128] sm:$0xf] %v912_v42  ;;  %v916_v44 = vld [vmem:[%s4372_s17 + $0x720] sm:$0xf]  ;;  %v918_v45 = vld [vmem:[%s4372_s17 + $0x738] sm:$0xf] }
  0xa4   : > { %915 = vst [vmem:[%s4378_s18 + $0x12c] sm:$0xf] %v914_v43  ;;  %917 = vst [vmem:[%s4378_s18 + $0x130] sm:$0xf] %v916_v44  ;;  %v920_v46 = vld [vmem:[%s4372_s17 + $0x750] sm:$0xf] }
  0xa5   : > { %919 = vst [vmem:[%s4378_s18 + $0x134] sm:$0xf] %v918_v45  ;;  %v922_v47 = vld [vmem:[%s4372_s17 + $0x768] sm:$0xf]  ;;  %v924_v48 = vld [vmem:[%s4372_s17 + $0x780] sm:$0xf] }
  0xa6   : > { %921 = vst [vmem:[%s4378_s18 + $0x138] sm:$0xf] %v920_v46  ;;  %923 = vst [vmem:[%s4378_s18 + $0x13c] sm:$0xf] %v922_v47  ;;  %v926_v49 = vld [vmem:[%s4372_s17 + $0x798] sm:$0xf] }
  0xa7   : > { %925 = vst [vmem:[%s4378_s18 + $0x140] sm:$0xf] %v924_v48  ;;  %v928_v50 = vld [vmem:[%s4372_s17 + $0x7b0] sm:$0xf]  ;;  %v930_v51 = vld [vmem:[%s4372_s17 + $0x7c8] sm:$0xf] }
  0xa8   : > { %927 = vst [vmem:[%s4378_s18 + $0x144] sm:$0xf] %v926_v49  ;;  %929 = vst [vmem:[%s4378_s18 + $0x148] sm:$0xf] %v928_v50  ;;  %v932_v52 = vld [vmem:[%s4372_s17 + $0x7e0] sm:$0xf] }
  0xa9   : > { %931 = vst [vmem:[%s4378_s18 + $0x14c] sm:$0xf] %v930_v51  ;;  %v934_v53 = vld [vmem:[%s4372_s17 + $0x7f8] sm:$0xf]  ;;  %v936_v54 = vld [vmem:[%s4372_s17 + $0x810] sm:$0xf] }
  0xaa   : > { %933 = vst [vmem:[%s4378_s18 + $0x150] sm:$0xf] %v932_v52  ;;  %935 = vst [vmem:[%s4378_s18 + $0x154] sm:$0xf] %v934_v53  ;;  %v938_v55 = vld [vmem:[%s4372_s17 + $0x828] sm:$0xf] }
  0xab   : > { %937 = vst [vmem:[%s4378_s18 + $0x158] sm:$0xf] %v936_v54  ;;  %v940_v56 = vld [vmem:[%s4372_s17 + $0x840] sm:$0xf]  ;;  %v942_v57 = vld [vmem:[%s4372_s17 + $0x858] sm:$0xf] }
  0xac   : > { %939 = vst [vmem:[%s4378_s18 + $0x15c] sm:$0xf] %v938_v55  ;;  %941 = vst [vmem:[%s4378_s18 + $0x160] sm:$0xf] %v940_v56  ;;  %v944_v58 = vld [vmem:[%s4372_s17 + $0x870] sm:$0xf] }
  0xad   : > { %943 = vst [vmem:[%s4378_s18 + $0x164] sm:$0xf] %v942_v57  ;;  %v946_v59 = vld [vmem:[%s4372_s17 + $0x888] sm:$0xf]  ;;  %v948_v60 = vld [vmem:[%s4372_s17 + $0x8a0] sm:$0xf] }
  0xae   : > { %945 = vst [vmem:[%s4378_s18 + $0x168] sm:$0xf] %v944_v58  ;;  %947 = vst [vmem:[%s4378_s18 + $0x16c] sm:$0xf] %v946_v59  ;;  %v950_v61 = vld [vmem:[%s4372_s17 + $0x8b8] sm:$0xf] }
  0xaf   : > { %949 = vst [vmem:[%s4378_s18 + $0x170] sm:$0xf] %v948_v60  ;;  %v952_v62 = vld [vmem:[%s4372_s17 + $0x8d0] sm:$0xf]  ;;  %v954_v63 = vld [vmem:[%s4372_s17 + $0x8e8] sm:$0xf] }
  0xb0   : > { %951 = vst [vmem:[%s4378_s18 + $0x174] sm:$0xf] %v950_v61  ;;  %953 = vst [vmem:[%s4378_s18 + $0x178] sm:$0xf] %v952_v62 }
  0xb1   : > { %955 = vst [vmem:[%s4378_s18 + $0x17c] sm:$0xf] %v954_v63 }
  0xb2 PF: > { %p3285_p5 = scmp.ge.s32.totalorder %s4008_s12, 1  ;;  %p1193_p12 = scmp.lt.s32.totalorder %s4008_s12, 13 }
  0xb4   : > { %p1194_p1 = pnand %p3285_p5, %p1193_p12 }
  0xb5   : > { %s1199_s23 = sand.u32 (!%p1194_p1), 1, %s3984_s28  }
  0xb6   : > { %1197 = sbr.rel (%p1194_p1) target bundleno = 1920 (0x780), region = 126  ;;  %s1200_s22 = scalar_lea.sflag (!%p1194_p1), [#allocation3], %s1199_s23 }
  0xb7   : > { %s4572_s24 = smul.u32 (!%p1194_p1), 384, %s1199_s23 }
  0xb9   : > { %s4575_s25 = scalar_lea.vmem (!%p1194_p1), [#allocation2], %s4572_s24 }
  0xbd   : > { %3975 = dma.done.wait (%p4122_p8), %s1200_s22, 6144  }
  0xbe   : > { %3977 = vsyncadd (%p4122_p8), %s1200_s22, 4294961152  ;;  %v3756_v0 = vld [vmem:[%s4575_s25 + $0x40] sm:$0xff]   ;;  %v3760_v4 = vld [vmem:[%s4575_s25 + $0x48] sm:$0xff]   ;;  %p1278_p8 = scmp.lt.s32.totalorder %s3996_s9, 1  ;;  %s4635_s26 = scalar_lea.vmem [#allocation4], %s4572_s24  ;;  %vm4015_vm0 = vmmov 0  }
  0xbf   : > { %v3757_v1 = vld [vmem:[%s4575_s25 + $0xc0] sm:$0xff]   ;;  %3448 = vmatprep.subr.bf16.mxu0 %v3756_v0  ;;  %v3761_v5 = vld [vmem:[%s4575_s25 + $0xc8] sm:$0xff]   ;;  %v3764_v8 = vld [vmem:[%s4575_s25 + $0x50] sm:$0xff]   ;;  %s4720_s13 = scalar_lea.vmem [#allocation5], %s4572_s24  ;;  %p1283_p2 = scmp.lt.s32.totalorder %s3992_s30, 5  ;;  %vm2865_vm1 = vcmask 523264  }
  0xc0   : > { %v3758_v2 = vld [vmem:[%s4575_s25] sm:$0xff]   ;;  %3470 = vmatprep.subr.bf16.mxu1 %v3757_v1  ;;  %v3762_v6 = vld [vmem:[%s4575_s25 + $0x8] sm:$0xff]   ;;  %v3765_v9 = vld [vmem:[%s4575_s25 + $0xd0] sm:$0xff]   ;;  %s4882_s9 = smov (!%p1278_p8, %s3996_s9), 1  ;;  %s4016_s22 = smov 64   ;;  %vm2936_vm2 = vcmask 1043456  }
  0xc1   : > { %v3759_v3 = vld [vmem:[%s4575_s25 + $0x80] sm:$0xff]   ;;  %3449 = vmatpush3.bf16.msra.mxu0 %v3758_v2  ;;  %v3763_v7 = vld [vmem:[%s4575_s25 + $0x88] sm:$0xff]   ;;  %v3766_v10 = vld [vmem:[%s4575_s25 + $0x10] sm:$0xff]   ;;  %s3682_s20 = smul.u32 24, %s4882_s9  ;;  %s4884_s30 = smov (!%p1283_p2, %s3992_s30), 5  ;;  %vm2920_vm3 = vcmask 64512  }
  0xc2   : > { %3471 = vmatpush3.bf16.msra.mxu1 %v3759_v3  ;;  %3450 = vmatprep.subr.bf16.mxu0 %v3760_v4  ;;  %v3767_v11 = vld [vmem:[%s4575_s25 + $0x90] sm:$0xff]   ;;  %v3768_v12 = vld [vmem:[%s4575_s25 + $0x58] sm:$0xff]   ;;  %v3772_v16 = vld [vmem:[%s4575_s25 + $0x60] sm:$0xff]   ;;  %s1285_s17 = scalar_lea.vmem %s4856_s4, %s4884_s30  ;;  %s1288_s24 = scalar_lea.vmem %s4857_s5, %s4884_s30 }
  0xc3   : > { %3472 = vmatprep.subr.bf16.mxu1 %v3761_v5  ;;  %v3769_v13 = vld [vmem:[%s4575_s25 + $0xd8] sm:$0xff]   ;;  %v3773_v17 = vld [vmem:[%s4575_s25 + $0xe0] sm:$0xff]   ;;  %v3776_v20 = vld [vmem:[%s4575_s25 + $0x68] sm:$0xff]   ;;  %s4619_s27 = scalar_lea.vmem %s4852_s0, %s3682_s20  ;;  %s1291_s15 = scalar_lea.vmem %s4858_s6, %s4884_s30 }
  0xc4   : > { %v3770_v14 = vld [vmem:[%s4575_s25 + $0x18] sm:$0xff]   ;;  %v3774_v18 = vld [vmem:[%s4575_s25 + $0x20] sm:$0xff]   ;;  %v3777_v21 = vld [vmem:[%s4575_s25 + $0xe8] sm:$0xff]  }
  0xc5   : > { %3451 = vmatpush3.bf16.msra.mxu0 %v3762_v6  ;;  %v3771_v15 = vld [vmem:[%s4575_s25 + $0x98] sm:$0xff]   ;;  %v3775_v19 = vld [vmem:[%s4575_s25 + $0xa0] sm:$0xff]   ;;  %v3778_v22 = vld [vmem:[%s4575_s25 + $0x28] sm:$0xff]  }
  0xc6   : > { %3473 = vmatpush3.bf16.msra.mxu1 %v3763_v7  ;;  %3452 = vmatprep.subr.bf16.mxu0 %v3764_v8  ;;  %v3779_v23 = vld [vmem:[%s4575_s25 + $0xa8] sm:$0xff]   ;;  %v3780_v24 = vld [vmem:[%s4575_s25 + $0x70] sm:$0xff]   ;;  %v3784_v28 = vld [vmem:[%s4575_s25 + $0x78] sm:$0xff]  }
  0xc7   : > { %3474 = vmatprep.subr.bf16.mxu1 %v3765_v9  ;;  %v3781_v25 = vld [vmem:[%s4575_s25 + $0xf0] sm:$0xff]   ;;  %v3785_v29 = vld [vmem:[%s4575_s25 + $0xf8] sm:$0xff]   ;;  %v1304_v32 = vld [vmem:[%s4619_s27] sm:$0xff] }
  0xc8   : > { %v3782_v26 = vld [vmem:[%s4575_s25 + $0x30] sm:$0xff]   ;;  %v3786_v30 = vld [vmem:[%s4575_s25 + $0x38] sm:$0xff]   ;;  %v1305_v33 = vld [vmem:[%s4619_s27 + $0x8] sm:$0xff]  ;;  %v4625_v34 = vcombine.high %v1304_v32, %v1304_v32  ;;  %v4629_v36 = vcombine.low %v1304_v32, %v1304_v32 }
  0xc9   : > { %3453 = vmatpush3.bf16.msra.mxu0 %v3766_v10  ;;  %v3783_v27 = vld [vmem:[%s4575_s25 + $0xb0] sm:$0xff]   ;;  %v3787_v31 = vld [vmem:[%s4575_s25 + $0xb8] sm:$0xff]   ;;  %v4627_v35 = vcombine.high %v1305_v33, %v1305_v33  ;;  %v4631_v37 = vcombine.low %v1305_v33, %v1305_v33  ;;  %v3792_v38 = vld [vmem:[%s4575_s25 + $0x140] sm:$0xff]  }
  0xca   : > { %3475 = vmatpush3.bf16.msra.mxu1 %v3767_v11  ;;  %3454 = vmatprep.subr.bf16.mxu0 %v3768_v12  ;;  %v3793_v39 = vld [vmem:[%s4635_s26 + $0x40] sm:$0xff]   ;;  %v3796_v42 = vld [vmem:[%s4575_s25 + $0x148] sm:$0xff]   ;;  %v3800_v46 = vld [vmem:[%s4575_s25 + $0x150] sm:$0xff]  }
  0xcb   : > { %3476 = vmatprep.subr.bf16.mxu1 %v3769_v13  ;;  %1752 = vmatprep.mubr.bf16.mxu0 %v4625_v34  ;;  %v3794_v40 = vld [vmem:[%s4575_s25 + $0x100] sm:$0xff]   ;;  %v3797_v43 = vld [vmem:[%s4635_s26 + $0x48] sm:$0xff]   ;;  %v3801_v47 = vld [vmem:[%s4635_s26 + $0x50] sm:$0xff]  }
  0xcc   : > { %1792 = vmatprep.mubr.bf16.mxu1 %v4627_v35  ;;  %v3795_v41 = vld [vmem:[%s4635_s26] sm:$0xff]   ;;  %v3798_v44 = vld [vmem:[%s4575_s25 + $0x108] sm:$0xff]   ;;  %v3802_v48 = vld [vmem:[%s4575_s25 + $0x110] sm:$0xff]  }
  0xcd   : > { %3455 = vmatpush3.bf16.msra.mxu0 %v3770_v14  ;;  %v3799_v45 = vld [vmem:[%s4635_s26 + $0x8] sm:$0xff]   ;;  %v3803_v49 = vld [vmem:[%s4635_s26 + $0x10] sm:$0xff]   ;;  %v3804_v50 = vld [vmem:[%s4575_s25 + $0x158] sm:$0xff]  }
  0xce   : > { %3477 = vmatpush3.bf16.msra.mxu1 %v3771_v15  ;;  %3456 = vmatprep.subr.bf16.mxu0 %v3772_v16  ;;  %v3805_v51 = vld [vmem:[%s4635_s26 + $0x58] sm:$0xff]   ;;  %v3808_v54 = vld [vmem:[%s4575_s25 + $0x160] sm:$0xff]   ;;  %v3812_v58 = vld [vmem:[%s4575_s25 + $0x168] sm:$0xff]  }
  0xcf   : > { %3478 = vmatprep.subr.bf16.mxu1 %v3773_v17  ;;  %v3806_v52 = vld [vmem:[%s4575_s25 + $0x118] sm:$0xff]   ;;  %v3809_v55 = vld [vmem:[%s4635_s26 + $0x60] sm:$0xff]   ;;  %v3813_v59 = vld [vmem:[%s4635_s26 + $0x68] sm:$0xff]  }
  0xd0   : > { %v3807_v53 = vld [vmem:[%s4635_s26 + $0x18] sm:$0xff]   ;;  %v3810_v56 = vld [vmem:[%s4575_s25 + $0x120] sm:$0xff]   ;;  %v3814_v60 = vld [vmem:[%s4575_s25 + $0x128] sm:$0xff]  }
  0xd1   : > { %3457 = vmatpush3.bf16.msra.mxu0 %v3774_v18  ;;  %v3811_v57 = vld [vmem:[%s4635_s26 + $0x20] sm:$0xff]   ;;  %v3815_v61 = vld [vmem:[%s4635_s26 + $0x28] sm:$0xff]   ;;  %v3816_v62 = vld [vmem:[%s4575_s25 + $0x170] sm:$0xff]  }
  0xd2   : > { %3479 = vmatpush3.bf16.msra.mxu1 %v3775_v19  ;;  %3458 = vmatprep.subr.bf16.mxu0 %v3776_v20  ;;  %v3817_v63 = vld [vmem:[%s4635_s26 + $0x70] sm:$0xff]   ;;  %v3820_v2 = vld [vmem:[%s4575_s25 + $0x178] sm:$0xff]   ;;  %v3826_v9 = vld [vmem:[%s4635_s26 + $0xc0] sm:$0xff]  }
  0xd3   : > { %3480 = vmatprep.subr.bf16.mxu1 %v3777_v21  ;;  %v3818_v0 = vld [vmem:[%s4575_s25 + $0x130] sm:$0xff]   ;;  %v3821_v3 = vld [vmem:[%s4635_s26 + $0x78] sm:$0xff]   ;;  %v3827_v10 = vld [vmem:[%s4635_s26 + $0x140] sm:$0xff]  }
  0xd4   : > { %v3819_v1 = vld [vmem:[%s4635_s26 + $0x30] sm:$0xff]   ;;  %v3822_v4 = vld [vmem:[%s4575_s25 + $0x138] sm:$0xff]   ;;  %v3828_v11 = vld [vmem:[%s4635_s26 + $0x80] sm:$0xff]  }
  0xd5   : > { %3459 = vmatpush3.bf16.msra.mxu0 %v3778_v22  ;;  %v3823_v5 = vld [vmem:[%s4635_s26 + $0x38] sm:$0xff]   ;;  %v1306_v6 = vld [vmem:[%s4619_s27 + $0x10] sm:$0xff]  ;;  %v3829_v12 = vld [vmem:[%s4635_s26 + $0x100] sm:$0xff]  }
  0xd6   : > { %3481 = vmatpush3.bf16.msra.mxu1 %v3779_v23  ;;  %3460 = vmatprep.subr.bf16.mxu0 %v3780_v24  ;;  %v4674_v7 = vcombine.low %v1306_v6, %v1306_v6  ;;  %v4676_v8 = vcombine.high %v1306_v6, %v1306_v6  ;;  %v3830_v13 = vld [vmem:[%s4635_s26 + $0xc8] sm:$0xff]   ;;  %v3834_v17 = vld [vmem:[%s4635_s26 + $0xd0] sm:$0xff]   ;;  %v3838_v21 = vld [vmem:[%s4635_s26 + $0xd8] sm:$0xff]  }
  0xd7   : > { %3482 = vmatprep.subr.bf16.mxu1 %v3781_v25  ;;  %v3831_v14 = vld [vmem:[%s4635_s26 + $0x148] sm:$0xff]   ;;  %v3835_v18 = vld [vmem:[%s4635_s26 + $0x150] sm:$0xff]   ;;  %v3839_v22 = vld [vmem:[%s4635_s26 + $0x158] sm:$0xff]  }
  0xd8   : > { %v3832_v15 = vld [vmem:[%s4635_s26 + $0x88] sm:$0xff]   ;;  %v3836_v19 = vld [vmem:[%s4635_s26 + $0x90] sm:$0xff]   ;;  %v3840_v23 = vld [vmem:[%s4635_s26 + $0x98] sm:$0xff]  }
  0xd9   : > { %3461 = vmatpush3.bf16.msra.mxu0 %v3782_v26  ;;  %v3833_v16 = vld [vmem:[%s4635_s26 + $0x108] sm:$0xff]   ;;  %v3837_v20 = vld [vmem:[%s4635_s26 + $0x110] sm:$0xff]   ;;  %v3841_v24 = vld [vmem:[%s4635_s26 + $0x118] sm:$0xff]  }
  0xda   : > { %3483 = vmatpush3.bf16.msra.mxu1 %v3783_v27  ;;  %3462 = vmatprep.subr.bf16.mxu0 %v3784_v28  ;;  %v3842_v25 = vld [vmem:[%s4635_s26 + $0xe0] sm:$0xff]   ;;  %v3849_v32 = vld [vmem:[%s4635_s26 + $0x128] sm:$0xff]   ;;  %v3850_v33 = vld [vmem:[%s4635_s26 + $0xf0] sm:$0xff]  }
  0xdb   : > { %3484 = vmatprep.subr.bf16.mxu1 %v3785_v29  ;;  %v3843_v26 = vld [vmem:[%s4635_s26 + $0x160] sm:$0xff]   ;;  %v3846_v29 = vld [vmem:[%s4635_s26 + $0xe8] sm:$0xff]   ;;  %v3885_v6 = vld [vmem:[%s4720_s13 + $0x98] sm:$0xff]  }
  0xdc   : > { %v3844_v27 = vld [vmem:[%s4635_s26 + $0xa0] sm:$0xff]  }
  0xdd   : > { %3463 = vmatpush3.bf16.msra.mxu0 %v3786_v30  ;;  %v3845_v28 = vld [vmem:[%s4635_s26 + $0x120] sm:$0xff]   ;;  %v3847_v30 = vld [vmem:[%s4635_s26 + $0x168] sm:$0xff]  }
  0xde   : > { %3485 = vmatpush3.bf16.msra.mxu1 %v3787_v31  ;;  %3492 = vmatprep.subr.bf16.mxu0 %v3792_v38  ;;  %v3848_v31 = vld [vmem:[%s4635_s26 + $0xa8] sm:$0xff]   ;;  %v3851_v38 = vld [vmem:[%s4635_s26 + $0x170] sm:$0xff]  }
  0xdf   : > { %3514 = vmatprep.subr.bf16.mxu1 %v3793_v39  ;;  %v3852_v39 = vld [vmem:[%s4635_s26 + $0xb0] sm:$0xff]  }
  0xe0   : > { %1753 = vmatmul.mubr.bf16.vlgmr.msra.gmra.mrb[0].mxu0 %v4629_v36 }
  0xe1   : > { %1793 = vmatmul.mubr.bf16.vlgmr.msra.gmra.mrb[0].mxu1 %v4631_v37  ;;  %3493 = vmatpush3.bf16.msra.mxu0 %v3794_v40  ;;  %v3853_v40 = vld [vmem:[%s4635_s26 + $0x130] sm:$0xff]  }
  0xe2   : > { %3515 = vmatpush3.bf16.msra.mxu1 %v3795_v41  ;;  %3494 = vmatprep.subr.bf16.mxu0 %v3796_v42  ;;  %v3854_v41 = vld [vmem:[%s4635_s26 + $0xf8] sm:$0xff]  }
  0xe3   : > { %2264 = vmatprep.mubr.bf16.mxu1 %v4625_v34  ;;  %3516 = vmatprep.subr.bf16.mxu1 %v3797_v43  ;;  %v3855_v42 = vld [vmem:[%s4635_s26 + $0x178] sm:$0xff]  }
  0xe4   : > { %1832 = vmatprep.mubr.bf16.mxu0 %v4676_v8  ;;  %v3856_v43 = vld [vmem:[%s4635_s26 + $0xb8] sm:$0xff]  }
  0xe5   : > { %3495 = vmatpush3.bf16.msra.mxu0 %v3798_v44  ;;  %v3857_v44 = vld [vmem:[%s4635_s26 + $0x138] sm:$0xff]   ;;  %s1294_s26 = scalar_lea.vmem %s4859_s7, %s4882_s9 }
  0xe6   : > { %3517 = vmatpush3.bf16.msra.mxu1 %v3799_v45  ;;  %3496 = vmatprep.subr.bf16.mxu0 %v3800_v46  ;;  %v3858_v45 = vld [vmem:[%s4720_s13 + $0x40] sm:$0xff]  }
  0xe7   : > { %3518 = vmatprep.subr.bf16.mxu1 %v3801_v47  ;;  %v3859_v46 = vld [vmem:[%s4720_s13] sm:$0xff]   ;;  %v3860_v47 = vld [vmem:[%s4720_s13 + $0x48] sm:$0xff]  }
  0xe9   : > { %3497 = vmatpush3.bf16.msra.mxu0 %v3802_v48  ;;  %v3863_v48 = vld [vmem:[%s4720_s13 + $0x10] sm:$0xff]  }
  0xea   : > { %3519 = vmatpush3.bf16.msra.mxu1 %v3803_v49  ;;  %3498 = vmatprep.subr.bf16.mxu0 %v3804_v50  ;;  %v3864_v49 = vld [vmem:[%s4720_s13 + $0x58] sm:$0xff]  }
  0xeb   : > { %3520 = vmatprep.subr.bf16.mxu1 %v3805_v51  ;;  %v3865_v50 = vld [vmem:[%s4720_s13 + $0x18] sm:$0xff]   ;;  %v3866_v51 = vld [vmem:[%s4720_s13 + $0x60] sm:$0xff]  }
  0xed   : > { %3499 = vmatpush3.bf16.msra.mxu0 %v3806_v52  ;;  %v3867_v52 = vld [vmem:[%s4720_s13 + $0x20] sm:$0xff]  }
  0xee   : > { %3521 = vmatpush3.bf16.msra.mxu1 %v3807_v53  ;;  %3500 = vmatprep.subr.bf16.mxu0 %v3808_v54  ;;  %v3868_v53 = vld [vmem:[%s4720_s13 + $0x68] sm:$0xff]  }
  0xef   : > { %3522 = vmatprep.subr.bf16.mxu1 %v3809_v55  ;;  %v3869_v54 = vld [vmem:[%s4720_s13 + $0x28] sm:$0xff]   ;;  %v3870_v55 = vld [vmem:[%s4720_s13 + $0x70] sm:$0xff]  }
  0xf1   : > { %3501 = vmatpush3.bf16.msra.mxu0 %v3810_v56  ;;  %v3871_v56 = vld [vmem:[%s4720_s13 + $0x30] sm:$0xff]  }
  0xf2   : > { %3523 = vmatpush3.bf16.msra.mxu1 %v3811_v57  ;;  %3502 = vmatprep.subr.bf16.mxu0 %v3812_v58  ;;  %v3872_v57 = vld [vmem:[%s4720_s13 + $0xc0] sm:$0xff]  }
  0xf3   : > { %3524 = vmatprep.subr.bf16.mxu1 %v3813_v59  ;;  %v3873_v58 = vld [vmem:[%s4720_s13 + $0x80] sm:$0xff]   ;;  %v3874_v59 = vld [vmem:[%s4720_s13 + $0x78] sm:$0xff]  }
  0xf5   : > { %3503 = vmatpush3.bf16.msra.mxu0 %v3814_v60  ;;  %v3875_v60 = vld [vmem:[%s4720_s13 + $0x38] sm:$0xff]  }
  0xf6   : > { %3525 = vmatpush3.bf16.msra.mxu1 %v3815_v61  ;;  %3504 = vmatprep.subr.bf16.mxu0 %v3816_v62  ;;  %v3876_v61 = vld [vmem:[%s4720_s13 + $0xc8] sm:$0xff]  }
  0xf7   : > { %3526 = vmatprep.subr.bf16.mxu1 %v3817_v63  ;;  %v3877_v62 = vld [vmem:[%s4720_s13 + $0x88] sm:$0xff]   ;;  %v3878_v63 = vld [vmem:[%s4720_s13 + $0x140] sm:$0xff]  }
  0xf9   : > { %3505 = vmatpush3.bf16.msra.mxu0 %v3818_v0  ;;  %v3879_v0 = vld [vmem:[%s4720_s13 + $0xd0] sm:$0xff]  }
  0xfa   : > { %3527 = vmatpush3.bf16.msra.mxu1 %v3819_v1  ;;  %3506 = vmatprep.subr.bf16.mxu0 %v3820_v2  ;;  %v3880_v1 = vld [vmem:[%s4720_s13 + $0x100] sm:$0xff]   ;;  %v3882_v2 = vld [vmem:[%s4720_s13 + $0x148] sm:$0xff]  }
  0xfb   : > { %3528 = vmatprep.subr.bf16.mxu1 %v3821_v3  ;;  %v3881_v3 = vld [vmem:[%s4720_s13 + $0x90] sm:$0xff]  }
  0xfd   : > { %3507 = vmatpush3.bf16.msra.mxu0 %v3822_v4  ;;  %v3883_v4 = vld [vmem:[%s4720_s13 + $0xd8] sm:$0xff]  }
  0xfe   : > { %3529 = vmatpush3.bf16.msra.mxu1 %v3823_v5  ;;  %3536 = vmatprep.subr.bf16.mxu0 %v3826_v9  ;;  %v3884_v5 = vld [vmem:[%s4720_s13 + $0x108] sm:$0xff]   ;;  %v3886_v9 = vld [vmem:[%s4720_s13 + $0x150] sm:$0xff]  }
  0xff   : > { %3558 = vmatprep.subr.bf16.mxu1 %v3827_v10  ;;  %v3887_v10 = vld [vmem:[%s4720_s13 + $0xe0] sm:$0xff]  }
 0x100   : > { %1833 = vmatmul.mubr.bf16.vlgmr.msra.gmra.mrb[4].mxu0 %v4674_v7 }
 0x101   : > { %2265 = vmatmul.mubr.bf16.vlgmr.msra.gmra.mrb[4].mxu1 %v4629_v36  ;;  %3537 = vmatpush3.bf16.msra.mxu0 %v3828_v11  ;;  %v3888_v11 = vld [vmem:[%s4720_s13 + $0x110] sm:$0xff]  }
 0x102   : > { %3559 = vmatpush3.bf16.msra.mxu1 %v3829_v12  ;;  %3538 = vmatprep.subr.bf16.mxu0 %v3830_v13  ;;  %v3890_v12 = vld [vmem:[%s4720_s13 + $0x158] sm:$0xff]   ;;  %v3891_v13 = vld [vmem:[%s4720_s13 + $0xe8] sm:$0xff]  }
 0x103   : > { %2304 = vmatprep.mubr.bf16.mxu0 %v4627_v35  ;;  %3560 = vmatprep.subr.bf16.mxu1 %v3831_v14  ;;  %v3894_v14 = vld [vmem:[%s4720_s13 + $0x160] sm:$0xff]  }
 0x104   : > { %2344 = vmatprep.mubr.bf16.mxu1 %v4676_v8 }
 0x105   : > { %3539 = vmatpush3.bf16.msra.mxu0 %v3832_v15  ;;  %v3893_v15 = vld [vmem:[%s4720_s13 + $0xa8] sm:$0xff]  }
 0x106   : > { %3561 = vmatpush3.bf16.msra.mxu1 %v3833_v16  ;;  %3540 = vmatprep.subr.bf16.mxu0 %v3834_v17  ;;  %v3895_v16 = vld [vmem:[%s4720_s13 + $0xf0] sm:$0xff]   ;;  %v3896_v17 = vld [vmem:[%s4720_s13 + $0x120] sm:$0xff]  }
 0x107   : > { %3562 = vmatprep.subr.bf16.mxu1 %v3835_v18  ;;  %v3897_v18 = vld [vmem:[%s4720_s13 + $0xb0] sm:$0xff]  }
 0x109   : > { %3541 = vmatpush3.bf16.msra.mxu0 %v3836_v19  ;;  %v3898_v19 = vld [vmem:[%s4720_s13 + $0x168] sm:$0xff]  }
 0x10a   : > { %3563 = vmatpush3.bf16.msra.mxu1 %v3837_v20  ;;  %3542 = vmatprep.subr.bf16.mxu0 %v3838_v21  ;;  %v3900_v20 = vld [vmem:[%s4720_s13 + $0x128] sm:$0xff]   ;;  %v3899_v21 = vld [vmem:[%s4720_s13 + $0xf8] sm:$0xff]  }
 0x10b   : > { %3564 = vmatprep.subr.bf16.mxu1 %v3839_v22  ;;  %v3901_v22 = vld [vmem:[%s4720_s13 + $0xb8] sm:$0xff]  }
 0x10d   : > { %3543 = vmatpush3.bf16.msra.mxu0 %v3840_v23  ;;  %v3902_v23 = vld [vmem:[%s4720_s13 + $0x170] sm:$0xff]  }
 0x10e   : > { %3565 = vmatpush3.bf16.msra.mxu1 %v3841_v24  ;;  %3544 = vmatprep.subr.bf16.mxu0 %v3842_v25  ;;  %v3903_v24 = vld [vmem:[%s4720_s13 + $0x130] sm:$0xff]   ;;  %v3904_v25 = vld [vmem:[%s4720_s13 + $0x178] sm:$0xff]  }
 0x10f   : > { %3566 = vmatprep.subr.bf16.mxu1 %v3843_v26  ;;  %v3905_v26 = vld [vmem:[%s4720_s13 + $0x138] sm:$0xff]  }
 0x111   : > { %3545 = vmatpush3.bf16.msra.mxu0 %v3844_v27  ;;  %v4014_v27 = vmov 0.0  }
 0x112   : > { %3567 = vmatpush3.bf16.msra.mxu1 %v3845_v28  ;;  %3546 = vmatprep.subr.bf16.mxu0 %v3846_v29  ;;  %v3288_v29 = vld [vmem:[%s1285_s17] ss:$0 sm:$0xff] }
 0x113   : > { %3568 = vmatprep.subr.bf16.mxu1 %v3847_v30 }
 0x115   : > { %3547 = vmatpush3.bf16.msra.mxu0 %v3848_v31 }
 0x116   : > { %3569 = vmatpush3.bf16.msra.mxu1 %v3849_v32  ;;  %3548 = vmatprep.subr.bf16.mxu0 %v3850_v33 }
 0x117   : > { %3570 = vmatprep.subr.bf16.mxu1 %v3851_v38 }
 0x119   : > { %3549 = vmatpush3.bf16.msra.mxu0 %v3852_v39 }
 0x11a   : > { %3571 = vmatpush3.bf16.msra.mxu1 %v3853_v40  ;;  %3550 = vmatprep.subr.bf16.mxu0 %v3854_v41 }
 0x11b   : > { %3572 = vmatprep.subr.bf16.mxu1 %v3855_v42 }
 0x11d   : > { %3551 = vmatpush3.bf16.msra.mxu0 %v3856_v43 }
 0x11e   : > { %3573 = vmatpush3.bf16.msra.mxu1 %v3857_v44  ;;  %3580 = vmatprep.subr.bf16.mxu0 %v3858_v45 }
 0x11f   : > { %3602 = vmatprep.subr.bf16.mxu1 %v3872_v57 }
 0x120   : > { %2305 = vmatmul.mubr.bf16.vlgmr.msra.gmra.mrb[8].mxu0 %v4631_v37 }
 0x121   : > { %2345 = vmatmul.mubr.bf16.vlgmr.msra.gmra.mrb[8].mxu1 %v4674_v7  ;;  %2776 = vmatprep.mubr.bf16.mxu0 %v4625_v34  ;;  %v3861_v34 = vld [vmem:[%s4720_s13 + $0x8] sm:$0xff]  }
 0x122   : > { %2816 = vmatprep.mubr.bf16.mxu1 %v4627_v35  ;;  %3581 = vmatpush3.bf16.msra.mxu0 %v3859_v46  ;;  %v3862_v35 = vld [vmem:[%s4720_s13 + $0x50] sm:$0xff]  }
 0x123   : > { %3582 = vmatprep.subr.bf16.mxu0 %v3860_v47  ;;  %3603 = vmatpush3.bf16.msra.mxu1 %v3873_v58 }
 0x124   : > { %3604 = vmatprep.subr.bf16.mxu1 %v3876_v61 }
 0x126   : > { %3583 = vmatpush3.bf16.msra.mxu0 %v3861_v34 }
 0x127   : > { %3584 = vmatprep.subr.bf16.mxu0 %v3862_v35  ;;  %3605 = vmatpush3.bf16.msra.mxu1 %v3877_v62 }
 0x128   : > { %3606 = vmatprep.subr.bf16.mxu1 %v3879_v0 }
 0x12a   : > { %3585 = vmatpush3.bf16.msra.mxu0 %v3863_v48 }
 0x12b   : > { %3586 = vmatprep.subr.bf16.mxu0 %v3864_v49  ;;  %3607 = vmatpush3.bf16.msra.mxu1 %v3881_v3 }
 0x12c   : > { %3608 = vmatprep.subr.bf16.mxu1 %v3883_v4 }
 0x12e   : > { %3587 = vmatpush3.bf16.msra.mxu0 %v3865_v50 }
 0x12f   : > { %3588 = vmatprep.subr.bf16.mxu0 %v3866_v51  ;;  %3609 = vmatpush3.bf16.msra.mxu1 %v3885_v6 }
 0x130   : > { %3610 = vmatprep.subr.bf16.mxu1 %v3887_v10 }
 0x132   : > { %3589 = vmatpush3.bf16.msra.mxu0 %v3867_v52  ;;  %v3343_v52 = vld [vmem:[%s1288_s24] ss:$0 sm:$0xff] }
 0x133   : > { %3590 = vmatprep.subr.bf16.mxu0 %v3868_v53 }
 0x136   : > { %3591 = vmatpush3.bf16.msra.mxu0 %v3869_v54 }
 0x137   : > { %3592 = vmatprep.subr.bf16.mxu0 %v3870_v55 }
 0x13a   : > { %3593 = vmatpush3.bf16.msra.mxu0 %v3871_v56 }
 0x13b   : > { %3594 = vmatprep.subr.bf16.mxu0 %v3874_v59 }
 0x13e   : > { %3595 = vmatpush3.bf16.msra.mxu0 %v3875_v60 }
 0x13f   : > { %3624 = vmatprep.subr.bf16.mxu0 %v3878_v63 }
 0x141   : > { %2777 = vmatmul.mubr.bf16.vlgmr.msra.gmra.mrb[12].mxu0 %v4629_v36  ;;  %v3889_v36 = vld [vmem:[%s4720_s13 + $0xa0] sm:$0xff]  }
 0x142   : > { %3625 = vmatpush3.bf16.msra.mxu0 %v3880_v1  ;;  %2856 = vmatprep.mubr.bf16.mxu0 %v4676_v8  ;;  %v3892_v8 = vld [vmem:[%s4720_s13 + $0x118] sm:$0xff]   ;;  %s3683_s13 = smul.u32 6, %s4882_s9 }
 0x143   : > { %3626 = vmatprep.subr.bf16.mxu0 %v3882_v2  ;;  %3611 = vmatpush3.bf16.msra.mxu1 %v3889_v36 }
 0x144   : > { %3612 = vmatprep.subr.bf16.mxu1 %v3891_v13  ;;  %s1300_s16 = sadd.s32 %s3683_s13, %s4884_s30 }
 0x145   : > { %s3287_s14 = sshll.u32 %s1300_s16, 2 }
 0x146   : > { %3627 = vmatpush3.bf16.msra.mxu0 %v3884_v5  ;;  %s1302_s23 = scalar_lea.vmem %s4860_s8, %s3287_s14 }
 0x147   : > { %3628 = vmatprep.subr.bf16.mxu0 %v3886_v9  ;;  %3613 = vmatpush3.bf16.msra.mxu1 %v3893_v15 }
 0x148   : > { %3614 = vmatprep.subr.bf16.mxu1 %v3895_v16 }
 0x14a   : > { %3629 = vmatpush3.bf16.msra.mxu0 %v3888_v11 }
 0x14b   : > { %3630 = vmatprep.subr.bf16.mxu0 %v3890_v12  ;;  %3615 = vmatpush3.bf16.msra.mxu1 %v3897_v18  ;;  %v3392_v12 = vld [vmem:[%s1291_s15] ss:$0 sm:$0xff] }
 0x14c   : > { %3616 = vmatprep.subr.bf16.mxu1 %v3899_v21 }
 0x14e   : > { %3631 = vmatpush3.bf16.msra.mxu0 %v3892_v8 }
 0x14f   : > { %3632 = vmatprep.subr.bf16.mxu0 %v3894_v14  ;;  %3617 = vmatpush3.bf16.msra.mxu1 %v3901_v22 }
 0x150   : > { %3654 = vmatprep.subr.bf16.mxu1 %v4014_v27 }
 0x152   : > { %3633 = vmatpush3.bf16.msra.mxu0 %v3896_v17  ;;  %2817 = vmatmul.mubr.bf16.vlgmr.msra.gmra.mrb[12].mxu1 %v4631_v37 }
 0x153   : > { %3634 = vmatprep.subr.bf16.mxu0 %v3898_v19  ;;  %3656 = vmatprep.mubr.msk.bf16.mxu1 %vm4015_vm0, %v4014_v27 }
 0x156   : > { %3635 = vmatpush3.bf16.msra.mxu0 %v3900_v20 }
 0x157   : > { %3636 = vmatprep.subr.bf16.mxu0 %v3902_v23 }
 0x15a   : > { %3637 = vmatpush3.bf16.msra.mxu0 %v3903_v24 }
 0x15b   : > { %3638 = vmatprep.subr.bf16.mxu0 %v3904_v25 }
 0x15e   : > { %3639 = vmatpush3.bf16.msra.mxu0 %v3905_v26 }
 0x161   : > { %2857 = vmatmul.mubr.bf16.vlgmr.msra.gmra.mrb[16].mxu0 %v4674_v7 }
 0x1b3   : > { %v3464_v37 = vpop.f32.mrb[0].mxu0 }
 0x1b4   : > { %v3486_v28 = vpop.f32.mrb[0].mxu1  ;;  %v3465_v30 = vpop.f32.mrb[1].mxu0 }
 0x1b5   : > { %v3487_v31 = vpop.f32.mrb[1].mxu1  ;;  %v3466_v32 = vadd.f32 %v3465_v30, %v3464_v37  ;;  %v3467_v7 = vpop.f32.mrb[2].mxu0  ;;  %v3442_v37 = vld [vmem:[%s1294_s26] ss:$0 sm:$0xff] }
 0x1b6   : > { %v3488_v33 = vadd.f32 %v3487_v31, %v3486_v28  ;;  %v3489_v38 = vpop.f32.mrb[2].mxu1  ;;  %v3468_v39 = vpop.f32.mrb[3].mxu0 }
 0x1b7   : > { %v3490_v40 = vpop.f32.mrb[3].mxu1  ;;  %v1755_v41 = vadd.f32 %v3466_v32, %v3288_v29 }
 0x1b9   : > { %v1795_v42 = vadd.f32 %v3488_v33, %v1755_v41 }
 0x1d3   : > { %v3508_v43 = vpop.f32.mrb[4].mxu0 }
 0x1d4   : > { %v3530_v44 = vpop.f32.mrb[4].mxu1  ;;  %v3509_v45 = vpop.f32.mrb[5].mxu0 }
 0x1d5   : > { %v3531_v46 = vpop.f32.mrb[5].mxu1  ;;  %v3510_v47 = vadd.f32 %v3509_v45, %v3508_v43  ;;  %v3511_v35 = vpop.f32.mrb[6].mxu0 }
 0x1d6   : > { %v3532_v34 = vadd.f32 %v3531_v46, %v3530_v44  ;;  %v3533_v48 = vpop.f32.mrb[6].mxu1  ;;  %v3512_v49 = vpop.f32.mrb[7].mxu0 }
 0x1d7   : > { %v3534_v50 = vpop.f32.mrb[7].mxu1  ;;  %v1835_v51 = vadd.f32 %v3510_v47, %v1795_v42 }
 0x1d8   : > { %v2267_v57 = vadd.f32 %v3532_v34, %v3343_v52 }
 0x1d9   : > { %v1840_v4 = vpack.c.bf16 %v1835_v51, %v1835_v51 }
 0x1f3   : > { %v3552_v53 = vpop.f32.mrb[8].mxu0 }
 0x1f4   : > { %v3574_v54 = vpop.f32.mrb[8].mxu1  ;;  %v3553_v55 = vpop.f32.mrb[9].mxu0 }
 0x1f5   : > { %v3575_v56 = vpop.f32.mrb[9].mxu1  ;;  %v3554_v58 = vadd.f32 %v3553_v55, %v3552_v53  ;;  %v3555_v60 = vpop.f32.mrb[10].mxu0 }
 0x1f6   : > { %v3576_v59 = vadd.f32 %v3575_v56, %v3574_v54  ;;  %v3577_v61 = vpop.f32.mrb[10].mxu1  ;;  %v3556_v62 = vpop.f32.mrb[11].mxu0 }
 0x1f7   : > { %v3578_v63 = vpop.f32.mrb[11].mxu1  ;;  %v2307_v0 = vadd.f32 %v3554_v58, %v2267_v57 }
 0x1f9   : > { %v2347_v1 = vadd.f32 %v3576_v59, %v2307_v0 }
 0x1fb   : > { %v2352_v2 = vpack.c.bf16 %v2347_v1, %v2347_v1 }
 0x1fd   : > { %2984 = vrot.lane.b32.xlu1 %v2352_v2, %s4016_s22  ;;  %v2870_v3 = vsel %vm2865_vm1, %v2352_v2, 0 }
 0x1fe   : > { %3655 = vmatpush3.bf16.xpose.msra.mxu1 %v2870_v3 }
 0x1ff   : > { %3660 = vmatprep.subr.bf16.mxu1 %v4014_v27 }
 0x201   : > { %2981 = vrot.lane.b32.xlu1 %v1840_v4, %s4016_s22 }
 0x205   : > { %3657 = vmatmul.mubr.msk.bf16.vlgmr.msra.gmra.mrb[16].mxu1 %vm2865_vm1, %v1840_v4 }
 0x206   : > { %3662 = vmatprep.mubr.msk.bf16.mxu1 %vm4015_vm0, %v4014_v27 }
 0x214   : > { %v3596_v5 = vpop.f32.mrb[12].mxu0 }
 0x215   : > { %v3597_v6 = vpop.f32.mrb[13].mxu0 }
 0x216   : > { %v3598_v9 = vadd.f32 %v3597_v6, %v3596_v5  ;;  %v3599_v10 = vpop.f32.mrb[14].mxu0 }
 0x217   : > { %v3600_v11 = vpop.f32.mrb[15].mxu0 }
 0x218   : > { %v2779_v13 = vadd.f32 %v3598_v9, %v3392_v12 }
 0x225   : > { %v3618_v36 = vpop.f32.mrb[12].mxu1 }
 0x226   : > { %v3619_v8 = vpop.f32.mrb[13].mxu1 }
 0x227   : > { %v3620_v14 = vadd.f32 %v3619_v8, %v3618_v36  ;;  %v3621_v15 = vpop.f32.mrb[14].mxu1 }
 0x228   : > { %v3622_v16 = vpop.f32.mrb[15].mxu1 }
 0x229   : > { %v2819_v17 = vadd.f32 %v3620_v14, %v2779_v13 }
 0x234   : > { %v3640_v18 = vpop.f32.mrb[16].mxu0 }
 0x235   : > { %v3641_v19 = vpop.f32.mrb[17].mxu0 }
 0x236   : > { %v3642_v20 = vadd.f32 %v3641_v19, %v3640_v18  ;;  %v3643_v21 = vpop.f32.mrb[18].mxu0 }
 0x237   : > { %v3644_v22 = vpop.f32.mrb[19].mxu0 }
 0x238   : > { %v2859_v23 = vadd.f32 %v3642_v20, %v2819_v17 }
 0x23a   : > { %v2864_v24 = vpack.c.bf16 %v2859_v23, %v2859_v23 }
 0x23c   : > { %v2938_v25 = vsel %vm2936_vm2, %v2864_v24, 0 }
 0x23d   : > { %3661 = vmatpush3.bf16.msra.mxu1 %v2938_v25 }
 0x23e   : > { %3666 = vmatprep.subr.bf16.mxu1 %v4014_v27 }
 0x26f   : > { %v2985_v45 = vpop.permute.xlu1 %2984 }
 0x270   : > { %v2990_v47 = vsel %vm2865_vm1, %v2985_v45, 0 }
 0x273   : > { %v2982_v34 = vpop.permute.xlu1 %2981 }
 0x2d8   : > { %v2906_v26 = vpop.f32.mrb[16].mxu1 }
 0x2d9   : > { %v2912_v28 = vmul.f32 0.125, %v2906_v26  ;;  %v3658_v29 = vpop.f32.mrb[17].mxu1 }
 0x2da   : > { %v2909_v30 = vpop.f32.mrb[18].mxu1 }
 0x2db   : > { %v3659_v31 = vpop.f32.mrb[19].mxu1  ;;  %v2919_v32 = vadd.f32 %v3442_v37, %v2912_v28 }
 0x2dd   : > { %v2921_v33 = vsel %vm2920_vm3, %v2919_v32, -inf }
 0x2de   : > { %2922 = vmax.xlane.f32.xlu0 %v2921_v33 }
 0x36b   : > { %v2923_v7 = vpop.xlane.xlu0 %2922 }
 0x36c   : > { %v2924_v38 = vsub.f32 %v2919_v32, %v2923_v7 }
 0x36e   : > { %v2925_v39 = vmul.f32 1.442695, %v2924_v38 }
 0x370   : > { %3906 = vpow2.f32 %v2925_v39 }
 0x37a   : > { %v3907_v40 = vpop.eup %3906 }
 0x37b   : > { %v2927_v41 = vsel %vm2920_vm3, %v3907_v40, 0.0 }
 0x37c   : > { %2928 = vadd.xlane.f32.xlu0 %v2927_v41 }
 0x409   : > { %v2929_v42 = vpop.xlane.xlu0 %2928 }
 0x40a   : > { %3908 = vrcp.f32 %v2929_v42 }
 0x414   : > { %v3909_v43 = vpop.eup %3908 }
 0x415   : > { %v2931_v44 = vmul.f32 %v3909_v43, %v3907_v40 }
 0x417   : > { %v2932_v46 = vpack.c.bf16 %v2931_v44, %v2931_v44 }
 0x419   : > { %3663 = vmatmul.mubr.msk.bf16.vlgmr.msra.gmra.mrb[20].mxu1 %vm2920_vm3, %v2932_v46 }
 0x41a   : > { %3667 = vmatpush3.bf16.xpose.msra.mxu1 %v2990_v47  ;;  %3668 = vmatprep.mubr.msk.bf16.mxu1 %vm4015_vm0, %v4014_v27 }
 0x41b   : > { %3672 = vmatprep.subr.bf16.mxu1 %v4014_v27 }
 0x421   : > { %3669 = vmatmul.mubr.msk.bf16.vlgmr.msra.gmra.mrb[24].mxu1 %vm2865_vm1, %v2982_v34 }
 0x422   : > { %3674 = vmatprep.mubr.msk.bf16.mxu1 %vm4015_vm0, %v4014_v27 }
 0x4ec   : > { %v2974_v35 = vpop.f32.mrb[20].mxu1 }
 0x4ed   : > { %v3664_v48 = vpop.f32.mrb[21].mxu1 }
 0x4ee   : > { %v2977_v49 = vpop.f32.mrb[22].mxu1 }
 0x4ef   : > { %v3665_v50 = vpop.f32.mrb[23].mxu1 }
 0x4f4   : > { %v3026_v51 = vpop.f32.mrb[24].mxu1 }
 0x4f5   : > { %v3032_v52 = vmul.f32 0.125, %v3026_v51  ;;  %v3670_v53 = vpop.f32.mrb[25].mxu1 }
 0x4f6   : > { %v3029_v54 = vpop.f32.mrb[26].mxu1 }
 0x4f7   : > { %v3671_v55 = vpop.f32.mrb[27].mxu1  ;;  %v3033_v56 = vadd.f32 %v3442_v37, %v3032_v52 }
 0x4f9   : > { %v3034_v57 = vsel %vm2920_vm3, %v3033_v56, -inf }
 0x4fa   : > { %3035 = vmax.xlane.f32.xlu0 %v3034_v57 }
 0x510   : > { %3047 = vrot.lane.b32.xlu0 %v2864_v24, %s4016_s22 }
 0x587   : > { %v3036_v58 = vpop.xlane.xlu0 %3035 }
 0x588   : > { %v3037_v59 = vsub.f32 %v3033_v56, %v3036_v58 }
 0x58a   : > { %v3038_v60 = vmul.f32 1.442695, %v3037_v59 }
 0x58b   : > { %v3048_v61 = vpop.permute.xlu0 %3047 }
 0x58c   : > { %3910 = vpow2.f32 %v3038_v60  ;;  %v3053_v27 = vsel %vm2936_vm2, %v3048_v61, 0 }
 0x58d   : > { %3673 = vmatpush3.bf16.msra.mxu1 %v3053_v27 }
 0x596   : > { %v3911_v62 = vpop.eup %3910 }
 0x597   : > { %v3040_v63 = vsel %vm2920_vm3, %v3911_v62, 0.0 }
 0x598   : > { %3041 = vadd.xlane.f32.xlu1 %v3040_v63 }
 0x625   : > { %v3042_v0 = vpop.xlane.xlu1 %3041 }
 0x626   : > { %3912 = vrcp.f32 %v3042_v0 }
 0x630   : > { %v3913_v1 = vpop.eup %3912 }
 0x631   : > { %v3044_v2 = vmul.f32 %v3913_v1, %v3911_v62 }
 0x633   : > { %v3045_v3 = vpack.c.bf16 %v3044_v2, %v3044_v2 }
 0x635   : > { %3675 = vmatmul.mubr.msk.bf16.vlgmr.msra.gmra.mrb[28].mxu1 %vm2920_vm3, %v3045_v3 }
 0x708   : > { %v3089_v4 = vpop.f32.mrb[28].mxu1 }
 0x709   : > { %3096 = vrot.lane.b32.xlu0 %v3089_v4, %s4016_s22  ;;  %v3676_v5 = vpop.f32.mrb[29].mxu1 }
 0x70a   : > { %v3092_v6 = vpop.f32.mrb[30].mxu1 }
 0x70b   : > { %v3677_v9 = vpop.f32.mrb[31].mxu1 }
 0x77b   : > { %v3097_v10 = vpop.permute.xlu0 %3096 }
 0x77c   : > { %v3099_v11 = vsel %vm2865_vm1, %v2974_v35, %v3097_v10 }
 0x77d   : > { %v3100_v12 = vpack.c.bf16 %v3099_v11, %v3099_v11 }
 0x77f   : > { %3101 = vst [vmem:[%s1302_s23] sm:$0xf] %v3100_v12 }
 0x780 PF: > { %s21_s12 = sadd.s32 1, %s4008_s12   ;;  %s4866_s24 = sld [smem:[#allocation7_spill]] }
 0x781   : > { %p18_p3 = scmp.ge.s32.totalorder %s21_s12, 14   ;;  %s4867_s22 = sld [smem:[#allocation8_spill]] }
 0x782   : > { %s4868_s27 = smov %s3984_s28  ;;  %s4869_s28 = smov %s3988_s29 }
 0x783   : > { %s4870_s29 = smov %s4120_s19  ;;  %s4871_s30 = smov %s4000_s10 }
 0x784   : > { %s4872_s9 = smov %s4004_s11  ;;  %20 = sbr.rel (!%p18_p3) target bundleno = 5 (0x5), region = 205 }
 0x786   : > { %s4873_s10 = smov %s4866_s24 }
 0x787   : > { %s4874_s11 = smov %s4867_s22 }
 0x78b   :  { %3129 = vsyncpa [#allocation3], 1 }
 0x78c   :  { %3131 = vsyncpa [#allocation3 + $0x1], 1 }

// kernel: _lambda_.28
= control target key start
LH: loop header
LB: loop body
LE: loop exit
PB: predicated region body
PF: predicated region fallthrough
CT: control target
= control target key end

     0   :  { %s11816_s0 = inlined_call_operand.vmem [shape: bf16[16,768], index: 0, kind: input, shape index: {}]   ;;  %s11817_s1 = inlined_call_operand.vmem [shape: bf16[16,768], index: 1, kind: input, shape index: {}]   ;;  %s11818_s2 = inlined_call_operand.vmem [shape: bf16[768,768], index: 2, kind: input, shape index: {}]   ;;  %s11819_s3 = inlined_call_operand.vmem [shape: f32[1,768], index: 3, kind: input, shape index: {}]   ;;  %s11820_s4 = inlined_call_operand.vmem [shape: f32[1,768], index: 4, kind: input, shape index: {}]   ;;  %s11821_s5 = inlined_call_operand.vmem [shape: f32[1,768], index: 5, kind: input, shape index: {}]   ;;  %s11822_s6 = inlined_call_operand.hbm [shape: bf16[768,3072], index: 6, kind: input, shape index: {}]   ;;  %s11823_s7 = inlined_call_operand.vmem [shape: f32[1,3072], index: 7, kind: input, shape index: {}]   ;;  %s11824_s8 = inlined_call_operand.vmem [shape: bf16[3072,768], index: 8, kind: input, shape index: {}]   ;;  %s11825_s9 = inlined_call_operand.vmem [shape: f32[1,768], index: 9, kind: input, shape index: {}]   ;;  %s11826_s10 = inlined_call_operand.vmem [shape: f32[1,768], index: 10, kind: input, shape index: {}]   ;;  %s11827_s11 = inlined_call_operand.vmem [shape: f32[1,768], index: 11, kind: input, shape index: {}]   ;;  %s11828_s12 = inlined_call_operand.vmem [shape: bf16[16,768], index: 12, kind: output, shape index: {}]  }
   0x1   :  { %11834 = sst [smem:[#allocation14_spill]] %s11816_s0 }
   0x2   :  { %11835 = sst [smem:[#allocation15_spill]] %s11822_s6 }
   0x3   :  { %17 = vsyncpa [#allocation5], 0 }
   0x4   :  { %19 = vsyncpa [#allocation5 + $0x1], 0  ;;  %s9953_s21 = smov 0   ;;  %s9955_s22 = smov 0  }
   0x5   :  { %s9957_s23 = smov 0   ;;  %s9959_s24 = smov 0  }
   0x6   :  { %s9961_s25 = smov 0   ;;  %s9963_s26 = smov 0  }
   0x7   :  { %s9965_s27 = smov 0   ;;  %s9967_s28 = smov 0  }
   0x8 LB: > { %11836 = sst [smem:[#allocation7_spill]] %s9857_s22  ;;  %s7467_s29 = sadd.s32 4294967295, %s9881_s28   ;;  %s9881_s28 = sphi %s9967_s28, %s25_s28   ;;  %s9877_s27 = sphi %s9965_s27, %s11854_s27   ;;  %s9873_s26 = sphi %s9963_s26, %s11853_s26   ;;  %s9869_s25 = sphi %s9961_s25, %s11852_s25   ;;  %s9865_s24 = sphi %s9959_s24, %s11851_s24   ;;  %s9861_s23 = sphi %s9957_s23, %s11850_s23   ;;  %s9857_s22 = sphi %s9955_s22, %s11849_s22   ;;  %s9853_s21 = sphi %s9953_s21, %s11848_s21  }
   0x9   : > { %11837 = sst [smem:[#allocation8_spill]] %s9861_s23  ;;  %s34_s30 = sadd.s32 1, %s9873_s26 }
   0xa   : > { %11838 = sst [smem:[#allocation9_spill]] %s9873_s26  ;;  %p35_p0 = scmp.ge.s32.totalorder %s34_s30, 4 }
   0xb   : > { %11839 = sst [smem:[#allocation10_spill]] %s9877_s27  ;;  %s37_s13 = sadd.s32 1, %s9877_s27 }
   0xc   : > { %s180_s14 = sadd.s32 1, %s9861_s23  ;;  %p187_p1 = scmp.ne.s32.totalorder %s9861_s23, %s9857_s22 }
   0xd   : > { %s11856_s30 = smov (%p35_p0, %s34_s30), 0  ;;  %s11858_s13 = smov (!%p35_p0, %s37_s13), %s9877_s27 }
   0xe   : > { %11840 = sst [smem:[#allocation11_spill]] %s11856_s30  ;;  %s177_s15 = ssub.s32 %s9873_s26, %s11856_s30 }
   0xf   : > { %p188_p2 = scmp.eq.s32.totalorder %s9881_s28, 0  ;;  %p39_p3 = scmp.ge.s32.totalorder %s11858_s13, 2 }
  0x10   : > { %p178_p4 = scmp.eq.s32.totalorder %s177_s15, 0  ;;  %p193_p6 = scmp.ne.s32.totalorder %s9857_s22, %s9853_s21 }
  0x11   : > { %p189_p5 = por %p188_p2, %p187_p1  ;;  %s11860_s13 = smov (%p39_p3, %s11858_s13), 0 }
  0x12   : > { %11841 = sst [smem:[#allocation12_spill]] %s11860_s13  ;;  %p194_p7 = scmp.eq.s32.totalorder %s7467_s29, 0 }
  0x13   : > { %s10007_s16 = scalar_select %p178_p4, %s9861_s23, %s180_s14  }
  0x14   : > { %p8398_p8 = scmp.lt.s32.totalorder %s9881_s28, 8  ;;  %s395_s17 = sand.u32 1, %s9861_s23  }
  0x15   : > { %11842 = sst [smem:[#allocation13_spill]] %s10007_s16  ;;  %p10011_p9 = por %p194_p7, %p193_p6 }
  0x16   : > { %s8388_s19 = smul.u32 2304, %s395_s17  ;;  %p10015_p10 = pnand %p8398_p8, %p189_p5 }
  0x17   : > { %s8354_s15 = smul.u32 384, %s9873_s26  ;;  %s11845_s6 = sld [smem:[#allocation15_spill]] }
  0x18   : > { %s399_s29 = scalar_lea.vmem [#allocation4], %s8388_s19  ;;  %s10028_s27 = scalar_lea.sflag [#allocation5], %s395_s17 }
  0x19   : > { %s406_s13 = sshll.u32 %s399_s29, 4  ;;  %p9787_p13 = pneg %p10015_p10  ;;  %s10025_s13 = int_to_ptr.vmem [resolvable:$true] %s406_s13 }
  0x1d   : > { %s10023_s14 = scalar_lea.hbm %s11845_s6, %s8354_s15  ;;  %s9790_s21 = scalar_lea.hbm %s11845_s6, 147456 }
  0x1e   : > { %s9785_s16 = scalar_lea.hbm %s10023_s14, 36864  ;;  %p9791_p2 = scmp.lt.u32.totalorder %s10023_s14, %s11845_s6 }
  0x1f   : > { %p9786_p12 = scmp.ne.s32.totalorder %s10023_s14, %s9785_s16  ;;  %p9792_p3 = scmp.lt.u32.totalorder %s9790_s21, %s9785_s16 }
  0x20   : > { %p9794_p5 = scmp.lt.u32.totalorder %s9785_s16, %s10023_s14 }
  0x21   : > { %p9788_p0 = pnand %p9787_p13, %p9786_p12  ;;  %p9793_p4 = por %p9792_p3, %p9791_p2 }
  0x23   : > { %p9789_p1 = pneg %p9788_p0  ;;  %p9795_p6 = por %p9794_p5, %p9793_p4 }
  0x25   : > { %p9796_p7 = pnand %p9795_p6, %p9789_p1 }
  0x27   : > { %9799 = shalt.err (!%p9796_p7)
}
  0x28   : > { %s9800_s17 = scalar_lea.vmem %s10025_s13, 36864  ;;  %s9883_s29 = smov [#allocation4]  }
  0x29   : > { %p9801_p8 = scmp.ne.s32.totalorder %s10025_s13, %s9800_s17  ;;  %s9805_s30 = sshll.u32 %s9883_s29, 4  ;;  %s9806_s30 = int_to_ptr.vmem [resolvable:$false] %s9805_s30 }
  0x2a   : > { %s9807_s26 = scalar_lea.vmem %s9806_s30, 73728  ;;  %p9808_p11 = scmp.lt.s32.totalorder %s10025_s13, %s9806_s30 }
  0x2b   : > { %p9803_p12 = pnand %p9801_p8, %p9787_p13  ;;  %p9809_p2 = scmp.lt.s32.totalorder %s9807_s26, %s9800_s17 }
  0x2d   : > { %p9804_p0 = pneg %p9803_p12  ;;  %p9810_p3 = por %p9809_p2, %p9808_p11 }
  0x2f   : > { %p9811_p4 = pnand %p9810_p3, %p9804_p0 }
  0x31   : > { %9814 = shalt.err (!%p9811_p4)
}
  0x32   : > { %s9884_s16 = smov 1536   ;;  %s9885_s15 = smov 384  }
  0x33   : > { %s9886_s21 = smov 24   ;;  %p432_p13 = scmp.lt.s32.totalorder %s9881_s28, 9 }
  0x34   : > { %8397 = dma.hbm_to_vmem [thread:$0]  (!%p10015_p10), %s10023_s14, 36864, %s10025_s13, %s10028_s27, %s9884_s16, %s9885_s15, %s9886_s21  }
  0x35   : > { %p11846_p1 = scmp.ge.s32.totalorder %s9881_s28, 1 }
  0x37   : > { %p433_p5 = pnand %p11846_p1, %p432_p13 }
  0x38   : > { %s438_s19 = sand.u32 (!%p433_p5), 1, %s9857_s22  }
  0x39   : > { %436 = sbr.rel (%p433_p5) target bundleno = 2312 (0x908), region = 68  ;;  %s439_s29 = scalar_lea.sflag (!%p433_p5), [#allocation5], %s438_s19 }
  0x3a   : > { %s8389_s17 = smul.u32 (!%p433_p5), 2304, %s438_s19 }
  0x3c   : > { %s10060_s30 = scalar_lea.vmem (!%p433_p5), [#allocation4], %s8389_s17 }
  0x40   : > { %9848 = dma.done.wait (%p10011_p9), %s439_s29, 36864  }
  0x41   : > { %9850 = vsyncadd (%p10011_p9), %s439_s29, 4294930432  ;;  %p503_p10 = scmp.lt.s32.totalorder %s9869_s25, 1  ;;  %s514_s27 = smul.u32 6, %s9865_s24 }
  0x42   : > { %s519_s13 = smul.u32 96, %s9865_s24  ;;  %s11847_s0 = sld [smem:[#allocation14_spill]] }
  0x43   : > { %s11862_s25 = smov (!%p503_p10, %s9869_s25), 1  ;;  %p515_p11 = scmp.lt.s32.totalorder %s514_s27, 23 }
  0x44   : > { %s8390_s20 = smul.u32 24, %s11862_s25  ;;  %p520_p6 = scmp.lt.s32.totalorder %s519_s13, 383 }
  0x45   : > { %s11864_s27 = smov (!%p515_p11, %s514_s27), 23  ;;  %p7477_p9 = scmp.ne.s32.totalorder %s9865_s24, 0 }
  0x46   : > { %s10080_s21 = scalar_lea.vmem %s11817_s1, %s8390_s20  ;;  %s517_s29 = scalar_lea.vmem %s11823_s7, %s11864_s27  ;;  %v8467_v0 = vld [vmem:[%s11818_s2 + $0x4] ss:$24 sps:$4 sm:$0xff] (!%p7477_p9)   ;;  %v8469_v1 = vld [vmem:[%s11818_s2] ss:$24 sps:$4 sm:$0xff] (!%p7477_p9)   ;;  %v8473_v4 = vld [vmem:[%s11818_s2 + $0x34] ss:$24 sps:$4 sm:$0xff] (!%p7477_p9)  }
  0x47   : > { %s10089_s23 = scalar_lea.vmem %s11828_s12, %s8390_s20  ;;  %s11866_s13 = smov (!%p520_p6, %s519_s13), 383  ;;  %2319 = vmatprep.subr.bf16.mxu0 (!%p7477_p9), %v8467_v0  ;;  %v8470_v2 = vld [vmem:[%s11818_s2 + $0x304] ss:$24 sps:$4 sm:$0xff] (!%p7477_p9)   ;;  %v8472_v3 = vld [vmem:[%s11818_s2 + $0x300] ss:$24 sps:$4 sm:$0xff] (!%p7477_p9)  }
  0x48   : > { %s10075_s16 = scalar_lea.vmem %s11847_s0, %s8390_s20  ;;  %s8391_s22 = smul.u32 24, %s11866_s13  ;;  %2320 = vmatpush1.bf16.msra.mxu0 (!%p7477_p9), %v8469_v1  ;;  %v8475_v5 = vld [vmem:[%s11818_s2 + $0x30] ss:$24 sps:$4 sm:$0xff] (!%p7477_p9)   ;;  %2360 = vmatprep.subr.bf16.mxu1 (!%p7477_p9), %v8470_v2  ;;  %v8476_v6 = vld [vmem:[%s11818_s2 + $0x334] ss:$24 sps:$4 sm:$0xff] (!%p7477_p9)  }
  0x49   : > { %534 = sbr.rel (%p7477_p9) target bundleno = 935 (0x3a7), region = 76  ;;  %2361 = vmatpush1.bf16.msra.mxu1 (!%p7477_p9), %v8472_v3  ;;  %2321 = vmatprep.subr.bf16.mxu0 (!%p7477_p9), %v8473_v4  ;;  %v8478_v7 = vld [vmem:[%s11818_s2 + $0x330] ss:$24 sps:$4 sm:$0xff] (!%p7477_p9)   ;;  %v8479_v8 = vld [vmem:[%s11818_s2 + $0x64] ss:$24 sps:$4 sm:$0xff] (!%p7477_p9)  }
  0x4a   : > { %s10094_s0 = scalar_lea.vmem %s11824_s8, %s8391_s22  ;;  %2362 = vmatprep.subr.bf16.mxu1 (!%p7477_p9), %v8476_v6  ;;  %v8481_v9 = vld [vmem:[%s11818_s2 + $0x60] ss:$24 sps:$4 sm:$0xff] (!%p7477_p9)   ;;  %v8482_v10 = vld [vmem:[%s11818_s2 + $0x364] ss:$24 sps:$4 sm:$0xff] (!%p7477_p9)   ;;  %v8485_v11 = vld [vmem:[%s11818_s2 + $0x94] ss:$24 sps:$4 sm:$0xff] (!%p7477_p9)  }
  0x4b   : > { %v8484_v12 = vld [vmem:[%s11818_s2 + $0x360] ss:$24 sps:$4 sm:$0xff] (!%p7477_p9)   ;;  %v8488_v13 = vld [vmem:[%s11818_s2 + $0x394] ss:$24 sps:$4 sm:$0xff] (!%p7477_p9)   ;;  %v8487_v14 = vld [vmem:[%s11818_s2 + $0x90] ss:$24 sps:$4 sm:$0xff] (!%p7477_p9)  }
  0x4c   : > { %2322 = vmatpush1.bf16.msra.mxu0 (!%p7477_p9), %v8475_v5  ;;  %v8491_v15 = vld [vmem:[%s11818_s2 + $0xc4] ss:$24 sps:$4 sm:$0xff] (!%p7477_p9)   ;;  %v8490_v16 = vld [vmem:[%s11818_s2 + $0x390] ss:$24 sps:$4 sm:$0xff] (!%p7477_p9)   ;;  %v8493_v18 = vld [vmem:[%s11818_s2 + $0xc0] ss:$24 sps:$4 sm:$0xff] (!%p7477_p9)  }
  0x4d   : > { %2323 = vmatprep.subr.bf16.mxu0 (!%p7477_p9), %v8479_v8  ;;  %2363 = vmatpush1.bf16.msra.mxu1 (!%p7477_p9), %v8478_v7  ;;  %v8494_v17 = vld [vmem:[%s11818_s2 + $0x3c4] ss:$24 sps:$4 sm:$0xff] (!%p7477_p9)   ;;  %v8497_v19 = vld [vmem:[%s11818_s2 + $0xf4] ss:$24 sps:$4 sm:$0xff] (!%p7477_p9)   ;;  %v8496_v20 = vld [vmem:[%s11818_s2 + $0x3c0] ss:$24 sps:$4 sm:$0xff] (!%p7477_p9)  }
  0x4e   : > { %2364 = vmatprep.subr.bf16.mxu1 (!%p7477_p9), %v8482_v10  ;;  %v8500_v21 = vld [vmem:[%s11818_s2 + $0x3f4] ss:$24 sps:$4 sm:$0xff] (!%p7477_p9)   ;;  %v8499_v22 = vld [vmem:[%s11818_s2 + $0xf0] ss:$24 sps:$4 sm:$0xff] (!%p7477_p9)   ;;  %v8503_v23 = vld [vmem:[%s11818_s2 + $0x124] ss:$24 sps:$4 sm:$0xff] (!%p7477_p9)  }
  0x4f   : > { %v8502_v24 = vld [vmem:[%s11818_s2 + $0x3f0] ss:$24 sps:$4 sm:$0xff] (!%p7477_p9)   ;;  %v8506_v25 = vld [vmem:[%s11818_s2 + $0x424] ss:$24 sps:$4 sm:$0xff] (!%p7477_p9)   ;;  %v8505_v26 = vld [vmem:[%s11818_s2 + $0x120] ss:$24 sps:$4 sm:$0xff] (!%p7477_p9)  }
  0x50   : > { %2324 = vmatpush1.bf16.msra.mxu0 %v8481_v9  ;;  %v8509_v27 = vld [vmem:[%s11818_s2 + $0x154] ss:$24 sps:$4 sm:$0xff]   ;;  %v8508_v28 = vld [vmem:[%s11818_s2 + $0x420] ss:$24 sps:$4 sm:$0xff]   ;;  %v8511_v30 = vld [vmem:[%s11818_s2 + $0x150] ss:$24 sps:$4 sm:$0xff]  }
  0x51   : > { %2325 = vmatprep.subr.bf16.mxu0 %v8485_v11  ;;  %2365 = vmatpush1.bf16.msra.mxu1 %v8484_v12  ;;  %v8512_v29 = vld [vmem:[%s11818_s2 + $0x454] ss:$24 sps:$4 sm:$0xff]   ;;  %v8515_v31 = vld [vmem:[%s11818_s2 + $0x184] ss:$24 sps:$4 sm:$0xff]   ;;  %v8514_v32 = vld [vmem:[%s11818_s2 + $0x450] ss:$24 sps:$4 sm:$0xff]  }
  0x52   : > { %2366 = vmatprep.subr.bf16.mxu1 %v8488_v13  ;;  %v8518_v33 = vld [vmem:[%s11818_s2 + $0x484] ss:$24 sps:$4 sm:$0xff]   ;;  %v8517_v34 = vld [vmem:[%s11818_s2 + $0x180] ss:$24 sps:$4 sm:$0xff]   ;;  %v8521_v35 = vld [vmem:[%s11818_s2 + $0x1b4] ss:$24 sps:$4 sm:$0xff]  }
  0x53   : > { %v8520_v36 = vld [vmem:[%s11818_s2 + $0x480] ss:$24 sps:$4 sm:$0xff]   ;;  %v8524_v37 = vld [vmem:[%s11818_s2 + $0x4b4] ss:$24 sps:$4 sm:$0xff]   ;;  %v8523_v38 = vld [vmem:[%s11818_s2 + $0x1b0] ss:$24 sps:$4 sm:$0xff]  }
  0x54   : > { %2326 = vmatpush1.bf16.msra.mxu0 %v8487_v14  ;;  %v8527_v39 = vld [vmem:[%s11818_s2 + $0x1e4] ss:$24 sps:$4 sm:$0xff]   ;;  %v8526_v40 = vld [vmem:[%s11818_s2 + $0x4b0] ss:$24 sps:$4 sm:$0xff]   ;;  %v8529_v42 = vld [vmem:[%s11818_s2 + $0x1e0] ss:$24 sps:$4 sm:$0xff]  }
  0x55   : > { %2327 = vmatprep.subr.bf16.mxu0 %v8491_v15  ;;  %2367 = vmatpush1.bf16.msra.mxu1 %v8490_v16  ;;  %v8530_v41 = vld [vmem:[%s11818_s2 + $0x4e4] ss:$24 sps:$4 sm:$0xff]   ;;  %v8533_v43 = vld [vmem:[%s11818_s2 + $0x214] ss:$24 sps:$4 sm:$0xff]   ;;  %v8532_v44 = vld [vmem:[%s11818_s2 + $0x4e0] ss:$24 sps:$4 sm:$0xff]  }
  0x56   : > { %2368 = vmatprep.subr.bf16.mxu1 %v8494_v17  ;;  %v8536_v45 = vld [vmem:[%s11818_s2 + $0x514] ss:$24 sps:$4 sm:$0xff]   ;;  %v535_v46 = vld [vmem:[%s10075_s16] sm:$0xff]  ;;  %v8535_v47 = vld [vmem:[%s11818_s2 + $0x210] ss:$24 sps:$4 sm:$0xff]  }
  0x57   : > { %v10239_v48 = vcombine.high %v535_v46, %v535_v46  ;;  %v8539_v49 = vld [vmem:[%s11818_s2 + $0x244] ss:$24 sps:$4 sm:$0xff]   ;;  %v536_v50 = vld [vmem:[%s10075_s16 + $0x8] sm:$0xff]  ;;  %v8541_v54 = vld [vmem:[%s11818_s2 + $0x240] ss:$24 sps:$4 sm:$0xff]   ;;  %v10300_v5 = vcombine.low %v535_v46, %v535_v46 }
  0x58   : > { %2328 = vmatpush1.bf16.msra.mxu0 %v8493_v18  ;;  %v8538_v51 = vld [vmem:[%s11818_s2 + $0x510] ss:$24 sps:$4 sm:$0xff]   ;;  %v10249_v52 = vcombine.high %v536_v50, %v536_v50  ;;  %v8542_v53 = vld [vmem:[%s11818_s2 + $0x544] ss:$24 sps:$4 sm:$0xff]   ;;  %v8545_v55 = vld [vmem:[%s11818_s2 + $0x274] ss:$24 sps:$4 sm:$0xff]   ;;  %v10308_v8 = vcombine.low %v536_v50, %v536_v50 }
  0x59   : > { %2329 = vmatprep.subr.bf16.mxu0 %v8497_v19  ;;  %2369 = vmatpush1.bf16.msra.mxu1 %v8496_v20  ;;  %v8544_v56 = vld [vmem:[%s11818_s2 + $0x540] ss:$24 sps:$4 sm:$0xff]   ;;  %v8548_v57 = vld [vmem:[%s11818_s2 + $0x574] ss:$24 sps:$4 sm:$0xff]   ;;  %v8547_v58 = vld [vmem:[%s11818_s2 + $0x270] ss:$24 sps:$4 sm:$0xff]  }
  0x5a   : > { %2370 = vmatprep.subr.bf16.mxu1 %v8500_v21  ;;  %2351 = vmatprep.mubr.bf16.mxu0 %v10239_v48  ;;  %v8551_v59 = vld [vmem:[%s11818_s2 + $0x2a4] ss:$24 sps:$4 sm:$0xff]   ;;  %v8550_v60 = vld [vmem:[%s11818_s2 + $0x570] ss:$24 sps:$4 sm:$0xff]   ;;  %v8553_v62 = vld [vmem:[%s11818_s2 + $0x2a0] ss:$24 sps:$4 sm:$0xff]  }
  0x5b   : > { %2392 = vmatprep.mubr.bf16.mxu1 %v10249_v52  ;;  %v8554_v61 = vld [vmem:[%s11818_s2 + $0x5a4] ss:$24 sps:$4 sm:$0xff]   ;;  %v8557_v63 = vld [vmem:[%s11818_s2 + $0x2d4] ss:$24 sps:$4 sm:$0xff]   ;;  %v8556_v0 = vld [vmem:[%s11818_s2 + $0x5a0] ss:$24 sps:$4 sm:$0xff]  }
  0x5c   : > { %2330 = vmatpush1.bf16.msra.mxu0 %v8499_v22  ;;  %v8560_v1 = vld [vmem:[%s11818_s2 + $0x5d4] ss:$24 sps:$4 sm:$0xff]   ;;  %v8559_v2 = vld [vmem:[%s11818_s2 + $0x2d0] ss:$24 sps:$4 sm:$0xff]   ;;  %v8567_v3 = vld [vmem:[%s11818_s2 + $0x604] ss:$24 sps:$4 sm:$0xff]  }
  0x5d   : > { %2331 = vmatprep.subr.bf16.mxu0 %v8503_v23  ;;  %2371 = vmatpush1.bf16.msra.mxu1 %v8502_v24  ;;  %v8563_v4 = vld [vmem:[%s11818_s2 + $0x5d0] ss:$24 sps:$4 sm:$0xff]   ;;  %v8572_v6 = vld [vmem:[%s11818_s2 + $0xc] ss:$24 sps:$4 sm:$0xff]   ;;  %v8565_v7 = vld [vmem:[%s11818_s2 + $0x600] ss:$24 sps:$4 sm:$0xff]  }
  0x5e   : > { %2372 = vmatprep.subr.bf16.mxu1 %v8506_v25  ;;  %v8575_v9 = vld [vmem:[%s11818_s2 + $0x634] ss:$24 sps:$4 sm:$0xff]   ;;  %v8570_v10 = vld [vmem:[%s11818_s2 + $0x8] ss:$24 sps:$4 sm:$0xff]   ;;  %v8581_v13 = vld [vmem:[%s11818_s2 + $0x664] ss:$24 sps:$4 sm:$0xff]  }
  0x5f   : > { %v8578_v11 = vld [vmem:[%s11818_s2 + $0x3c] ss:$24 sps:$4 sm:$0xff]   ;;  %v8573_v12 = vld [vmem:[%s11818_s2 + $0x630] ss:$24 sps:$4 sm:$0xff]   ;;  %v8584_v15 = vld [vmem:[%s11818_s2 + $0x6c] ss:$24 sps:$4 sm:$0xff]  }
  0x60   : > { %2332 = vmatpush1.bf16.msra.mxu0 %v8505_v26  ;;  %v8576_v14 = vld [vmem:[%s11818_s2 + $0x38] ss:$24 sps:$4 sm:$0xff]   ;;  %v8587_v17 = vld [vmem:[%s11818_s2 + $0x694] ss:$24 sps:$4 sm:$0xff]   ;;  %v8582_v18 = vld [vmem:[%s11818_s2 + $0x68] ss:$24 sps:$4 sm:$0xff]  }
  0x61   : > { %2333 = vmatprep.subr.bf16.mxu0 %v8509_v27  ;;  %2373 = vmatpush1.bf16.msra.mxu1 %v8508_v28  ;;  %v8579_v16 = vld [vmem:[%s11818_s2 + $0x660] ss:$24 sps:$4 sm:$0xff]   ;;  %v8590_v19 = vld [vmem:[%s11818_s2 + $0x9c] ss:$24 sps:$4 sm:$0xff]   ;;  %v8585_v20 = vld [vmem:[%s11818_s2 + $0x690] ss:$24 sps:$4 sm:$0xff]  }
  0x62   : > { %2374 = vmatprep.subr.bf16.mxu1 %v8512_v29  ;;  %v8593_v21 = vld [vmem:[%s11818_s2 + $0x6c4] ss:$24 sps:$4 sm:$0xff]   ;;  %v8588_v22 = vld [vmem:[%s11818_s2 + $0x98] ss:$24 sps:$4 sm:$0xff]   ;;  %v8599_v25 = vld [vmem:[%s11818_s2 + $0x6f4] ss:$24 sps:$4 sm:$0xff]  }
  0x63   : > { %v8596_v23 = vld [vmem:[%s11818_s2 + $0xcc] ss:$24 sps:$4 sm:$0xff]   ;;  %v8591_v24 = vld [vmem:[%s11818_s2 + $0x6c0] ss:$24 sps:$4 sm:$0xff]   ;;  %v8602_v27 = vld [vmem:[%s11818_s2 + $0xfc] ss:$24 sps:$4 sm:$0xff]  }
  0x64   : > { %2334 = vmatpush1.bf16.msra.mxu0 %v8511_v30  ;;  %v8594_v26 = vld [vmem:[%s11818_s2 + $0xc8] ss:$24 sps:$4 sm:$0xff]   ;;  %v8605_v29 = vld [vmem:[%s11818_s2 + $0x724] ss:$24 sps:$4 sm:$0xff]   ;;  %v8600_v30 = vld [vmem:[%s11818_s2 + $0xf8] ss:$24 sps:$4 sm:$0xff]  }
  0x65   : > { %2335 = vmatprep.subr.bf16.mxu0 %v8515_v31  ;;  %2375 = vmatpush1.bf16.msra.mxu1 %v8514_v32  ;;  %v8597_v28 = vld [vmem:[%s11818_s2 + $0x6f0] ss:$24 sps:$4 sm:$0xff]   ;;  %v8608_v31 = vld [vmem:[%s11818_s2 + $0x12c] ss:$24 sps:$4 sm:$0xff]  }
  0x66   : > { %2376 = vmatprep.subr.bf16.mxu1 %v8518_v33  ;;  %v10383_v32 = vld [vmem:[%s10075_s16 + $0x10] sm:$0xff]  ;;  %v8603_v33 = vld [vmem:[%s11818_s2 + $0x720] ss:$24 sps:$4 sm:$0xff]   ;;  %v8632_v50 = vld [vmem:[%s11818_s2 + $0x1ec] ss:$24 sps:$4 sm:$0xff]  }
  0x67   : > { %v8621_v46 = vld [vmem:[%s11818_s2 + $0x7b0] ss:$24 sps:$4 sm:$0xff]  }
  0x68   : > { %2336 = vmatpush1.bf16.msra.mxu0 %v8517_v34  ;;  %v10390_v34 = vcombine.high %v10383_v32, %v10383_v32 }
  0x69   : > { %2337 = vmatprep.subr.bf16.mxu0 %v8521_v35  ;;  %2377 = vmatpush1.bf16.msra.mxu1 %v8520_v36  ;;  %v8611_v35 = vld [vmem:[%s11818_s2 + $0x754] ss:$24 sps:$4 sm:$0xff]   ;;  %v8606_v36 = vld [vmem:[%s11818_s2 + $0x128] ss:$24 sps:$4 sm:$0xff]  }
  0x6a   : > { %2378 = vmatprep.subr.bf16.mxu1 %v8524_v37  ;;  %v8614_v37 = vld [vmem:[%s11818_s2 + $0x15c] ss:$24 sps:$4 sm:$0xff]  }
  0x6c   : > { %2338 = vmatpush1.bf16.msra.mxu0 %v8523_v38  ;;  %v8609_v38 = vld [vmem:[%s11818_s2 + $0x750] ss:$24 sps:$4 sm:$0xff]  }
  0x6d   : > { %2339 = vmatprep.subr.bf16.mxu0 %v8527_v39  ;;  %2379 = vmatpush1.bf16.msra.mxu1 %v8526_v40  ;;  %v8617_v39 = vld [vmem:[%s11818_s2 + $0x784] ss:$24 sps:$4 sm:$0xff]   ;;  %v8612_v40 = vld [vmem:[%s11818_s2 + $0x158] ss:$24 sps:$4 sm:$0xff]  }
  0x6e   : > { %2380 = vmatprep.subr.bf16.mxu1 %v8530_v41  ;;  %v8620_v41 = vld [vmem:[%s11818_s2 + $0x18c] ss:$24 sps:$4 sm:$0xff]  }
  0x70   : > { %2340 = vmatpush1.bf16.msra.mxu0 %v8529_v42  ;;  %v8615_v42 = vld [vmem:[%s11818_s2 + $0x780] ss:$24 sps:$4 sm:$0xff]  }
  0x71   : > { %2341 = vmatprep.subr.bf16.mxu0 %v8533_v43  ;;  %2381 = vmatpush1.bf16.msra.mxu1 %v8532_v44  ;;  %v8623_v43 = vld [vmem:[%s11818_s2 + $0x7b4] ss:$24 sps:$4 sm:$0xff]   ;;  %v8618_v44 = vld [vmem:[%s11818_s2 + $0x188] ss:$24 sps:$4 sm:$0xff]  }
  0x72   : > { %2382 = vmatprep.subr.bf16.mxu1 %v8536_v45  ;;  %v8626_v45 = vld [vmem:[%s11818_s2 + $0x1bc] ss:$24 sps:$4 sm:$0xff]  }
  0x74   : > { %2342 = vmatpush1.bf16.msra.mxu0 %v8535_v47  ;;  %v8629_v47 = vld [vmem:[%s11818_s2 + $0x7e4] ss:$24 sps:$4 sm:$0xff]  }
  0x75   : > { %2343 = vmatprep.subr.bf16.mxu0 %v8539_v49  ;;  %2383 = vmatpush1.bf16.msra.mxu1 %v8538_v51  ;;  %v8624_v49 = vld [vmem:[%s11818_s2 + $0x1b8] ss:$24 sps:$4 sm:$0xff]  }
  0x76   : > { %2384 = vmatprep.subr.bf16.mxu1 %v8542_v53  ;;  %v8627_v51 = vld [vmem:[%s11818_s2 + $0x7e0] ss:$24 sps:$4 sm:$0xff]   ;;  %v8635_v53 = vld [vmem:[%s11818_s2 + $0x814] ss:$24 sps:$4 sm:$0xff]  }
  0x78   : > { %2344 = vmatpush1.bf16.msra.mxu0 %v8541_v54  ;;  %v8630_v54 = vld [vmem:[%s11818_s2 + $0x1e8] ss:$24 sps:$4 sm:$0xff]  }
  0x79   : > { %2345 = vmatprep.subr.bf16.mxu0 %v8545_v55  ;;  %2385 = vmatpush1.bf16.msra.mxu1 %v8544_v56  ;;  %v8638_v55 = vld [vmem:[%s11818_s2 + $0x21c] ss:$24 sps:$4 sm:$0xff]   ;;  %v8633_v56 = vld [vmem:[%s11818_s2 + $0x810] ss:$24 sps:$4 sm:$0xff]  }
  0x7a   : > { %2386 = vmatprep.subr.bf16.mxu1 %v8548_v57  ;;  %v8641_v57 = vld [vmem:[%s11818_s2 + $0x844] ss:$24 sps:$4 sm:$0xff]  }
  0x7c   : > { %2346 = vmatpush1.bf16.msra.mxu0 %v8547_v58  ;;  %v8636_v58 = vld [vmem:[%s11818_s2 + $0x218] ss:$24 sps:$4 sm:$0xff]  }
  0x7d   : > { %2347 = vmatprep.subr.bf16.mxu0 %v8551_v59  ;;  %2387 = vmatpush1.bf16.msra.mxu1 %v8550_v60  ;;  %v8644_v59 = vld [vmem:[%s11818_s2 + $0x24c] ss:$24 sps:$4 sm:$0xff]   ;;  %v8639_v60 = vld [vmem:[%s11818_s2 + $0x840] ss:$24 sps:$4 sm:$0xff]  }
  0x7e   : > { %2388 = vmatprep.subr.bf16.mxu1 %v8554_v61  ;;  %v8647_v61 = vld [vmem:[%s11818_s2 + $0x874] ss:$24 sps:$4 sm:$0xff]  }
  0x80   : > { %2348 = vmatpush1.bf16.msra.mxu0 %v8553_v62  ;;  %v8642_v62 = vld [vmem:[%s11818_s2 + $0x248] ss:$24 sps:$4 sm:$0xff]  }
  0x81   : > { %2349 = vmatprep.subr.bf16.mxu0 %v8557_v63  ;;  %2389 = vmatpush1.bf16.msra.mxu1 %v8556_v0  ;;  %v8650_v63 = vld [vmem:[%s11818_s2 + $0x27c] ss:$24 sps:$4 sm:$0xff]   ;;  %v8645_v0 = vld [vmem:[%s11818_s2 + $0x870] ss:$24 sps:$4 sm:$0xff]  }
  0x82   : > { %2390 = vmatprep.subr.bf16.mxu1 %v8560_v1  ;;  %v8653_v1 = vld [vmem:[%s11818_s2 + $0x8a4] ss:$24 sps:$4 sm:$0xff]  }
  0x84   : > { %2350 = vmatpush1.bf16.msra.mxu0 %v8559_v2  ;;  %v8648_v2 = vld [vmem:[%s11818_s2 + $0x278] ss:$24 sps:$4 sm:$0xff]  }
  0x85   : > { %2401 = vmatprep.subr.bf16.mxu0 %v8567_v3  ;;  %2391 = vmatpush1.bf16.msra.mxu1 %v8563_v4  ;;  %v8656_v3 = vld [vmem:[%s11818_s2 + $0x2ac] ss:$24 sps:$4 sm:$0xff]   ;;  %v8651_v4 = vld [vmem:[%s11818_s2 + $0x8a0] ss:$24 sps:$4 sm:$0xff]  }
  0x86   : > { %2442 = vmatprep.subr.bf16.mxu1 %v8572_v6  ;;  %v8659_v6 = vld [vmem:[%s11818_s2 + $0x8d4] ss:$24 sps:$4 sm:$0xff]  }
  0x87   : > { %2352 = vmatmul.mubr.bf16.vlgmr.msra.gmra.mrb[0].mxu0 %v10300_v5 }
  0x88   : > { %2402 = vmatpush1.bf16.msra.mxu0 %v8565_v7  ;;  %2393 = vmatmul.mubr.bf16.vlgmr.msra.gmra.mrb[0].mxu1 %v10308_v8  ;;  %v8654_v7 = vld [vmem:[%s11818_s2 + $0x2a8] ss:$24 sps:$4 sm:$0xff]  }
  0x89   : > { %2403 = vmatprep.subr.bf16.mxu0 %v8575_v9  ;;  %2443 = vmatpush1.bf16.msra.mxu1 %v8570_v10  ;;  %v8662_v9 = vld [vmem:[%s11818_s2 + $0x2dc] ss:$24 sps:$4 sm:$0xff]   ;;  %v8657_v10 = vld [vmem:[%s11818_s2 + $0x8d0] ss:$24 sps:$4 sm:$0xff]  }
  0x8a   : > { %2474 = vmatprep.mubr.bf16.mxu1 %v10239_v48  ;;  %2444 = vmatprep.subr.bf16.mxu1 %v8578_v11  ;;  %v8667_v11 = vld [vmem:[%s11818_s2 + $0x30c] ss:$24 sps:$4 sm:$0xff]  }
  0x8b   : > { %2433 = vmatprep.mubr.bf16.mxu0 %v10390_v34 }
  0x8c   : > { %2404 = vmatpush1.bf16.msra.mxu0 %v8573_v12  ;;  %v8660_v12 = vld [vmem:[%s11818_s2 + $0x2d8] ss:$24 sps:$4 sm:$0xff]  }
  0x8d   : > { %2405 = vmatprep.subr.bf16.mxu0 %v8581_v13  ;;  %2445 = vmatpush1.bf16.msra.mxu1 %v8576_v14  ;;  %v10509_v13 = vcombine.low %v10383_v32, %v10383_v32  ;;  %v8670_v14 = vld [vmem:[%s11818_s2 + $0x60c] ss:$24 sps:$4 sm:$0xff]   ;;  %v8697_v32 = vld [vmem:[%s11818_s2 + $0x3fc] ss:$24 sps:$4 sm:$0xff]  }
  0x8e   : > { %2446 = vmatprep.subr.bf16.mxu1 %v8584_v15  ;;  %v8665_v15 = vld [vmem:[%s11818_s2 + $0x308] ss:$24 sps:$4 sm:$0xff]  }
  0x90   : > { %2406 = vmatpush1.bf16.msra.mxu0 %v8579_v16  ;;  %v8673_v16 = vld [vmem:[%s11818_s2 + $0x33c] ss:$24 sps:$4 sm:$0xff]  }
  0x91   : > { %2407 = vmatprep.subr.bf16.mxu0 %v8587_v17  ;;  %2447 = vmatpush1.bf16.msra.mxu1 %v8582_v18  ;;  %v8668_v17 = vld [vmem:[%s11818_s2 + $0x608] ss:$24 sps:$4 sm:$0xff]   ;;  %v8676_v18 = vld [vmem:[%s11818_s2 + $0x63c] ss:$24 sps:$4 sm:$0xff]  }
  0x92   : > { %2448 = vmatprep.subr.bf16.mxu1 %v8590_v19  ;;  %v8671_v19 = vld [vmem:[%s11818_s2 + $0x338] ss:$24 sps:$4 sm:$0xff]  }
  0x94   : > { %2408 = vmatpush1.bf16.msra.mxu0 %v8585_v20  ;;  %v8679_v20 = vld [vmem:[%s11818_s2 + $0x36c] ss:$24 sps:$4 sm:$0xff]  }
  0x95   : > { %2409 = vmatprep.subr.bf16.mxu0 %v8593_v21  ;;  %2449 = vmatpush1.bf16.msra.mxu1 %v8588_v22  ;;  %v8674_v21 = vld [vmem:[%s11818_s2 + $0x638] ss:$24 sps:$4 sm:$0xff]   ;;  %v8682_v22 = vld [vmem:[%s11818_s2 + $0x66c] ss:$24 sps:$4 sm:$0xff]  }
  0x96   : > { %2450 = vmatprep.subr.bf16.mxu1 %v8596_v23  ;;  %v8677_v23 = vld [vmem:[%s11818_s2 + $0x368] ss:$24 sps:$4 sm:$0xff]  }
  0x98   : > { %2410 = vmatpush1.bf16.msra.mxu0 %v8591_v24  ;;  %v8685_v24 = vld [vmem:[%s11818_s2 + $0x39c] ss:$24 sps:$4 sm:$0xff]  }
  0x99   : > { %2411 = vmatprep.subr.bf16.mxu0 %v8599_v25  ;;  %2451 = vmatpush1.bf16.msra.mxu1 %v8594_v26  ;;  %v8680_v25 = vld [vmem:[%s11818_s2 + $0x668] ss:$24 sps:$4 sm:$0xff]   ;;  %v8688_v26 = vld [vmem:[%s11818_s2 + $0x69c] ss:$24 sps:$4 sm:$0xff]  }
  0x9a   : > { %2452 = vmatprep.subr.bf16.mxu1 %v8602_v27  ;;  %v8683_v27 = vld [vmem:[%s11818_s2 + $0x398] ss:$24 sps:$4 sm:$0xff]  }
  0x9c   : > { %2412 = vmatpush1.bf16.msra.mxu0 %v8597_v28  ;;  %v8691_v28 = vld [vmem:[%s11818_s2 + $0x3cc] ss:$24 sps:$4 sm:$0xff]  }
  0x9d   : > { %2413 = vmatprep.subr.bf16.mxu0 %v8605_v29  ;;  %2453 = vmatpush1.bf16.msra.mxu1 %v8600_v30  ;;  %v8686_v29 = vld [vmem:[%s11818_s2 + $0x698] ss:$24 sps:$4 sm:$0xff]   ;;  %v8694_v30 = vld [vmem:[%s11818_s2 + $0x6cc] ss:$24 sps:$4 sm:$0xff]  }
  0x9e   : > { %2454 = vmatprep.subr.bf16.mxu1 %v8608_v31  ;;  %v8689_v31 = vld [vmem:[%s11818_s2 + $0x3c8] ss:$24 sps:$4 sm:$0xff]  }
  0xa0   : > { %2414 = vmatpush1.bf16.msra.mxu0 %v8603_v33  ;;  %v8692_v33 = vld [vmem:[%s11818_s2 + $0x6c8] ss:$24 sps:$4 sm:$0xff]  }
  0xa1   : > { %2415 = vmatprep.subr.bf16.mxu0 %v8611_v35  ;;  %2455 = vmatpush1.bf16.msra.mxu1 %v8606_v36  ;;  %v8700_v35 = vld [vmem:[%s11818_s2 + $0x6fc] ss:$24 sps:$4 sm:$0xff]   ;;  %v8695_v36 = vld [vmem:[%s11818_s2 + $0x3f8] ss:$24 sps:$4 sm:$0xff]  }
  0xa2   : > { %2456 = vmatprep.subr.bf16.mxu1 %v8614_v37  ;;  %v8703_v37 = vld [vmem:[%s11818_s2 + $0x42c] ss:$24 sps:$4 sm:$0xff]  }
  0xa4   : > { %2416 = vmatpush1.bf16.msra.mxu0 %v8609_v38  ;;  %v8698_v38 = vld [vmem:[%s11818_s2 + $0x6f8] ss:$24 sps:$4 sm:$0xff]  }
  0xa5   : > { %2417 = vmatprep.subr.bf16.mxu0 %v8617_v39  ;;  %2457 = vmatpush1.bf16.msra.mxu1 %v8612_v40  ;;  %v8706_v39 = vld [vmem:[%s11818_s2 + $0x72c] ss:$24 sps:$4 sm:$0xff]   ;;  %v8701_v40 = vld [vmem:[%s11818_s2 + $0x428] ss:$24 sps:$4 sm:$0xff]  }
  0xa6   : > { %2458 = vmatprep.subr.bf16.mxu1 %v8620_v41  ;;  %v8709_v41 = vld [vmem:[%s11818_s2 + $0x45c] ss:$24 sps:$4 sm:$0xff]  }
  0xa8   : > { %2418 = vmatpush1.bf16.msra.mxu0 %v8615_v42  ;;  %v8704_v42 = vld [vmem:[%s11818_s2 + $0x728] ss:$24 sps:$4 sm:$0xff]  }
  0xa9   : > { %2419 = vmatprep.subr.bf16.mxu0 %v8623_v43  ;;  %2459 = vmatpush1.bf16.msra.mxu1 %v8618_v44  ;;  %v8712_v43 = vld [vmem:[%s11818_s2 + $0x75c] ss:$24 sps:$4 sm:$0xff]   ;;  %v8707_v44 = vld [vmem:[%s11818_s2 + $0x458] ss:$24 sps:$4 sm:$0xff]  }
  0xaa   : > { %2460 = vmatprep.subr.bf16.mxu1 %v8626_v45  ;;  %v8715_v45 = vld [vmem:[%s11818_s2 + $0x48c] ss:$24 sps:$4 sm:$0xff]  }
  0xac   : > { %2420 = vmatpush1.bf16.msra.mxu0 %v8621_v46  ;;  %v8710_v46 = vld [vmem:[%s11818_s2 + $0x758] ss:$24 sps:$4 sm:$0xff]  }
  0xad   : > { %2421 = vmatprep.subr.bf16.mxu0 %v8629_v47  ;;  %2461 = vmatpush1.bf16.msra.mxu1 %v8624_v49  ;;  %v8718_v47 = vld [vmem:[%s11818_s2 + $0x78c] ss:$24 sps:$4 sm:$0xff]   ;;  %v8713_v49 = vld [vmem:[%s11818_s2 + $0x488] ss:$24 sps:$4 sm:$0xff]  }
  0xae   : > { %2462 = vmatprep.subr.bf16.mxu1 %v8632_v50  ;;  %v8721_v50 = vld [vmem:[%s11818_s2 + $0x4bc] ss:$24 sps:$4 sm:$0xff]  }
  0xb0   : > { %2422 = vmatpush1.bf16.msra.mxu0 %v8627_v51  ;;  %v8716_v51 = vld [vmem:[%s11818_s2 + $0x788] ss:$24 sps:$4 sm:$0xff]  }
  0xb1   : > { %2423 = vmatprep.subr.bf16.mxu0 %v8635_v53  ;;  %2463 = vmatpush1.bf16.msra.mxu1 %v8630_v54  ;;  %v8724_v53 = vld [vmem:[%s11818_s2 + $0x7bc] ss:$24 sps:$4 sm:$0xff]   ;;  %v8719_v54 = vld [vmem:[%s11818_s2 + $0x4b8] ss:$24 sps:$4 sm:$0xff]  }
  0xb2   : > { %2464 = vmatprep.subr.bf16.mxu1 %v8638_v55  ;;  %v8727_v55 = vld [vmem:[%s11818_s2 + $0x4ec] ss:$24 sps:$4 sm:$0xff]  }
  0xb4   : > { %2424 = vmatpush1.bf16.msra.mxu0 %v8633_v56  ;;  %v8722_v56 = vld [vmem:[%s11818_s2 + $0x7b8] ss:$24 sps:$4 sm:$0xff]  }
  0xb5   : > { %2425 = vmatprep.subr.bf16.mxu0 %v8641_v57  ;;  %2465 = vmatpush1.bf16.msra.mxu1 %v8636_v58  ;;  %v8730_v57 = vld [vmem:[%s11818_s2 + $0x7ec] ss:$24 sps:$4 sm:$0xff]   ;;  %v8725_v58 = vld [vmem:[%s11818_s2 + $0x4e8] ss:$24 sps:$4 sm:$0xff]  }
  0xb6   : > { %2466 = vmatprep.subr.bf16.mxu1 %v8644_v59  ;;  %v8733_v59 = vld [vmem:[%s11818_s2 + $0x51c] ss:$24 sps:$4 sm:$0xff]  }
  0xb8   : > { %2426 = vmatpush1.bf16.msra.mxu0 %v8639_v60  ;;  %v8728_v60 = vld [vmem:[%s11818_s2 + $0x7e8] ss:$24 sps:$4 sm:$0xff]  }
  0xb9   : > { %2427 = vmatprep.subr.bf16.mxu0 %v8647_v61  ;;  %2467 = vmatpush1.bf16.msra.mxu1 %v8642_v62  ;;  %v8736_v61 = vld [vmem:[%s11818_s2 + $0x81c] ss:$24 sps:$4 sm:$0xff]   ;;  %v8731_v62 = vld [vmem:[%s11818_s2 + $0x518] ss:$24 sps:$4 sm:$0xff]  }
  0xba   : > { %2468 = vmatprep.subr.bf16.mxu1 %v8650_v63  ;;  %v8739_v63 = vld [vmem:[%s11818_s2 + $0x54c] ss:$24 sps:$4 sm:$0xff]  }
  0xbc   : > { %2428 = vmatpush1.bf16.msra.mxu0 %v8645_v0  ;;  %v8734_v0 = vld [vmem:[%s11818_s2 + $0x818] ss:$24 sps:$4 sm:$0xff]  }
  0xbd   : > { %2429 = vmatprep.subr.bf16.mxu0 %v8653_v1  ;;  %2469 = vmatpush1.bf16.msra.mxu1 %v8648_v2  ;;  %v8742_v1 = vld [vmem:[%s11818_s2 + $0x84c] ss:$24 sps:$4 sm:$0xff]   ;;  %v8737_v2 = vld [vmem:[%s11818_s2 + $0x548] ss:$24 sps:$4 sm:$0xff]  }
  0xbe   : > { %2470 = vmatprep.subr.bf16.mxu1 %v8656_v3  ;;  %v8745_v3 = vld [vmem:[%s11818_s2 + $0x57c] ss:$24 sps:$4 sm:$0xff]  }
  0xc0   : > { %2430 = vmatpush1.bf16.msra.mxu0 %v8651_v4  ;;  %v8740_v4 = vld [vmem:[%s11818_s2 + $0x848] ss:$24 sps:$4 sm:$0xff]  }
  0xc1   : > { %2431 = vmatprep.subr.bf16.mxu0 %v8659_v6  ;;  %2471 = vmatpush1.bf16.msra.mxu1 %v8654_v7  ;;  %v8748_v6 = vld [vmem:[%s11818_s2 + $0x87c] ss:$24 sps:$4 sm:$0xff]   ;;  %v8743_v7 = vld [vmem:[%s11818_s2 + $0x578] ss:$24 sps:$4 sm:$0xff]  }
  0xc2   : > { %2472 = vmatprep.subr.bf16.mxu1 %v8662_v9  ;;  %v8751_v9 = vld [vmem:[%s11818_s2 + $0x5ac] ss:$24 sps:$4 sm:$0xff]  }
  0xc4   : > { %2432 = vmatpush1.bf16.msra.mxu0 %v8657_v10  ;;  %v8746_v10 = vld [vmem:[%s11818_s2 + $0x878] ss:$24 sps:$4 sm:$0xff]  }
  0xc5   : > { %2483 = vmatprep.subr.bf16.mxu0 %v8667_v11  ;;  %2473 = vmatpush1.bf16.msra.mxu1 %v8660_v12  ;;  %v8754_v11 = vld [vmem:[%s11818_s2 + $0x8ac] ss:$24 sps:$4 sm:$0xff]   ;;  %v8749_v12 = vld [vmem:[%s11818_s2 + $0x5a8] ss:$24 sps:$4 sm:$0xff]  }
  0xc6   : > { %2524 = vmatprep.subr.bf16.mxu1 %v8670_v14  ;;  %v8757_v14 = vld [vmem:[%s11818_s2 + $0x5dc] ss:$24 sps:$4 sm:$0xff]  }
  0xc7   : > { %2434 = vmatmul.mubr.bf16.vlgmr.msra.gmra.mrb[4].mxu0 %v10509_v13 }
  0xc8   : > { %2484 = vmatpush1.bf16.msra.mxu0 %v8665_v15  ;;  %2515 = vmatprep.mubr.bf16.mxu0 %v10249_v52  ;;  %v8752_v15 = vld [vmem:[%s11818_s2 + $0x8a8] ss:$24 sps:$4 sm:$0xff]  }
  0xc9   : > { %2475 = vmatmul.mubr.bf16.vlgmr.msra.gmra.mrb[4].mxu1 %v10300_v5  ;;  %2485 = vmatprep.subr.bf16.mxu0 %v8673_v16  ;;  %v8760_v16 = vld [vmem:[%s11818_s2 + $0x8dc] ss:$24 sps:$4 sm:$0xff]  }
  0xca   : > { %2525 = vmatpush1.bf16.msra.mxu1 %v8668_v17  ;;  %2556 = vmatprep.mubr.bf16.mxu1 %v10390_v34  ;;  %v8755_v17 = vld [vmem:[%s11818_s2 + $0x5d8] ss:$24 sps:$4 sm:$0xff]  }
  0xcb   : > { %2526 = vmatprep.subr.bf16.mxu1 %v8676_v18  ;;  %v8763_v18 = vld [vmem:[%s11818_s2 + $0x14] ss:$24 sps:$4 sm:$0xff]  }
  0xcc   : > { %2486 = vmatpush1.bf16.msra.mxu0 %v8671_v19  ;;  %v8758_v19 = vld [vmem:[%s11818_s2 + $0x8d8] ss:$24 sps:$4 sm:$0xff]  }
  0xcd   : > { %2487 = vmatprep.subr.bf16.mxu0 %v8679_v20  ;;  %v8766_v20 = vld [vmem:[%s11818_s2 + $0x314] ss:$24 sps:$4 sm:$0xff]  }
  0xce   : > { %2527 = vmatpush1.bf16.msra.mxu1 %v8674_v21  ;;  %v8761_v21 = vld [vmem:[%s11818_s2 + $0x10] ss:$24 sps:$4 sm:$0xff]  }
  0xcf   : > { %2528 = vmatprep.subr.bf16.mxu1 %v8682_v22  ;;  %v8769_v22 = vld [vmem:[%s11818_s2 + $0x44] ss:$24 sps:$4 sm:$0xff]  }
  0xd0   : > { %2488 = vmatpush1.bf16.msra.mxu0 %v8677_v23  ;;  %v8764_v23 = vld [vmem:[%s11818_s2 + $0x310] ss:$24 sps:$4 sm:$0xff]  }
  0xd1   : > { %2489 = vmatprep.subr.bf16.mxu0 %v8685_v24  ;;  %v8772_v24 = vld [vmem:[%s11818_s2 + $0x344] ss:$24 sps:$4 sm:$0xff]  }
  0xd2   : > { %2529 = vmatpush1.bf16.msra.mxu1 %v8680_v25  ;;  %v8767_v25 = vld [vmem:[%s11818_s2 + $0x40] ss:$24 sps:$4 sm:$0xff]  }
  0xd3   : > { %2530 = vmatprep.subr.bf16.mxu1 %v8688_v26  ;;  %v8775_v26 = vld [vmem:[%s11818_s2 + $0x74] ss:$24 sps:$4 sm:$0xff]  }
  0xd4   : > { %2490 = vmatpush1.bf16.msra.mxu0 %v8683_v27  ;;  %v8770_v27 = vld [vmem:[%s11818_s2 + $0x340] ss:$24 sps:$4 sm:$0xff]  }
  0xd5   : > { %2491 = vmatprep.subr.bf16.mxu0 %v8691_v28  ;;  %v8778_v28 = vld [vmem:[%s11818_s2 + $0x374] ss:$24 sps:$4 sm:$0xff]  }
  0xd6   : > { %2531 = vmatpush1.bf16.msra.mxu1 %v8686_v29  ;;  %v8781_v29 = vld [vmem:[%s11818_s2 + $0xa4] ss:$24 sps:$4 sm:$0xff]  }
  0xd7   : > { %2532 = vmatprep.subr.bf16.mxu1 %v8694_v30  ;;  %v8784_v30 = vld [vmem:[%s11818_s2 + $0x3a4] ss:$24 sps:$4 sm:$0xff]  }
  0xd8   : > { %2492 = vmatpush1.bf16.msra.mxu0 %v8689_v31  ;;  %v8779_v31 = vld [vmem:[%s11818_s2 + $0xa0] ss:$24 sps:$4 sm:$0xff]  }
  0xd9   : > { %2493 = vmatprep.subr.bf16.mxu0 %v8697_v32  ;;  %v8787_v32 = vld [vmem:[%s11818_s2 + $0xd4] ss:$24 sps:$4 sm:$0xff]  }
  0xda   : > { %2533 = vmatpush1.bf16.msra.mxu1 %v8692_v33  ;;  %v8782_v33 = vld [vmem:[%s11818_s2 + $0x3a0] ss:$24 sps:$4 sm:$0xff]  }
  0xdb   : > { %2534 = vmatprep.subr.bf16.mxu1 %v8700_v35  ;;  %v8790_v35 = vld [vmem:[%s11818_s2 + $0x3d4] ss:$24 sps:$4 sm:$0xff]  }
  0xdc   : > { %2494 = vmatpush1.bf16.msra.mxu0 %v8695_v36  ;;  %v8785_v36 = vld [vmem:[%s11818_s2 + $0xd0] ss:$24 sps:$4 sm:$0xff]  }
  0xdd   : > { %2495 = vmatprep.subr.bf16.mxu0 %v8703_v37  ;;  %v8793_v37 = vld [vmem:[%s11818_s2 + $0x104] ss:$24 sps:$4 sm:$0xff]  }
  0xde   : > { %2535 = vmatpush1.bf16.msra.mxu1 %v8698_v38  ;;  %v8788_v38 = vld [vmem:[%s11818_s2 + $0x3d0] ss:$24 sps:$4 sm:$0xff]  }
  0xdf   : > { %2536 = vmatprep.subr.bf16.mxu1 %v8706_v39  ;;  %v8796_v39 = vld [vmem:[%s11818_s2 + $0x404] ss:$24 sps:$4 sm:$0xff]  }
  0xe0   : > { %2496 = vmatpush1.bf16.msra.mxu0 %v8701_v40  ;;  %v8791_v40 = vld [vmem:[%s11818_s2 + $0x100] ss:$24 sps:$4 sm:$0xff]  }
  0xe1   : > { %2497 = vmatprep.subr.bf16.mxu0 %v8709_v41  ;;  %v8799_v41 = vld [vmem:[%s11818_s2 + $0x134] ss:$24 sps:$4 sm:$0xff]  }
  0xe2   : > { %2537 = vmatpush1.bf16.msra.mxu1 %v8704_v42  ;;  %v8794_v42 = vld [vmem:[%s11818_s2 + $0x400] ss:$24 sps:$4 sm:$0xff]  }
  0xe3   : > { %2538 = vmatprep.subr.bf16.mxu1 %v8712_v43  ;;  %v8802_v43 = vld [vmem:[%s11818_s2 + $0x434] ss:$24 sps:$4 sm:$0xff]  }
  0xe4   : > { %2498 = vmatpush1.bf16.msra.mxu0 %v8707_v44  ;;  %v8797_v44 = vld [vmem:[%s11818_s2 + $0x130] ss:$24 sps:$4 sm:$0xff]  }
  0xe5   : > { %2499 = vmatprep.subr.bf16.mxu0 %v8715_v45  ;;  %v8805_v45 = vld [vmem:[%s11818_s2 + $0x164] ss:$24 sps:$4 sm:$0xff]  }
  0xe6   : > { %2539 = vmatpush1.bf16.msra.mxu1 %v8710_v46  ;;  %v8800_v46 = vld [vmem:[%s11818_s2 + $0x430] ss:$24 sps:$4 sm:$0xff]  }
  0xe7   : > { %2540 = vmatprep.subr.bf16.mxu1 %v8718_v47  ;;  %v8808_v47 = vld [vmem:[%s11818_s2 + $0x464] ss:$24 sps:$4 sm:$0xff]  }
  0xe8   : > { %2500 = vmatpush1.bf16.msra.mxu0 %v8713_v49  ;;  %v8803_v49 = vld [vmem:[%s11818_s2 + $0x160] ss:$24 sps:$4 sm:$0xff]  }
  0xe9   : > { %2501 = vmatprep.subr.bf16.mxu0 %v8721_v50  ;;  %v8811_v50 = vld [vmem:[%s11818_s2 + $0x194] ss:$24 sps:$4 sm:$0xff]  }
  0xea   : > { %2541 = vmatpush1.bf16.msra.mxu1 %v8716_v51  ;;  %v8806_v51 = vld [vmem:[%s11818_s2 + $0x460] ss:$24 sps:$4 sm:$0xff]  }
  0xeb   : > { %2542 = vmatprep.subr.bf16.mxu1 %v8724_v53  ;;  %v8814_v53 = vld [vmem:[%s11818_s2 + $0x494] ss:$24 sps:$4 sm:$0xff]  }
  0xec   : > { %2502 = vmatpush1.bf16.msra.mxu0 %v8719_v54  ;;  %v8809_v54 = vld [vmem:[%s11818_s2 + $0x190] ss:$24 sps:$4 sm:$0xff]  }
  0xed   : > { %2503 = vmatprep.subr.bf16.mxu0 %v8727_v55  ;;  %v8817_v55 = vld [vmem:[%s11818_s2 + $0x1c4] ss:$24 sps:$4 sm:$0xff]  }
  0xee   : > { %2543 = vmatpush1.bf16.msra.mxu1 %v8722_v56  ;;  %v8812_v56 = vld [vmem:[%s11818_s2 + $0x490] ss:$24 sps:$4 sm:$0xff]  }
  0xef   : > { %2544 = vmatprep.subr.bf16.mxu1 %v8730_v57  ;;  %v8820_v57 = vld [vmem:[%s11818_s2 + $0x4c4] ss:$24 sps:$4 sm:$0xff]  }
  0xf0   : > { %2504 = vmatpush1.bf16.msra.mxu0 %v8725_v58  ;;  %v8815_v58 = vld [vmem:[%s11818_s2 + $0x1c0] ss:$24 sps:$4 sm:$0xff]  }
  0xf1   : > { %2505 = vmatprep.subr.bf16.mxu0 %v8733_v59  ;;  %v8823_v59 = vld [vmem:[%s11818_s2 + $0x1f4] ss:$24 sps:$4 sm:$0xff]  }
  0xf2   : > { %2545 = vmatpush1.bf16.msra.mxu1 %v8728_v60  ;;  %v8818_v60 = vld [vmem:[%s11818_s2 + $0x4c0] ss:$24 sps:$4 sm:$0xff]  }
  0xf3   : > { %2546 = vmatprep.subr.bf16.mxu1 %v8736_v61  ;;  %v8826_v61 = vld [vmem:[%s11818_s2 + $0x4f4] ss:$24 sps:$4 sm:$0xff]  }
  0xf4   : > { %2506 = vmatpush1.bf16.msra.mxu0 %v8731_v62  ;;  %v8821_v62 = vld [vmem:[%s11818_s2 + $0x1f0] ss:$24 sps:$4 sm:$0xff]  }
  0xf5   : > { %2507 = vmatprep.subr.bf16.mxu0 %v8739_v63  ;;  %v8829_v63 = vld [vmem:[%s11818_s2 + $0x224] ss:$24 sps:$4 sm:$0xff]  }
  0xf6   : > { %2547 = vmatpush1.bf16.msra.mxu1 %v8734_v0  ;;  %v8824_v0 = vld [vmem:[%s11818_s2 + $0x4f0] ss:$24 sps:$4 sm:$0xff]  }
  0xf7   : > { %2548 = vmatprep.subr.bf16.mxu1 %v8742_v1  ;;  %v8832_v1 = vld [vmem:[%s11818_s2 + $0x524] ss:$24 sps:$4 sm:$0xff]  }
  0xf8   : > { %2508 = vmatpush1.bf16.msra.mxu0 %v8737_v2  ;;  %v8827_v2 = vld [vmem:[%s11818_s2 + $0x220] ss:$24 sps:$4 sm:$0xff]  }
  0xf9   : > { %2509 = vmatprep.subr.bf16.mxu0 %v8745_v3  ;;  %v8835_v3 = vld [vmem:[%s11818_s2 + $0x254] ss:$24 sps:$4 sm:$0xff]  }
  0xfa   : > { %2549 = vmatpush1.bf16.msra.mxu1 %v8740_v4  ;;  %v8830_v4 = vld [vmem:[%s11818_s2 + $0x520] ss:$24 sps:$4 sm:$0xff]  }
  0xfb   : > { %2550 = vmatprep.subr.bf16.mxu1 %v8748_v6  ;;  %v8838_v6 = vld [vmem:[%s11818_s2 + $0x554] ss:$24 sps:$4 sm:$0xff]  }
  0xfc   : > { %2510 = vmatpush1.bf16.msra.mxu0 %v8743_v7  ;;  %v8833_v7 = vld [vmem:[%s11818_s2 + $0x250] ss:$24 sps:$4 sm:$0xff]  }
  0xfd   : > { %2511 = vmatprep.subr.bf16.mxu0 %v8751_v9  ;;  %v8841_v9 = vld [vmem:[%s11818_s2 + $0x284] ss:$24 sps:$4 sm:$0xff]  }
  0xfe   : > { %2551 = vmatpush1.bf16.msra.mxu1 %v8746_v10  ;;  %v8836_v10 = vld [vmem:[%s11818_s2 + $0x550] ss:$24 sps:$4 sm:$0xff]  }
  0xff   : > { %2552 = vmatprep.subr.bf16.mxu1 %v8754_v11  ;;  %v8844_v11 = vld [vmem:[%s11818_s2 + $0x584] ss:$24 sps:$4 sm:$0xff]  }
 0x100   : > { %2512 = vmatpush1.bf16.msra.mxu0 %v8749_v12  ;;  %v8839_v12 = vld [vmem:[%s11818_s2 + $0x280] ss:$24 sps:$4 sm:$0xff]  }
 0x101   : > { %2513 = vmatprep.subr.bf16.mxu0 %v8757_v14  ;;  %v8847_v14 = vld [vmem:[%s11818_s2 + $0x2b4] ss:$24 sps:$4 sm:$0xff]  }
 0x102   : > { %2553 = vmatpush1.bf16.msra.mxu1 %v8752_v15  ;;  %v8842_v15 = vld [vmem:[%s11818_s2 + $0x580] ss:$24 sps:$4 sm:$0xff]  }
 0x103   : > { %2554 = vmatprep.subr.bf16.mxu1 %v8760_v16  ;;  %v8850_v16 = vld [vmem:[%s11818_s2 + $0x5b4] ss:$24 sps:$4 sm:$0xff]  }
 0x104   : > { %2514 = vmatpush1.bf16.msra.mxu0 %v8755_v17  ;;  %v8845_v17 = vld [vmem:[%s11818_s2 + $0x2b0] ss:$24 sps:$4 sm:$0xff]  }
 0x105   : > { %2565 = vmatprep.subr.bf16.mxu0 %v8763_v18  ;;  %v8853_v18 = vld [vmem:[%s11818_s2 + $0x2e4] ss:$24 sps:$4 sm:$0xff]  }
 0x106   : > { %2555 = vmatpush1.bf16.msra.mxu1 %v8758_v19  ;;  %v8848_v19 = vld [vmem:[%s11818_s2 + $0x5b0] ss:$24 sps:$4 sm:$0xff]  }
 0x107   : > { %2516 = vmatmul.mubr.bf16.vlgmr.msra.gmra.mrb[8].mxu0 %v10308_v8  ;;  %2606 = vmatprep.subr.bf16.mxu1 %v8766_v20  ;;  %v8856_v20 = vld [vmem:[%s11818_s2 + $0x5e4] ss:$24 sps:$4 sm:$0xff]  }
 0x108   : > { %2566 = vmatpush1.bf16.msra.mxu0 %v8761_v21  ;;  %2597 = vmatprep.mubr.bf16.mxu0 %v10239_v48  ;;  %v8773_v48 = vld [vmem:[%s11818_s2 + $0x70] ss:$24 sps:$4 sm:$0xff]   ;;  %v8851_v21 = vld [vmem:[%s11818_s2 + $0x2e0] ss:$24 sps:$4 sm:$0xff]  }
 0x109   : > { %2557 = vmatmul.mubr.bf16.vlgmr.msra.gmra.mrb[8].mxu1 %v10509_v13  ;;  %2567 = vmatprep.subr.bf16.mxu0 %v8769_v22  ;;  %v8859_v22 = vld [vmem:[%s11818_s2 + $0x614] ss:$24 sps:$4 sm:$0xff]  }
 0x10a   : > { %2607 = vmatpush1.bf16.msra.mxu1 %v8764_v23  ;;  %2638 = vmatprep.mubr.bf16.mxu1 %v10249_v52  ;;  %v8776_v52 = vld [vmem:[%s11818_s2 + $0x370] ss:$24 sps:$4 sm:$0xff]   ;;  %v8854_v23 = vld [vmem:[%s11818_s2 + $0x5e0] ss:$24 sps:$4 sm:$0xff]  }
 0x10b   : > { %2608 = vmatprep.subr.bf16.mxu1 %v8772_v24  ;;  %v8857_v24 = vld [vmem:[%s11818_s2 + $0x610] ss:$24 sps:$4 sm:$0xff]  }
 0x10c   : > { %2568 = vmatpush1.bf16.msra.mxu0 %v8767_v25  ;;  %v8862_v25 = vld [vmem:[%s11818_s2 + $0x644] ss:$24 sps:$4 sm:$0xff]  }
 0x10d   : > { %2569 = vmatprep.subr.bf16.mxu0 %v8775_v26  ;;  %v8860_v26 = vld [vmem:[%s11818_s2 + $0x640] ss:$24 sps:$4 sm:$0xff]  }
 0x10e   : > { %2609 = vmatpush1.bf16.msra.mxu1 %v8770_v27  ;;  %v8865_v27 = vld [vmem:[%s11818_s2 + $0x674] ss:$24 sps:$4 sm:$0xff]  }
 0x10f   : > { %2610 = vmatprep.subr.bf16.mxu1 %v8778_v28  ;;  %v828_v28 = vlaneseq }
 0x110   : > { %2570 = vmatpush1.bf16.msra.mxu0 %v8773_v48  ;;  %v8868_v48 = vld [vmem:[%s11818_s2 + $0x6a4] ss:$24 sps:$4 sm:$0xff]  }
 0x111   : > { %2571 = vmatprep.subr.bf16.mxu0 %v8781_v29  ;;  %v10924_v29 = vshrl.u32 %v828_v28, 7 }
 0x112   : > { %2611 = vmatpush1.bf16.msra.mxu1 %v8776_v52 }
 0x113   : > { %2612 = vmatprep.subr.bf16.mxu1 %v8784_v30  ;;  %v10933_v52 = vsub.s32 0, %v10924_v29  ;;  %v8869_v30 = vld [vmem:[%s11818_s2 + $0x6d0] ss:$24 sps:$4 sm:$0xff]  }
 0x114   : > { %2572 = vmatpush1.bf16.msra.mxu0 %v8779_v31  ;;  %v10941_v31 = vld [vmem:[%s11819_s3] sm:$0x3f] }
 0x115   : > { %2573 = vmatprep.subr.bf16.mxu0 %v8787_v32  ;;  %v10944_v32 = vsub.s32 1, %v10924_v29 }
 0x116   : > { %2613 = vmatpush1.bf16.msra.mxu1 %v8782_v33  ;;  %v8874_v33 = vld [vmem:[%s11818_s2 + $0x704] ss:$24 sps:$4 sm:$0xff]  }
 0x117   : > { %2614 = vmatprep.subr.bf16.mxu1 %v8790_v35  ;;  %v831_v35 = vrot.slane %v10941_v31, %v10933_v52 }
 0x118   : > { %2574 = vmatpush1.bf16.msra.mxu0 %v8785_v36  ;;  %v835_v36 = vrot.slane %v10941_v31, %v10944_v32 }
 0x119   : > { %2575 = vmatprep.subr.bf16.mxu0 %v8793_v37  ;;  %v8872_v37 = vld [vmem:[%s11818_s2 + $0x700] ss:$24 sps:$4 sm:$0xff]  }
 0x11a   : > { %2615 = vmatpush1.bf16.msra.mxu1 %v8788_v38  ;;  %v8877_v38 = vld [vmem:[%s11818_s2 + $0x734] ss:$24 sps:$4 sm:$0xff]  }
 0x11b   : > { %2616 = vmatprep.subr.bf16.mxu1 %v8796_v39 }
 0x11c   : > { %2576 = vmatpush1.bf16.msra.mxu0 %v8791_v40 }
 0x11d   : > { %2577 = vmatprep.subr.bf16.mxu0 %v8799_v41 }
 0x11e   : > { %2617 = vmatpush1.bf16.msra.mxu1 %v8794_v42 }
 0x11f   : > { %2618 = vmatprep.subr.bf16.mxu1 %v8802_v43 }
 0x120   : > { %2578 = vmatpush1.bf16.msra.mxu0 %v8797_v44 }
 0x121   : > { %2579 = vmatprep.subr.bf16.mxu0 %v8805_v45  ;;  %v8875_v45 = vld [vmem:[%s11818_s2 + $0x730] ss:$24 sps:$4 sm:$0xff]  }
 0x122   : > { %2619 = vmatpush1.bf16.msra.mxu1 %v8800_v46 }
 0x123   : > { %2620 = vmatprep.subr.bf16.mxu1 %v8808_v47 }
 0x124   : > { %2580 = vmatpush1.bf16.msra.mxu0 %v8803_v49 }
 0x125   : > { %2581 = vmatprep.subr.bf16.mxu0 %v8811_v50  ;;  %v8880_v50 = vld [vmem:[%s11818_s2 + $0x764] ss:$24 sps:$4 sm:$0xff]  }
 0x126   : > { %2621 = vmatpush1.bf16.msra.mxu1 %v8806_v51 }
 0x127   : > { %2622 = vmatprep.subr.bf16.mxu1 %v8814_v53 }
 0x128   : > { %2582 = vmatpush1.bf16.msra.mxu0 %v8809_v54 }
 0x129   : > { %2583 = vmatprep.subr.bf16.mxu0 %v8817_v55  ;;  %v8878_v55 = vld [vmem:[%s11818_s2 + $0x760] ss:$24 sps:$4 sm:$0xff]  }
 0x12a   : > { %2623 = vmatpush1.bf16.msra.mxu1 %v8812_v56  ;;  %v8883_v56 = vld [vmem:[%s11818_s2 + $0x794] ss:$24 sps:$4 sm:$0xff]  }
 0x12b   : > { %2624 = vmatprep.subr.bf16.mxu1 %v8820_v57  ;;  %v8881_v57 = vld [vmem:[%s11818_s2 + $0x790] ss:$24 sps:$4 sm:$0xff]  }
 0x12c   : > { %2584 = vmatpush1.bf16.msra.mxu0 %v8815_v58  ;;  %v8886_v58 = vld [vmem:[%s11818_s2 + $0x7c4] ss:$24 sps:$4 sm:$0xff]  }
 0x12d   : > { %2585 = vmatprep.subr.bf16.mxu0 %v8823_v59  ;;  %v8884_v59 = vld [vmem:[%s11818_s2 + $0x7c0] ss:$24 sps:$4 sm:$0xff]  }
 0x12e   : > { %2625 = vmatpush1.bf16.msra.mxu1 %v8818_v60  ;;  %v8889_v60 = vld [vmem:[%s11818_s2 + $0x7f4] ss:$24 sps:$4 sm:$0xff]  }
 0x12f   : > { %2626 = vmatprep.subr.bf16.mxu1 %v8826_v61  ;;  %v8887_v61 = vld [vmem:[%s11818_s2 + $0x7f0] ss:$24 sps:$4 sm:$0xff]  }
 0x130   : > { %2586 = vmatpush1.bf16.msra.mxu0 %v8821_v62  ;;  %v8892_v62 = vld [vmem:[%s11818_s2 + $0x824] ss:$24 sps:$4 sm:$0xff]  }
 0x131   : > { %2587 = vmatprep.subr.bf16.mxu0 %v8829_v63  ;;  %v8890_v63 = vld [vmem:[%s11818_s2 + $0x820] ss:$24 sps:$4 sm:$0xff]  }
 0x132   : > { %2627 = vmatpush1.bf16.msra.mxu1 %v8824_v0  ;;  %v8895_v0 = vld [vmem:[%s11818_s2 + $0x854] ss:$24 sps:$4 sm:$0xff]  }
 0x133   : > { %2628 = vmatprep.subr.bf16.mxu1 %v8832_v1  ;;  %v8893_v1 = vld [vmem:[%s11818_s2 + $0x850] ss:$24 sps:$4 sm:$0xff]  }
 0x134   : > { %2588 = vmatpush1.bf16.msra.mxu0 %v8827_v2  ;;  %v8898_v2 = vld [vmem:[%s11818_s2 + $0x884] ss:$24 sps:$4 sm:$0xff]  }
 0x135   : > { %2589 = vmatprep.subr.bf16.mxu0 %v8835_v3  ;;  %v8896_v3 = vld [vmem:[%s11818_s2 + $0x880] ss:$24 sps:$4 sm:$0xff]  }
 0x136   : > { %2629 = vmatpush1.bf16.msra.mxu1 %v8830_v4  ;;  %v8901_v4 = vld [vmem:[%s11818_s2 + $0x8b4] ss:$24 sps:$4 sm:$0xff]  }
 0x137   : > { %2630 = vmatprep.subr.bf16.mxu1 %v8838_v6  ;;  %v8899_v6 = vld [vmem:[%s11818_s2 + $0x8b0] ss:$24 sps:$4 sm:$0xff]  }
 0x138   : > { %2590 = vmatpush1.bf16.msra.mxu0 %v8833_v7  ;;  %v8904_v7 = vld [vmem:[%s11818_s2 + $0x8e4] ss:$24 sps:$4 sm:$0xff]  }
 0x139   : > { %2591 = vmatprep.subr.bf16.mxu0 %v8841_v9  ;;  %v8902_v9 = vld [vmem:[%s11818_s2 + $0x8e0] ss:$24 sps:$4 sm:$0xff]  }
 0x13a   : > { %2631 = vmatpush1.bf16.msra.mxu1 %v8836_v10 }
 0x13b   : > { %2632 = vmatprep.subr.bf16.mxu1 %v8844_v11 }
 0x13c   : > { %2592 = vmatpush1.bf16.msra.mxu0 %v8839_v12 }
 0x13d   : > { %2593 = vmatprep.subr.bf16.mxu0 %v8847_v14 }
 0x13e   : > { %2633 = vmatpush1.bf16.msra.mxu1 %v8842_v15 }
 0x13f   : > { %2634 = vmatprep.subr.bf16.mxu1 %v8850_v16 }
 0x140   : > { %2594 = vmatpush1.bf16.msra.mxu0 %v8845_v17 }
 0x141   : > { %2595 = vmatprep.subr.bf16.mxu0 %v8853_v18 }
 0x142   : > { %2635 = vmatpush1.bf16.msra.mxu1 %v8848_v19 }
 0x143   : > { %2636 = vmatprep.subr.bf16.mxu1 %v8856_v20 }
 0x144   : > { %2596 = vmatpush1.bf16.msra.mxu0 %v8851_v21  ;;  %v11018_v21 = vsub.s32 2, %v10924_v29 }
 0x145   : > { %2647 = vmatprep.subr.bf16.mxu0 %v8859_v22  ;;  %v11021_v22 = vsub.s32 3, %v10924_v29 }
 0x146   : > { %2637 = vmatpush1.bf16.msra.mxu1 %v8854_v23  ;;  %v839_v23 = vrot.slane %v10941_v31, %v11018_v21 }
 0x147   : > { %2598 = vmatmul.mubr.bf16.vlgmr.msra.gmra.mrb[12].mxu0 %v10300_v5  ;;  %v8863_v5 = vld [vmem:[%s11818_s2 + $0x670] ss:$24 sps:$4 sm:$0xff]  }
 0x148   : > { %2648 = vmatpush1.bf16.msra.mxu0 %v8857_v24  ;;  %2679 = vmatprep.mubr.bf16.mxu0 %v10390_v34  ;;  %v8871_v34 = vld [vmem:[%s11818_s2 + $0x6d4] ss:$24 sps:$4 sm:$0xff]  }
 0x149   : > { %2639 = vmatmul.mubr.bf16.vlgmr.msra.gmra.mrb[12].mxu1 %v10308_v8  ;;  %2649 = vmatprep.subr.bf16.mxu0 %v8862_v25  ;;  %v8866_v8 = vld [vmem:[%s11818_s2 + $0x6a0] ss:$24 sps:$4 sm:$0xff]  }
 0x14c   : > { %2650 = vmatpush1.bf16.msra.mxu0 %v8860_v26 }
 0x14d   : > { %2651 = vmatprep.subr.bf16.mxu0 %v8865_v27 }
 0x150   : > { %2652 = vmatpush1.bf16.msra.mxu0 %v8863_v5 }
 0x151   : > { %2653 = vmatprep.subr.bf16.mxu0 %v8868_v48 }
 0x154   : > { %2654 = vmatpush1.bf16.msra.mxu0 %v8866_v8 }
 0x155   : > { %2655 = vmatprep.subr.bf16.mxu0 %v8871_v34 }
 0x158   : > { %2656 = vmatpush1.bf16.msra.mxu0 %v8869_v30 }
 0x159   : > { %2657 = vmatprep.subr.bf16.mxu0 %v8874_v33 }
 0x15a   : > { %v2353_v39 = vpop.f32.mrb[0].mxu0 }
 0x15b   : > { %v2354_v40 = vadd.f32 %v2353_v39, %v831_v35  ;;  %v2355_v41 = vpop.f32.mrb[1].mxu0  ;;  %v2394_v44 = vpop.f32.mrb[0].mxu1  ;;  %v11031_v39 = vsub.s32 5, %v10924_v29 }
 0x15c   : > { %v2356_v42 = vadd.f32 %v2355_v41, %v835_v36  ;;  %v2357_v43 = vpop.f32.mrb[2].mxu0  ;;  %2658 = vmatpush1.bf16.msra.mxu0 %v8872_v37  ;;  %v2396_v49 = vpop.f32.mrb[1].mxu1 }
 0x15d   : > { %v2395_v46 = vadd.f32 %v2394_v44, %v2354_v40  ;;  %v2358_v47 = vpop.f32.mrb[3].mxu0  ;;  %2659 = vmatprep.subr.bf16.mxu0 %v8877_v38  ;;  %v2398_v53 = vpop.f32.mrb[2].mxu1  ;;  %v11028_v38 = vsub.s32 4, %v10924_v29  ;;  %v851_v41 = vrot.slane %v10941_v31, %v11031_v39 }
 0x15e   : > { %v2397_v51 = vadd.f32 %v2396_v49, %v2356_v42  ;;  %v2399_v54 = vpop.f32.mrb[3].mxu1 }
 0x15f   : > { %v847_v40 = vrot.slane %v10941_v31, %v11028_v38 }
 0x160   : > { %2660 = vmatpush1.bf16.msra.mxu0 %v8875_v45 }
 0x161   : > { %2661 = vmatprep.subr.bf16.mxu0 %v8880_v50 }
 0x164   : > { %2662 = vmatpush1.bf16.msra.mxu0 %v8878_v55  ;;  %v2688_v55 = vld [vmem:[%s10080_s21] sm:$0xff] }
 0x165   : > { %2663 = vmatprep.subr.bf16.mxu0 %v8883_v56  ;;  %v2689_v56 = vld [vmem:[%s10080_s21 + $0x8] sm:$0xff] }
 0x168   : > { %2664 = vmatpush1.bf16.msra.mxu0 %v8881_v57  ;;  %v2691_v57 = vunpack.c.l.bf16 %v2688_v55 }
 0x169   : > { %2665 = vmatprep.subr.bf16.mxu0 %v8886_v58  ;;  %v2692_v58 = vunpack.c.h.bf16 %v2688_v55 }
 0x16c   : > { %2666 = vmatpush1.bf16.msra.mxu0 %v8884_v59  ;;  %v2693_v59 = vunpack.c.l.bf16 %v2689_v56 }
 0x16d   : > { %2667 = vmatprep.subr.bf16.mxu0 %v8889_v60 }
 0x170   : > { %2668 = vmatpush1.bf16.msra.mxu0 %v8887_v61 }
 0x171   : > { %2669 = vmatprep.subr.bf16.mxu0 %v8892_v62  ;;  %v2694_v62 = vunpack.c.h.bf16 %v2689_v56 }
 0x174   : > { %2670 = vmatpush1.bf16.msra.mxu0 %v8890_v63  ;;  %v2690_v63 = vld [vmem:[%s10080_s21 + $0x10] sm:$0xff] }
 0x175   : > { %2671 = vmatprep.subr.bf16.mxu0 %v8895_v0 }
 0x178   : > { %2672 = vmatpush1.bf16.msra.mxu0 %v8893_v1 }
 0x179   : > { %2673 = vmatprep.subr.bf16.mxu0 %v8898_v2 }
 0x17c   : > { %2674 = vmatpush1.bf16.msra.mxu0 %v8896_v3  ;;  %v2695_v3 = vunpack.c.l.bf16 %v2690_v63 }
 0x17d   : > { %2675 = vmatprep.subr.bf16.mxu0 %v8901_v4 }
 0x180   : > { %2676 = vmatpush1.bf16.msra.mxu0 %v8899_v6  ;;  %v2696_v6 = vunpack.c.h.bf16 %v2690_v63 }
 0x181   : > { %2677 = vmatprep.subr.bf16.mxu0 %v8904_v7 }
 0x184   : > { %2678 = vmatpush1.bf16.msra.mxu0 %v8902_v9 }
 0x187   : > { %2680 = vmatmul.mubr.bf16.vlgmr.msra.gmra.mrb[16].mxu0 %v10509_v13  ;;  %v843_v13 = vrot.slane %v10941_v31, %v11021_v22 }
 0x19a   : > { %v2435_v10 = vpop.f32.mrb[4].mxu0 }
 0x19b   : > { %v2436_v11 = vadd.f32 %v2435_v10, %v2395_v46  ;;  %v2437_v12 = vpop.f32.mrb[5].mxu0 }
 0x19c   : > { %v2438_v14 = vadd.f32 %v2437_v12, %v2397_v51  ;;  %v2439_v15 = vpop.f32.mrb[6].mxu0  ;;  %v2476_v16 = vpop.f32.mrb[4].mxu1 }
 0x19d   : > { %v2440_v17 = vpop.f32.mrb[7].mxu0  ;;  %v2478_v18 = vpop.f32.mrb[5].mxu1  ;;  %v2477_v24 = vadd.f32 %v2476_v16, %v839_v23  ;;  %v2697_v60 = vadd.f32 %v2691_v57, %v2436_v11 }
 0x19e   : > { %v2480_v19 = vpop.f32.mrb[6].mxu1  ;;  %v2479_v25 = vadd.f32 %v2478_v18, %v843_v13  ;;  %v2698_v31 = vadd.f32 %v2692_v58, %v2438_v14 }
 0x19f   : > { %v2481_v20 = vpop.f32.mrb[7].mxu1 }
 0x1a0   : > { %v2705_v0 = vadd.f32 %v2698_v31, %v2697_v60 }
 0x1da   : > { %v2517_v26 = vpop.f32.mrb[8].mxu0 }
 0x1db   : > { %v2518_v27 = vadd.f32 %v2517_v26, %v2477_v24  ;;  %v2519_v28 = vpop.f32.mrb[9].mxu0 }
 0x1dc   : > { %v2520_v5 = vadd.f32 %v2519_v28, %v2479_v25  ;;  %v2521_v48 = vpop.f32.mrb[10].mxu0  ;;  %v2558_v8 = vpop.f32.mrb[8].mxu1 }
 0x1dd   : > { %v2559_v34 = vadd.f32 %v2558_v8, %v2518_v27  ;;  %v2522_v30 = vpop.f32.mrb[11].mxu0  ;;  %v2560_v33 = vpop.f32.mrb[9].mxu1 }
 0x1de   : > { %v2561_v35 = vadd.f32 %v2560_v33, %v2520_v5  ;;  %v2562_v36 = vpop.f32.mrb[10].mxu1 }
 0x1df   : > { %v2563_v37 = vpop.f32.mrb[11].mxu1  ;;  %v2699_v61 = vadd.f32 %v2693_v59, %v2559_v34 }
 0x1e0   : > { %v2700_v2 = vadd.f32 %v2694_v62, %v2561_v35 }
 0x1e1   : > { %v2706_v1 = vadd.f32 %v2705_v0, %v2699_v61 }
 0x1e3   : > { %v2707_v17 = vadd.f32 %v2706_v1, %v2700_v2 }
 0x21a   : > { %v2599_v42 = vpop.f32.mrb[12].mxu0 }
 0x21b   : > { %v2600_v43 = vadd.f32 %v2599_v42, %v847_v40  ;;  %v2601_v44 = vpop.f32.mrb[13].mxu0 }
 0x21c   : > { %v2602_v45 = vadd.f32 %v2601_v44, %v851_v41  ;;  %v2603_v46 = vpop.f32.mrb[14].mxu0  ;;  %v2640_v47 = vpop.f32.mrb[12].mxu1  ;;  %v9887_v41 = vmov 0.0  }
 0x21d   : > { %v2641_v49 = vadd.f32 %v2640_v47, %v2600_v43  ;;  %v2604_v50 = vpop.f32.mrb[15].mxu0  ;;  %v2642_v51 = vpop.f32.mrb[13].mxu1  ;;  %2822 = vst [vmem:[#allocation3] sm:$0xff] %v9887_v41  ;;  %2823 = vst [vmem:[#allocation3 + $0x8] sm:$0xff] %v9887_v41  ;;  %v2704_v46 = vld [vmem:[%s11821_s5] sm:$0x3f] }
 0x21e   : > { %v2643_v53 = vadd.f32 %v2642_v51, %v2602_v45  ;;  %v2644_v29 = vpop.f32.mrb[14].mxu1  ;;  %2824 = vst [vmem:[#allocation3 + $0x10] sm:$0xff] %v9887_v41  ;;  %2825 = vst [vmem:[#allocation3 + $0x18] sm:$0xff] %v9887_v41  ;;  %v2703_v45 = vld [vmem:[%s11820_s4] sm:$0x3f]  ;;  %v2783_v50 = vrot.slane %v2704_v46, %v10933_v52  ;;  %v2787_v51 = vrot.slane %v2704_v46, %v10944_v32 }
 0x21f   : > { %v2645_v54 = vpop.f32.mrb[15].mxu1  ;;  %2826 = vst [vmem:[#allocation3 + $0x20] sm:$0xff] %v9887_v41  ;;  %2827 = vst [vmem:[#allocation3 + $0x28] sm:$0xff] %v9887_v41  ;;  %v2746_v47 = vrot.slane %v2703_v45, %v10933_v52  ;;  %v2758_v29 = vrot.slane %v2703_v45, %v11021_v22  ;;  %v2791_v55 = vrot.slane %v2704_v46, %v11018_v21 }
 0x220   : > { %v2795_v56 = vrot.slane %v2704_v46, %v11021_v22  ;;  %v2762_v57 = vrot.slane %v2703_v45, %v11028_v38  ;;  %v2766_v58 = vrot.slane %v2703_v45, %v11031_v39  ;;  %v2799_v52 = vrot.slane %v2704_v46, %v11028_v38 }
 0x25a   : > { %v2681_v4 = vpop.f32.mrb[16].mxu0 }
 0x25b   : > { %v2682_v7 = vadd.f32 %v2681_v4, %v2641_v49  ;;  %v2683_v9 = vpop.f32.mrb[17].mxu0  ;;  %v2750_v49 = vrot.slane %v2703_v45, %v10944_v32  ;;  %v2803_v32 = vrot.slane %v2704_v46, %v11031_v39 }
 0x25c   : > { %v2684_v10 = vadd.f32 %v2683_v9, %v2643_v53  ;;  %v2685_v12 = vpop.f32.mrb[18].mxu0  ;;  %v2754_v53 = vrot.slane %v2703_v45, %v11018_v21 }
 0x25d   : > { %v2701_v15 = vadd.f32 %v2695_v3, %v2682_v7  ;;  %v2686_v16 = vpop.f32.mrb[19].mxu0 }
 0x25e   : > { %v2702_v18 = vadd.f32 %v2696_v6, %v2684_v10 }
 0x25f   : > { %v2708_v19 = vadd.f32 %v2707_v17, %v2701_v15 }
 0x261   : > { %v2709_v11 = vadd.f32 %v2708_v19, %v2702_v18 }
 0x263   : > { %2710 = vadd.xlane.f32.xlu0 %v2709_v11 }
 0x2f0   : > { %v2711_v14 = vpop.xlane.xlu0 %2710 }
 0x2f1   : > { %v2713_v20 = vmul.f32 0.0013020834, %v2711_v14 }
 0x2f3   : > { %v2714_v23 = vsub.f32 %v2697_v60, %v2713_v20  ;;  %v2715_v13 = vsub.f32 %v2698_v31, %v2713_v20  ;;  %v2716_v24 = vsub.f32 %v2699_v61, %v2713_v20  ;;  %v2717_v25 = vsub.f32 %v2700_v2, %v2713_v20 }
 0x2f4   : > { %v2718_v28 = vsub.f32 %v2701_v15, %v2713_v20  ;;  %v2719_v8 = vsub.f32 %v2702_v18, %v2713_v20 }
 0x2f5   : > { %v2720_v26 = vmul.f32 %v2714_v23, %v2714_v23  ;;  %v2721_v27 = vmul.f32 %v2715_v13, %v2715_v13  ;;  %v2722_v5 = vmul.f32 %v2716_v24, %v2716_v24  ;;  %v2723_v34 = vmul.f32 %v2717_v25, %v2717_v25 }
 0x2f6   : > { %v2724_v33 = vmul.f32 %v2718_v28, %v2718_v28  ;;  %v2725_v36 = vmul.f32 %v2719_v8, %v2719_v8 }
 0x2f7   : > { %v2726_v48 = vadd.f32 %v2721_v27, %v2720_v26 }
 0x2f9   : > { %v2727_v30 = vadd.f32 %v2726_v48, %v2722_v5 }
 0x2fb   : > { %v2728_v35 = vadd.f32 %v2727_v30, %v2723_v34 }
 0x2fd   : > { %v2729_v37 = vadd.f32 %v2728_v35, %v2724_v33 }
 0x2ff   : > { %v2730_v40 = vadd.f32 %v2729_v37, %v2725_v36 }
 0x301   : > { %2731 = vadd.xlane.f32.xlu0 %v2730_v40 }
 0x38e   : > { %v2732_v42 = vpop.xlane.xlu0 %2731 }
 0x38f   : > { %v2733_v43 = vmul.f32 0.0013020834, %v2732_v42 }
 0x391   : > { %v2734_v44 = vadd.f32 1e-12, %v2733_v43 }
 0x393   : > { %8905 = vrsqrt.f32 %v2734_v44 }
 0x39d   : > { %v8906_v54 = vpop.eup %8905 }
 0x39e   : > { %v2736_v59 = vmul.f32 %v8906_v54, %v2714_v23  ;;  %v2737_v60 = vmul.f32 %v8906_v54, %v2715_v13  ;;  %v2738_v31 = vmul.f32 %v8906_v54, %v2716_v24  ;;  %v2739_v61 = vmul.f32 %v8906_v54, %v2717_v25 }
 0x39f   : > { %v2740_v62 = vmul.f32 %v8906_v54, %v2718_v28  ;;  %v2741_v63 = vmul.f32 %v8906_v54, %v2719_v8 }
 0x3a0   : > { %v2773_v0 = vmul.f32 %v2746_v47, %v2736_v59  ;;  %v2774_v1 = vmul.f32 %v2750_v49, %v2737_v60  ;;  %v2775_v2 = vmul.f32 %v2754_v53, %v2738_v31  ;;  %v2776_v21 = vmul.f32 %v2758_v29, %v2739_v61 }
 0x3a1   : > { %v2777_v3 = vmul.f32 %v2762_v57, %v2740_v62  ;;  %v2778_v22 = vmul.f32 %v2766_v58, %v2741_v63 }
 0x3a2   : > { %v2810_v4 = vadd.f32 %v2783_v50, %v2773_v0  ;;  %v2811_v6 = vadd.f32 %v2787_v51, %v2774_v1  ;;  %v2812_v7 = vadd.f32 %v2791_v55, %v2775_v2  ;;  %v2813_v9 = vadd.f32 %v2795_v56, %v2776_v21 }
 0x3a3   : > { %v2814_v10 = vadd.f32 %v2799_v52, %v2777_v3  ;;  %v2815_v12 = vadd.f32 %v2803_v32, %v2778_v22 }
 0x3a4   : > { %2816 = vst [vmem:[#allocation2] sm:$0xff] %v2810_v4  ;;  %2817 = vst [vmem:[#allocation2 + $0x8] sm:$0xff] %v2811_v6 }
 0x3a5   : > { %2818 = vst [vmem:[#allocation2 + $0x10] sm:$0xff] %v2812_v7  ;;  %2819 = vst [vmem:[#allocation2 + $0x18] sm:$0xff] %v2813_v9 }
 0x3a6   : > { %2820 = vst [vmem:[#allocation2 + $0x20] sm:$0xff] %v2814_v10  ;;  %2821 = vst [vmem:[#allocation2 + $0x28] sm:$0xff] %v2815_v12 }
 0x3a7 PF: > { %v8907_v38 = vld [vmem:[%s10060_s30 + $0x4] ss:$24 sps:$4 sm:$0xff]   ;;  %v8911_v15 = vld [vmem:[%s10060_s30] ss:$24 sps:$4 sm:$0xff]   ;;  %v8913_v17 = vld [vmem:[%s10060_s30 + $0x34] ss:$24 sps:$4 sm:$0xff]  }
 0x3a8   : > { %v8909_v39 = vld [vmem:[%s10060_s30 + $0xc] ss:$24 sps:$4 sm:$0xff]   ;;  %4600 = vmatprep.subr.bf16.mxu0 %v8907_v38  ;;  %v8912_v16 = vld [vmem:[%s10060_s30 + $0x8] ss:$24 sps:$4 sm:$0xff]   ;;  %v8915_v18 = vld [vmem:[%s10060_s30 + $0x3c] ss:$24 sps:$4 sm:$0xff]  }
 0x3a9   : > { %4723 = vmatprep.subr.bf16.mxu1 %v8909_v39  ;;  %4601 = vmatpush1.bf16.msra.mxu0 %v8911_v15  ;;  %v8917_v19 = vld [vmem:[%s10060_s30 + $0x30] ss:$24 sps:$4 sm:$0xff]   ;;  %v8919_v14 = vld [vmem:[%s10060_s30 + $0x64] ss:$24 sps:$4 sm:$0xff]   ;;  %v8923_v23 = vld [vmem:[%s10060_s30 + $0x60] ss:$24 sps:$4 sm:$0xff]  }
 0x3aa   : > { %4724 = vmatpush1.bf16.msra.mxu1 %v8912_v16  ;;  %4602 = vmatprep.subr.bf16.mxu0 %v8913_v17  ;;  %v8918_v11 = vld [vmem:[%s10060_s30 + $0x38] ss:$24 sps:$4 sm:$0xff]   ;;  %v8921_v20 = vld [vmem:[%s10060_s30 + $0x6c] ss:$24 sps:$4 sm:$0xff]   ;;  %v8924_v13 = vld [vmem:[%s10060_s30 + $0x68] ss:$24 sps:$4 sm:$0xff]  }
 0x3ab   : > { %4725 = vmatprep.subr.bf16.mxu1 %v8915_v18  ;;  %v8925_v24 = vld [vmem:[%s10060_s30 + $0x94] ss:$24 sps:$4 sm:$0xff]   ;;  %v8929_v26 = vld [vmem:[%s10060_s30 + $0x90] ss:$24 sps:$4 sm:$0xff]   ;;  %v8931_v28 = vld [vmem:[%s10060_s30 + $0xc4] ss:$24 sps:$4 sm:$0xff]  }
 0x3ac   : > { %v8927_v25 = vld [vmem:[%s10060_s30 + $0x9c] ss:$24 sps:$4 sm:$0xff]   ;;  %v8930_v27 = vld [vmem:[%s10060_s30 + $0x98] ss:$24 sps:$4 sm:$0xff]   ;;  %v8933_v5 = vld [vmem:[%s10060_s30 + $0xcc] ss:$24 sps:$4 sm:$0xff]  }
 0x3ad   : > { %4603 = vmatpush1.bf16.msra.mxu0 %v8917_v19  ;;  %v8935_v48 = vld [vmem:[%s10060_s30 + $0xc0] ss:$24 sps:$4 sm:$0xff]   ;;  %v8937_v34 = vld [vmem:[%s10060_s30 + $0xf4] ss:$24 sps:$4 sm:$0xff]   ;;  %v8941_v33 = vld [vmem:[%s10060_s30 + $0xf0] ss:$24 sps:$4 sm:$0xff]  }
 0x3ae   : > { %4726 = vmatpush1.bf16.msra.mxu1 %v8918_v11  ;;  %4604 = vmatprep.subr.bf16.mxu0 %v8919_v14  ;;  %v8936_v8 = vld [vmem:[%s10060_s30 + $0xc8] ss:$24 sps:$4 sm:$0xff]   ;;  %v8939_v30 = vld [vmem:[%s10060_s30 + $0xfc] ss:$24 sps:$4 sm:$0xff]   ;;  %v8942_v35 = vld [vmem:[%s10060_s30 + $0xf8] ss:$24 sps:$4 sm:$0xff]  }
 0x3af   : > { %4727 = vmatprep.subr.bf16.mxu1 %v8921_v20  ;;  %v8943_v36 = vld [vmem:[%s10060_s30 + $0x124] ss:$24 sps:$4 sm:$0xff]   ;;  %v8947_v40 = vld [vmem:[%s10060_s30 + $0x120] ss:$24 sps:$4 sm:$0xff]   ;;  %v8949_v42 = vld [vmem:[%s10060_s30 + $0x154] ss:$24 sps:$4 sm:$0xff]  }
 0x3b0   : > { %v8945_v37 = vld [vmem:[%s10060_s30 + $0x12c] ss:$24 sps:$4 sm:$0xff]   ;;  %v8948_v41 = vld [vmem:[%s10060_s30 + $0x128] ss:$24 sps:$4 sm:$0xff]   ;;  %v8951_v43 = vld [vmem:[%s10060_s30 + $0x15c] ss:$24 sps:$4 sm:$0xff]  }
 0x3b1   : > { %4605 = vmatpush1.bf16.msra.mxu0 %v8923_v23  ;;  %v8953_v44 = vld [vmem:[%s10060_s30 + $0x150] ss:$24 sps:$4 sm:$0xff]   ;;  %v8955_v46 = vld [vmem:[%s10060_s30 + $0x184] ss:$24 sps:$4 sm:$0xff]   ;;  %v8959_v49 = vld [vmem:[%s10060_s30 + $0x180] ss:$24 sps:$4 sm:$0xff]  }
 0x3b2   : > { %4728 = vmatpush1.bf16.msra.mxu1 %v8924_v13  ;;  %4606 = vmatprep.subr.bf16.mxu0 %v8925_v24  ;;  %v8954_v45 = vld [vmem:[%s10060_s30 + $0x158] ss:$24 sps:$4 sm:$0xff]   ;;  %v8957_v47 = vld [vmem:[%s10060_s30 + $0x18c] ss:$24 sps:$4 sm:$0xff]   ;;  %v8960_v50 = vld [vmem:[%s10060_s30 + $0x188] ss:$24 sps:$4 sm:$0xff]  }
 0x3b3   : > { %4729 = vmatprep.subr.bf16.mxu1 %v8927_v25  ;;  %v8961_v51 = vld [vmem:[%s10060_s30 + $0x1b4] ss:$24 sps:$4 sm:$0xff]   ;;  %v8965_v29 = vld [vmem:[%s10060_s30 + $0x1b0] ss:$24 sps:$4 sm:$0xff]   ;;  %v8967_v55 = vld [vmem:[%s10060_s30 + $0x1e4] ss:$24 sps:$4 sm:$0xff]  }
 0x3b4   : > { %v8963_v53 = vld [vmem:[%s10060_s30 + $0x1bc] ss:$24 sps:$4 sm:$0xff]   ;;  %v8966_v54 = vld [vmem:[%s10060_s30 + $0x1b8] ss:$24 sps:$4 sm:$0xff]   ;;  %v8969_v56 = vld [vmem:[%s10060_s30 + $0x1ec] ss:$24 sps:$4 sm:$0xff]  }
 0x3b5   : > { %4607 = vmatpush1.bf16.msra.mxu0 %v8929_v26  ;;  %v8971_v57 = vld [vmem:[%s10060_s30 + $0x1e0] ss:$24 sps:$4 sm:$0xff]   ;;  %v8973_v59 = vld [vmem:[%s10060_s30 + $0x214] ss:$24 sps:$4 sm:$0xff]   ;;  %v8977_v61 = vld [vmem:[%s10060_s30 + $0x210] ss:$24 sps:$4 sm:$0xff]  }
 0x3b6   : > { %4730 = vmatpush1.bf16.msra.mxu1 %v8930_v27  ;;  %4608 = vmatprep.subr.bf16.mxu0 %v8931_v28  ;;  %v8972_v58 = vld [vmem:[%s10060_s30 + $0x1e8] ss:$24 sps:$4 sm:$0xff]   ;;  %v8975_v60 = vld [vmem:[%s10060_s30 + $0x21c] ss:$24 sps:$4 sm:$0xff]   ;;  %v8978_v32 = vld [vmem:[%s10060_s30 + $0x218] ss:$24 sps:$4 sm:$0xff]  }
 0x3b7   : > { %4731 = vmatprep.subr.bf16.mxu1 %v8933_v5  ;;  %v2829_v31 = vld [vmem:[#allocation2 + $0x8] sm:$0xff]  ;;  %v8979_v62 = vld [vmem:[%s10060_s30 + $0x244] ss:$24 sps:$4 sm:$0xff]   ;;  %v8983_v0 = vld [vmem:[%s10060_s30 + $0x240] ss:$24 sps:$4 sm:$0xff]   ;;  %p8348_p7 = scmp.ne.s32.totalorder %s9865_s24, 3 }
 0x3b8   : > { %v11105_v52 = vpack.c.bf16 %v2829_v31, %v2829_v31  ;;  %v8981_v63 = vld [vmem:[%s10060_s30 + $0x24c] ss:$24 sps:$4 sm:$0xff]   ;;  %v8984_v1 = vld [vmem:[%s10060_s30 + $0x248] ss:$24 sps:$4 sm:$0xff]   ;;  %v8987_v21 = vld [vmem:[%s10060_s30 + $0x27c] ss:$24 sps:$4 sm:$0xff]  }
 0x3b9   : > { %4609 = vmatpush1.bf16.msra.mxu0 %v8935_v48  ;;  %v8985_v2 = vld [vmem:[%s10060_s30 + $0x274] ss:$24 sps:$4 sm:$0xff]   ;;  %v8989_v3 = vld [vmem:[%s10060_s30 + $0x270] ss:$24 sps:$4 sm:$0xff]   ;;  %v8991_v4 = vld [vmem:[%s10060_s30 + $0x2a4] ss:$24 sps:$4 sm:$0xff]  }
 0x3ba   : > { %4732 = vmatpush1.bf16.msra.mxu1 %v8936_v8  ;;  %4610 = vmatprep.subr.bf16.mxu0 %v8937_v34  ;;  %v8990_v22 = vld [vmem:[%s10060_s30 + $0x278] ss:$24 sps:$4 sm:$0xff]   ;;  %v8993_v6 = vld [vmem:[%s10060_s30 + $0x2ac] ss:$24 sps:$4 sm:$0xff]   ;;  %v8996_v9 = vld [vmem:[%s10060_s30 + $0x2a8] ss:$24 sps:$4 sm:$0xff]  }
 0x3bb   : > { %4733 = vmatprep.subr.bf16.mxu1 %v8939_v30  ;;  %4632 = vmatprep.mubr.bf16.mxu0 %v11105_v52  ;;  %v8995_v7 = vld [vmem:[%s10060_s30 + $0x2a0] ss:$24 sps:$4 sm:$0xff]   ;;  %v8997_v10 = vld [vmem:[%s10060_s30 + $0x2d4] ss:$24 sps:$4 sm:$0xff]   ;;  %v9001_v38 = vld [vmem:[%s10060_s30 + $0x2d0] ss:$24 sps:$4 sm:$0xff]  }
 0x3bc   : > { %4755 = vmatprep.mubr.bf16.mxu1 %v11105_v52  ;;  %v8999_v12 = vld [vmem:[%s10060_s30 + $0x2dc] ss:$24 sps:$4 sm:$0xff]   ;;  %v9002_v39 = vld [vmem:[%s10060_s30 + $0x2d8] ss:$24 sps:$4 sm:$0xff]   ;;  %v2828_v15 = vld [vmem:[#allocation2] sm:$0xff] }
 0x3bd   : > { %4611 = vmatpush1.bf16.msra.mxu0 %v8941_v33  ;;  %v9005_v16 = vld [vmem:[%s10060_s30 + $0x304] ss:$24 sps:$4 sm:$0xff]   ;;  %v11128_v18 = vpack.c.bf16 %v2828_v15, %v2828_v15  ;;  %v9003_v19 = vld [vmem:[%s10060_s30 + $0x300] ss:$24 sps:$4 sm:$0xff]   ;;  %v9011_v14 = vld [vmem:[%s10060_s30 + $0x334] ss:$24 sps:$4 sm:$0xff]  }
 0x3be   : > { %4734 = vmatpush1.bf16.msra.mxu1 %v8942_v35  ;;  %4612 = vmatprep.subr.bf16.mxu0 %v8943_v36  ;;  %v9008_v17 = vld [vmem:[%s10060_s30 + $0x30c] ss:$24 sps:$4 sm:$0xff]   ;;  %v9006_v11 = vld [vmem:[%s10060_s30 + $0x308] ss:$24 sps:$4 sm:$0xff]   ;;  %v9014_v20 = vld [vmem:[%s10060_s30 + $0x33c] ss:$24 sps:$4 sm:$0xff]  }
 0x3bf   : > { %4735 = vmatprep.subr.bf16.mxu1 %v8945_v37  ;;  %v9009_v23 = vld [vmem:[%s10060_s30 + $0x330] ss:$24 sps:$4 sm:$0xff]   ;;  %v9017_v24 = vld [vmem:[%s10060_s30 + $0x364] ss:$24 sps:$4 sm:$0xff]   ;;  %v9015_v26 = vld [vmem:[%s10060_s30 + $0x360] ss:$24 sps:$4 sm:$0xff]  }
 0x3c0   : > { %v9012_v13 = vld [vmem:[%s10060_s30 + $0x338] ss:$24 sps:$4 sm:$0xff]   ;;  %v9020_v25 = vld [vmem:[%s10060_s30 + $0x36c] ss:$24 sps:$4 sm:$0xff]   ;;  %v9018_v27 = vld [vmem:[%s10060_s30 + $0x368] ss:$24 sps:$4 sm:$0xff]  }
 0x3c1   : > { %4613 = vmatpush1.bf16.msra.mxu0 %v8947_v40  ;;  %v9023_v28 = vld [vmem:[%s10060_s30 + $0x394] ss:$24 sps:$4 sm:$0xff]   ;;  %v9021_v48 = vld [vmem:[%s10060_s30 + $0x390] ss:$24 sps:$4 sm:$0xff]   ;;  %v9029_v34 = vld [vmem:[%s10060_s30 + $0x3c4] ss:$24 sps:$4 sm:$0xff]  }
 0x3c2   : > { %4736 = vmatpush1.bf16.msra.mxu1 %v8948_v41  ;;  %4614 = vmatprep.subr.bf16.mxu0 %v8949_v42  ;;  %v9026_v5 = vld [vmem:[%s10060_s30 + $0x39c] ss:$24 sps:$4 sm:$0xff]   ;;  %v9024_v8 = vld [vmem:[%s10060_s30 + $0x398] ss:$24 sps:$4 sm:$0xff]   ;;  %v9032_v30 = vld [vmem:[%s10060_s30 + $0x3cc] ss:$24 sps:$4 sm:$0xff]  }
 0x3c3   : > { %4737 = vmatprep.subr.bf16.mxu1 %v8951_v43  ;;  %v9027_v33 = vld [vmem:[%s10060_s30 + $0x3c0] ss:$24 sps:$4 sm:$0xff]   ;;  %v9035_v36 = vld [vmem:[%s10060_s30 + $0x3f4] ss:$24 sps:$4 sm:$0xff]   ;;  %v9033_v40 = vld [vmem:[%s10060_s30 + $0x3f0] ss:$24 sps:$4 sm:$0xff]  }
 0x3c4   : > { %v9030_v35 = vld [vmem:[%s10060_s30 + $0x3c8] ss:$24 sps:$4 sm:$0xff]   ;;  %v9038_v37 = vld [vmem:[%s10060_s30 + $0x3fc] ss:$24 sps:$4 sm:$0xff]   ;;  %v9036_v41 = vld [vmem:[%s10060_s30 + $0x3f8] ss:$24 sps:$4 sm:$0xff]  }
 0x3c5   : > { %4615 = vmatpush1.bf16.msra.mxu0 %v8953_v44  ;;  %v9041_v42 = vld [vmem:[%s10060_s30 + $0x424] ss:$24 sps:$4 sm:$0xff]   ;;  %v9090_v15 = vld [vmem:[%s10060_s30 + $0x5a8] ss:$24 sps:$4 sm:$0xff]  }
 0x3c6   : > { %4738 = vmatpush1.bf16.msra.mxu1 %v8954_v45  ;;  %4616 = vmatprep.subr.bf16.mxu0 %v8955_v46  ;;  %v9044_v43 = vld [vmem:[%s10060_s30 + $0x42c] ss:$24 sps:$4 sm:$0xff]   ;;  %v2831_v44 = vld [vmem:[#allocation2 + $0x18] sm:$0xff] }
 0x3c7   : > { %4739 = vmatprep.subr.bf16.mxu1 %v8957_v47  ;;  %v9039_v45 = vld [vmem:[%s10060_s30 + $0x420] ss:$24 sps:$4 sm:$0xff]   ;;  %v11157_v46 = vpack.c.bf16 %v2831_v44, %v2831_v44  ;;  %v9065_v31 = vld [vmem:[%s10060_s30 + $0x4e4] ss:$24 sps:$4 sm:$0xff]  }
 0x3c8   : > { %v9042_v47 = vld [vmem:[%s10060_s30 + $0x428] ss:$24 sps:$4 sm:$0xff]  }
 0x3c9   : > { %4617 = vmatpush1.bf16.msra.mxu0 %v8959_v49  ;;  %v9047_v49 = vld [vmem:[%s10060_s30 + $0x454] ss:$24 sps:$4 sm:$0xff]   ;;  %v9123_v44 = vld [vmem:[%s10060_s30 + $0x6c0] ss:$24 sps:$4 sm:$0xff]  }
 0x3ca   : > { %4740 = vmatpush1.bf16.msra.mxu1 %v8960_v50  ;;  %4618 = vmatprep.subr.bf16.mxu0 %v8961_v51  ;;  %v9050_v50 = vld [vmem:[%s10060_s30 + $0x45c] ss:$24 sps:$4 sm:$0xff]   ;;  %v9045_v51 = vld [vmem:[%s10060_s30 + $0x450] ss:$24 sps:$4 sm:$0xff]  }
 0x3cb   : > { %4741 = vmatprep.subr.bf16.mxu1 %v8963_v53  ;;  %v9048_v53 = vld [vmem:[%s10060_s30 + $0x458] ss:$24 sps:$4 sm:$0xff]  }
 0x3cd   : > { %4619 = vmatpush1.bf16.msra.mxu0 %v8965_v29  ;;  %v9053_v29 = vld [vmem:[%s10060_s30 + $0x484] ss:$24 sps:$4 sm:$0xff]  }
 0x3ce   : > { %4742 = vmatpush1.bf16.msra.mxu1 %v8966_v54  ;;  %4620 = vmatprep.subr.bf16.mxu0 %v8967_v55  ;;  %v9056_v54 = vld [vmem:[%s10060_s30 + $0x48c] ss:$24 sps:$4 sm:$0xff]   ;;  %v9051_v55 = vld [vmem:[%s10060_s30 + $0x480] ss:$24 sps:$4 sm:$0xff]  }
 0x3cf   : > { %4743 = vmatprep.subr.bf16.mxu1 %v8969_v56  ;;  %v9054_v56 = vld [vmem:[%s10060_s30 + $0x488] ss:$24 sps:$4 sm:$0xff]  }
 0x3d1   : > { %4621 = vmatpush1.bf16.msra.mxu0 %v8971_v57  ;;  %v9059_v57 = vld [vmem:[%s10060_s30 + $0x4b4] ss:$24 sps:$4 sm:$0xff]  }
 0x3d2   : > { %4744 = vmatpush1.bf16.msra.mxu1 %v8972_v58  ;;  %4622 = vmatprep.subr.bf16.mxu0 %v8973_v59  ;;  %v9062_v58 = vld [vmem:[%s10060_s30 + $0x4bc] ss:$24 sps:$4 sm:$0xff]   ;;  %v9057_v59 = vld [vmem:[%s10060_s30 + $0x4b0] ss:$24 sps:$4 sm:$0xff]  }
 0x3d3   : > { %4745 = vmatprep.subr.bf16.mxu1 %v8975_v60  ;;  %v9060_v60 = vld [vmem:[%s10060_s30 + $0x4b8] ss:$24 sps:$4 sm:$0xff]  }
 0x3d5   : > { %4623 = vmatpush1.bf16.msra.mxu0 %v8977_v61  ;;  %v9068_v61 = vld [vmem:[%s10060_s30 + $0x4ec] ss:$24 sps:$4 sm:$0xff]  }
 0x3d6   : > { %4746 = vmatpush1.bf16.msra.mxu1 %v8978_v32  ;;  %4624 = vmatprep.subr.bf16.mxu0 %v8979_v62  ;;  %v9063_v32 = vld [vmem:[%s10060_s30 + $0x4e0] ss:$24 sps:$4 sm:$0xff]  }
 0x3d7   : > { %4747 = vmatprep.subr.bf16.mxu1 %v8981_v63  ;;  %v9066_v62 = vld [vmem:[%s10060_s30 + $0x4e8] ss:$24 sps:$4 sm:$0xff]   ;;  %v9071_v63 = vld [vmem:[%s10060_s30 + $0x514] ss:$24 sps:$4 sm:$0xff]  }
 0x3d9   : > { %4625 = vmatpush1.bf16.msra.mxu0 %v8983_v0  ;;  %v9074_v0 = vld [vmem:[%s10060_s30 + $0x51c] ss:$24 sps:$4 sm:$0xff]  }
 0x3da   : > { %4748 = vmatpush1.bf16.msra.mxu1 %v8984_v1  ;;  %4626 = vmatprep.subr.bf16.mxu0 %v8985_v2  ;;  %v9069_v1 = vld [vmem:[%s10060_s30 + $0x510] ss:$24 sps:$4 sm:$0xff]  }
 0x3db   : > { %4749 = vmatprep.subr.bf16.mxu1 %v8987_v21  ;;  %v9072_v2 = vld [vmem:[%s10060_s30 + $0x518] ss:$24 sps:$4 sm:$0xff]   ;;  %v9077_v21 = vld [vmem:[%s10060_s30 + $0x544] ss:$24 sps:$4 sm:$0xff]  }
 0x3dd   : > { %4627 = vmatpush1.bf16.msra.mxu0 %v8989_v3  ;;  %v9080_v3 = vld [vmem:[%s10060_s30 + $0x54c] ss:$24 sps:$4 sm:$0xff]  }
 0x3de   : > { %4750 = vmatpush1.bf16.msra.mxu1 %v8990_v22  ;;  %4628 = vmatprep.subr.bf16.mxu0 %v8991_v4  ;;  %v9075_v22 = vld [vmem:[%s10060_s30 + $0x540] ss:$24 sps:$4 sm:$0xff]  }
 0x3df   : > { %4751 = vmatprep.subr.bf16.mxu1 %v8993_v6  ;;  %v9078_v4 = vld [vmem:[%s10060_s30 + $0x548] ss:$24 sps:$4 sm:$0xff]   ;;  %v9083_v6 = vld [vmem:[%s10060_s30 + $0x574] ss:$24 sps:$4 sm:$0xff]  }
 0x3e1   : > { %4629 = vmatpush1.bf16.msra.mxu0 %v8995_v7  ;;  %v9086_v7 = vld [vmem:[%s10060_s30 + $0x57c] ss:$24 sps:$4 sm:$0xff]  }
 0x3e2   : > { %4752 = vmatpush1.bf16.msra.mxu1 %v8996_v9  ;;  %4630 = vmatprep.subr.bf16.mxu0 %v8997_v10  ;;  %v9081_v9 = vld [vmem:[%s10060_s30 + $0x570] ss:$24 sps:$4 sm:$0xff]  }
 0x3e3   : > { %4753 = vmatprep.subr.bf16.mxu1 %v8999_v12  ;;  %v9084_v10 = vld [vmem:[%s10060_s30 + $0x578] ss:$24 sps:$4 sm:$0xff]   ;;  %v9089_v12 = vld [vmem:[%s10060_s30 + $0x5a4] ss:$24 sps:$4 sm:$0xff]  }
 0x3e5   : > { %4631 = vmatpush1.bf16.msra.mxu0 %v9001_v38  ;;  %v9092_v38 = vld [vmem:[%s10060_s30 + $0x5ac] ss:$24 sps:$4 sm:$0xff]  }
 0x3e6   : > { %4754 = vmatpush1.bf16.msra.mxu1 %v9002_v39  ;;  %4641 = vmatprep.subr.bf16.mxu0 %v9005_v16  ;;  %v9087_v39 = vld [vmem:[%s10060_s30 + $0x5a0] ss:$24 sps:$4 sm:$0xff]   ;;  %v9095_v16 = vld [vmem:[%s10060_s30 + $0x5d4] ss:$24 sps:$4 sm:$0xff]  }
 0x3e7   : > { %4764 = vmatprep.subr.bf16.mxu1 %v9008_v17  ;;  %v9098_v17 = vld [vmem:[%s10060_s30 + $0x5dc] ss:$24 sps:$4 sm:$0xff]  }
 0x3e8   : > { %4633 = vmatmul.mubr.bf16.vlgmr.msra.gmra.mrb[0].mxu0 %v11128_v18 }
 0x3e9   : > { %4756 = vmatmul.mubr.bf16.vlgmr.msra.gmra.mrb[0].mxu1 %v11128_v18  ;;  %4642 = vmatpush1.bf16.msra.mxu0 %v9003_v19  ;;  %v9093_v19 = vld [vmem:[%s10060_s30 + $0x5d0] ss:$24 sps:$4 sm:$0xff]  }
 0x3ea   : > { %4765 = vmatpush1.bf16.msra.mxu1 %v9006_v11  ;;  %4643 = vmatprep.subr.bf16.mxu0 %v9011_v14  ;;  %v9096_v11 = vld [vmem:[%s10060_s30 + $0x5d8] ss:$24 sps:$4 sm:$0xff]   ;;  %v9101_v14 = vld [vmem:[%s10060_s30 + $0x604] ss:$24 sps:$4 sm:$0xff]  }
 0x3eb   : > { %4766 = vmatprep.subr.bf16.mxu1 %v9014_v20  ;;  %4673 = vmatprep.mubr.bf16.mxu0 %v11157_v46  ;;  %v2830_v20 = vld [vmem:[#allocation2 + $0x10] sm:$0xff] }
 0x3ec   : > { %4796 = vmatprep.mubr.bf16.mxu1 %v11157_v46 }
 0x3ed   : > { %4644 = vmatpush1.bf16.msra.mxu0 %v9009_v23  ;;  %v9104_v23 = vld [vmem:[%s10060_s30 + $0x60c] ss:$24 sps:$4 sm:$0xff]  }
 0x3ee   : > { %4767 = vmatpush1.bf16.msra.mxu1 %v9012_v13  ;;  %4645 = vmatprep.subr.bf16.mxu0 %v9017_v24  ;;  %v9099_v13 = vld [vmem:[%s10060_s30 + $0x600] ss:$24 sps:$4 sm:$0xff]   ;;  %v11201_v24 = vpack.c.bf16 %v2830_v20, %v2830_v20 }
 0x3ef   : > { %4768 = vmatprep.subr.bf16.mxu1 %v9020_v25  ;;  %v9102_v25 = vld [vmem:[%s10060_s30 + $0x608] ss:$24 sps:$4 sm:$0xff]  }
 0x3f0   : > { %v9183_v20 = vld [vmem:[%s10060_s30 + $0x8a0] ss:$24 sps:$4 sm:$0xff]  }
 0x3f1   : > { %4646 = vmatpush1.bf16.msra.mxu0 %v9015_v26  ;;  %v9107_v26 = vld [vmem:[%s10060_s30 + $0x634] ss:$24 sps:$4 sm:$0xff]  }
 0x3f2   : > { %4769 = vmatpush1.bf16.msra.mxu1 %v9018_v27  ;;  %4647 = vmatprep.subr.bf16.mxu0 %v9023_v28  ;;  %v9110_v27 = vld [vmem:[%s10060_s30 + $0x63c] ss:$24 sps:$4 sm:$0xff]   ;;  %v2833_v28 = vld [vmem:[#allocation2 + $0x28] sm:$0xff] }
 0x3f3   : > { %4770 = vmatprep.subr.bf16.mxu1 %v9026_v5  ;;  %v11206_v5 = vpack.c.bf16 %v2833_v28, %v2833_v28  ;;  %v2832_v28 = vld [vmem:[#allocation2 + $0x20] sm:$0xff] }
 0x3f5   : > { %4648 = vmatpush1.bf16.msra.mxu0 %v9021_v48  ;;  %v9105_v48 = vld [vmem:[%s10060_s30 + $0x630] ss:$24 sps:$4 sm:$0xff]  }
 0x3f6   : > { %4771 = vmatpush1.bf16.msra.mxu1 %v9024_v8  ;;  %4649 = vmatprep.subr.bf16.mxu0 %v9029_v34  ;;  %v9108_v8 = vld [vmem:[%s10060_s30 + $0x638] ss:$24 sps:$4 sm:$0xff]   ;;  %v9113_v34 = vld [vmem:[%s10060_s30 + $0x664] ss:$24 sps:$4 sm:$0xff]  }
 0x3f7   : > { %4772 = vmatprep.subr.bf16.mxu1 %v9032_v30  ;;  %v9116_v30 = vld [vmem:[%s10060_s30 + $0x66c] ss:$24 sps:$4 sm:$0xff]  }
 0x3f9   : > { %4650 = vmatpush1.bf16.msra.mxu0 %v9027_v33  ;;  %v9111_v33 = vld [vmem:[%s10060_s30 + $0x660] ss:$24 sps:$4 sm:$0xff]  }
 0x3fa   : > { %4773 = vmatpush1.bf16.msra.mxu1 %v9030_v35  ;;  %4651 = vmatprep.subr.bf16.mxu0 %v9035_v36  ;;  %v9114_v35 = vld [vmem:[%s10060_s30 + $0x668] ss:$24 sps:$4 sm:$0xff]   ;;  %v9119_v36 = vld [vmem:[%s10060_s30 + $0x694] ss:$24 sps:$4 sm:$0xff]  }
 0x3fb   : > { %4774 = vmatprep.subr.bf16.mxu1 %v9038_v37  ;;  %v9122_v37 = vld [vmem:[%s10060_s30 + $0x69c] ss:$24 sps:$4 sm:$0xff]  }
 0x3fd   : > { %4652 = vmatpush1.bf16.msra.mxu0 %v9033_v40  ;;  %v9117_v40 = vld [vmem:[%s10060_s30 + $0x690] ss:$24 sps:$4 sm:$0xff]  }
 0x3fe   : > { %4775 = vmatpush1.bf16.msra.mxu1 %v9036_v41  ;;  %4653 = vmatprep.subr.bf16.mxu0 %v9041_v42  ;;  %v9120_v41 = vld [vmem:[%s10060_s30 + $0x698] ss:$24 sps:$4 sm:$0xff]   ;;  %v9125_v42 = vld [vmem:[%s10060_s30 + $0x6c4] ss:$24 sps:$4 sm:$0xff]  }
 0x3ff   : > { %4776 = vmatprep.subr.bf16.mxu1 %v9044_v43  ;;  %v9128_v43 = vld [vmem:[%s10060_s30 + $0x6cc] ss:$24 sps:$4 sm:$0xff]  }
 0x401   : > { %4654 = vmatpush1.bf16.msra.mxu0 %v9039_v45  ;;  %v9126_v45 = vld [vmem:[%s10060_s30 + $0x6c8] ss:$24 sps:$4 sm:$0xff]  }
 0x402   : > { %4777 = vmatpush1.bf16.msra.mxu1 %v9042_v47  ;;  %4655 = vmatprep.subr.bf16.mxu0 %v9047_v49  ;;  %v9131_v47 = vld [vmem:[%s10060_s30 + $0x6f4] ss:$24 sps:$4 sm:$0xff]  }
 0x403   : > { %4778 = vmatprep.subr.bf16.mxu1 %v9050_v50  ;;  %v9134_v49 = vld [vmem:[%s10060_s30 + $0x6fc] ss:$24 sps:$4 sm:$0xff]   ;;  %v9129_v50 = vld [vmem:[%s10060_s30 + $0x6f0] ss:$24 sps:$4 sm:$0xff]  }
 0x405   : > { %4656 = vmatpush1.bf16.msra.mxu0 %v9045_v51  ;;  %v9132_v51 = vld [vmem:[%s10060_s30 + $0x6f8] ss:$24 sps:$4 sm:$0xff]  }
 0x406   : > { %4779 = vmatpush1.bf16.msra.mxu1 %v9048_v53  ;;  %4657 = vmatprep.subr.bf16.mxu0 %v9053_v29  ;;  %v9137_v53 = vld [vmem:[%s10060_s30 + $0x724] ss:$24 sps:$4 sm:$0xff]  }
 0x407   : > { %4780 = vmatprep.subr.bf16.mxu1 %v9056_v54  ;;  %v9140_v29 = vld [vmem:[%s10060_s30 + $0x72c] ss:$24 sps:$4 sm:$0xff]   ;;  %v9135_v54 = vld [vmem:[%s10060_s30 + $0x720] ss:$24 sps:$4 sm:$0xff]  }
 0x409   : > { %4658 = vmatpush1.bf16.msra.mxu0 %v9051_v55  ;;  %v9138_v55 = vld [vmem:[%s10060_s30 + $0x728] ss:$24 sps:$4 sm:$0xff]  }
 0x40a   : > { %4781 = vmatpush1.bf16.msra.mxu1 %v9054_v56  ;;  %4659 = vmatprep.subr.bf16.mxu0 %v9059_v57  ;;  %v9143_v56 = vld [vmem:[%s10060_s30 + $0x754] ss:$24 sps:$4 sm:$0xff]  }
 0x40b   : > { %4782 = vmatprep.subr.bf16.mxu1 %v9062_v58  ;;  %v9146_v57 = vld [vmem:[%s10060_s30 + $0x75c] ss:$24 sps:$4 sm:$0xff]   ;;  %v9141_v58 = vld [vmem:[%s10060_s30 + $0x750] ss:$24 sps:$4 sm:$0xff]  }
 0x40d   : > { %4660 = vmatpush1.bf16.msra.mxu0 %v9057_v59  ;;  %v9144_v59 = vld [vmem:[%s10060_s30 + $0x758] ss:$24 sps:$4 sm:$0xff]  }
 0x40e   : > { %4783 = vmatpush1.bf16.msra.mxu1 %v9060_v60  ;;  %4661 = vmatprep.subr.bf16.mxu0 %v9065_v31  ;;  %v9149_v60 = vld [vmem:[%s10060_s30 + $0x784] ss:$24 sps:$4 sm:$0xff]  }
 0x40f   : > { %4784 = vmatprep.subr.bf16.mxu1 %v9068_v61  ;;  %v9152_v31 = vld [vmem:[%s10060_s30 + $0x78c] ss:$24 sps:$4 sm:$0xff]   ;;  %v9147_v61 = vld [vmem:[%s10060_s30 + $0x780] ss:$24 sps:$4 sm:$0xff]  }
 0x411   : > { %4662 = vmatpush1.bf16.msra.mxu0 %v9063_v32  ;;  %v9150_v32 = vld [vmem:[%s10060_s30 + $0x788] ss:$24 sps:$4 sm:$0xff]  }
 0x412   : > { %4785 = vmatpush1.bf16.msra.mxu1 %v9066_v62  ;;  %4663 = vmatprep.subr.bf16.mxu0 %v9071_v63  ;;  %v9155_v62 = vld [vmem:[%s10060_s30 + $0x7b4] ss:$24 sps:$4 sm:$0xff]  }
 0x413   : > { %4786 = vmatprep.subr.bf16.mxu1 %v9074_v0  ;;  %v9158_v63 = vld [vmem:[%s10060_s30 + $0x7bc] ss:$24 sps:$4 sm:$0xff]   ;;  %v9153_v0 = vld [vmem:[%s10060_s30 + $0x7b0] ss:$24 sps:$4 sm:$0xff]  }
 0x415   : > { %4664 = vmatpush1.bf16.msra.mxu0 %v9069_v1  ;;  %v9156_v1 = vld [vmem:[%s10060_s30 + $0x7b8] ss:$24 sps:$4 sm:$0xff]  }
 0x416   : > { %4787 = vmatpush1.bf16.msra.mxu1 %v9072_v2  ;;  %4665 = vmatprep.subr.bf16.mxu0 %v9077_v21  ;;  %v9161_v2 = vld [vmem:[%s10060_s30 + $0x7e4] ss:$24 sps:$4 sm:$0xff]  }
 0x417   : > { %4788 = vmatprep.subr.bf16.mxu1 %v9080_v3  ;;  %v9164_v21 = vld [vmem:[%s10060_s30 + $0x7ec] ss:$24 sps:$4 sm:$0xff]   ;;  %v9159_v3 = vld [vmem:[%s10060_s30 + $0x7e0] ss:$24 sps:$4 sm:$0xff]  }
 0x419   : > { %4666 = vmatpush1.bf16.msra.mxu0 %v9075_v22  ;;  %v9162_v22 = vld [vmem:[%s10060_s30 + $0x7e8] ss:$24 sps:$4 sm:$0xff]  }
 0x41a   : > { %4789 = vmatpush1.bf16.msra.mxu1 %v9078_v4  ;;  %4667 = vmatprep.subr.bf16.mxu0 %v9083_v6  ;;  %v9167_v4 = vld [vmem:[%s10060_s30 + $0x814] ss:$24 sps:$4 sm:$0xff]  }
 0x41b   : > { %4790 = vmatprep.subr.bf16.mxu1 %v9086_v7  ;;  %v9170_v6 = vld [vmem:[%s10060_s30 + $0x81c] ss:$24 sps:$4 sm:$0xff]   ;;  %v9165_v7 = vld [vmem:[%s10060_s30 + $0x810] ss:$24 sps:$4 sm:$0xff]  }
 0x41d   : > { %4668 = vmatpush1.bf16.msra.mxu0 %v9081_v9  ;;  %v9168_v9 = vld [vmem:[%s10060_s30 + $0x818] ss:$24 sps:$4 sm:$0xff]  }
 0x41e   : > { %4791 = vmatpush1.bf16.msra.mxu1 %v9084_v10  ;;  %4669 = vmatprep.subr.bf16.mxu0 %v9089_v12  ;;  %v9173_v10 = vld [vmem:[%s10060_s30 + $0x844] ss:$24 sps:$4 sm:$0xff]  }
 0x41f   : > { %4792 = vmatprep.subr.bf16.mxu1 %v9092_v38  ;;  %v9176_v12 = vld [vmem:[%s10060_s30 + $0x84c] ss:$24 sps:$4 sm:$0xff]   ;;  %v9171_v38 = vld [vmem:[%s10060_s30 + $0x840] ss:$24 sps:$4 sm:$0xff]  }
 0x421   : > { %4670 = vmatpush1.bf16.msra.mxu0 %v9087_v39  ;;  %v9174_v39 = vld [vmem:[%s10060_s30 + $0x848] ss:$24 sps:$4 sm:$0xff]  }
 0x422   : > { %4793 = vmatpush1.bf16.msra.mxu1 %v9090_v15  ;;  %4671 = vmatprep.subr.bf16.mxu0 %v9095_v16  ;;  %v9179_v15 = vld [vmem:[%s10060_s30 + $0x874] ss:$24 sps:$4 sm:$0xff]  }
 0x423   : > { %4794 = vmatprep.subr.bf16.mxu1 %v9098_v17  ;;  %v9182_v16 = vld [vmem:[%s10060_s30 + $0x87c] ss:$24 sps:$4 sm:$0xff]   ;;  %v9177_v17 = vld [vmem:[%s10060_s30 + $0x870] ss:$24 sps:$4 sm:$0xff]  }
 0x425   : > { %4672 = vmatpush1.bf16.msra.mxu0 %v9093_v19  ;;  %v9180_v19 = vld [vmem:[%s10060_s30 + $0x878] ss:$24 sps:$4 sm:$0xff]  }
 0x426   : > { %4795 = vmatpush1.bf16.msra.mxu1 %v9096_v11  ;;  %4682 = vmatprep.subr.bf16.mxu0 %v9101_v14  ;;  %v9185_v11 = vld [vmem:[%s10060_s30 + $0x8a4] ss:$24 sps:$4 sm:$0xff]  }
 0x427   : > { %4805 = vmatprep.subr.bf16.mxu1 %v9104_v23  ;;  %v9188_v14 = vld [vmem:[%s10060_s30 + $0x8ac] ss:$24 sps:$4 sm:$0xff]   ;;  %v9186_v23 = vld [vmem:[%s10060_s30 + $0x8a8] ss:$24 sps:$4 sm:$0xff]  }
 0x428   : > { %4674 = vmatmul.mubr.bf16.vlgmr.msra.gmra.mrb[0].mxu0 %v11201_v24 }
 0x429   : > { %4797 = vmatmul.mubr.bf16.vlgmr.msra.gmra.mrb[0].mxu1 %v11201_v24  ;;  %4683 = vmatpush1.bf16.msra.mxu0 %v9099_v13  ;;  %v9191_v13 = vld [vmem:[%s10060_s30 + $0x8d4] ss:$24 sps:$4 sm:$0xff]  }
 0x42a   : > { %4806 = vmatpush1.bf16.msra.mxu1 %v9102_v25  ;;  %4684 = vmatprep.subr.bf16.mxu0 %v9107_v26  ;;  %v9194_v25 = vld [vmem:[%s10060_s30 + $0x8dc] ss:$24 sps:$4 sm:$0xff]   ;;  %v9189_v26 = vld [vmem:[%s10060_s30 + $0x8d0] ss:$24 sps:$4 sm:$0xff]  }
 0x42b   : > { %4807 = vmatprep.subr.bf16.mxu1 %v9110_v27  ;;  %4714 = vmatprep.mubr.bf16.mxu0 %v11206_v5  ;;  %v9192_v27 = vld [vmem:[%s10060_s30 + $0x8d8] ss:$24 sps:$4 sm:$0xff]  }
 0x42c   : > { %4837 = vmatprep.mubr.bf16.mxu1 %v11206_v5 }
 0x42d   : > { %4685 = vmatpush1.bf16.msra.mxu0 %v9105_v48  ;;  %v9197_v48 = vld [vmem:[%s10060_s30 + $0x14] ss:$24 sps:$4 sm:$0xff]  }
 0x42e   : > { %4808 = vmatpush1.bf16.msra.mxu1 %v9108_v8  ;;  %4686 = vmatprep.subr.bf16.mxu0 %v9113_v34  ;;  %v11271_v8 = vpack.c.bf16 %v2832_v28, %v2832_v28  ;;  %v9195_v34 = vld [vmem:[%s10060_s30 + $0x10] ss:$24 sps:$4 sm:$0xff]   ;;  %v9258_v28 = vld [vmem:[%s10060_s30 + $0x400] ss:$24 sps:$4 sm:$0xff]  }
 0x42f   : > { %4809 = vmatprep.subr.bf16.mxu1 %v9116_v30  ;;  %v9200_v30 = vld [vmem:[%s10060_s30 + $0x44] ss:$24 sps:$4 sm:$0xff]  }
 0x431   : > { %4687 = vmatpush1.bf16.msra.mxu0 %v9111_v33  ;;  %v9198_v33 = vld [vmem:[%s10060_s30 + $0x40] ss:$24 sps:$4 sm:$0xff]  }
 0x432   : > { %4810 = vmatpush1.bf16.msra.mxu1 %v9114_v35  ;;  %4688 = vmatprep.subr.bf16.mxu0 %v9119_v36  ;;  %v9203_v35 = vld [vmem:[%s10060_s30 + $0x74] ss:$24 sps:$4 sm:$0xff]   ;;  %v9201_v36 = vld [vmem:[%s10060_s30 + $0x70] ss:$24 sps:$4 sm:$0xff]  }
 0x433   : > { %4811 = vmatprep.subr.bf16.mxu1 %v9122_v37  ;;  %v9206_v37 = vld [vmem:[%s10060_s30 + $0xa4] ss:$24 sps:$4 sm:$0xff]  }
 0x435   : > { %4689 = vmatpush1.bf16.msra.mxu0 %v9117_v40  ;;  %v9204_v40 = vld [vmem:[%s10060_s30 + $0xa0] ss:$24 sps:$4 sm:$0xff]  }
 0x436   : > { %4812 = vmatpush1.bf16.msra.mxu1 %v9120_v41  ;;  %4690 = vmatprep.subr.bf16.mxu0 %v9125_v42  ;;  %v9209_v41 = vld [vmem:[%s10060_s30 + $0xd4] ss:$24 sps:$4 sm:$0xff]   ;;  %v9207_v42 = vld [vmem:[%s10060_s30 + $0xd0] ss:$24 sps:$4 sm:$0xff]  }
 0x437   : > { %4813 = vmatprep.subr.bf16.mxu1 %v9128_v43  ;;  %v9212_v43 = vld [vmem:[%s10060_s30 + $0x104] ss:$24 sps:$4 sm:$0xff]  }
 0x439   : > { %4691 = vmatpush1.bf16.msra.mxu0 %v9123_v44  ;;  %v9215_v44 = vld [vmem:[%s10060_s30 + $0x134] ss:$24 sps:$4 sm:$0xff]  }
 0x43a   : > { %4814 = vmatpush1.bf16.msra.mxu1 %v9126_v45  ;;  %4692 = vmatprep.subr.bf16.mxu0 %v9131_v47  ;;  %v9213_v45 = vld [vmem:[%s10060_s30 + $0x130] ss:$24 sps:$4 sm:$0xff]   ;;  %v9218_v47 = vld [vmem:[%s10060_s30 + $0x164] ss:$24 sps:$4 sm:$0xff]  }
 0x43b   : > { %4815 = vmatprep.subr.bf16.mxu1 %v9134_v49  ;;  %v9216_v49 = vld [vmem:[%s10060_s30 + $0x160] ss:$24 sps:$4 sm:$0xff]  }
 0x43d   : > { %4693 = vmatpush1.bf16.msra.mxu0 %v9129_v50  ;;  %v9221_v50 = vld [vmem:[%s10060_s30 + $0x194] ss:$24 sps:$4 sm:$0xff]  }
 0x43e   : > { %4816 = vmatpush1.bf16.msra.mxu1 %v9132_v51  ;;  %4694 = vmatprep.subr.bf16.mxu0 %v9137_v53  ;;  %v9219_v51 = vld [vmem:[%s10060_s30 + $0x190] ss:$24 sps:$4 sm:$0xff]   ;;  %v9224_v53 = vld [vmem:[%s10060_s30 + $0x1c4] ss:$24 sps:$4 sm:$0xff]  }
 0x43f   : > { %4817 = vmatprep.subr.bf16.mxu1 %v9140_v29  ;;  %v9222_v29 = vld [vmem:[%s10060_s30 + $0x1c0] ss:$24 sps:$4 sm:$0xff]  }
 0x441   : > { %4695 = vmatpush1.bf16.msra.mxu0 %v9135_v54  ;;  %v9227_v54 = vld [vmem:[%s10060_s30 + $0x1f4] ss:$24 sps:$4 sm:$0xff]  }
 0x442   : > { %4818 = vmatpush1.bf16.msra.mxu1 %v9138_v55  ;;  %4696 = vmatprep.subr.bf16.mxu0 %v9143_v56  ;;  %v9225_v55 = vld [vmem:[%s10060_s30 + $0x1f0] ss:$24 sps:$4 sm:$0xff]   ;;  %v9230_v56 = vld [vmem:[%s10060_s30 + $0x224] ss:$24 sps:$4 sm:$0xff]  }
 0x443   : > { %4819 = vmatprep.subr.bf16.mxu1 %v9146_v57  ;;  %v9228_v57 = vld [vmem:[%s10060_s30 + $0x220] ss:$24 sps:$4 sm:$0xff]  }
 0x445   : > { %4697 = vmatpush1.bf16.msra.mxu0 %v9141_v58  ;;  %v9233_v58 = vld [vmem:[%s10060_s30 + $0x254] ss:$24 sps:$4 sm:$0xff]  }
 0x446   : > { %4820 = vmatpush1.bf16.msra.mxu1 %v9144_v59  ;;  %4698 = vmatprep.subr.bf16.mxu0 %v9149_v60  ;;  %v9231_v59 = vld [vmem:[%s10060_s30 + $0x250] ss:$24 sps:$4 sm:$0xff]   ;;  %v9236_v60 = vld [vmem:[%s10060_s30 + $0x284] ss:$24 sps:$4 sm:$0xff]  }
 0x447   : > { %4821 = vmatprep.subr.bf16.mxu1 %v9152_v31  ;;  %v9332_v31 = vld [vmem:[%s10094_s0 + $0x4] ss:$24 sps:$4 sm:$0xff]  }
 0x449   : > { %4699 = vmatpush1.bf16.msra.mxu0 %v9147_v61  ;;  %v9234_v61 = vld [vmem:[%s10060_s30 + $0x280] ss:$24 sps:$4 sm:$0xff]  }
 0x44a   : > { %4822 = vmatpush1.bf16.msra.mxu1 %v9150_v32  ;;  %4700 = vmatprep.subr.bf16.mxu0 %v9155_v62  ;;  %v9239_v32 = vld [vmem:[%s10060_s30 + $0x2b4] ss:$24 sps:$4 sm:$0xff]   ;;  %v9330_v62 = vld [vmem:[%s10094_s0] ss:$24 sps:$4 sm:$0xff]  }
 0x44b   : > { %4823 = vmatprep.subr.bf16.mxu1 %v9158_v63  ;;  %v9338_v63 = vld [vmem:[%s10094_s0 + $0x34] ss:$24 sps:$4 sm:$0xff]  }
 0x44d   : > { %4701 = vmatpush1.bf16.msra.mxu0 %v9153_v0  ;;  %v9237_v0 = vld [vmem:[%s10060_s30 + $0x2b0] ss:$24 sps:$4 sm:$0xff]  }
 0x44e   : > { %4824 = vmatpush1.bf16.msra.mxu1 %v9156_v1  ;;  %4702 = vmatprep.subr.bf16.mxu0 %v9161_v2  ;;  %v9242_v1 = vld [vmem:[%s10060_s30 + $0x2e4] ss:$24 sps:$4 sm:$0xff]   ;;  %v9336_v2 = vld [vmem:[%s10094_s0 + $0x30] ss:$24 sps:$4 sm:$0xff]  }
 0x44f   : > { %4825 = vmatprep.subr.bf16.mxu1 %v9164_v21  ;;  %v9344_v21 = vld [vmem:[%s10094_s0 + $0x64] ss:$24 sps:$4 sm:$0xff]  }
 0x451   : > { %4703 = vmatpush1.bf16.msra.mxu0 %v9159_v3  ;;  %v9240_v3 = vld [vmem:[%s10060_s30 + $0x2e0] ss:$24 sps:$4 sm:$0xff]  }
 0x452   : > { %4826 = vmatpush1.bf16.msra.mxu1 %v9162_v22  ;;  %4704 = vmatprep.subr.bf16.mxu0 %v9167_v4  ;;  %v9245_v22 = vld [vmem:[%s10060_s30 + $0x314] ss:$24 sps:$4 sm:$0xff]   ;;  %v9342_v4 = vld [vmem:[%s10094_s0 + $0x60] ss:$24 sps:$4 sm:$0xff]  }
 0x453   : > { %4827 = vmatprep.subr.bf16.mxu1 %v9170_v6  ;;  %v9243_v6 = vld [vmem:[%s10060_s30 + $0x310] ss:$24 sps:$4 sm:$0xff]  }
 0x455   : > { %4705 = vmatpush1.bf16.msra.mxu0 %v9165_v7  ;;  %v9350_v7 = vld [vmem:[%s10094_s0 + $0x94] ss:$24 sps:$4 sm:$0xff]  }
 0x456   : > { %4828 = vmatpush1.bf16.msra.mxu1 %v9168_v9  ;;  %4706 = vmatprep.subr.bf16.mxu0 %v9173_v10  ;;  %v9348_v9 = vld [vmem:[%s10094_s0 + $0x90] ss:$24 sps:$4 sm:$0xff]   ;;  %v9248_v10 = vld [vmem:[%s10060_s30 + $0x344] ss:$24 sps:$4 sm:$0xff]  }
 0x457   : > { %4829 = vmatprep.subr.bf16.mxu1 %v9176_v12  ;;  %v9356_v12 = vld [vmem:[%s10094_s0 + $0xc4] ss:$24 sps:$4 sm:$0xff]  }
 0x459   : > { %4707 = vmatpush1.bf16.msra.mxu0 %v9171_v38  ;;  %v9246_v38 = vld [vmem:[%s10060_s30 + $0x340] ss:$24 sps:$4 sm:$0xff]  }
 0x45a   : > { %4830 = vmatpush1.bf16.msra.mxu1 %v9174_v39  ;;  %4708 = vmatprep.subr.bf16.mxu0 %v9179_v15  ;;  %v9251_v39 = vld [vmem:[%s10060_s30 + $0x374] ss:$24 sps:$4 sm:$0xff]   ;;  %v9354_v15 = vld [vmem:[%s10094_s0 + $0xc0] ss:$24 sps:$4 sm:$0xff]  }
 0x45b   : > { %4831 = vmatprep.subr.bf16.mxu1 %v9182_v16  ;;  %v9362_v16 = vld [vmem:[%s10094_s0 + $0xf4] ss:$24 sps:$4 sm:$0xff]  }
 0x45d   : > { %4709 = vmatpush1.bf16.msra.mxu0 %v9177_v17  ;;  %v9249_v17 = vld [vmem:[%s10060_s30 + $0x370] ss:$24 sps:$4 sm:$0xff]  }
 0x45e   : > { %4832 = vmatpush1.bf16.msra.mxu1 %v9180_v19  ;;  %4710 = vmatprep.subr.bf16.mxu0 %v9185_v11  ;;  %v9360_v19 = vld [vmem:[%s10094_s0 + $0xf0] ss:$24 sps:$4 sm:$0xff]   ;;  %v9368_v11 = vld [vmem:[%s10094_s0 + $0x124] ss:$24 sps:$4 sm:$0xff]  }
 0x45f   : > { %4833 = vmatprep.subr.bf16.mxu1 %v9188_v14  ;;  %v9257_v14 = vld [vmem:[%s10060_s30 + $0x3d4] ss:$24 sps:$4 sm:$0xff]  }
 0x461   : > { %4711 = vmatpush1.bf16.msra.mxu0 %v9183_v20  ;;  %v9366_v20 = vld [vmem:[%s10094_s0 + $0x120] ss:$24 sps:$4 sm:$0xff]  }
 0x462   : > { %4834 = vmatpush1.bf16.msra.mxu1 %v9186_v23  ;;  %4712 = vmatprep.subr.bf16.mxu0 %v9191_v13  ;;  %v9374_v23 = vld [vmem:[%s10094_s0 + $0x154] ss:$24 sps:$4 sm:$0xff]   ;;  %v9255_v13 = vld [vmem:[%s10060_s30 + $0x3d0] ss:$24 sps:$4 sm:$0xff]  }
 0x463   : > { %4835 = vmatprep.subr.bf16.mxu1 %v9194_v25  ;;  %v9260_v25 = vld [vmem:[%s10060_s30 + $0x404] ss:$24 sps:$4 sm:$0xff]  }
 0x465   : > { %4713 = vmatpush1.bf16.msra.mxu0 %v9189_v26  ;;  %v9372_v26 = vld [vmem:[%s10094_s0 + $0x150] ss:$24 sps:$4 sm:$0xff]  }
 0x466   : > { %4836 = vmatpush1.bf16.msra.mxu1 %v9192_v27  ;;  %4846 = vmatprep.subr.bf16.mxu0 %v9197_v48  ;;  %v9380_v27 = vld [vmem:[%s10094_s0 + $0x184] ss:$24 sps:$4 sm:$0xff]   ;;  %v9378_v48 = vld [vmem:[%s10094_s0 + $0x180] ss:$24 sps:$4 sm:$0xff]  }
 0x467   : > { %6763 = vmatprep.subr.bf16.mxu1 %v9332_v31  ;;  %v9279_v31 = vld [vmem:[%s10060_s30 + $0x550] ss:$24 sps:$4 sm:$0xff]  }
 0x468   : > { %4715 = vmatmul.mubr.bf16.vlgmr.msra.gmra.mrb[0].mxu0 %v11271_v8 }
 0x469   : > { %4838 = vmatmul.mubr.bf16.vlgmr.msra.gmra.mrb[0].mxu1 %v11271_v8  ;;  %4847 = vmatpush1.bf16.msra.mxu0 %v9195_v34  ;;  %v9263_v34 = vld [vmem:[%s10060_s30 + $0x434] ss:$24 sps:$4 sm:$0xff]  }
 0x46a   : > { %4878 = vmatprep.mubr.bf16.mxu0 %v11105_v52  ;;  %4848 = vmatprep.subr.bf16.mxu0 %v9200_v30  ;;  %v9210_v52 = vld [vmem:[%s10060_s30 + $0x100] ss:$24 sps:$4 sm:$0xff]   ;;  %v9261_v30 = vld [vmem:[%s10060_s30 + $0x430] ss:$24 sps:$4 sm:$0xff]  }
 0x46b   : > { %6764 = vmatpush1.bf16.msra.mxu1 %v9330_v62  ;;  %v9282_v62 = vld [vmem:[%s10060_s30 + $0x580] ss:$24 sps:$4 sm:$0xff]  }
 0x46c   : > { %6765 = vmatprep.subr.bf16.mxu1 %v9338_v63  ;;  %v9428_v63 = vld [vmem:[%s10094_s0 + $0x304] ss:$24 sps:$4 sm:$0xff]  }
 0x46d   : > { %4849 = vmatpush1.bf16.msra.mxu0 %v9198_v33  ;;  %v9386_v33 = vld [vmem:[%s10094_s0 + $0x1b4] ss:$24 sps:$4 sm:$0xff]  }
 0x46e   : > { %4850 = vmatprep.subr.bf16.mxu0 %v9203_v35  ;;  %v9384_v35 = vld [vmem:[%s10094_s0 + $0x1b0] ss:$24 sps:$4 sm:$0xff]  }
 0x46f   : > { %6766 = vmatpush1.bf16.msra.mxu1 %v9336_v2  ;;  %v9290_v2 = vld [vmem:[%s10060_s30 + $0x5e4] ss:$24 sps:$4 sm:$0xff]  }
 0x470   : > { %6767 = vmatprep.subr.bf16.mxu1 %v9344_v21  ;;  %v9288_v21 = vld [vmem:[%s10060_s30 + $0x5e0] ss:$24 sps:$4 sm:$0xff]  }
 0x471   : > { %4851 = vmatpush1.bf16.msra.mxu0 %v9201_v36  ;;  %v9266_v36 = vld [vmem:[%s10060_s30 + $0x464] ss:$24 sps:$4 sm:$0xff]  }
 0x472   : > { %4852 = vmatprep.subr.bf16.mxu0 %v9206_v37  ;;  %v9264_v37 = vld [vmem:[%s10060_s30 + $0x460] ss:$24 sps:$4 sm:$0xff]  }
 0x473   : > { %6768 = vmatpush1.bf16.msra.mxu1 %v9342_v4  ;;  %v9296_v4 = vld [vmem:[%s10060_s30 + $0x644] ss:$24 sps:$4 sm:$0xff]  }
 0x474   : > { %6769 = vmatprep.subr.bf16.mxu1 %v9350_v7  ;;  %v9299_v7 = vld [vmem:[%s10060_s30 + $0x674] ss:$24 sps:$4 sm:$0xff]  }
 0x475   : > { %4853 = vmatpush1.bf16.msra.mxu0 %v9204_v40  ;;  %v9392_v40 = vld [vmem:[%s10094_s0 + $0x1e4] ss:$24 sps:$4 sm:$0xff]  }
 0x476   : > { %4854 = vmatprep.subr.bf16.mxu0 %v9209_v41  ;;  %v9390_v41 = vld [vmem:[%s10094_s0 + $0x1e0] ss:$24 sps:$4 sm:$0xff]  }
 0x477   : > { %6770 = vmatpush1.bf16.msra.mxu1 %v9348_v9  ;;  %v9297_v9 = vld [vmem:[%s10060_s30 + $0x670] ss:$24 sps:$4 sm:$0xff]  }
 0x478   : > { %6771 = vmatprep.subr.bf16.mxu1 %v9356_v12  ;;  %v9300_v12 = vld [vmem:[%s10060_s30 + $0x6a0] ss:$24 sps:$4 sm:$0xff]  }
 0x479   : > { %4855 = vmatpush1.bf16.msra.mxu0 %v9207_v42  ;;  %v9269_v42 = vld [vmem:[%s10060_s30 + $0x494] ss:$24 sps:$4 sm:$0xff]  }
 0x47a   : > { %4856 = vmatprep.subr.bf16.mxu0 %v9212_v43  ;;  %v9398_v43 = vld [vmem:[%s10094_s0 + $0x214] ss:$24 sps:$4 sm:$0xff]  }
 0x47b   : > { %6772 = vmatpush1.bf16.msra.mxu1 %v9354_v15  ;;  %v9311_v15 = vld [vmem:[%s10060_s30 + $0x734] ss:$24 sps:$4 sm:$0xff]  }
 0x47c   : > { %6773 = vmatprep.subr.bf16.mxu1 %v9362_v16  ;;  %v9309_v16 = vld [vmem:[%s10060_s30 + $0x730] ss:$24 sps:$4 sm:$0xff]  }
 0x47d   : > { %4857 = vmatpush1.bf16.msra.mxu0 %v9210_v52  ;;  %v9267_v52 = vld [vmem:[%s10060_s30 + $0x490] ss:$24 sps:$4 sm:$0xff]  }
 0x47e   : > { %4858 = vmatprep.subr.bf16.mxu0 %v9215_v44  ;;  %v9272_v44 = vld [vmem:[%s10060_s30 + $0x4c4] ss:$24 sps:$4 sm:$0xff]  }
 0x47f   : > { %6774 = vmatpush1.bf16.msra.mxu1 %v9360_v19  ;;  %v9317_v19 = vld [vmem:[%s10060_s30 + $0x794] ss:$24 sps:$4 sm:$0xff]  }
 0x480   : > { %6775 = vmatprep.subr.bf16.mxu1 %v9368_v11  ;;  %v9315_v11 = vld [vmem:[%s10060_s30 + $0x790] ss:$24 sps:$4 sm:$0xff]  }
 0x481   : > { %4859 = vmatpush1.bf16.msra.mxu0 %v9213_v45  ;;  %v9396_v45 = vld [vmem:[%s10094_s0 + $0x210] ss:$24 sps:$4 sm:$0xff]  }
 0x482   : > { %4860 = vmatprep.subr.bf16.mxu0 %v9218_v47  ;;  %v9404_v47 = vld [vmem:[%s10094_s0 + $0x244] ss:$24 sps:$4 sm:$0xff]  }
 0x483   : > { %6776 = vmatpush1.bf16.msra.mxu1 %v9366_v20  ;;  %v9323_v20 = vld [vmem:[%s10060_s30 + $0x7f4] ss:$24 sps:$4 sm:$0xff]  }
 0x484   : > { %6777 = vmatprep.subr.bf16.mxu1 %v9374_v23  ;;  %v9321_v23 = vld [vmem:[%s10060_s30 + $0x7f0] ss:$24 sps:$4 sm:$0xff]  }
 0x485   : > { %4861 = vmatpush1.bf16.msra.mxu0 %v9216_v49  ;;  %v9270_v49 = vld [vmem:[%s10060_s30 + $0x4c0] ss:$24 sps:$4 sm:$0xff]  }
 0x486   : > { %4862 = vmatprep.subr.bf16.mxu0 %v9221_v50  ;;  %v9275_v50 = vld [vmem:[%s10060_s30 + $0x4f4] ss:$24 sps:$4 sm:$0xff]  }
 0x487   : > { %6778 = vmatpush1.bf16.msra.mxu1 %v9372_v26  ;;  %v9329_v26 = vld [vmem:[%s10060_s30 + $0x854] ss:$24 sps:$4 sm:$0xff]  }
 0x488   : > { %6779 = vmatprep.subr.bf16.mxu1 %v9380_v27  ;;  %v9327_v27 = vld [vmem:[%s10060_s30 + $0x850] ss:$24 sps:$4 sm:$0xff]  }
 0x489   : > { %4863 = vmatpush1.bf16.msra.mxu0 %v9219_v51  ;;  %v9402_v51 = vld [vmem:[%s10094_s0 + $0x240] ss:$24 sps:$4 sm:$0xff]  }
 0x48a   : > { %4864 = vmatprep.subr.bf16.mxu0 %v9224_v53  ;;  %v9410_v53 = vld [vmem:[%s10094_s0 + $0x274] ss:$24 sps:$4 sm:$0xff]  }
 0x48b   : > { %6780 = vmatpush1.bf16.msra.mxu1 %v9378_v48  ;;  %v9333_v48 = vld [vmem:[%s10060_s30 + $0x880] ss:$24 sps:$4 sm:$0xff]  }
 0x48c   : > { %6781 = vmatprep.subr.bf16.mxu1 %v9386_v33  ;;  %v9347_v33 = vld [vmem:[%s10060_s30 + $0x8e4] ss:$24 sps:$4 sm:$0xff]  }
 0x48d   : > { %4865 = vmatpush1.bf16.msra.mxu0 %v9222_v29  ;;  %v9273_v29 = vld [vmem:[%s10060_s30 + $0x4f0] ss:$24 sps:$4 sm:$0xff]  }
 0x48e   : > { %4866 = vmatprep.subr.bf16.mxu0 %v9227_v54  ;;  %v9278_v54 = vld [vmem:[%s10060_s30 + $0x524] ss:$24 sps:$4 sm:$0xff]  }
 0x48f   : > { %6782 = vmatpush1.bf16.msra.mxu1 %v9384_v35  ;;  %v9345_v35 = vld [vmem:[%s10060_s30 + $0x8e0] ss:$24 sps:$4 sm:$0xff]  }
 0x490   : > { %6783 = vmatprep.subr.bf16.mxu1 %v9392_v40  ;;  %v9359_v40 = vld [vmem:[%s10094_s0 + $0x3c] ss:$24 sps:$4 sm:$0xff]  }
 0x491   : > { %4867 = vmatpush1.bf16.msra.mxu0 %v9225_v55  ;;  %v9408_v55 = vld [vmem:[%s10094_s0 + $0x270] ss:$24 sps:$4 sm:$0xff]  }
 0x492   : > { %4868 = vmatprep.subr.bf16.mxu0 %v9230_v56  ;;  %v9416_v56 = vld [vmem:[%s10094_s0 + $0x2a4] ss:$24 sps:$4 sm:$0xff]  }
 0x493   : > { %6784 = vmatpush1.bf16.msra.mxu1 %v9390_v41  ;;  %v9357_v41 = vld [vmem:[%s10094_s0 + $0x38] ss:$24 sps:$4 sm:$0xff]  }
 0x494   : > { %6785 = vmatprep.subr.bf16.mxu1 %v9398_v43  ;;  %v3130_v43 = vlaneseq }
 0x495   : > { %4869 = vmatpush1.bf16.msra.mxu0 %v9228_v57  ;;  %v9276_v57 = vld [vmem:[%s10060_s30 + $0x520] ss:$24 sps:$4 sm:$0xff]  }
 0x496   : > { %4870 = vmatprep.subr.bf16.mxu0 %v9233_v58  ;;  %v9281_v58 = vld [vmem:[%s10060_s30 + $0x554] ss:$24 sps:$4 sm:$0xff]  }
 0x497   : > { %6786 = vmatpush1.bf16.msra.mxu1 %v9396_v45  ;;  %v11416_v45 = vshrl.u32 %v3130_v43, 7 }
 0x498   : > { %6787 = vmatprep.subr.bf16.mxu1 %v9404_v47  ;;  %v9369_v47 = vld [vmem:[%s10094_s0 + $0x98] ss:$24 sps:$4 sm:$0xff]  }
 0x499   : > { %4871 = vmatpush1.bf16.msra.mxu0 %v9231_v59  ;;  %v9414_v59 = vld [vmem:[%s10094_s0 + $0x2a0] ss:$24 sps:$4 sm:$0xff]  }
 0x49a   : > { %4872 = vmatprep.subr.bf16.mxu0 %v9236_v60  ;;  %v9422_v60 = vld [vmem:[%s10094_s0 + $0x2d4] ss:$24 sps:$4 sm:$0xff]  }
 0x49b   : > { %6788 = vmatpush1.bf16.msra.mxu1 %v9402_v51  ;;  %v11429_v51 = vld [vmem:[%s517_s29] sm:$0x3f] }
 0x49c   : > { %6789 = vmatprep.subr.bf16.mxu1 %v9410_v53  ;;  %v11432_v53 = vsub.s32 1, %v11416_v45 }
 0x49d   : > { %4873 = vmatpush1.bf16.msra.mxu0 %v9234_v61  ;;  %v9284_v61 = vld [vmem:[%s10060_s30 + $0x584] ss:$24 sps:$4 sm:$0xff]  }
 0x49e   : > { %4874 = vmatprep.subr.bf16.mxu0 %v9239_v32  ;;  %v9420_v32 = vld [vmem:[%s10094_s0 + $0x2d0] ss:$24 sps:$4 sm:$0xff]  }
 0x49f   : > { %6790 = vmatpush1.bf16.msra.mxu1 %v9408_v55 }
 0x4a0   : > { %6791 = vmatprep.subr.bf16.mxu1 %v9416_v56  ;;  %v3137_v56 = vrot.slane %v11429_v51, %v11432_v53 }
 0x4a1   : > { %4875 = vmatpush1.bf16.msra.mxu0 %v9237_v0  ;;  %v9287_v0 = vld [vmem:[%s10060_s30 + $0x5b4] ss:$24 sps:$4 sm:$0xff]  }
 0x4a2   : > { %4876 = vmatprep.subr.bf16.mxu0 %v9242_v1  ;;  %v9285_v1 = vld [vmem:[%s10060_s30 + $0x5b0] ss:$24 sps:$4 sm:$0xff]  }
 0x4a3   : > { %6792 = vmatpush1.bf16.msra.mxu1 %v9414_v59  ;;  %v9389_v59 = vld [vmem:[%s10094_s0 + $0x12c] ss:$24 sps:$4 sm:$0xff]  }
 0x4a4   : > { %6793 = vmatprep.subr.bf16.mxu1 %v9422_v60 }
 0x4a5   : > { %4877 = vmatpush1.bf16.msra.mxu0 %v9240_v3  ;;  %v9293_v3 = vld [vmem:[%s10060_s30 + $0x614] ss:$24 sps:$4 sm:$0xff]  }
 0x4a6   : > { %4887 = vmatprep.subr.bf16.mxu0 %v9245_v22  ;;  %v9291_v22 = vld [vmem:[%s10060_s30 + $0x610] ss:$24 sps:$4 sm:$0xff]  }
 0x4a7   : > { %6794 = vmatpush1.bf16.msra.mxu1 %v9420_v32 }
 0x4a8   : > { %4879 = vmatmul.mubr.bf16.vlgmr.msra.gmra.mrb[4].mxu0 %v11128_v18  ;;  %v9254_v18 = vld [vmem:[%s10060_s30 + $0x3a4] ss:$24 sps:$4 sm:$0xff]   ;;  %6804 = vmatprep.subr.bf16.mxu1 %v9428_v63 }
 0x4a9   : > { %4888 = vmatpush1.bf16.msra.mxu0 %v9243_v6  ;;  %4919 = vmatprep.mubr.bf16.mxu0 %v11157_v46  ;;  %v9252_v46 = vld [vmem:[%s10060_s30 + $0x3a0] ss:$24 sps:$4 sm:$0xff]  }
 0x4aa   : > { %4889 = vmatprep.subr.bf16.mxu0 %v9248_v10  ;;  %v9294_v6 = vld [vmem:[%s10060_s30 + $0x640] ss:$24 sps:$4 sm:$0xff]   ;;  %v9302_v10 = vld [vmem:[%s10060_s30 + $0x6a4] ss:$24 sps:$4 sm:$0xff]  }
 0x4ad   : > { %4890 = vmatpush1.bf16.msra.mxu0 %v9246_v38  ;;  %v9303_v38 = vld [vmem:[%s10060_s30 + $0x6d0] ss:$24 sps:$4 sm:$0xff]  }
 0x4ae   : > { %4891 = vmatprep.subr.bf16.mxu0 %v9251_v39  ;;  %v9306_v39 = vld [vmem:[%s10060_s30 + $0x700] ss:$24 sps:$4 sm:$0xff]  }
 0x4b1   : > { %4892 = vmatpush1.bf16.msra.mxu0 %v9249_v17  ;;  %v9314_v17 = vld [vmem:[%s10060_s30 + $0x764] ss:$24 sps:$4 sm:$0xff]  }
 0x4b2   : > { %4893 = vmatprep.subr.bf16.mxu0 %v9254_v18  ;;  %v9312_v18 = vld [vmem:[%s10060_s30 + $0x760] ss:$24 sps:$4 sm:$0xff]  }
 0x4b5   : > { %4894 = vmatpush1.bf16.msra.mxu0 %v9252_v46  ;;  %v9320_v46 = vld [vmem:[%s10060_s30 + $0x7c4] ss:$24 sps:$4 sm:$0xff]  }
 0x4b6   : > { %4895 = vmatprep.subr.bf16.mxu0 %v9257_v14  ;;  %v9318_v14 = vld [vmem:[%s10060_s30 + $0x7c0] ss:$24 sps:$4 sm:$0xff]  }
 0x4b9   : > { %4896 = vmatpush1.bf16.msra.mxu0 %v9255_v13  ;;  %v9326_v13 = vld [vmem:[%s10060_s30 + $0x824] ss:$24 sps:$4 sm:$0xff]  }
 0x4ba   : > { %4897 = vmatprep.subr.bf16.mxu0 %v9260_v25  ;;  %v9324_v25 = vld [vmem:[%s10060_s30 + $0x820] ss:$24 sps:$4 sm:$0xff]  }
 0x4bd   : > { %4898 = vmatpush1.bf16.msra.mxu0 %v9258_v28  ;;  %v9335_v28 = vld [vmem:[%s10060_s30 + $0x884] ss:$24 sps:$4 sm:$0xff]  }
 0x4be   : > { %4899 = vmatprep.subr.bf16.mxu0 %v9263_v34  ;;  %v9341_v34 = vld [vmem:[%s10060_s30 + $0x8b4] ss:$24 sps:$4 sm:$0xff]  }
 0x4c1   : > { %4900 = vmatpush1.bf16.msra.mxu0 %v9261_v30  ;;  %v9339_v30 = vld [vmem:[%s10060_s30 + $0x8b0] ss:$24 sps:$4 sm:$0xff]  }
 0x4c2   : > { %4901 = vmatprep.subr.bf16.mxu0 %v9266_v36  ;;  %v9353_v36 = vld [vmem:[%s10094_s0 + $0xc] ss:$24 sps:$4 sm:$0xff]  }
 0x4c5   : > { %4902 = vmatpush1.bf16.msra.mxu0 %v9264_v37  ;;  %v9351_v37 = vld [vmem:[%s10094_s0 + $0x8] ss:$24 sps:$4 sm:$0xff]  }
 0x4c6   : > { %4903 = vmatprep.subr.bf16.mxu0 %v9269_v42  ;;  %v9365_v42 = vld [vmem:[%s10094_s0 + $0x6c] ss:$24 sps:$4 sm:$0xff]  }
 0x4c9   : > { %4904 = vmatpush1.bf16.msra.mxu0 %v9267_v52  ;;  %v9363_v52 = vld [vmem:[%s10094_s0 + $0x68] ss:$24 sps:$4 sm:$0xff]  }
 0x4ca   : > { %4905 = vmatprep.subr.bf16.mxu0 %v9272_v44  ;;  %v9371_v44 = vld [vmem:[%s10094_s0 + $0x9c] ss:$24 sps:$4 sm:$0xff]  }
 0x4cd   : > { %4906 = vmatpush1.bf16.msra.mxu0 %v9270_v49  ;;  %v11421_v49 = vsub.s32 0, %v11416_v45 }
 0x4ce   : > { %4907 = vmatprep.subr.bf16.mxu0 %v9275_v50  ;;  %v9375_v50 = vld [vmem:[%s10094_s0 + $0xc8] ss:$24 sps:$4 sm:$0xff]  }
 0x4cf   : > { %v3133_v55 = vrot.slane %v11429_v51, %v11421_v49 }
 0x4d1   : > { %4908 = vmatpush1.bf16.msra.mxu0 %v9273_v29  ;;  %v11435_v29 = vsub.s32 3, %v11416_v45 }
 0x4d2   : > { %4909 = vmatprep.subr.bf16.mxu0 %v9278_v54  ;;  %v9383_v54 = vld [vmem:[%s10094_s0 + $0xfc] ss:$24 sps:$4 sm:$0xff]  }
 0x4d5   : > { %4910 = vmatpush1.bf16.msra.mxu0 %v9276_v57  ;;  %v3145_v57 = vrot.slane %v11429_v51, %v11435_v29 }
 0x4d6   : > { %4911 = vmatprep.subr.bf16.mxu0 %v9281_v58  ;;  %v9381_v58 = vld [vmem:[%s10094_s0 + $0xf8] ss:$24 sps:$4 sm:$0xff]  }
 0x4d9   : > { %4912 = vmatpush1.bf16.msra.mxu0 %v9279_v31 }
 0x4da   : > { %4913 = vmatprep.subr.bf16.mxu0 %v9284_v61 }
 0x4dd   : > { %4914 = vmatpush1.bf16.msra.mxu0 %v9282_v62 }
 0x4de   : > { %4915 = vmatprep.subr.bf16.mxu0 %v9287_v0 }
 0x4e1   : > { %4916 = vmatpush1.bf16.msra.mxu0 %v9285_v1 }
 0x4e2   : > { %4917 = vmatprep.subr.bf16.mxu0 %v9290_v2 }
 0x4e5   : > { %4918 = vmatpush1.bf16.msra.mxu0 %v9288_v21  ;;  %v9387_v21 = vld [vmem:[%s10094_s0 + $0x128] ss:$24 sps:$4 sm:$0xff]  }
 0x4e6   : > { %4928 = vmatprep.subr.bf16.mxu0 %v9293_v3 }
 0x4e8   : > { %4920 = vmatmul.mubr.bf16.vlgmr.msra.gmra.mrb[4].mxu0 %v11201_v24  ;;  %v9305_v24 = vld [vmem:[%s10060_s30 + $0x6d4] ss:$24 sps:$4 sm:$0xff]  }
 0x4e9   : > { %4929 = vmatpush1.bf16.msra.mxu0 %v9291_v22  ;;  %4960 = vmatprep.mubr.bf16.mxu0 %v11206_v5  ;;  %v9308_v5 = vld [vmem:[%s10060_s30 + $0x704] ss:$24 sps:$4 sm:$0xff]  }
 0x4ea   : > { %4930 = vmatprep.subr.bf16.mxu0 %v9296_v4 }
 0x4ed   : > { %4931 = vmatpush1.bf16.msra.mxu0 %v9294_v6  ;;  %v9395_v6 = vld [vmem:[%s10094_s0 + $0x15c] ss:$24 sps:$4 sm:$0xff]  }
 0x4ee   : > { %4932 = vmatprep.subr.bf16.mxu0 %v9299_v7 }
 0x4f1   : > { %4933 = vmatpush1.bf16.msra.mxu0 %v9297_v9 }
 0x4f2   : > { %4934 = vmatprep.subr.bf16.mxu0 %v9302_v10 }
 0x4f5   : > { %4935 = vmatpush1.bf16.msra.mxu0 %v9300_v12 }
 0x4f6   : > { %4936 = vmatprep.subr.bf16.mxu0 %v9305_v24 }
 0x4f9   : > { %4937 = vmatpush1.bf16.msra.mxu0 %v9303_v38  ;;  %v9393_v38 = vld [vmem:[%s10094_s0 + $0x158] ss:$24 sps:$4 sm:$0xff]  }
 0x4fa   : > { %4938 = vmatprep.subr.bf16.mxu0 %v9308_v5 }
 0x4fd   : > { %4939 = vmatpush1.bf16.msra.mxu0 %v9306_v39  ;;  %v9401_v39 = vld [vmem:[%s10094_s0 + $0x18c] ss:$24 sps:$4 sm:$0xff]  }
 0x4fe   : > { %4940 = vmatprep.subr.bf16.mxu0 %v9311_v15 }
 0x501   : > { %4941 = vmatpush1.bf16.msra.mxu0 %v9309_v16 }
 0x502   : > { %4942 = vmatprep.subr.bf16.mxu0 %v9314_v17 }
 0x505   : > { %4943 = vmatpush1.bf16.msra.mxu0 %v9312_v18  ;;  %v9399_v18 = vld [vmem:[%s10094_s0 + $0x188] ss:$24 sps:$4 sm:$0xff]  }
 0x506   : > { %4944 = vmatprep.subr.bf16.mxu0 %v9317_v19 }
 0x509   : > { %4945 = vmatpush1.bf16.msra.mxu0 %v9315_v11 }
 0x50a   : > { %4946 = vmatprep.subr.bf16.mxu0 %v9320_v46  ;;  %v9407_v46 = vld [vmem:[%s10094_s0 + $0x1bc] ss:$24 sps:$4 sm:$0xff]  }
 0x50d   : > { %4947 = vmatpush1.bf16.msra.mxu0 %v9318_v14 }
 0x50e   : > { %4948 = vmatprep.subr.bf16.mxu0 %v9323_v20 }
 0x511   : > { %4949 = vmatpush1.bf16.msra.mxu0 %v9321_v23 }
 0x512   : > { %4950 = vmatprep.subr.bf16.mxu0 %v9326_v13  ;;  %v9405_v13 = vld [vmem:[%s10094_s0 + $0x1b8] ss:$24 sps:$4 sm:$0xff]  }
 0x515   : > { %4951 = vmatpush1.bf16.msra.mxu0 %v9324_v25  ;;  %v9413_v25 = vld [vmem:[%s10094_s0 + $0x1ec] ss:$24 sps:$4 sm:$0xff]  }
 0x516   : > { %4952 = vmatprep.subr.bf16.mxu0 %v9329_v26  ;;  %v9411_v26 = vld [vmem:[%s10094_s0 + $0x1e8] ss:$24 sps:$4 sm:$0xff]  }
 0x519   : > { %4953 = vmatpush1.bf16.msra.mxu0 %v9327_v27  ;;  %v9419_v27 = vld [vmem:[%s10094_s0 + $0x21c] ss:$24 sps:$4 sm:$0xff]  }
 0x51a   : > { %4954 = vmatprep.subr.bf16.mxu0 %v9335_v28  ;;  %v9417_v28 = vld [vmem:[%s10094_s0 + $0x218] ss:$24 sps:$4 sm:$0xff]  }
 0x51d   : > { %4955 = vmatpush1.bf16.msra.mxu0 %v9333_v48 }
 0x51e   : > { %4956 = vmatprep.subr.bf16.mxu0 %v9341_v34  ;;  %v9425_v34 = vld [vmem:[%s10094_s0 + $0x24c] ss:$24 sps:$4 sm:$0xff]  }
 0x521   : > { %4957 = vmatpush1.bf16.msra.mxu0 %v9339_v30 }
 0x522   : > { %4958 = vmatprep.subr.bf16.mxu0 %v9347_v33 }
 0x525   : > { %4959 = vmatpush1.bf16.msra.mxu0 %v9345_v35 }
 0x526   : > { %6886 = vmatprep.subr.bf16.mxu0 %v9353_v36 }
 0x528   : > { %4961 = vmatmul.mubr.bf16.vlgmr.msra.gmra.mrb[4].mxu0 %v11271_v8  ;;  %v9377_v8 = vld [vmem:[%s10094_s0 + $0xcc] ss:$24 sps:$4 sm:$0xff]  }
 0x529   : > { %6887 = vmatpush1.bf16.msra.mxu0 %v9351_v37 }
 0x52a   : > { %6888 = vmatprep.subr.bf16.mxu0 %v9359_v40 }
 0x52d   : > { %6889 = vmatpush1.bf16.msra.mxu0 %v9357_v41  ;;  %v9423_v41 = vld [vmem:[%s10094_s0 + $0x248] ss:$24 sps:$4 sm:$0xff]  }
 0x52e   : > { %6890 = vmatprep.subr.bf16.mxu0 %v9365_v42 }
 0x531   : > { %6891 = vmatpush1.bf16.msra.mxu0 %v9363_v52 }
 0x532   : > { %6892 = vmatprep.subr.bf16.mxu0 %v9371_v44 }
 0x535   : > { %6893 = vmatpush1.bf16.msra.mxu0 %v9369_v47 }
 0x536   : > { %6894 = vmatprep.subr.bf16.mxu0 %v9377_v8  ;;  %v9431_v8 = vld [vmem:[%s10094_s0 + $0x27c] ss:$24 sps:$4 sm:$0xff]  }
 0x539   : > { %6895 = vmatpush1.bf16.msra.mxu0 %v9375_v50 }
 0x53a   : > { %6896 = vmatprep.subr.bf16.mxu0 %v9383_v54  ;;  %v9426_v54 = vld [vmem:[%s10094_s0 + $0x300] ss:$24 sps:$4 sm:$0xff]  }
 0x53b   : > { %v4716_v60 = vpop.f32.mrb[0].mxu0 }
 0x53c   : > { %v11446_v31 = vpop.f32.mrb[0].mxu1  ;;  %v8358_v61 = vadd.f32 %v4716_v60, %v3133_v55  ;;  %v4718_v32 = vpop.f32.mrb[1].mxu0  ;;  %v9432_v60 = vld [vmem:[%s10094_s0 + $0x330] ss:$24 sps:$4 sm:$0xff]  }
 0x53d   : > { %v4841_v62 = vpop.f32.mrb[1].mxu1  ;;  %v8359_v63 = vadd.f32 %v4718_v32, %v3137_v56  ;;  %v4720_v1 = vpop.f32.mrb[2].mxu0  ;;  %6897 = vmatpush1.bf16.msra.mxu0 %v9381_v58  ;;  %v9429_v56 = vld [vmem:[%s10094_s0 + $0x278] ss:$24 sps:$4 sm:$0xff]   ;;  %v9440_v32 = vld [vmem:[%s10094_s0 + $0x364] ss:$24 sps:$4 sm:$0xff]  }
 0x53e   : > { %v8361_v0 = vadd.f32 %v4841_v62, %v3145_v57  ;;  %v4843_v2 = vpop.f32.mrb[2].mxu1  ;;  %v4975_v3 = vmul.f32 0.044715, %v8358_v61  ;;  %v4721_v22 = vpop.f32.mrb[3].mxu0  ;;  %6898 = vmatprep.subr.bf16.mxu0 %v9389_v59  ;;  %v4969_v33 = vmul.f32 0.5, %v8358_v61 }
 0x53f   : > { %v4844_v4 = vpop.f32.mrb[3].mxu1  ;;  %v4976_v7 = vmul.f32 0.044715, %v8359_v63  ;;  %v4970_v37 = vmul.f32 0.5, %v8359_v63  ;;  %v9434_v57 = vld [vmem:[%s10094_s0 + $0x334] ss:$24 sps:$4 sm:$0xff]  }
 0x540   : > { %v4978_v9 = vmul.f32 0.044715, %v8361_v0  ;;  %v4981_v10 = vmul.f32 %v8358_v61, %v4975_v3  ;;  %v4972_v43 = vmul.f32 0.5, %v8361_v0  ;;  %v9437_v59 = vld [vmem:[%s10094_s0 + $0x2ac] ss:$24 sps:$4 sm:$0xff]  }
 0x541   : > { %v4982_v12 = vmul.f32 %v8359_v63, %v4976_v7  ;;  %6899 = vmatpush1.bf16.msra.mxu0 %v9387_v21  ;;  %v9443_v62 = vld [vmem:[%s10094_s0 + $0x2dc] ss:$24 sps:$4 sm:$0xff]   ;;  %v9488_v2 = vld [vmem:[%s10094_s0 + $0x60c] ss:$24 sps:$4 sm:$0xff]   ;;  %v11485_v21 = vsub.s32 2, %v11416_v45 }
 0x542   : > { %v4984_v24 = vmul.f32 %v8361_v0, %v4978_v9  ;;  %v4987_v5 = vmul.f32 %v8358_v61, %v4981_v10  ;;  %6900 = vmatprep.subr.bf16.mxu0 %v9395_v6  ;;  %v9446_v1 = vld [vmem:[%s10094_s0 + $0x394] ss:$24 sps:$4 sm:$0xff]   ;;  %v9444_v3 = vld [vmem:[%s10094_s0 + $0x390] ss:$24 sps:$4 sm:$0xff]   ;;  %v9449_v22 = vld [vmem:[%s10094_s0 + $0x3c4] ss:$24 sps:$4 sm:$0xff]  }
 0x543   : > { %v4988_v15 = vmul.f32 %v8359_v63, %v4982_v12  ;;  %v9486_v4 = vld [vmem:[%s10094_s0 + $0x608] ss:$24 sps:$4 sm:$0xff]   ;;  %v9494_v6 = vld [vmem:[%s10094_s0 + $0x63c] ss:$24 sps:$4 sm:$0xff]   ;;  %v3141_v7 = vrot.slane %v11429_v51, %v11485_v21  ;;  %v9492_v12 = vld [vmem:[%s10094_s0 + $0x638] ss:$24 sps:$4 sm:$0xff]  }
 0x544   : > { %v4990_v16 = vmul.f32 %v8361_v0, %v4984_v24  ;;  %v4993_v17 = vadd.f32 %v8358_v61, %v4987_v5  ;;  %v9435_v61 = vld [vmem:[%s10094_s0 + $0x2a8] ss:$24 sps:$4 sm:$0xff]   ;;  %v9452_v10 = vld [vmem:[%s10094_s0 + $0x3f4] ss:$24 sps:$4 sm:$0xff]  }
 0x545   : > { %6901 = vmatpush1.bf16.msra.mxu0 %v9393_v38  ;;  %v4994_v19 = vadd.f32 %v8359_v63, %v4988_v15  ;;  %v9438_v63 = vld [vmem:[%s10094_s0 + $0x360] ss:$24 sps:$4 sm:$0xff]   ;;  %v9500_v24 = vld [vmem:[%s10094_s0 + $0x66c] ss:$24 sps:$4 sm:$0xff]   ;;  %v11499_v38 = vadd.f32 %v11446_v31, %v3141_v7  ;;  %v9450_v5 = vld [vmem:[%s10094_s0 + $0x3f0] ss:$24 sps:$4 sm:$0xff]  }
 0x546   : > { %v4996_v11 = vadd.f32 %v8361_v0, %v4990_v16  ;;  %6902 = vmatprep.subr.bf16.mxu0 %v9401_v39  ;;  %v4999_v14 = vmul.f32 0.7978846, %v4993_v17  ;;  %v9441_v0 = vld [vmem:[%s10094_s0 + $0x2d8] ss:$24 sps:$4 sm:$0xff]   ;;  %v9455_v39 = vld [vmem:[%s10094_s0 + $0x424] ss:$24 sps:$4 sm:$0xff]  }
 0x547   : > { %v5000_v20 = vmul.f32 0.7978846, %v4994_v19  ;;  %v9447_v9 = vld [vmem:[%s10094_s0 + $0x3c0] ss:$24 sps:$4 sm:$0xff]   ;;  %v9506_v16 = vld [vmem:[%s10094_s0 + $0x69c] ss:$24 sps:$4 sm:$0xff]  }
 0x548   : > { %v5002_v23 = vmul.f32 0.7978846, %v4996_v11  ;;  %9771 = vtanh.f32 %v4999_v14  ;;  %v9498_v15 = vld [vmem:[%s10094_s0 + $0x668] ss:$24 sps:$4 sm:$0xff]   ;;  %v4977_v17 = vmul.f32 0.044715, %v11499_v38 }
 0x549   : > { %6903 = vmatpush1.bf16.msra.mxu0 %v9399_v18  ;;  %9773 = vtanh.f32 %v5000_v20  ;;  %v9453_v18 = vld [vmem:[%s10094_s0 + $0x420] ss:$24 sps:$4 sm:$0xff]   ;;  %v9458_v31 = vld [vmem:[%s10094_s0 + $0x454] ss:$24 sps:$4 sm:$0xff]   ;;  %v9456_v14 = vld [vmem:[%s10094_s0 + $0x450] ss:$24 sps:$4 sm:$0xff]  }
 0x54a   : > { %6904 = vmatprep.subr.bf16.mxu0 %v9407_v46  ;;  %9775 = vtanh.f32 %v5002_v23  ;;  %v9504_v19 = vld [vmem:[%s10094_s0 + $0x698] ss:$24 sps:$4 sm:$0xff]   ;;  %v9512_v11 = vld [vmem:[%s10094_s0 + $0x6cc] ss:$24 sps:$4 sm:$0xff]   ;;  %v4983_v46 = vmul.f32 %v11499_v38, %v4977_v17  ;;  %v9510_v23 = vld [vmem:[%s10094_s0 + $0x6c8] ss:$24 sps:$4 sm:$0xff]  }
 0x54b   : > { %v9461_v20 = vld [vmem:[%s10094_s0 + $0x484] ss:$24 sps:$4 sm:$0xff]  }
 0x54c   : > { %v9497_v17 = vld [vmem:[%s10094_s0 + $0x664] ss:$24 sps:$4 sm:$0xff]  }
 0x54d   : > { %6905 = vmatpush1.bf16.msra.mxu0 %v9405_v13  ;;  %v9518_v13 = vld [vmem:[%s10094_s0 + $0x6fc] ss:$24 sps:$4 sm:$0xff]  }
 0x54e   : > { %6906 = vmatprep.subr.bf16.mxu0 %v9413_v25  ;;  %v4989_v25 = vmul.f32 %v11499_v38, %v4983_v46  ;;  %v9576_v46 = vld [vmem:[%s10094_s0 + $0x8d8] ss:$24 sps:$4 sm:$0xff]  }
 0x551   : > { %6907 = vmatpush1.bf16.msra.mxu0 %v9411_v26  ;;  %v9459_v26 = vld [vmem:[%s10094_s0 + $0x480] ss:$24 sps:$4 sm:$0xff]  }
 0x552   : > { %v9772_v48 = vpop.eup %9771  ;;  %6908 = vmatprep.subr.bf16.mxu0 %v9419_v27  ;;  %v9464_v27 = vld [vmem:[%s10094_s0 + $0x4b4] ss:$24 sps:$4 sm:$0xff]  }
 0x553   : > { %v9774_v30 = vpop.eup %9773  ;;  %v5011_v35 = vadd.f32 1.0, %v9772_v48  ;;  %v9524_v48 = vld [vmem:[%s10094_s0 + $0x72c] ss:$24 sps:$4 sm:$0xff]  }
 0x554   : > { %v9776_v36 = vpop.eup %9775  ;;  %v5012_v40 = vadd.f32 1.0, %v9774_v30  ;;  %v9462_v30 = vld [vmem:[%s10094_s0 + $0x4b0] ss:$24 sps:$4 sm:$0xff]  }
 0x555   : > { %6909 = vmatpush1.bf16.msra.mxu0 %v9417_v28  ;;  %v5017_v42 = vmul.f32 %v5011_v35, %v4969_v33  ;;  %v5014_v52 = vadd.f32 1.0, %v9776_v36  ;;  %v9516_v28 = vld [vmem:[%s10094_s0 + $0x6f8] ss:$24 sps:$4 sm:$0xff]   ;;  %v9467_v33 = vld [vmem:[%s10094_s0 + $0x4e4] ss:$24 sps:$4 sm:$0xff]  }
 0x556   : > { %6910 = vmatprep.subr.bf16.mxu0 %v9425_v34  ;;  %v5018_v44 = vmul.f32 %v5012_v40, %v4970_v37  ;;  %v4995_v34 = vadd.f32 %v11499_v38, %v4989_v25  ;;  %v9522_v35 = vld [vmem:[%s10094_s0 + $0x728] ss:$24 sps:$4 sm:$0xff]   ;;  %v9530_v36 = vld [vmem:[%s10094_s0 + $0x75c] ss:$24 sps:$4 sm:$0xff]  }
 0x557   : > { %v5020_v47 = vmul.f32 %v5014_v52, %v4972_v43  ;;  %v11465_v55 = vpack.c.bf16 %v5017_v42, %v5017_v42  ;;  %v9465_v37 = vld [vmem:[%s10094_s0 + $0x4e0] ss:$24 sps:$4 sm:$0xff]   ;;  %v9536_v43 = vld [vmem:[%s10094_s0 + $0x78c] ss:$24 sps:$4 sm:$0xff]   ;;  %v9468_v52 = vld [vmem:[%s10094_s0 + $0x510] ss:$24 sps:$4 sm:$0xff]  }
 0x558   : > { %v11462_v50 = vpack.c.bf16 %v5018_v44, %v5018_v44  ;;  %v5001_v40 = vmul.f32 0.7978846, %v4995_v34  ;;  %v9528_v42 = vld [vmem:[%s10094_s0 + $0x758] ss:$24 sps:$4 sm:$0xff]   ;;  %v9473_v44 = vld [vmem:[%s10094_s0 + $0x544] ss:$24 sps:$4 sm:$0xff]  }
 0x559   : > { %6911 = vmatpush1.bf16.msra.mxu0 %v9423_v41  ;;  %v11471_v58 = vpack.c.bf16 %v5020_v47, %v5020_v47  ;;  %v9470_v41 = vld [vmem:[%s10094_s0 + $0x514] ss:$24 sps:$4 sm:$0xff]   ;;  %v9534_v47 = vld [vmem:[%s10094_s0 + $0x788] ss:$24 sps:$4 sm:$0xff]  }
 0x55a   : > { %6795 = vmatprep.mubr.bf16.mxu1 %v11462_v50  ;;  %6918 = vmatprep.mubr.bf16.mxu0 %v11462_v50  ;;  %9777 = vtanh.f32 %v5001_v40  ;;  %v9515_v25 = vld [vmem:[%s10094_s0 + $0x6f4] ss:$24 sps:$4 sm:$0xff]   ;;  %v9525_v34 = vld [vmem:[%s10094_s0 + $0x750] ss:$24 sps:$4 sm:$0xff]   ;;  %v9543_v40 = vld [vmem:[%s10094_s0 + $0x7e0] ss:$24 sps:$4 sm:$0xff]  }
 0x55b   : > { %6796 = vmatmul.mubr.bf16.vlgmr.msra.gmra.mrb[4].mxu1 %v11465_v55  ;;  %6912 = vmatprep.subr.bf16.mxu0 %v9431_v8  ;;  %v9542_v8 = vld [vmem:[%s10094_s0 + $0x7bc] ss:$24 sps:$4 sm:$0xff]  }
 0x55c   : > { %6805 = vmatpush1.bf16.msra.mxu1 %v9426_v54  ;;  %6836 = vmatprep.mubr.bf16.mxu1 %v11471_v58  ;;  %v9471_v54 = vld [vmem:[%s10094_s0 + $0x540] ss:$24 sps:$4 sm:$0xff]  }
 0x55d   : > { %6913 = vmatpush1.bf16.msra.mxu0 %v9429_v56  ;;  %6806 = vmatprep.subr.bf16.mxu1 %v9434_v57  ;;  %v9476_v56 = vld [vmem:[%s10094_s0 + $0x574] ss:$24 sps:$4 sm:$0xff]   ;;  %v9540_v57 = vld [vmem:[%s10094_s0 + $0x7b8] ss:$24 sps:$4 sm:$0xff]  }
 0x55e   : > { %6914 = vmatprep.subr.bf16.mxu0 %v9437_v59  ;;  %v9548_v59 = vld [vmem:[%s10094_s0 + $0x7ec] ss:$24 sps:$4 sm:$0xff]  }
 0x560   : > { %6807 = vmatpush1.bf16.msra.mxu1 %v9432_v60  ;;  %v9474_v60 = vld [vmem:[%s10094_s0 + $0x570] ss:$24 sps:$4 sm:$0xff]  }
 0x561   : > { %6915 = vmatpush1.bf16.msra.mxu0 %v9435_v61  ;;  %6808 = vmatprep.subr.bf16.mxu1 %v9440_v32  ;;  %v9479_v61 = vld [vmem:[%s10094_s0 + $0x5a4] ss:$24 sps:$4 sm:$0xff]   ;;  %v9546_v32 = vld [vmem:[%s10094_s0 + $0x7e8] ss:$24 sps:$4 sm:$0xff]  }
 0x562   : > { %6916 = vmatprep.subr.bf16.mxu0 %v9443_v62 }
 0x564   : > { %6809 = vmatpush1.bf16.msra.mxu1 %v9438_v63  ;;  %v9778_v62 = vpop.eup %9777  ;;  %v9554_v63 = vld [vmem:[%s10094_s0 + $0x81c] ss:$24 sps:$4 sm:$0xff]  }
 0x565   : > { %6917 = vmatpush1.bf16.msra.mxu0 %v9441_v0  ;;  %6810 = vmatprep.subr.bf16.mxu1 %v9446_v1  ;;  %v9477_v0 = vld [vmem:[%s10094_s0 + $0x5a0] ss:$24 sps:$4 sm:$0xff]   ;;  %v9482_v1 = vld [vmem:[%s10094_s0 + $0x5d4] ss:$24 sps:$4 sm:$0xff]  }
 0x566   : > { %6968 = vmatprep.subr.bf16.mxu0 %v9488_v2  ;;  %v5013_v2 = vadd.f32 1.0, %v9778_v62 }
 0x568   : > { %6811 = vmatpush1.bf16.msra.mxu1 %v9444_v3  ;;  %6919 = vmatmul.mubr.bf16.vlgmr.msra.gmra.mrb[8].mxu0 %v11465_v55  ;;  %v9552_v3 = vld [vmem:[%s10094_s0 + $0x818] ss:$24 sps:$4 sm:$0xff]  }
 0x569   : > { %6812 = vmatprep.subr.bf16.mxu1 %v9449_v22  ;;  %6969 = vmatpush1.bf16.msra.mxu0 %v9486_v4  ;;  %v9560_v22 = vld [vmem:[%s10094_s0 + $0x84c] ss:$24 sps:$4 sm:$0xff]   ;;  %v4971_v4 = vmul.f32 0.5, %v11499_v38 }
 0x56a   : > { %6970 = vmatprep.subr.bf16.mxu0 %v9494_v6  ;;  %v9480_v6 = vld [vmem:[%s10094_s0 + $0x5d0] ss:$24 sps:$4 sm:$0xff]   ;;  %v9491_v38 = vld [vmem:[%s10094_s0 + $0x634] ss:$24 sps:$4 sm:$0xff]  }
 0x56b   : > { %v5019_v7 = vmul.f32 %v5013_v2, %v4971_v4 }
 0x56c   : > { %6813 = vmatpush1.bf16.msra.mxu1 %v9447_v9  ;;  %v9485_v9 = vld [vmem:[%s10094_s0 + $0x604] ss:$24 sps:$4 sm:$0xff]  }
 0x56d   : > { %6814 = vmatprep.subr.bf16.mxu1 %v9452_v10  ;;  %6971 = vmatpush1.bf16.msra.mxu0 %v9492_v12  ;;  %v9558_v10 = vld [vmem:[%s10094_s0 + $0x848] ss:$24 sps:$4 sm:$0xff]   ;;  %v9566_v12 = vld [vmem:[%s10094_s0 + $0x87c] ss:$24 sps:$4 sm:$0xff]  }
 0x56e   : > { %6972 = vmatprep.subr.bf16.mxu0 %v9500_v24  ;;  %v9483_v24 = vld [vmem:[%s10094_s0 + $0x600] ss:$24 sps:$4 sm:$0xff]  }
 0x570   : > { %6815 = vmatpush1.bf16.msra.mxu1 %v9450_v5  ;;  %v11551_v5 = vpack.c.bf16 %v5019_v7, %v5019_v7 }
 0x571   : > { %6816 = vmatprep.subr.bf16.mxu1 %v9455_v39  ;;  %6973 = vmatpush1.bf16.msra.mxu0 %v9498_v15  ;;  %v9564_v39 = vld [vmem:[%s10094_s0 + $0x878] ss:$24 sps:$4 sm:$0xff]   ;;  %v9572_v15 = vld [vmem:[%s10094_s0 + $0x8ac] ss:$24 sps:$4 sm:$0xff]  }
 0x572   : > { %6974 = vmatprep.subr.bf16.mxu0 %v9506_v16  ;;  %v9489_v16 = vld [vmem:[%s10094_s0 + $0x630] ss:$24 sps:$4 sm:$0xff]  }
 0x574   : > { %6817 = vmatpush1.bf16.msra.mxu1 %v9453_v18  ;;  %v9570_v18 = vld [vmem:[%s10094_s0 + $0x8a8] ss:$24 sps:$4 sm:$0xff]  }
 0x575   : > { %6818 = vmatprep.subr.bf16.mxu1 %v9458_v31  ;;  %6975 = vmatpush1.bf16.msra.mxu0 %v9504_v19  ;;  %v9578_v31 = vld [vmem:[%s10094_s0 + $0x8dc] ss:$24 sps:$4 sm:$0xff]   ;;  %v9495_v19 = vld [vmem:[%s10094_s0 + $0x660] ss:$24 sps:$4 sm:$0xff]  }
 0x576   : > { %6976 = vmatprep.subr.bf16.mxu0 %v9512_v11  ;;  %v9503_v11 = vld [vmem:[%s10094_s0 + $0x694] ss:$24 sps:$4 sm:$0xff]  }
 0x578   : > { %6819 = vmatpush1.bf16.msra.mxu1 %v9456_v14  ;;  %v9584_v14 = vld [vmem:[%s10094_s0 + $0x314] ss:$24 sps:$4 sm:$0xff]  }
 0x579   : > { %6820 = vmatprep.subr.bf16.mxu1 %v9461_v20  ;;  %6977 = vmatpush1.bf16.msra.mxu0 %v9510_v23  ;;  %v9501_v20 = vld [vmem:[%s10094_s0 + $0x690] ss:$24 sps:$4 sm:$0xff]   ;;  %v9509_v23 = vld [vmem:[%s10094_s0 + $0x6c4] ss:$24 sps:$4 sm:$0xff]  }
 0x57a   : > { %6978 = vmatprep.subr.bf16.mxu0 %v9518_v13  ;;  %v9507_v13 = vld [vmem:[%s10094_s0 + $0x6c0] ss:$24 sps:$4 sm:$0xff]  }
 0x57c   : > { %6821 = vmatpush1.bf16.msra.mxu1 %v9459_v26  ;;  %v9513_v26 = vld [vmem:[%s10094_s0 + $0x6f0] ss:$24 sps:$4 sm:$0xff]  }
 0x57d   : > { %6822 = vmatprep.subr.bf16.mxu1 %v9464_v27  ;;  %6979 = vmatpush1.bf16.msra.mxu0 %v9516_v28  ;;  %v9521_v27 = vld [vmem:[%s10094_s0 + $0x724] ss:$24 sps:$4 sm:$0xff]   ;;  %v9519_v28 = vld [vmem:[%s10094_s0 + $0x720] ss:$24 sps:$4 sm:$0xff]  }
 0x57e   : > { %6980 = vmatprep.subr.bf16.mxu0 %v9524_v48  ;;  %v9527_v48 = vld [vmem:[%s10094_s0 + $0x754] ss:$24 sps:$4 sm:$0xff]  }
 0x580   : > { %6823 = vmatpush1.bf16.msra.mxu1 %v9462_v30  ;;  %v9533_v30 = vld [vmem:[%s10094_s0 + $0x784] ss:$24 sps:$4 sm:$0xff]  }
 0x581   : > { %6824 = vmatprep.subr.bf16.mxu1 %v9467_v33  ;;  %6981 = vmatpush1.bf16.msra.mxu0 %v9522_v35  ;;  %v9531_v33 = vld [vmem:[%s10094_s0 + $0x780] ss:$24 sps:$4 sm:$0xff]   ;;  %v9539_v35 = vld [vmem:[%s10094_s0 + $0x7b4] ss:$24 sps:$4 sm:$0xff]  }
 0x582   : > { %6982 = vmatprep.subr.bf16.mxu0 %v9530_v36  ;;  %v9537_v36 = vld [vmem:[%s10094_s0 + $0x7b0] ss:$24 sps:$4 sm:$0xff]  }
 0x584   : > { %6825 = vmatpush1.bf16.msra.mxu1 %v9465_v37  ;;  %v9545_v37 = vld [vmem:[%s10094_s0 + $0x7e4] ss:$24 sps:$4 sm:$0xff]  }
 0x585   : > { %6826 = vmatprep.subr.bf16.mxu1 %v9470_v41  ;;  %6983 = vmatpush1.bf16.msra.mxu0 %v9528_v42  ;;  %v9551_v41 = vld [vmem:[%s10094_s0 + $0x814] ss:$24 sps:$4 sm:$0xff]   ;;  %v9549_v42 = vld [vmem:[%s10094_s0 + $0x810] ss:$24 sps:$4 sm:$0xff]  }
 0x586   : > { %6984 = vmatprep.subr.bf16.mxu0 %v9536_v43  ;;  %v9557_v43 = vld [vmem:[%s10094_s0 + $0x844] ss:$24 sps:$4 sm:$0xff]  }
 0x588   : > { %6827 = vmatpush1.bf16.msra.mxu1 %v9468_v52  ;;  %v9555_v52 = vld [vmem:[%s10094_s0 + $0x840] ss:$24 sps:$4 sm:$0xff]  }
 0x589   : > { %6828 = vmatprep.subr.bf16.mxu1 %v9473_v44  ;;  %6985 = vmatpush1.bf16.msra.mxu0 %v9534_v47  ;;  %v9563_v44 = vld [vmem:[%s10094_s0 + $0x874] ss:$24 sps:$4 sm:$0xff]   ;;  %v9561_v47 = vld [vmem:[%s10094_s0 + $0x870] ss:$24 sps:$4 sm:$0xff]  }
 0x58a   : > { %6986 = vmatprep.subr.bf16.mxu0 %v9542_v8  ;;  %v9569_v8 = vld [vmem:[%s10094_s0 + $0x8a4] ss:$24 sps:$4 sm:$0xff]  }
 0x58c   : > { %6829 = vmatpush1.bf16.msra.mxu1 %v9471_v54  ;;  %v9567_v54 = vld [vmem:[%s10094_s0 + $0x8a0] ss:$24 sps:$4 sm:$0xff]  }
 0x58d   : > { %6830 = vmatprep.subr.bf16.mxu1 %v9476_v56  ;;  %6987 = vmatpush1.bf16.msra.mxu0 %v9540_v57  ;;  %v9575_v56 = vld [vmem:[%s10094_s0 + $0x8d4] ss:$24 sps:$4 sm:$0xff]   ;;  %v9573_v57 = vld [vmem:[%s10094_s0 + $0x8d0] ss:$24 sps:$4 sm:$0xff]  }
 0x58e   : > { %6988 = vmatprep.subr.bf16.mxu0 %v9548_v59  ;;  %v9581_v59 = vld [vmem:[%s10094_s0 + $0x30c] ss:$24 sps:$4 sm:$0xff]  }
 0x590   : > { %6831 = vmatpush1.bf16.msra.mxu1 %v9474_v60  ;;  %v11592_v60 = vsub.s32 4, %v11416_v45 }
 0x591   : > { %6832 = vmatprep.subr.bf16.mxu1 %v9479_v61  ;;  %6989 = vmatpush1.bf16.msra.mxu0 %v9546_v32  ;;  %v11595_v61 = vsub.s32 5, %v11416_v45 }
 0x592   : > { %6990 = vmatprep.subr.bf16.mxu0 %v9554_v63  ;;  %v3149_v32 = vrot.slane %v11429_v51, %v11592_v60 }
 0x593   : > { %v3153_v62 = vrot.slane %v11429_v51, %v11595_v61 }
 0x594   : > { %6833 = vmatpush1.bf16.msra.mxu1 %v9477_v0 }
 0x595   : > { %6834 = vmatprep.subr.bf16.mxu1 %v9482_v1  ;;  %6991 = vmatpush1.bf16.msra.mxu0 %v9552_v3 }
 0x596   : > { %6992 = vmatprep.subr.bf16.mxu0 %v9560_v22 }
 0x598   : > { %6835 = vmatpush1.bf16.msra.mxu1 %v9480_v6 }
 0x599   : > { %6845 = vmatprep.subr.bf16.mxu1 %v9485_v9  ;;  %6993 = vmatpush1.bf16.msra.mxu0 %v9558_v10 }
 0x59a   : > { %6994 = vmatprep.subr.bf16.mxu0 %v9566_v12 }
 0x59b   : > { %6837 = vmatmul.mubr.bf16.vlgmr.msra.gmra.mrb[8].mxu1 %v11551_v5 }
 0x59c   : > { %6846 = vmatpush1.bf16.msra.mxu1 %v9483_v24 }
 0x59d   : > { %6847 = vmatprep.subr.bf16.mxu1 %v9491_v38  ;;  %6995 = vmatpush1.bf16.msra.mxu0 %v9564_v39 }
 0x59e   : > { %6996 = vmatprep.subr.bf16.mxu0 %v9572_v15 }
 0x5a0   : > { %6848 = vmatpush1.bf16.msra.mxu1 %v9489_v16 }
 0x5a1   : > { %6849 = vmatprep.subr.bf16.mxu1 %v9497_v17  ;;  %6997 = vmatpush1.bf16.msra.mxu0 %v9570_v18 }
 0x5a2   : > { %6998 = vmatprep.subr.bf16.mxu0 %v9578_v31 }
 0x5a4   : > { %6850 = vmatpush1.bf16.msra.mxu1 %v9495_v19 }
 0x5a5   : > { %6851 = vmatprep.subr.bf16.mxu1 %v9503_v11  ;;  %6999 = vmatpush1.bf16.msra.mxu0 %v9576_v46 }
 0x5a6   : > { %7050 = vmatprep.subr.bf16.mxu0 %v9584_v14  ;;  %v9579_v14 = vld [vmem:[%s10094_s0 + $0x308] ss:$24 sps:$4 sm:$0xff]  }
 0x5a8   : > { %6852 = vmatpush1.bf16.msra.mxu1 %v9501_v20  ;;  %v9582_v20 = vld [vmem:[%s10094_s0 + $0x310] ss:$24 sps:$4 sm:$0xff]  }
 0x5a9   : > { %6853 = vmatprep.subr.bf16.mxu1 %v9509_v23 }
 0x5ac   : > { %6854 = vmatpush1.bf16.msra.mxu1 %v9507_v13  ;;  %v9587_v13 = vld [vmem:[%s10094_s0 + $0x33c] ss:$24 sps:$4 sm:$0xff]  }
 0x5ad   : > { %6855 = vmatprep.subr.bf16.mxu1 %v9515_v25  ;;  %v9590_v25 = vld [vmem:[%s10094_s0 + $0x344] ss:$24 sps:$4 sm:$0xff]  }
 0x5b0   : > { %6856 = vmatpush1.bf16.msra.mxu1 %v9513_v26  ;;  %v9585_v26 = vld [vmem:[%s10094_s0 + $0x338] ss:$24 sps:$4 sm:$0xff]  }
 0x5b1   : > { %6857 = vmatprep.subr.bf16.mxu1 %v9521_v27  ;;  %v9588_v27 = vld [vmem:[%s10094_s0 + $0x340] ss:$24 sps:$4 sm:$0xff]  }
 0x5b4   : > { %6858 = vmatpush1.bf16.msra.mxu1 %v9519_v28  ;;  %v9593_v28 = vld [vmem:[%s10094_s0 + $0x36c] ss:$24 sps:$4 sm:$0xff]  }
 0x5b5   : > { %6859 = vmatprep.subr.bf16.mxu1 %v9527_v48  ;;  %v9596_v48 = vld [vmem:[%s10094_s0 + $0x374] ss:$24 sps:$4 sm:$0xff]  }
 0x5b8   : > { %6860 = vmatpush1.bf16.msra.mxu1 %v9525_v34  ;;  %v9591_v34 = vld [vmem:[%s10094_s0 + $0x368] ss:$24 sps:$4 sm:$0xff]  }
 0x5b9   : > { %6861 = vmatprep.subr.bf16.mxu1 %v9533_v30  ;;  %v9594_v30 = vld [vmem:[%s10094_s0 + $0x370] ss:$24 sps:$4 sm:$0xff]  }
 0x5bc   : > { %6862 = vmatpush1.bf16.msra.mxu1 %v9531_v33  ;;  %v9599_v33 = vld [vmem:[%s10094_s0 + $0x39c] ss:$24 sps:$4 sm:$0xff]  }
 0x5bd   : > { %6863 = vmatprep.subr.bf16.mxu1 %v9539_v35  ;;  %v9602_v35 = vld [vmem:[%s10094_s0 + $0x3a4] ss:$24 sps:$4 sm:$0xff]  }
 0x5c0   : > { %6864 = vmatpush1.bf16.msra.mxu1 %v9537_v36  ;;  %v9600_v36 = vld [vmem:[%s10094_s0 + $0x3a0] ss:$24 sps:$4 sm:$0xff]  }
 0x5c1   : > { %6865 = vmatprep.subr.bf16.mxu1 %v9545_v37  ;;  %v9605_v37 = vld [vmem:[%s10094_s0 + $0x3cc] ss:$24 sps:$4 sm:$0xff]  }
 0x5c4   : > { %6866 = vmatpush1.bf16.msra.mxu1 %v9543_v40  ;;  %v9608_v40 = vld [vmem:[%s10094_s0 + $0x3d4] ss:$24 sps:$4 sm:$0xff]  }
 0x5c5   : > { %6867 = vmatprep.subr.bf16.mxu1 %v9551_v41  ;;  %v9603_v41 = vld [vmem:[%s10094_s0 + $0x3c8] ss:$24 sps:$4 sm:$0xff]  }
 0x5c8   : > { %6868 = vmatpush1.bf16.msra.mxu1 %v9549_v42  ;;  %v9606_v42 = vld [vmem:[%s10094_s0 + $0x3d0] ss:$24 sps:$4 sm:$0xff]  }
 0x5c9   : > { %6869 = vmatprep.subr.bf16.mxu1 %v9557_v43  ;;  %v9611_v43 = vld [vmem:[%s10094_s0 + $0x3fc] ss:$24 sps:$4 sm:$0xff]  }
 0x5cc   : > { %6870 = vmatpush1.bf16.msra.mxu1 %v9555_v52  ;;  %v9614_v52 = vld [vmem:[%s10094_s0 + $0x404] ss:$24 sps:$4 sm:$0xff]  }
 0x5cd   : > { %6871 = vmatprep.subr.bf16.mxu1 %v9563_v44  ;;  %v9609_v44 = vld [vmem:[%s10094_s0 + $0x3f8] ss:$24 sps:$4 sm:$0xff]  }
 0x5d0   : > { %6872 = vmatpush1.bf16.msra.mxu1 %v9561_v47  ;;  %v9612_v47 = vld [vmem:[%s10094_s0 + $0x400] ss:$24 sps:$4 sm:$0xff]  }
 0x5d1   : > { %6873 = vmatprep.subr.bf16.mxu1 %v9569_v8  ;;  %v9617_v8 = vld [vmem:[%s10094_s0 + $0x42c] ss:$24 sps:$4 sm:$0xff]  }
 0x5d4   : > { %6874 = vmatpush1.bf16.msra.mxu1 %v9567_v54  ;;  %v9620_v54 = vld [vmem:[%s10094_s0 + $0x434] ss:$24 sps:$4 sm:$0xff]  }
 0x5d5   : > { %6875 = vmatprep.subr.bf16.mxu1 %v9575_v56 }
 0x5d8   : > { %6876 = vmatpush1.bf16.msra.mxu1 %v9573_v57 }
 0x5d9   : > { %6927 = vmatprep.subr.bf16.mxu1 %v9581_v59 }
 0x5fb   : > { %v4962_v63 = vpop.f32.mrb[4].mxu0 }
 0x5fc   : > { %v8362_v0 = vadd.f32 %v4962_v63, %v3149_v32  ;;  %v4964_v1 = vpop.f32.mrb[5].mxu0  ;;  %v9615_v32 = vld [vmem:[%s10094_s0 + $0x428] ss:$24 sps:$4 sm:$0xff]  }
 0x5fd   : > { %v8363_v2 = vadd.f32 %v4964_v1, %v3153_v62  ;;  %v4966_v3 = vpop.f32.mrb[6].mxu0  ;;  %v9618_v62 = vld [vmem:[%s10094_s0 + $0x430] ss:$24 sps:$4 sm:$0xff]   ;;  %v9626_v1 = vld [vmem:[%s10094_s0 + $0x464] ss:$24 sps:$4 sm:$0xff]  }
 0x5fe   : > { %v4979_v22 = vmul.f32 0.044715, %v8362_v0  ;;  %v4967_v4 = vpop.f32.mrb[7].mxu0  ;;  %v4973_v16 = vmul.f32 0.5, %v8362_v0  ;;  %v9624_v3 = vld [vmem:[%s10094_s0 + $0x460] ss:$24 sps:$4 sm:$0xff]  }
 0x5ff   : > { %v4980_v6 = vmul.f32 0.044715, %v8363_v2  ;;  %v4974_v18 = vmul.f32 0.5, %v8363_v2  ;;  %v9632_v4 = vld [vmem:[%s10094_s0 + $0x494] ss:$24 sps:$4 sm:$0xff]  }
 0x600   : > { %v4985_v7 = vmul.f32 %v8362_v0, %v4979_v22  ;;  %v9629_v22 = vld [vmem:[%s10094_s0 + $0x48c] ss:$24 sps:$4 sm:$0xff]  }
 0x601   : > { %v4986_v9 = vmul.f32 %v8363_v2, %v4980_v6  ;;  %v9627_v6 = vld [vmem:[%s10094_s0 + $0x488] ss:$24 sps:$4 sm:$0xff]  }
 0x602   : > { %v4991_v10 = vmul.f32 %v8362_v0, %v4985_v7  ;;  %v9630_v7 = vld [vmem:[%s10094_s0 + $0x490] ss:$24 sps:$4 sm:$0xff]  }
 0x603   : > { %v4992_v12 = vmul.f32 %v8363_v2, %v4986_v9  ;;  %v9635_v9 = vld [vmem:[%s10094_s0 + $0x4bc] ss:$24 sps:$4 sm:$0xff]  }
 0x604   : > { %v4997_v45 = vadd.f32 %v8362_v0, %v4991_v10  ;;  %v9623_v0 = vld [vmem:[%s10094_s0 + $0x45c] ss:$24 sps:$4 sm:$0xff]  }
 0x605   : > { %v4998_v24 = vadd.f32 %v8363_v2, %v4992_v12  ;;  %v9621_v2 = vld [vmem:[%s10094_s0 + $0x458] ss:$24 sps:$4 sm:$0xff]   ;;  %v9638_v10 = vld [vmem:[%s10094_s0 + $0x4c4] ss:$24 sps:$4 sm:$0xff]  }
 0x606   : > { %v5003_v38 = vmul.f32 0.7978846, %v4997_v45 }
 0x607   : > { %v5004_v39 = vmul.f32 0.7978846, %v4998_v24  ;;  %v9633_v24 = vld [vmem:[%s10094_s0 + $0x4b8] ss:$24 sps:$4 sm:$0xff]  }
 0x608   : > { %9779 = vtanh.f32 %v5003_v38  ;;  %v9636_v38 = vld [vmem:[%s10094_s0 + $0x4c0] ss:$24 sps:$4 sm:$0xff]  }
 0x609   : > { %9781 = vtanh.f32 %v5004_v39 }
 0x612   : > { %v9780_v51 = vpop.eup %9779 }
 0x613   : > { %v9782_v15 = vpop.eup %9781  ;;  %v5015_v17 = vadd.f32 1.0, %v9780_v51  ;;  %v9641_v51 = vld [vmem:[%s10094_s0 + $0x4ec] ss:$24 sps:$4 sm:$0xff]  }
 0x614   : > { %v5016_v31 = vadd.f32 1.0, %v9782_v15  ;;  %v9644_v15 = vld [vmem:[%s10094_s0 + $0x4f4] ss:$24 sps:$4 sm:$0xff]  }
 0x615   : > { %v5021_v19 = vmul.f32 %v5015_v17, %v4973_v16  ;;  %v9639_v17 = vld [vmem:[%s10094_s0 + $0x4e8] ss:$24 sps:$4 sm:$0xff]  }
 0x616   : > { %v5022_v11 = vmul.f32 %v5016_v31, %v4974_v18  ;;  %v9642_v18 = vld [vmem:[%s10094_s0 + $0x4f0] ss:$24 sps:$4 sm:$0xff]   ;;  %v9647_v31 = vld [vmem:[%s10094_s0 + $0x51c] ss:$24 sps:$4 sm:$0xff]  }
 0x617   : > { %v11605_v23 = vpack.c.bf16 %v5021_v19, %v5021_v19  ;;  %v9650_v19 = vld [vmem:[%s10094_s0 + $0x524] ss:$24 sps:$4 sm:$0xff]  }
 0x618   : > { %v11601_v46 = vpack.c.bf16 %v5022_v11, %v5022_v11  ;;  %v9645_v11 = vld [vmem:[%s10094_s0 + $0x518] ss:$24 sps:$4 sm:$0xff]  }
 0x61a   : > { %6877 = vmatprep.mubr.bf16.mxu1 %v11601_v46  ;;  %7000 = vmatprep.mubr.bf16.mxu0 %v11601_v46 }
 0x61b   : > { %6878 = vmatmul.mubr.bf16.vlgmr.msra.gmra.mrb[12].mxu1 %v11605_v23  ;;  %7001 = vmatmul.mubr.bf16.vlgmr.msra.gmra.mrb[12].mxu0 %v11605_v23 }
 0x61c   : > { %6928 = vmatpush1.bf16.msra.mxu1 %v9579_v14  ;;  %7051 = vmatpush1.bf16.msra.mxu0 %v9582_v20  ;;  %v9648_v14 = vld [vmem:[%s10094_s0 + $0x520] ss:$24 sps:$4 sm:$0xff]   ;;  %v9653_v20 = vld [vmem:[%s10094_s0 + $0x54c] ss:$24 sps:$4 sm:$0xff]  }
 0x61d   : > { %6959 = vmatprep.mubr.bf16.mxu1 %v11471_v58  ;;  %7082 = vmatprep.mubr.bf16.mxu0 %v11471_v58  ;;  %v9597_v58 = vld [vmem:[%s10094_s0 + $0x398] ss:$24 sps:$4 sm:$0xff]  }
 0x61e   : > { %6929 = vmatprep.subr.bf16.mxu1 %v9587_v13  ;;  %7052 = vmatprep.subr.bf16.mxu0 %v9590_v25  ;;  %v9656_v13 = vld [vmem:[%s10094_s0 + $0x554] ss:$24 sps:$4 sm:$0xff]   ;;  %v9651_v25 = vld [vmem:[%s10094_s0 + $0x548] ss:$24 sps:$4 sm:$0xff]  }
 0x620   : > { %6930 = vmatpush1.bf16.msra.mxu1 %v9585_v26  ;;  %7053 = vmatpush1.bf16.msra.mxu0 %v9588_v27  ;;  %v9654_v26 = vld [vmem:[%s10094_s0 + $0x550] ss:$24 sps:$4 sm:$0xff]   ;;  %v9659_v27 = vld [vmem:[%s10094_s0 + $0x57c] ss:$24 sps:$4 sm:$0xff]  }
 0x621   : > { %6931 = vmatprep.subr.bf16.mxu1 %v9593_v28  ;;  %7054 = vmatprep.subr.bf16.mxu0 %v9596_v48  ;;  %v9662_v28 = vld [vmem:[%s10094_s0 + $0x584] ss:$24 sps:$4 sm:$0xff]   ;;  %v9657_v48 = vld [vmem:[%s10094_s0 + $0x578] ss:$24 sps:$4 sm:$0xff]  }
 0x624   : > { %6932 = vmatpush1.bf16.msra.mxu1 %v9591_v34  ;;  %7055 = vmatpush1.bf16.msra.mxu0 %v9594_v30  ;;  %v9660_v34 = vld [vmem:[%s10094_s0 + $0x580] ss:$24 sps:$4 sm:$0xff]   ;;  %v9665_v30 = vld [vmem:[%s10094_s0 + $0x5ac] ss:$24 sps:$4 sm:$0xff]  }
 0x625   : > { %6933 = vmatprep.subr.bf16.mxu1 %v9599_v33  ;;  %7056 = vmatprep.subr.bf16.mxu0 %v9602_v35  ;;  %v9668_v33 = vld [vmem:[%s10094_s0 + $0x5b4] ss:$24 sps:$4 sm:$0xff]   ;;  %v9663_v35 = vld [vmem:[%s10094_s0 + $0x5a8] ss:$24 sps:$4 sm:$0xff]  }
 0x628   : > { %6934 = vmatpush1.bf16.msra.mxu1 %v9597_v58  ;;  %7057 = vmatpush1.bf16.msra.mxu0 %v9600_v36  ;;  %v9666_v58 = vld [vmem:[%s10094_s0 + $0x5b0] ss:$24 sps:$4 sm:$0xff]   ;;  %v9671_v36 = vld [vmem:[%s10094_s0 + $0x5dc] ss:$24 sps:$4 sm:$0xff]  }
 0x629   : > { %6935 = vmatprep.subr.bf16.mxu1 %v9605_v37  ;;  %7058 = vmatprep.subr.bf16.mxu0 %v9608_v40  ;;  %v9674_v37 = vld [vmem:[%s10094_s0 + $0x5e4] ss:$24 sps:$4 sm:$0xff]   ;;  %v9669_v40 = vld [vmem:[%s10094_s0 + $0x5d8] ss:$24 sps:$4 sm:$0xff]  }
 0x62c   : > { %6936 = vmatpush1.bf16.msra.mxu1 %v9603_v41  ;;  %7059 = vmatpush1.bf16.msra.mxu0 %v9606_v42  ;;  %v9672_v41 = vld [vmem:[%s10094_s0 + $0x5e0] ss:$24 sps:$4 sm:$0xff]   ;;  %v9677_v42 = vld [vmem:[%s10094_s0 + $0x14] ss:$24 sps:$4 sm:$0xff]  }
 0x62d   : > { %6937 = vmatprep.subr.bf16.mxu1 %v9611_v43  ;;  %7060 = vmatprep.subr.bf16.mxu0 %v9614_v52  ;;  %v9675_v43 = vld [vmem:[%s10094_s0 + $0x10] ss:$24 sps:$4 sm:$0xff]   ;;  %v9680_v52 = vld [vmem:[%s10094_s0 + $0x44] ss:$24 sps:$4 sm:$0xff]  }
 0x62e   : > { %v11635_v56 = vpop.f32.mrb[4].mxu1 }
 0x62f   : > { %v11637_v57 = vpop.f32.mrb[5].mxu1 }
 0x630   : > { %6938 = vmatpush1.bf16.msra.mxu1 %v9609_v44  ;;  %7061 = vmatpush1.bf16.msra.mxu0 %v9612_v47  ;;  %v6801_v59 = vpop.f32.mrb[6].mxu1  ;;  %v9678_v44 = vld [vmem:[%s10094_s0 + $0x40] ss:$24 sps:$4 sm:$0xff]   ;;  %v9683_v47 = vld [vmem:[%s10094_s0 + $0x74] ss:$24 sps:$4 sm:$0xff]  }
 0x631   : > { %v6802_v63 = vpop.f32.mrb[7].mxu1  ;;  %6939 = vmatprep.subr.bf16.mxu1 %v9617_v8  ;;  %7062 = vmatprep.subr.bf16.mxu0 %v9620_v54  ;;  %v9681_v8 = vld [vmem:[%s10094_s0 + $0x70] ss:$24 sps:$4 sm:$0xff]   ;;  %v9686_v54 = vld [vmem:[%s10094_s0 + $0xa4] ss:$24 sps:$4 sm:$0xff]  }
 0x632   : > { %v9684_v59 = vld [vmem:[%s10094_s0 + $0xa0] ss:$24 sps:$4 sm:$0xff]   ;;  %v9695_v63 = vld [vmem:[%s10094_s0 + $0x134] ss:$24 sps:$4 sm:$0xff]  }
 0x634   : > { %6940 = vmatpush1.bf16.msra.mxu1 %v9615_v32  ;;  %7063 = vmatpush1.bf16.msra.mxu0 %v9618_v62  ;;  %v9689_v32 = vld [vmem:[%s10094_s0 + $0xd4] ss:$24 sps:$4 sm:$0xff]   ;;  %v9692_v62 = vld [vmem:[%s10094_s0 + $0x104] ss:$24 sps:$4 sm:$0xff]  }
 0x635   : > { %6941 = vmatprep.subr.bf16.mxu1 %v9623_v0  ;;  %7064 = vmatprep.subr.bf16.mxu0 %v9626_v1 }
 0x638   : > { %6942 = vmatpush1.bf16.msra.mxu1 %v9621_v2  ;;  %7065 = vmatpush1.bf16.msra.mxu0 %v9624_v3 }
 0x639   : > { %6943 = vmatprep.subr.bf16.mxu1 %v9629_v22  ;;  %7066 = vmatprep.subr.bf16.mxu0 %v9632_v4  ;;  %v9693_v4 = vld [vmem:[%s10094_s0 + $0x130] ss:$24 sps:$4 sm:$0xff]  }
 0x63b   : > { %v11651_v12 = vpop.f32.mrb[8].mxu0 }
 0x63c   : > { %6944 = vmatpush1.bf16.msra.mxu1 %v9627_v6  ;;  %7067 = vmatpush1.bf16.msra.mxu0 %v9630_v7  ;;  %v11653_v45 = vpop.f32.mrb[9].mxu0  ;;  %v9698_v7 = vld [vmem:[%s10094_s0 + $0x164] ss:$24 sps:$4 sm:$0xff]  }
 0x63d   : > { %v6924_v39 = vpop.f32.mrb[10].mxu0  ;;  %6945 = vmatprep.subr.bf16.mxu1 %v9635_v9  ;;  %7068 = vmatprep.subr.bf16.mxu0 %v9638_v10  ;;  %v9696_v9 = vld [vmem:[%s10094_s0 + $0x160] ss:$24 sps:$4 sm:$0xff]   ;;  %v9699_v10 = vld [vmem:[%s10094_s0 + $0x190] ss:$24 sps:$4 sm:$0xff]  }
 0x63e   : > { %v6925_v16 = vpop.f32.mrb[11].mxu0  ;;  %v9705_v39 = vld [vmem:[%s10094_s0 + $0x1f0] ss:$24 sps:$4 sm:$0xff]  }
 0x63f   : > { %v9713_v16 = vld [vmem:[%s10094_s0 + $0x254] ss:$24 sps:$4 sm:$0xff]  }
 0x640   : > { %6946 = vmatpush1.bf16.msra.mxu1 %v9633_v24  ;;  %7069 = vmatpush1.bf16.msra.mxu0 %v9636_v38  ;;  %v9702_v24 = vld [vmem:[%s10094_s0 + $0x1c0] ss:$24 sps:$4 sm:$0xff]   ;;  %v9707_v38 = vld [vmem:[%s10094_s0 + $0x1f4] ss:$24 sps:$4 sm:$0xff]  }
 0x641   : > { %6947 = vmatprep.subr.bf16.mxu1 %v9641_v51  ;;  %7070 = vmatprep.subr.bf16.mxu0 %v9644_v15  ;;  %v9710_v51 = vld [vmem:[%s10094_s0 + $0x224] ss:$24 sps:$4 sm:$0xff]   ;;  %v9708_v15 = vld [vmem:[%s10094_s0 + $0x220] ss:$24 sps:$4 sm:$0xff]  }
 0x644   : > { %6948 = vmatpush1.bf16.msra.mxu1 %v9639_v17  ;;  %7071 = vmatpush1.bf16.msra.mxu0 %v9642_v18  ;;  %v9711_v17 = vld [vmem:[%s10094_s0 + $0x250] ss:$24 sps:$4 sm:$0xff]   ;;  %v9716_v18 = vld [vmem:[%s10094_s0 + $0x284] ss:$24 sps:$4 sm:$0xff]  }
 0x645   : > { %6949 = vmatprep.subr.bf16.mxu1 %v9647_v31  ;;  %7072 = vmatprep.subr.bf16.mxu0 %v9650_v19  ;;  %v9714_v31 = vld [vmem:[%s10094_s0 + $0x280] ss:$24 sps:$4 sm:$0xff]   ;;  %v9719_v19 = vld [vmem:[%s10094_s0 + $0x2b4] ss:$24 sps:$4 sm:$0xff]  }
 0x648   : > { %6950 = vmatpush1.bf16.msra.mxu1 %v9645_v11  ;;  %7073 = vmatpush1.bf16.msra.mxu0 %v9648_v14  ;;  %v9717_v11 = vld [vmem:[%s10094_s0 + $0x2b0] ss:$24 sps:$4 sm:$0xff]   ;;  %v9722_v14 = vld [vmem:[%s10094_s0 + $0x2e4] ss:$24 sps:$4 sm:$0xff]  }
 0x649   : > { %6951 = vmatprep.subr.bf16.mxu1 %v9653_v20  ;;  %7074 = vmatprep.subr.bf16.mxu0 %v9656_v13  ;;  %v9720_v20 = vld [vmem:[%s10094_s0 + $0x2e0] ss:$24 sps:$4 sm:$0xff]   ;;  %v9725_v13 = vld [vmem:[%s10094_s0 + $0x614] ss:$24 sps:$4 sm:$0xff]  }
 0x64c   : > { %6952 = vmatpush1.bf16.msra.mxu1 %v9651_v25  ;;  %7075 = vmatpush1.bf16.msra.mxu0 %v9654_v26  ;;  %v9723_v25 = vld [vmem:[%s10094_s0 + $0x610] ss:$24 sps:$4 sm:$0xff]   ;;  %v9728_v26 = vld [vmem:[%s10094_s0 + $0x644] ss:$24 sps:$4 sm:$0xff]  }
 0x64d   : > { %6953 = vmatprep.subr.bf16.mxu1 %v9659_v27  ;;  %7076 = vmatprep.subr.bf16.mxu0 %v9662_v28  ;;  %v9726_v27 = vld [vmem:[%s10094_s0 + $0x640] ss:$24 sps:$4 sm:$0xff]   ;;  %v9731_v28 = vld [vmem:[%s10094_s0 + $0x674] ss:$24 sps:$4 sm:$0xff]  }
 0x650   : > { %6954 = vmatpush1.bf16.msra.mxu1 %v9657_v48  ;;  %7077 = vmatpush1.bf16.msra.mxu0 %v9660_v34  ;;  %v9729_v48 = vld [vmem:[%s10094_s0 + $0x670] ss:$24 sps:$4 sm:$0xff]   ;;  %v9734_v34 = vld [vmem:[%s10094_s0 + $0x6a4] ss:$24 sps:$4 sm:$0xff]  }
 0x651   : > { %6955 = vmatprep.subr.bf16.mxu1 %v9665_v30  ;;  %7078 = vmatprep.subr.bf16.mxu0 %v9668_v33  ;;  %v9732_v30 = vld [vmem:[%s10094_s0 + $0x6a0] ss:$24 sps:$4 sm:$0xff]   ;;  %v9735_v33 = vld [vmem:[%s10094_s0 + $0x6d0] ss:$24 sps:$4 sm:$0xff]  }
 0x654   : > { %6956 = vmatpush1.bf16.msra.mxu1 %v9663_v35  ;;  %7079 = vmatpush1.bf16.msra.mxu0 %v9666_v58  ;;  %v9738_v35 = vld [vmem:[%s10094_s0 + $0x700] ss:$24 sps:$4 sm:$0xff]   ;;  %v9743_v58 = vld [vmem:[%s10094_s0 + $0x734] ss:$24 sps:$4 sm:$0xff]  }
 0x655   : > { %6957 = vmatprep.subr.bf16.mxu1 %v9671_v36  ;;  %7080 = vmatprep.subr.bf16.mxu0 %v9674_v37  ;;  %v9741_v36 = vld [vmem:[%s10094_s0 + $0x730] ss:$24 sps:$4 sm:$0xff]   ;;  %v9746_v37 = vld [vmem:[%s10094_s0 + $0x764] ss:$24 sps:$4 sm:$0xff]  }
 0x658   : > { %6958 = vmatpush1.bf16.msra.mxu1 %v9669_v40  ;;  %7081 = vmatpush1.bf16.msra.mxu0 %v9672_v41  ;;  %v9744_v40 = vld [vmem:[%s10094_s0 + $0x760] ss:$24 sps:$4 sm:$0xff]   ;;  %v9749_v41 = vld [vmem:[%s10094_s0 + $0x794] ss:$24 sps:$4 sm:$0xff]  }
 0x659   : > { %7009 = vmatprep.subr.bf16.mxu1 %v9677_v42  ;;  %v9747_v42 = vld [vmem:[%s10094_s0 + $0x790] ss:$24 sps:$4 sm:$0xff]  }
 0x65b   : > { %6960 = vmatmul.mubr.bf16.vlgmr.msra.gmra.mrb[16].mxu1 %v11551_v5  ;;  %7083 = vmatmul.mubr.bf16.vlgmr.msra.gmra.mrb[16].mxu0 %v11551_v5  ;;  %v9687_v5 = vld [vmem:[%s10094_s0 + $0xd0] ss:$24 sps:$4 sm:$0xff]  }
 0x65c   : > { %7010 = vmatpush1.bf16.msra.mxu1 %v9675_v43  ;;  %7041 = vmatprep.mubr.bf16.mxu1 %v11462_v50  ;;  %v9690_v50 = vld [vmem:[%s10094_s0 + $0x100] ss:$24 sps:$4 sm:$0xff]   ;;  %v9752_v43 = vld [vmem:[%s10094_s0 + $0x7c4] ss:$24 sps:$4 sm:$0xff]  }
 0x65d   : > { %7011 = vmatprep.subr.bf16.mxu1 %v9680_v52  ;;  %v9750_v52 = vld [vmem:[%s10094_s0 + $0x7c0] ss:$24 sps:$4 sm:$0xff]  }
 0x660   : > { %7012 = vmatpush1.bf16.msra.mxu1 %v9678_v44  ;;  %v9755_v44 = vld [vmem:[%s10094_s0 + $0x7f4] ss:$24 sps:$4 sm:$0xff]  }
 0x661   : > { %7013 = vmatprep.subr.bf16.mxu1 %v9683_v47  ;;  %v9753_v47 = vld [vmem:[%s10094_s0 + $0x7f0] ss:$24 sps:$4 sm:$0xff]  }
 0x664   : > { %7014 = vmatpush1.bf16.msra.mxu1 %v9681_v8  ;;  %v9758_v8 = vld [vmem:[%s10094_s0 + $0x824] ss:$24 sps:$4 sm:$0xff]  }
 0x665   : > { %7015 = vmatprep.subr.bf16.mxu1 %v9686_v54  ;;  %v9756_v54 = vld [vmem:[%s10094_s0 + $0x820] ss:$24 sps:$4 sm:$0xff]  }
 0x668   : > { %7016 = vmatpush1.bf16.msra.mxu1 %v9684_v59  ;;  %v9761_v59 = vld [vmem:[%s10094_s0 + $0x854] ss:$24 sps:$4 sm:$0xff]  }
 0x669   : > { %7017 = vmatprep.subr.bf16.mxu1 %v9689_v32  ;;  %v9759_v32 = vld [vmem:[%s10094_s0 + $0x850] ss:$24 sps:$4 sm:$0xff]  }
 0x66c   : > { %7018 = vmatpush1.bf16.msra.mxu1 %v9687_v5  ;;  %v9764_v5 = vld [vmem:[%s10094_s0 + $0x884] ss:$24 sps:$4 sm:$0xff]  }
 0x66d   : > { %7019 = vmatprep.subr.bf16.mxu1 %v9692_v62  ;;  %v9762_v62 = vld [vmem:[%s10094_s0 + $0x880] ss:$24 sps:$4 sm:$0xff]  }
 0x66e   : > { %v6838_v0 = vpop.f32.mrb[8].mxu1 }
 0x66f   : > { %v11698_v1 = vadd.f32 %v6838_v0, %v11635_v56  ;;  %v6840_v2 = vpop.f32.mrb[9].mxu1  ;;  %v9701_v56 = vld [vmem:[%s10094_s0 + $0x194] ss:$24 sps:$4 sm:$0xff]   ;;  %v9770_v0 = vld [vmem:[%s10094_s0 + $0x8e4] ss:$24 sps:$4 sm:$0xff]  }
 0x670   : > { %v11701_v3 = vadd.f32 %v6840_v2, %v11637_v57  ;;  %v6842_v22 = vpop.f32.mrb[10].mxu1  ;;  %7020 = vmatpush1.bf16.msra.mxu1 %v9690_v50  ;;  %v9704_v57 = vld [vmem:[%s10094_s0 + $0x1c4] ss:$24 sps:$4 sm:$0xff]   ;;  %v9767_v50 = vld [vmem:[%s10094_s0 + $0x8b4] ss:$24 sps:$4 sm:$0xff]  }
 0x671   : > { %v6843_v6 = vpop.f32.mrb[11].mxu1  ;;  %7021 = vmatprep.subr.bf16.mxu1 %v9695_v63  ;;  %v9765_v63 = vld [vmem:[%s10094_s0 + $0x8b0] ss:$24 sps:$4 sm:$0xff]   ;;  %v9768_v2 = vld [vmem:[%s10094_s0 + $0x8e0] ss:$24 sps:$4 sm:$0xff]  }
 0x672   : > { %v5029_v22 = vld [vmem:[#allocation3] sm:$0xff] }
 0x674   : > { %7022 = vmatpush1.bf16.msra.mxu1 %v9693_v4 }
 0x675   : > { %7023 = vmatprep.subr.bf16.mxu1 %v9698_v7 }
 0x678   : > { %7024 = vmatpush1.bf16.msra.mxu1 %v9696_v9  ;;  %v5030_v9 = vld [vmem:[#allocation3 + $0x8] sm:$0xff] }
 0x679   : > { %7025 = vmatprep.subr.bf16.mxu1 %v9701_v56 }
 0x67c   : > { %7026 = vmatpush1.bf16.msra.mxu1 %v9699_v10 }
 0x67d   : > { %7027 = vmatprep.subr.bf16.mxu1 %v9704_v57 }
 0x680   : > { %7028 = vmatpush1.bf16.msra.mxu1 %v9702_v24 }
 0x681   : > { %7029 = vmatprep.subr.bf16.mxu1 %v9707_v38 }
 0x684   : > { %7030 = vmatpush1.bf16.msra.mxu1 %v9705_v39 }
 0x685   : > { %7031 = vmatprep.subr.bf16.mxu1 %v9710_v51 }
 0x688   : > { %7032 = vmatpush1.bf16.msra.mxu1 %v9708_v15 }
 0x689   : > { %7033 = vmatprep.subr.bf16.mxu1 %v9713_v16 }
 0x68c   : > { %7034 = vmatpush1.bf16.msra.mxu1 %v9711_v17 }
 0x68d   : > { %7035 = vmatprep.subr.bf16.mxu1 %v9716_v18 }
 0x690   : > { %7036 = vmatpush1.bf16.msra.mxu1 %v9714_v31 }
 0x691   : > { %7037 = vmatprep.subr.bf16.mxu1 %v9719_v19 }
 0x694   : > { %7038 = vmatpush1.bf16.msra.mxu1 %v9717_v11 }
 0x695   : > { %7039 = vmatprep.subr.bf16.mxu1 %v9722_v14 }
 0x698   : > { %7040 = vmatpush1.bf16.msra.mxu1 %v9720_v20 }
 0x699   : > { %7091 = vmatprep.subr.bf16.mxu1 %v9725_v13  ;;  %v5032_v13 = vld [vmem:[#allocation3 + $0x18] sm:$0xff] }
 0x69b   : > { %7042 = vmatmul.mubr.bf16.vlgmr.msra.gmra.mrb[20].mxu1 %v11465_v55  ;;  %v9737_v55 = vld [vmem:[%s10094_s0 + $0x6d4] ss:$24 sps:$4 sm:$0xff]  }
 0x69c   : > { %7092 = vmatpush1.bf16.msra.mxu1 %v9723_v25  ;;  %7123 = vmatprep.mubr.bf16.mxu1 %v11601_v46  ;;  %v9740_v46 = vld [vmem:[%s10094_s0 + $0x704] ss:$24 sps:$4 sm:$0xff]  }
 0x69d   : > { %7093 = vmatprep.subr.bf16.mxu1 %v9728_v26 }
 0x6a0   : > { %7094 = vmatpush1.bf16.msra.mxu1 %v9726_v27 }
 0x6a1   : > { %7095 = vmatprep.subr.bf16.mxu1 %v9731_v28 }
 0x6a4   : > { %7096 = vmatpush1.bf16.msra.mxu1 %v9729_v48 }
 0x6a5   : > { %7097 = vmatprep.subr.bf16.mxu1 %v9734_v34 }
 0x6a8   : > { %7098 = vmatpush1.bf16.msra.mxu1 %v9732_v30 }
 0x6a9   : > { %7099 = vmatprep.subr.bf16.mxu1 %v9737_v55 }
 0x6ac   : > { %7100 = vmatpush1.bf16.msra.mxu1 %v9735_v33 }
 0x6ad   : > { %7101 = vmatprep.subr.bf16.mxu1 %v9740_v46 }
 0x6b0   : > { %7102 = vmatpush1.bf16.msra.mxu1 %v9738_v35  ;;  %v5033_v35 = vld [vmem:[#allocation3 + $0x20] sm:$0xff] }
 0x6b1   : > { %7103 = vmatprep.subr.bf16.mxu1 %v9743_v58 }
 0x6b4   : > { %7104 = vmatpush1.bf16.msra.mxu1 %v9741_v36  ;;  %v5034_v36 = vld [vmem:[#allocation3 + $0x28] sm:$0xff] }
 0x6b5   : > { %7105 = vmatprep.subr.bf16.mxu1 %v9746_v37 }
 0x6b8   : > { %7106 = vmatpush1.bf16.msra.mxu1 %v9744_v40 }
 0x6b9   : > { %7107 = vmatprep.subr.bf16.mxu1 %v9749_v41 }
 0x6bc   : > { %7108 = vmatpush1.bf16.msra.mxu1 %v9747_v42 }
 0x6bd   : > { %7109 = vmatprep.subr.bf16.mxu1 %v9752_v43 }
 0x6c0   : > { %7110 = vmatpush1.bf16.msra.mxu1 %v9750_v52 }
 0x6c1   : > { %7111 = vmatprep.subr.bf16.mxu1 %v9755_v44 }
 0x6c4   : > { %7112 = vmatpush1.bf16.msra.mxu1 %v9753_v47 }
 0x6c5   : > { %7113 = vmatprep.subr.bf16.mxu1 %v9758_v8 }
 0x6c8   : > { %7114 = vmatpush1.bf16.msra.mxu1 %v9756_v54 }
 0x6c9   : > { %7115 = vmatprep.subr.bf16.mxu1 %v9761_v59  ;;  %v7154_v59 = vld [vmem:[%s11825_s9] sm:$0x3f] (!%p8348_p7) }
 0x6cc   : > { %7116 = vmatpush1.bf16.msra.mxu1 %v9759_v32 }
 0x6cd   : > { %7117 = vmatprep.subr.bf16.mxu1 %v9764_v5  ;;  %v7159_v5 = vrot.slane (!%p8348_p7), %v7154_v59, %v11421_v49 }
 0x6d0   : > { %7118 = vmatpush1.bf16.msra.mxu1 %v9762_v62  ;;  %v7163_v62 = vrot.slane (!%p8348_p7), %v7154_v59, %v11432_v53 }
 0x6d1   : > { %7119 = vmatprep.subr.bf16.mxu1 %v9767_v50  ;;  %v7167_v50 = vrot.slane (!%p8348_p7), %v7154_v59, %v11485_v21 }
 0x6d4   : > { %7120 = vmatpush1.bf16.msra.mxu1 %v9765_v63  ;;  %v7171_v63 = vrot.slane (!%p8348_p7), %v7154_v59, %v11435_v29 }
 0x6d5   : > { %7121 = vmatprep.subr.bf16.mxu1 %v9770_v0  ;;  %v7175_v0 = vrot.slane (!%p8348_p7), %v7154_v59, %v11592_v60 }
 0x6d8   : > { %7122 = vmatpush1.bf16.msra.mxu1 %v9768_v2  ;;  %v7179_v2 = vrot.slane (!%p8348_p7), %v7154_v59, %v11595_v61 }
 0x6db   : > { %7124 = vmatmul.mubr.bf16.vlgmr.msra.gmra.mrb[24].mxu1 %v11605_v23 }
 0x6ee   : > { %v6879_v4 = vpop.f32.mrb[12].mxu1  ;;  %v7002_v6 = vpop.f32.mrb[12].mxu0 }
 0x6ef   : > { %v6880_v7 = vadd.f32 %v6879_v4, %v11698_v1  ;;  %v6881_v56 = vpop.f32.mrb[13].mxu1  ;;  %v7004_v10 = vpop.f32.mrb[13].mxu0  ;;  %v5031_v1 = vld [vmem:[#allocation3 + $0x10] sm:$0xff]  ;;  %v7193_v4 = vld [vmem:[#allocation2 + $0x8] sm:$0xff] (!%p8348_p7) }
 0x6f0   : > { %v6882_v57 = vadd.f32 %v6881_v56, %v11701_v3  ;;  %v6883_v24 = vpop.f32.mrb[14].mxu1  ;;  %v7006_v38 = vpop.f32.mrb[14].mxu0 }
 0x6f1   : > { %v7132_v39 = vadd.f32 %v6880_v7, %v5029_v22  ;;  %v6884_v51 = vpop.f32.mrb[15].mxu1  ;;  %v7007_v15 = vpop.f32.mrb[15].mxu0  ;;  %v7192_v22 = vld [vmem:[#allocation2] sm:$0xff] (!%p8348_p7)  ;;  %v7195_v24 = vld [vmem:[#allocation2 + $0x18] sm:$0xff] (!%p8348_p7) }
 0x6f2   : > { %v7133_v16 = vadd.f32 %v6882_v57, %v5030_v9 }
 0x6f3   : > { %7138 = vst [vmem:[#allocation3] sm:$0xff] %v7132_v39 }
 0x6f4   : > { %7139 = vst [vmem:[#allocation3 + $0x8] sm:$0xff] %v7133_v16  ;;  %v7196_v16 = vld [vmem:[#allocation2 + $0x20] sm:$0xff] (!%p8348_p7) }
 0x6fa   : > { %v7148_v44 = vld [vmem:[#allocation3] sm:$0xff] (!%p8348_p7) }
 0x6fb   : > { %v7149_v47 = vld [vmem:[#allocation3 + $0x8] sm:$0xff] (!%p8348_p7)  ;;  %v7186_v7 = vadd.f32 (!%p8348_p7), %v7159_v5, %v7148_v44  ;;  %v7204_v44 = vld [vmem:[%s11826_s10] sm:$0x3f] (!%p8348_p7) }
 0x6fc   : > { %v7187_v9 = vadd.f32 (!%p8348_p7), %v7163_v62, %v7149_v47  ;;  %v7205_v47 = vld [vmem:[%s11827_s11] sm:$0x3f] (!%p8348_p7)  ;;  %v7255_v59 = vrot.slane (!%p8348_p7), %v7204_v44, %v11485_v21  ;;  %v7263_v5 = vrot.slane (!%p8348_p7), %v7204_v44, %v11592_v60  ;;  %v7267_v62 = vrot.slane (!%p8348_p7), %v7204_v44, %v11595_v61 }
 0x6fd   : > { %v7198_v39 = vadd.f32 (!%p8348_p7), %v7192_v22, %v7186_v7  ;;  %v7296_v22 = vrot.slane (!%p8348_p7), %v7205_v47, %v11435_v29 }
 0x6fe   : > { %v7199_v51 = vadd.f32 (!%p8348_p7), %v7193_v4, %v7187_v9 }
 0x72e   : > { %v6961_v17 = vpop.f32.mrb[16].mxu1  ;;  %v7084_v23 = vpop.f32.mrb[16].mxu0 }
 0x72f   : > { %v6962_v18 = vadd.f32 %v6961_v17, %v11651_v12  ;;  %v6963_v31 = vpop.f32.mrb[17].mxu1  ;;  %v7086_v19 = vpop.f32.mrb[17].mxu0 }
 0x730   : > { %v6964_v11 = vadd.f32 %v6963_v31, %v11653_v45  ;;  %v6965_v14 = vpop.f32.mrb[18].mxu1  ;;  %v7088_v20 = vpop.f32.mrb[18].mxu0  ;;  %v7197_v31 = vld [vmem:[#allocation2 + $0x28] sm:$0xff] (!%p8348_p7) }
 0x731   : > { %v7003_v3 = vadd.f32 %v7002_v6, %v6962_v18  ;;  %v6966_v25 = vpop.f32.mrb[19].mxu1  ;;  %v7089_v26 = vpop.f32.mrb[19].mxu0  ;;  %v7194_v6 = vld [vmem:[#allocation2 + $0x10] sm:$0xff] (!%p8348_p7)  ;;  %v7206_v18 = vadd.f32 (!%p8348_p7), %v7199_v51, %v7198_v39 }
 0x732   : > { %v7005_v27 = vadd.f32 %v7004_v10, %v6964_v11 }
 0x733   : > { %v7134_v28 = vadd.f32 %v7003_v3, %v5031_v1 }
 0x734   : > { %v7135_v48 = vadd.f32 %v7005_v27, %v5032_v13 }
 0x735   : > { %7140 = vst [vmem:[#allocation3 + $0x10] sm:$0xff] %v7134_v28 }
 0x736   : > { %7141 = vst [vmem:[#allocation3 + $0x18] sm:$0xff] %v7135_v48 }
 0x73c   : > { %v7150_v8 = vld [vmem:[#allocation3 + $0x10] sm:$0xff] (!%p8348_p7) }
 0x73d   : > { %v7151_v54 = vld [vmem:[#allocation3 + $0x18] sm:$0xff] (!%p8348_p7)  ;;  %v7188_v56 = vadd.f32 (!%p8348_p7), %v7167_v50, %v7150_v8  ;;  %v7247_v8 = vrot.slane (!%p8348_p7), %v7204_v44, %v11421_v49 }
 0x73e   : > { %v7189_v10 = vadd.f32 (!%p8348_p7), %v7171_v63, %v7151_v54  ;;  %v7251_v54 = vrot.slane (!%p8348_p7), %v7204_v44, %v11432_v53  ;;  %v7284_v63 = vrot.slane (!%p8348_p7), %v7205_v47, %v11421_v49 }
 0x73f   : > { %v7200_v15 = vadd.f32 (!%p8348_p7), %v7194_v6, %v7188_v56  ;;  %v7300_v56 = vrot.slane (!%p8348_p7), %v7205_v47, %v11592_v60 }
 0x741   : > { %v7207_v1 = vadd.f32 (!%p8348_p7), %v7206_v18, %v7200_v15 }
 0x76e   : > { %v7043_v34 = vpop.f32.mrb[20].mxu1 }
 0x76f   : > { %v7085_v30 = vadd.f32 %v7084_v23, %v7043_v34  ;;  %v7045_v55 = vpop.f32.mrb[21].mxu1  ;;  %v7201_v23 = vadd.f32 (!%p8348_p7), %v7195_v24, %v7189_v10  ;;  %v7304_v10 = vrot.slane (!%p8348_p7), %v7205_v47, %v11595_v61 }
 0x770   : > { %v7087_v12 = vadd.f32 %v7086_v19, %v7045_v55  ;;  %v7047_v33 = vpop.f32.mrb[22].mxu1 }
 0x771   : > { %v7048_v46 = vpop.f32.mrb[23].mxu1  ;;  %v7208_v14 = vadd.f32 (!%p8348_p7), %v7207_v1, %v7201_v23 }
 0x7ae   : > { %v7125_v58 = vpop.f32.mrb[24].mxu1  ;;  %7147 = sbr.rel (%p8348_p7) target bundleno = 2312 (0x908), region = 80 }
 0x7af   : > { %v7126_v45 = vadd.f32 %v7125_v58, %v7085_v30  ;;  %v7127_v37 = vpop.f32.mrb[25].mxu1 }
 0x7b0   : > { %v7128_v40 = vadd.f32 %v7127_v37, %v7087_v12  ;;  %v7129_v41 = vpop.f32.mrb[26].mxu1 }
 0x7b1   : > { %v7136_v42 = vadd.f32 %v7126_v45, %v5033_v35  ;;  %v7130_v43 = vpop.f32.mrb[27].mxu1 }
 0x7b2   : > { %v7137_v52 = vadd.f32 %v7128_v40, %v5034_v36 }
 0x7b3   : > { %7142 = vst [vmem:[#allocation3 + $0x20] sm:$0xff] %v7136_v42 }
 0x7b4   : > { %7143 = vst [vmem:[#allocation3 + $0x28] sm:$0xff] %v7137_v52 }
 0x7ba   : > { %v7152_v32 = vld [vmem:[#allocation3 + $0x20] sm:$0xff] }
 0x7bb   : > { %v7153_v57 = vld [vmem:[#allocation3 + $0x28] sm:$0xff]  ;;  %v7190_v38 = vadd.f32 %v7175_v0, %v7152_v32  ;;  %v7259_v32 = vrot.slane %v7204_v44, %v11435_v29  ;;  %v7288_v0 = vrot.slane %v7205_v47, %v11432_v53 }
 0x7bc   : > { %v7191_v17 = vadd.f32 %v7179_v2, %v7153_v57  ;;  %v7292_v2 = vrot.slane %v7205_v47, %v11485_v21 }
 0x7bd   : > { %v7202_v19 = vadd.f32 %v7196_v16, %v7190_v38 }
 0x7be   : > { %v7203_v11 = vadd.f32 %v7197_v31, %v7191_v17 }
 0x7bf   : > { %v7209_v20 = vadd.f32 %v7208_v14, %v7202_v19 }
 0x7c1   : > { %v7210_v3 = vadd.f32 %v7209_v20, %v7203_v11 }
 0x7c3   : > { %7211 = vadd.xlane.f32.xlu0 %v7210_v3 }
 0x850   : > { %v7212_v13 = vpop.xlane.xlu0 %7211 }
 0x851   : > { %v7214_v25 = vmul.f32 0.0013020834, %v7212_v13 }
 0x853   : > { %v7215_v26 = vsub.f32 %v7198_v39, %v7214_v25  ;;  %v7216_v27 = vsub.f32 %v7199_v51, %v7214_v25  ;;  %v7217_v28 = vsub.f32 %v7200_v15, %v7214_v25  ;;  %v7218_v48 = vsub.f32 %v7201_v23, %v7214_v25 }
 0x854   : > { %v7219_v55 = vsub.f32 %v7202_v19, %v7214_v25  ;;  %v7220_v46 = vsub.f32 %v7203_v11, %v7214_v25 }
 0x855   : > { %v7221_v34 = vmul.f32 %v7215_v26, %v7215_v26  ;;  %v7222_v30 = vmul.f32 %v7216_v27, %v7216_v27  ;;  %v7223_v12 = vmul.f32 %v7217_v28, %v7217_v28  ;;  %v7224_v35 = vmul.f32 %v7218_v48, %v7218_v48 }
 0x856   : > { %v7225_v45 = vmul.f32 %v7219_v55, %v7219_v55  ;;  %v7226_v37 = vmul.f32 %v7220_v46, %v7220_v46 }
 0x857   : > { %v7227_v33 = vadd.f32 %v7222_v30, %v7221_v34 }
 0x859   : > { %v7228_v58 = vadd.f32 %v7227_v33, %v7223_v12 }
 0x85b   : > { %v7229_v36 = vadd.f32 %v7228_v58, %v7224_v35 }
 0x85d   : > { %v7230_v40 = vadd.f32 %v7229_v36, %v7225_v45 }
 0x85f   : > { %v7231_v41 = vadd.f32 %v7230_v40, %v7226_v37 }
 0x861   : > { %7232 = vadd.xlane.f32.xlu0 %v7231_v41 }
 0x8ee   : > { %v7233_v42 = vpop.xlane.xlu0 %7232 }
 0x8ef   : > { %v7234_v43 = vmul.f32 0.0013020834, %v7233_v42 }
 0x8f1   : > { %v7235_v52 = vadd.f32 1e-12, %v7234_v43 }
 0x8f3   : > { %9783 = vrsqrt.f32 %v7235_v52 }
 0x8fd   : > { %v9784_v50 = vpop.eup %9783 }
 0x8fe   : > { %v7237_v4 = vmul.f32 %v9784_v50, %v7215_v26  ;;  %v7238_v6 = vmul.f32 %v9784_v50, %v7216_v27  ;;  %v7239_v7 = vmul.f32 %v9784_v50, %v7217_v28  ;;  %v7240_v9 = vmul.f32 %v9784_v50, %v7218_v48 }
 0x8ff   : > { %v7241_v57 = vmul.f32 %v9784_v50, %v7219_v55  ;;  %v7242_v24 = vmul.f32 %v9784_v50, %v7220_v46 }
 0x900   : > { %v7274_v38 = vmul.f32 %v7247_v8, %v7237_v4  ;;  %v7275_v49 = vmul.f32 %v7251_v54, %v7238_v6  ;;  %v7276_v53 = vmul.f32 %v7255_v59, %v7239_v7  ;;  %v7277_v39 = vmul.f32 %v7259_v32, %v7240_v9 }
 0x901   : > { %v7278_v21 = vmul.f32 %v7263_v5, %v7241_v57  ;;  %v7279_v51 = vmul.f32 %v7267_v62, %v7242_v24 }
 0x902   : > { %v7311_v29 = vadd.f32 %v7284_v63, %v7274_v38  ;;  %v7312_v15 = vadd.f32 %v7288_v0, %v7275_v49  ;;  %v7313_v16 = vadd.f32 %v7292_v2, %v7276_v53  ;;  %v7314_v17 = vadd.f32 %v7296_v22, %v7277_v39 }
 0x903   : > { %v7315_v23 = vadd.f32 %v7300_v56, %v7278_v21  ;;  %v7316_v18 = vadd.f32 %v7304_v10, %v7279_v51 }
 0x904   : > { %v8355_v60 = vpack.c.bf16 %v7312_v15, %v7311_v29  ;;  %v8356_v31 = vpack.c.bf16 %v7314_v17, %v7313_v16 }
 0x905   : > { %v8357_v61 = vpack.c.bf16 %v7316_v18, %v7315_v23 }
 0x906   : > { %7341 = vst [vmem:[%s10089_s23] sm:$0xff] %v8355_v60  ;;  %7342 = vst [vmem:[%s10089_s23 + $0x8] sm:$0xff] %v8356_v31 }
 0x907   : > { %7343 = vst [vmem:[%s10089_s23 + $0x10] sm:$0xff] %v8357_v61 }
 0x908 PF: > { %s25_s28 = sadd.s32 1, %s9881_s28   ;;  %s11848_s21 = sld [smem:[#allocation7_spill]] }
 0x909   : > { %p22_p8 = scmp.ge.s32.totalorder %s25_s28, 10   ;;  %s11849_s22 = sld [smem:[#allocation8_spill]] }
 0x90a   : > { %s11850_s23 = sld [smem:[#allocation13_spill]]  ;;  %s11851_s24 = sld [smem:[#allocation9_spill]] }
 0x90b   : > { %s11852_s25 = sld [smem:[#allocation10_spill]]  ;;  %s11853_s26 = sld [smem:[#allocation11_spill]] }
 0x90c   : > { %s11854_s27 = sld [smem:[#allocation12_spill]]  ;;  %24 = sbr.rel (!%p22_p8) target bundleno = 8 (0x8), region = 128 }
 0x913   :  { %7365 = vsyncpa [#allocation5], 1 }
 0x914   :  { %7367 = vsyncpa [#allocation5 + $0x1], 1 }

</bundles_post_ra>
